<compile_context>
chip_gen: v5e
topology: v5e:2x2
jax: 0.10.0
libtpu: 0.0.40
codegen_flags: <defaults>
</compile_context>

<pallas_src>
import jax
import jax.numpy as jnp
from jax.experimental import pallas as pl
from jax.experimental.pallas import tpu as pltpu

MAX_PRED = 20
MASK_ID = 50264          # roberta-base <mask>
BOS_ID, PAD_ID, EOS_ID = 0, 1, 2

OUT_LANES = 128          # lane-dense packed MLM output width
POS_OFF = 64             # lanes [POS_OFF, POS_OFF+MAX_PRED) hold masked_pos
KEY_SENTINEL = 0x7FFFFFFF
DIRECT_S_MAX = 512       # up to here the rank uses a single (TB, S, S) pass


def _rank_key(prio, ids, idx, hi_mask):
    """One int32 ranking key per position: random high bits | index low bits.
    Non-candidates get INT32_MAX; candidate keys are strictly smaller, so a
    single `key_j < key_i` compare handles priority, tie-break and filtering."""
    cand = (ids != BOS_ID) & (ids != PAD_ID) & (ids != EOS_ID)
    key = jnp.bitwise_or(jnp.bitwise_and(prio, jnp.int32(hi_mask)), idx)
    return jnp.where(cand, key, jnp.int32(KEY_SENTINEL)), cand


def _mlm_kernel(prio_ref, ids_ref, ids_out_ref, mlm_out_ref):
    ids = ids_ref[...]                                               # (TB, S)
    prio = prio_ref[...]                                             # (TB, S)
    TB, S = ids.shape

    # Key layout (trace-time constants): bits [lb, 30) random, bits [0, lb) idx.
    lb = (S - 1).bit_length()
    hi_mask = 0x3FFFFFFF & ~((1 << lb) - 1)      # candidate keys < KEY_SENTINEL

    idx = jax.lax.broadcasted_iota(jnp.int32, (TB, S), 1)
    key, cand = _rank_key(prio, ids, idx, hi_mask)
    key_i = key[:, :, None]                                          # (TB, S, 1)

    if S <= DIRECT_S_MAX:
        # Small S: one (TB, S, S) pass.
        before = key[:, None, :] < key_i
        rank = jnp.sum(before.astype(jnp.int32), axis=2)             # (TB, S)
    else:
        # Large S: accumulate over lane-aligned j-chunks so the peak temporary
        # is (TB, S, TJ) instead of (TB, S, S) (v7x 64 MiB VMEM constraint).
        tj = 256 if S % 256 == 0 else 128

        def chunk_body(c, acc):
            j0 = pl.multiple_of(c * tj, tj)
            prio_j = prio_ref[:, pl.ds(j0, tj)]
            ids_j = ids_ref[:, pl.ds(j0, tj)]
            idx_j = jax.lax.broadcasted_iota(jnp.int32, (TB, tj), 1) + j0
            key_j, _ = _rank_key(prio_j, ids_j, idx_j, hi_mask)      # O(TB*tj)
            before = key_j[:, None, :] < key_i                       # (TB, S, tj)
            return acc + jnp.sum(before.astype(jnp.int32), axis=2)

        rank = jax.lax.fori_loop(0, S // tj, chunk_body,
                                 jnp.zeros((TB, S), jnp.int32), unroll=2)

    # n_pred = min(20, max(1, round(0.15 * n_candidates)))
    n_cand = jnp.sum(cand.astype(jnp.int32), axis=1, keepdims=True)  # (TB, 1)
    n_pred = jnp.round(n_cand.astype(jnp.float32) * 0.15).astype(jnp.int32)
    n_pred = jnp.clip(n_pred, 1, MAX_PRED)

    selected = cand & (rank < n_pred)                                # (TB, S)

    # ids with selected positions replaced by <mask>.
    ids_out_ref[...] = jnp.where(selected, jnp.int32(MASK_ID), ids)

    # Fused scatter: payload = (position << 16) | token, one select + reduce.
    payload = jnp.bitwise_or(jnp.left_shift(idx, 16), ids)           # (TB, S)
    slot = jax.lax.broadcasted_iota(jnp.int32, (TB, MAX_PRED, S), 1)
    onehot = (slot == rank[:, None, :]) & selected[:, None, :]
    packed = jnp.sum(jnp.where(onehot, payload[:, None, :], jnp.int32(0)),
                     axis=2)                                         # (TB, P)

    tok = jnp.bitwise_and(packed, jnp.int32(0xFFFF))
    pos = jnp.bitwise_and(jnp.right_shift(packed, 16), jnp.int32(0xFFFF))

    # Single unmasked full-width store: tokens @ [0,20), positions @ [64,84).
    mlm_out_ref[...] = jnp.concatenate(
        [tok,
         jnp.zeros((TB, POS_OFF - MAX_PRED), jnp.int32),
         pos,
         jnp.zeros((TB, OUT_LANES - POS_OFF - MAX_PRED), jnp.int32)],
        axis=1)


def features_mlm(ids, attention_mask, seed, *, tb=8):
    """ids, attention_mask: [B, S]; seed: python int.
    Returns (ids, masks, mlm_tokens, mlm_pos) like the PyTorch module."""
    B, S = ids.shape
    assert S % 128 == 0, "sequence length must be lane-aligned (multiple of 128)"
    assert S <= 65536, "position packing uses 16 bits"
    assert tb % 8 == 0, "batch block must fill int32 sublanes"

    ids_i32 = jnp.asarray(ids, jnp.int32)
    Bp = -(-B // tb) * tb
    if Bp != B:                       # pad with <pad>-only rows (no candidates)
        ids_p = jnp.concatenate(
            [ids_i32, jnp.full((Bp - B, S), PAD_ID, jnp.int32)], axis=0)
    else:
        ids_p = ids_i32

    # Random priorities drawn outside the kernel (interpret-mode safe; every
    # row/grid block gets independent randomness).
    prio = jax.random.randint(jax.random.PRNGKey(seed), (Bp, S),
                              0, 0x7FFFFFFF, dtype=jnp.int32)

    new_ids, mlm_packed = pl.pallas_call(
        _mlm_kernel,
        out_shape=(
            jax.ShapeDtypeStruct((Bp, S), jnp.int32),
            jax.ShapeDtypeStruct((Bp, OUT_LANES), jnp.int32),
        ),
        grid=(Bp // tb,),
        in_specs=[
            pl.BlockSpec((tb, S), lambda b: (b, 0)),                 # prio
            pl.BlockSpec((tb, S), lambda b: (b, 0)),                 # ids
        ],
        out_specs=(
            pl.BlockSpec((tb, S), lambda b: (b, 0)),
            pl.BlockSpec((tb, OUT_LANES), lambda b: (b, 0)),
        ),
        compiler_params=pltpu.CompilerParams(
            dimension_semantics=("parallel",)),
    )(prio, ids_p)

    mlm_tokens = mlm_packed[:B, 0:MAX_PRED]
    mlm_pos = mlm_packed[:B, POS_OFF:POS_OFF + MAX_PRED]
    # attention_mask is a pure pass-through in the reference module.
    return new_ids[:B], attention_mask, mlm_tokens, mlm_pos


def _make_synthetic_batch(key, B, S):
    """Deterministic 'tokenized' sequences: [<s>, tok..., </s>, <pad>...]."""
    # TODO(synk): RobertaTokenizer.tokenize/encode_plus is string processing with
    # no Pallas equivalent; synthetic token ids stand in for its output.
    body = jax.random.randint(key, (B, S), 3, 50000, dtype=jnp.int32)
    lengths = jnp.array([37, 90][:B], dtype=jnp.int32)       # tokens incl. specials
    pos = jax.lax.broadcasted_iota(jnp.int32, (B, S), 1)
    L = lengths[:, None]
    ids = jnp.where(pos == 0, BOS_ID,
          jnp.where(pos == L - 1, EOS_ID,
          jnp.where(pos < L - 1, body, PAD_ID))).astype(jnp.int32)
    attention_mask = (pos < L).astype(jnp.int32)
    return ids, attention_mask


if __name__ == "__main__":
    B, S = 2, 128
    key = jax.random.PRNGKey(0)
    ids, attention_mask = _make_synthetic_batch(key, B, S)

    out_ids, out_masks, mlm_tokens, mlm_pos = features_mlm(ids, attention_mask, 0)
    jax.block_until_ready((out_ids, out_masks, mlm_tokens, mlm_pos))

    # light sanity checks
    assert out_ids.shape == (B, S) and out_masks.shape == (B, S)
    assert mlm_tokens.shape == (B, MAX_PRED) and mlm_pos.shape == (B, MAX_PRED)
    n_masked = int(jnp.sum((out_ids == MASK_ID).astype(jnp.int32)))
    n_sel = int(jnp.sum((mlm_pos > 0).astype(jnp.int32)))
    assert n_masked == n_sel and n_masked > 0
    # recorded masked tokens must equal the original ids at the masked positions
    gathered = jnp.take_along_axis(ids, mlm_pos, axis=1)
    valid = mlm_pos > 0
    assert bool(jnp.all(jnp.where(valid, gathered == mlm_tokens, True)))

    print("KERNEL_OK")
</pallas_src>

<mosaic_0001>
module attributes {stable_mosaic.version = 11 : i64} {
  func.func @_mlm_kernel(%arg0: i32, %arg1: memref<8x128xi32, #tpu.memory_space<vmem>>, %arg2: memref<8x128xi32, #tpu.memory_space<vmem>>, %arg3: memref<8x128xi32, #tpu.memory_space<vmem>>, %arg4: memref<8x128xi32, #tpu.memory_space<vmem>>) attributes {dimension_semantics = [#tpu.dimension_semantics<parallel>], iteration_bounds = array<i64: 1>, scalar_prefetch = 0 : i64, scratch_operands = 0 : i64, tpu.core_type = #tpu.core_type<tc>, window_params = [{transform_indices = @transform_0, window_bounds = array<i64: 8, 128>}, {transform_indices = @transform_1, window_bounds = array<i64: 8, 128>}, {transform_indices = @transform_2, window_bounds = array<i64: 8, 128>}, {transform_indices = @transform_3, window_bounds = array<i64: 8, 128>}]} {
    %c0 = arith.constant 0 : index
    %c0_0 = arith.constant 0 : index
    %0 = vector.load %arg2[%c0, %c0_0] : memref<8x128xi32, #tpu.memory_space<vmem>>, vector<8x128xi32>
    %c0_1 = arith.constant 0 : index
    %c0_2 = arith.constant 0 : index
    %1 = vector.load %arg1[%c0_1, %c0_2] : memref<8x128xi32, #tpu.memory_space<vmem>>, vector<8x128xi32>
    %2 = tpu.iota {dimensions = array<i32: 1>} : vector<8x128xi32>
    %c0_i32 = arith.constant 0 : i32
    %3 = vector.broadcast %c0_i32 : i32 to vector<8x128xi32>
    %4 = arith.cmpi ne, %0, %3 : vector<8x128xi32>
    %c1_i32 = arith.constant 1 : i32
    %5 = vector.broadcast %c1_i32 : i32 to vector<8x128xi32>
    %6 = arith.cmpi ne, %0, %5 : vector<8x128xi32>
    %7 = arith.andi %4, %6 : vector<8x128xi1>
    %c2_i32 = arith.constant 2 : i32
    %8 = vector.broadcast %c2_i32 : i32 to vector<8x128xi32>
    %9 = arith.cmpi ne, %0, %8 : vector<8x128xi32>
    %10 = arith.andi %7, %9 : vector<8x128xi1>
    %c1073741696_i32 = arith.constant 1073741696 : i32
    %11 = vector.broadcast %c1073741696_i32 : i32 to vector<8x128xi32>
    %12 = arith.andi %1, %11 : vector<8x128xi32>
    %13 = arith.ori %12, %2 : vector<8x128xi32>
    %c2147483647_i32 = arith.constant 2147483647 : i32
    %14 = vector.broadcast %c2147483647_i32 : i32 to vector<8x128xi32>
    %15 = arith.select %10, %13, %14 : vector<8x128xi1>, vector<8x128xi32>
    %16 = vector.shape_cast %15 : vector<8x128xi32> to vector<8x128x1xi32>
    %17 = vector.shape_cast %15 : vector<8x128xi32> to vector<8x1x128xi32>
    %18 = vector.broadcast %17 : vector<8x1x128xi32> to vector<8x128x128xi32>
    %19 = vector.broadcast %16 : vector<8x128x1xi32> to vector<8x128x128xi32>
    %20 = arith.cmpi slt, %18, %19 : vector<8x128x128xi32>
    %21 = arith.extui %20 : vector<8x128x128xi1> to vector<8x128x128xi32>
    %cst = arith.constant dense<0> : vector<8x128xi32>
    %22 = vector.multi_reduction <add>, %21, %cst [2] : vector<8x128x128xi32> to vector<8x128xi32>
    %23 = arith.extui %10 : vector<8x128xi1> to vector<8x128xi32>
    %cst_3 = arith.constant dense<0> : vector<8xi32>
    %24 = vector.multi_reduction <add>, %23, %cst_3 [1] : vector<8x128xi32> to vector<8xi32>
    %25 = vector.shape_cast %24 : vector<8xi32> to vector<8x1xi32>
    %26 = arith.sitofp %25 : vector<8x1xi32> to vector<8x1xf32>
    %cst_4 = arith.constant 1.500000e-01 : f32
    %27 = vector.broadcast %cst_4 : f32 to vector<8x1xf32>
    %28 = arith.mulf %26, %27 : vector<8x1xf32>
    %29 = math.roundeven %28 : vector<8x1xf32>
    %30 = arith.fptosi %29 : vector<8x1xf32> to vector<8x1xi32>
    %c1_i32_5 = arith.constant 1 : i32
    %c20_i32 = arith.constant 20 : i32
    %31 = vector.broadcast %c1_i32_5 : i32 to vector<8x1xi32>
    %32 = arith.maxsi %31, %30 : vector<8x1xi32>
    %33 = vector.broadcast %c20_i32 : i32 to vector<8x1xi32>
    %34 = arith.minsi %33, %32 : vector<8x1xi32>
    %35 = vector.broadcast %34 : vector<8x1xi32> to vector<8x128xi32>
    %36 = arith.cmpi slt, %22, %35 : vector<8x128xi32>
    %37 = arith.andi %10, %36 : vector<8x128xi1>
    %c50264_i32 = arith.constant 50264 : i32
    %38 = vector.broadcast %c50264_i32 : i32 to vector<8x128xi32>
    %39 = arith.select %37, %38, %0 : vector<8x128xi1>, vector<8x128xi32>
    %c0_6 = arith.constant 0 : index
    %c0_7 = arith.constant 0 : index
    %40 = vector.load %arg3[%c0_6, %c0_7] : memref<8x128xi32, #tpu.memory_space<vmem>>, vector<8x128xi32>
    tpu.vector_store %arg3[%c0_6, %c0_7], %39 {strides = array<i32>} : memref<8x128xi32, #tpu.memory_space<vmem>>, vector<8x128xi32>,
    %c16_i32 = arith.constant 16 : i32
    %41 = vector.broadcast %c16_i32 : i32 to vector<8x128xi32>
    %42 = arith.shli %2, %41 : vector<8x128xi32>
    %43 = arith.ori %42, %0 : vector<8x128xi32>
    %44 = tpu.iota {dimensions = array<i32: 1>} : vector<8x20x128xi32>
    %45 = vector.shape_cast %22 : vector<8x128xi32> to vector<8x1x128xi32>
    %46 = vector.broadcast %45 : vector<8x1x128xi32> to vector<8x20x128xi32>
    %47 = arith.cmpi eq, %44, %46 : vector<8x20x128xi32>
    %48 = vector.shape_cast %37 : vector<8x128xi1> to vector<8x1x128xi1>
    %49 = vector.broadcast %48 : vector<8x1x128xi1> to vector<8x20x128xi1>
    %50 = arith.andi %47, %49 : vector<8x20x128xi1>
    %51 = vector.shape_cast %43 : vector<8x128xi32> to vector<8x1x128xi32>
    %c0_i32_8 = arith.constant 0 : i32
    %52 = vector.shape_cast %51 : vector<8x1x128xi32> to vector<8x1x128xi32>
    %53 = vector.broadcast %52 : vector<8x1x128xi32> to vector<8x20x128xi32>
    %54 = vector.broadcast %c0_i32_8 : i32 to vector<8x20x128xi32>
    %55 = arith.select %50, %53, %54 : vector<8x20x128xi1>, vector<8x20x128xi32>
    %cst_9 = arith.constant dense<0> : vector<8x20xi32>
    %56 = vector.multi_reduction <add>, %55, %cst_9 [2] : vector<8x20x128xi32> to vector<8x20xi32>
    %c65535_i32 = arith.constant 65535 : i32
    %57 = vector.broadcast %c65535_i32 : i32 to vector<8x20xi32>
    %58 = arith.andi %56, %57 : vector<8x20xi32>
    %c16_i32_10 = arith.constant 16 : i32
    %59 = vector.broadcast %c16_i32_10 : i32 to vector<8x20xi32>
    %60 = arith.shrsi %56, %59 : vector<8x20xi32>
    %c65535_i32_11 = arith.constant 65535 : i32
    %61 = vector.broadcast %c65535_i32_11 : i32 to vector<8x20xi32>
    %62 = arith.andi %60, %61 : vector<8x20xi32>
    %c0_i32_12 = arith.constant 0 : i32
    %63 = vector.broadcast %c0_i32_12 : i32 to vector<8x44xi32>
    %c0_i32_13 = arith.constant 0 : i32
    %64 = vector.broadcast %c0_i32_13 : i32 to vector<8x44xi32>
    %65 = tpu.concatenate %58, %63, %62, %64 in 1 : vector<8x20xi32>, vector<8x44xi32>, vector<8x20xi32>, vector<8x44xi32> -> vector<8x128xi32>
    %c0_14 = arith.constant 0 : index
    %c0_15 = arith.constant 0 : index
    %66 = vector.load %arg4[%c0_14, %c0_15] : memref<8x128xi32, #tpu.memory_space<vmem>>, vector<8x128xi32>
    tpu.vector_store %arg4[%c0_14, %c0_15], %65 {strides = array<i32>} : memref<8x128xi32, #tpu.memory_space<vmem>>, vector<8x128xi32>,
    return
  }
  func.func @transform_0(%arg0: i32) -> (i32, i32) {
    %c0_i32 = arith.constant 0 : i32
    %c0_i32_0 = arith.constant 0 : i32
    return %arg0, %c0_i32 : i32, i32
  }
  func.func @transform_1(%arg0: i32) -> (i32, i32) {
    %c0_i32 = arith.constant 0 : i32
    %c0_i32_0 = arith.constant 0 : i32
    return %arg0, %c0_i32 : i32, i32
  }
  func.func @transform_2(%arg0: i32) -> (i32, i32) {
    %c0_i32 = arith.constant 0 : i32
    %c0_i32_0 = arith.constant 0 : i32
    return %arg0, %c0_i32 : i32, i32
  }
  func.func @transform_3(%arg0: i32) -> (i32, i32) {
    %c0_i32 = arith.constant 0 : i32
    %c0_i32_0 = arith.constant 0 : i32
    return %arg0, %c0_i32 : i32, i32
  }
}

</mosaic_0001>

<bundles_post_ra>
// kernel: tpu_custom_call.1
= control target key start
LH: loop header
LB: loop body
LE: loop exit
PB: predicated region body
PF: predicated region fallthrough
CT: control target
= control target key end

     0   :  { %9 = vsyncpa [#allocation3], 0  ;;  %s8666_s0 = inlined_call_operand.hbm [shape: s32[8,128], index: 0, kind: input, shape index: {}]   ;;  %s8667_s1 = inlined_call_operand.hbm [shape: s32[8,128], index: 1, kind: input, shape index: {}]   ;;  %s8668_s2 = inlined_call_operand.hbm [shape: s32[8,128], index: 2, kind: output, shape index: {0}]   ;;  %s8669_s3 = inlined_call_operand.hbm [shape: s32[8,128], index: 3, kind: output, shape index: {1}]  }
   0x1   :  { %10 = vsyncpa [#allocation6], 0 }
   0x2   :  { %11 = vsyncpa [#allocation4], 0 }
   0x3   :  { %12 = vsyncpa [#allocation9], 0  ;;  %s18_s14 = sshll.u32 %s8666_s0, 4  ;;  %s4790_s15 = smov [#allocation2]   ;;  %s19_s14 = int_to_ptr.hbm [resolvable:$true] %s18_s14 }
   0x4   :  { %s20_s16 = sshll.u32 %s4790_s15, 4  ;;  %s29_s19 = sshll.u32 %s8667_s1, 4  ;;  %s21_s16 = int_to_ptr.vmem [resolvable:$true] %s20_s16  ;;  %s30_s19 = int_to_ptr.hbm [resolvable:$true] %s29_s19 }
   0x5   :  { %23 = dma.hbm_to_vmem [thread:$0]  %s19_s14, 128, %s21_s16, [#allocation3]  }
   0x6   :  { %s4791_s20 = smov [#allocation5]  }
   0x7   :  { %s31_s21 = sshll.u32 %s4791_s20, 4  ;;  %s32_s21 = int_to_ptr.vmem [resolvable:$true] %s31_s21 }
   0x8   :  { %34 = dma.hbm_to_vmem [thread:$0]  %s30_s19, 128, %s32_s21, [#allocation6]  }
   0x9   :  { %4782 = dma.done.wait [#allocation3], 128  }
   0xa   :  { %4783 = vsyncadd [#allocation3], 4294967168 }
   0xb   :  { %4784 = dma.done.wait [#allocation6], 128  }
   0xc   :  { %4785 = vsyncadd [#allocation6], 4294967168  ;;  %v45_v0 = vlaneseq  ;;  %v43_v5 = vld [vmem:[#allocation5] sm:$0xff]  ;;  %v44_v6 = vld [vmem:[#allocation2] sm:$0xff]  ;;  %v8861_v8 = vmov 0  ;;  %v8718_v36 = vmov 0  }
   0xd   :  { %vm47_vm0 = vcmp.ne.s32.totalorder %v43_v5, 0  ;;  %vm48_vm1 = vcmp.ne.s32.totalorder %v43_v5, 1  ;;  %vm50_vm2 = vcmp.ne.s32.totalorder %v43_v5, 2  ;;  %v52_v7 = vand.u32 1073741696, %v44_v6  ;;  %s4505_s22 = sshll.u32 %s8668_s2, 4  ;;  %s4506_s22 = int_to_ptr.hbm [resolvable:$true] %s4505_s22 }
   0xe   :  { %v4821_v1 = vshrl.u32 %v45_v0, 7  ;;  %v4830_v4 = vand.u32 127, %v45_v0  ;;  %vm49_vm3 = vmand %vm47_vm0, %vm48_vm1  ;;  %s4793_s23 = smov [#allocation7]   ;;  %s4794_s2 = smov [#allocation8]  }
   0xf   :  { %vm4834_vm4 = vmand %vm49_vm3, %vm50_vm2  ;;  %s4503_s24 = sshll.u32 %s4793_s23, 4  ;;  %s4514_s25 = sshll.u32 %s4794_s2, 4  ;;  %s4504_s24 = int_to_ptr.vmem [resolvable:$true] %s4503_s24  ;;  %s4515_s25 = int_to_ptr.vmem [resolvable:$true] %s4514_s25 }
  0x10   :  { %8858 = vst [vmem:[#allocation14_spill] sm:$0xff] %v4821_v1  ;;  %4564 = vset.pattern.permute.xlu0 %v4821_v1  ;;  %v4825_v2 = vadd.s32 32, %v4821_v1  ;;  %v4828_v3 = vadd.s32 16, %v4821_v1  ;;  %v8862_v8 = vsel %vm4834_vm4, 4294967295, %v8861_v8  ;;  %v53_v9 = vor.u32 %v52_v7, %v4830_v4  ;;  %s4516_s28 = sshll.u32 %s8669_s3, 4  ;;  %s4517_s28 = int_to_ptr.hbm [resolvable:$true] %s4516_s28 }
  0x11   :  { %8860 = vst [vmem:[#allocation16_spill] sm:$0xff] %v4830_v4  ;;  %v4850_v12 = vadd.s32 40, %v4821_v1  ;;  %v4853_v13 = vadd.s32 24, %v4821_v1  ;;  %v4865_v15 = vadd.s32 56, %v4821_v1  ;;  %v4868_v16 = vadd.s32 48, %v4821_v1 }
  0x12   :  { %8859 = vst [vmem:[#allocation15_spill] sm:$0xff] %v4828_v3  ;;  %4567 = vset.pattern.permute.xlu2 %v4825_v2  ;;  %4565 = vset.pattern.permute.xlu1 %v4828_v3  ;;  %v4841_v10 = vsel %vm4834_vm4, %v53_v9, 2147483647  ;;  %v4874_v17 = vadd.s32 80, %v4821_v1  ;;  %v4880_v18 = vadd.s32 72, %v4821_v1  ;;  %v4886_v19 = vadd.s32 120, %v4821_v1 }
  0x13   :  { %8863 = vst [vmem:[#allocation17_spill] sm:$0xff] %v8862_v8  ;;  %v4844_v11 = vperm.slane %v4841_v10, 0  ;;  %v4856_v14 = vperm.slane %v4841_v10, 3  ;;  %v4892_v20 = vadd.s32 96, %v4821_v1  ;;  %v4895_v21 = vadd.s32 88, %v4821_v1 }
  0x14   :  { %v4904_v22 = vadd.s32 112, %v4821_v1  ;;  %v4907_v23 = vperm.slane %v4841_v10, 4  ;;  %v4916_v24 = vadd.s32 8, %v4821_v1  ;;  %v152_v25 = vperm.slane %v4841_v10, 1 }
  0x15   :  { %v4928_v26 = vperm.slane %v4841_v10, 5  ;;  %v4934_v27 = vadd.s32 64, %v4821_v1  ;;  %v4942_v28 = vadd.s32 104, %v4821_v1  ;;  %v249_v29 = vperm.slane %v4841_v10, 2 }
  0x16   :  { %8864 = vst [vmem:[#allocation18_spill] sm:$0xff] %v4916_v24  ;;  %v4956_v30 = vperm.slane %v4841_v10, 6  ;;  %v4976_v31 = vperm.slane %v4841_v10, 7 }
  0x18   :  { %60 = vperm.xlu0 %4564, %v4844_v11  }
  0x1a   :  { %84 = vperm.xlu2 %4567, %v4844_v11   ;;  %72 = vperm.xlu1 %4565, %v4844_v11  }
  0x20   :  { %351 = vperm.xlu0 %4564, %v4856_v14  }
  0x22   :  { %4568 = vset.pattern.permute.xlu2 %v4850_v12  ;;  %4566 = vset.pattern.permute.xlu1 %v4853_v13 }
  0x28   :  { %4607 = vset.pattern.permute.xlu0 %v4850_v12 }
  0x2a   :  { %90 = vperm.xlu2 %4568, %v4844_v11   ;;  %78 = vperm.xlu1 %4566, %v4844_v11  }
  0x30   :  { %381 = vperm.xlu0 %4607, %v4856_v14  }
  0x32   :  { %4570 = vset.pattern.permute.xlu2 %v4865_v15  ;;  %4569 = vset.pattern.permute.xlu1 %v4868_v16 }
  0x38   :  { %4612 = vset.pattern.permute.xlu0 %v4874_v17 }
  0x3a   :  { %102 = vperm.xlu2 %4570, %v4844_v11   ;;  %96 = vperm.xlu1 %4569, %v4844_v11  }
  0x40   :  { %411 = vperm.xlu0 %4612, %v4856_v14  }
  0x42   :  { %4572 = vset.pattern.permute.xlu2 %v4874_v17  ;;  %4571 = vset.pattern.permute.xlu1 %v4880_v18 }
  0x48   :  { %4617 = vset.pattern.permute.xlu0 %v4886_v19 }
  0x4a   :  { %120 = vperm.xlu2 %4572, %v4844_v11   ;;  %114 = vperm.xlu1 %4571, %v4844_v11  }
  0x50   :  { %441 = vperm.xlu0 %4617, %v4856_v14  }
  0x52   :  { %4574 = vset.pattern.permute.xlu2 %v4892_v20  ;;  %4573 = vset.pattern.permute.xlu1 %v4895_v21 }
  0x58   :  { %4622 = vset.pattern.permute.xlu0 %v4825_v2 }
  0x5a   :  { %132 = vperm.xlu2 %4574, %v4844_v11   ;;  %126 = vperm.xlu1 %4573, %v4844_v11  }
  0x60   :  { %472 = vperm.xlu0 %4622, %v4907_v23  }
  0x62   :  { %4576 = vset.pattern.permute.xlu2 %v4886_v19  ;;  %4575 = vset.pattern.permute.xlu1 %v4904_v22 }
  0x68   :  { %4627 = vset.pattern.permute.xlu0 %v4880_v18 }
  0x6a   :  { %150 = vperm.xlu2 %4576, %v4844_v11   ;;  %144 = vperm.xlu1 %4575, %v4844_v11  }
  0x70   :  { %502 = vperm.xlu0 %4627, %v4907_v23  }
  0x72   :  { %4578 = vset.pattern.permute.xlu2 %v4916_v24  ;;  %4577 = vset.pattern.permute.xlu1 %v4821_v1 }
  0x74   :  { %v5025_v46 = vpop.permute.xlu2 %84 }
  0x78   :  { %4632 = vset.pattern.permute.xlu0 %v4904_v22 }
  0x7a   :  { %163 = vperm.xlu2 %4578, %v152_v25   ;;  %157 = vperm.xlu1 %4577, %v152_v25  }
  0x80   :  { %532 = vperm.xlu0 %4632, %v4907_v23  }
  0x82   :  { %4580 = vset.pattern.permute.xlu2 %v4825_v2  ;;  %4579 = vset.pattern.permute.xlu1 %v4853_v13 }
  0x84   :  { %v91_v51 = vpop.permute.xlu2 %90 }
  0x85   :  { %vm850_vm8 = vcmp.lt.s32.totalorder %v4844_v11, %v91_v51 }
  0x86   :  { %v5041_v54 = vsel %vm850_vm8, 1, %v8718_v36 }
  0x87   :  { %v1161_v57 = vand.u32 65535, %v5041_v54 }
  0x88   :  { %4637 = vset.pattern.permute.xlu0 %v4853_v13 }
  0x89   :  { %v1163_v58 = vcvt.s32.f32 %v1161_v57 }
  0x8a   :  { %181 = vperm.xlu2 %4580, %v152_v25   ;;  %175 = vperm.xlu1 %4579, %v152_v25   ;;  %v61_v32 = vpop.permute.xlu0 %60 }
  0x8b   :  { %vm845_vm5 = vcmp.lt.s32.totalorder %v4844_v11, %v61_v32 }
  0x8c   :  { %v5012_v39 = vsel %vm845_vm5, 1, %v8718_v36  ;;  %v73_v41 = vpop.permute.xlu1 %72 }
  0x8d   :  { %v1101_v40 = vand.u32 65535, %v5012_v39  ;;  %vm847_vm6 = vcmp.lt.s32.totalorder %v4844_v11, %v73_v41 }
  0x8e   :  { %v5023_v44 = vsel %vm847_vm6, 1, %v8718_v36 }
  0x8f   :  { %v1103_v43 = vcvt.s32.f32 %v1101_v40  ;;  %v1125_v47 = vand.u32 65535, %v5023_v44 }
  0x90   :  { %563 = vperm.xlu0 %4637, %v4928_v26  }
  0x91   :  { %v1127_v49 = vcvt.s32.f32 %v1125_v47 }
  0x92   :  { %4582 = vset.pattern.permute.xlu2 %v4868_v16  ;;  %4581 = vset.pattern.permute.xlu1 %v4850_v12  ;;  %v4988_v33 = vpop.permute.xlu0 %351 }
  0x94   :  { %v5060_v6 = vpop.permute.xlu2 %102 }
  0x98   :  { %4638 = vset.pattern.permute.xlu0 %v4934_v27 }
  0x9a   :  { %193 = vperm.xlu2 %4582, %v152_v25   ;;  %187 = vperm.xlu1 %4581, %v152_v25  }
  0x9c   :  { %v79_v45 = vpop.permute.xlu1 %78 }
  0x9d   :  { %vm848_vm7 = vcmp.lt.s32.totalorder %v4844_v11, %v79_v45 }
  0x9e   :  { %v5034_v50 = vsel %vm848_vm7, 1, %v8718_v36 }
  0x9f   :  { %v1138_v52 = vshrl.u32 %v5034_v50, 16 }
  0xa0   :  { %108 = vperm.xlu0 %4638, %v4844_v11  }
  0xa1   :  { %v1140_v53 = vcvt.s32.f32 %v1138_v52 }
  0xa2   :  { %4584 = vset.pattern.permute.xlu2 %v4880_v18  ;;  %4583 = vset.pattern.permute.xlu1 %v4934_v27  ;;  %v4992_v34 = vpop.permute.xlu0 %381 }
  0xa8   :  { %593 = vperm.xlu0 %4638, %v4928_v26  }
  0xaa   :  { %211 = vperm.xlu2 %4584, %v152_v25   ;;  %205 = vperm.xlu1 %4583, %v152_v25  }
  0xac   :  { %v97_v56 = vpop.permute.xlu1 %96 }
  0xad   :  { %vm851_vm9 = vcmp.lt.s32.totalorder %v4844_v11, %v97_v56 }
  0xae   :  { %v5050_v59 = vsel %vm851_vm9, 1, %v8718_v36 }
  0xaf   :  { %v1174_v61 = vshrl.u32 %v5050_v59, 16 }
  0xb0   :  { %4643 = vset.pattern.permute.xlu0 %v4942_v28 }
  0xb1   :  { %v1176_v63 = vcvt.s32.f32 %v1174_v61  ;;  %v831_v61 = vrot.slane %v4841_v10, 1 }
  0xb2   :  { %4586 = vset.pattern.permute.xlu2 %v4895_v21  ;;  %4585 = vset.pattern.permute.xlu1 %v4874_v17  ;;  %v4997_v35 = vpop.permute.xlu0 %411 }
  0xb3   :  { %8865 = vst [vmem:[#allocation19_spill] sm:$0xff] %v4997_v35 }
  0xb8   :  { %138 = vperm.xlu0 %4643, %v4844_v11  }
  0xba   :  { %223 = vperm.xlu2 %4586, %v152_v25   ;;  %217 = vperm.xlu1 %4585, %v152_v25  }
  0xbc   :  { %v115_v5 = vpop.permute.xlu1 %114 }
  0xbd   :  { %vm854_vm11 = vcmp.lt.s32.totalorder %v4844_v11, %v115_v5 }
  0xbe   :  { %v5066_v9 = vsel %vm854_vm11, 1, %v8718_v36 }
  0xc0   :  { %623 = vperm.xlu0 %4643, %v4928_v26  }
  0xc2   :  { %4588 = vset.pattern.permute.xlu2 %v4904_v22  ;;  %4587 = vset.pattern.permute.xlu1 %v4942_v28  ;;  %v5004_v37 = vpop.permute.xlu0 %441 }
  0xc8   :  { %4648 = vset.pattern.permute.xlu0 %v4828_v3 }
  0xca   :  { %241 = vperm.xlu2 %4588, %v152_v25   ;;  %235 = vperm.xlu1 %4587, %v152_v25  }
  0xd0   :  { %169 = vperm.xlu0 %4648, %v152_v25  }
  0xd2   :  { %4590 = vset.pattern.permute.xlu2 %v4821_v1  ;;  %4589 = vset.pattern.permute.xlu1 %v4886_v19  ;;  %v5008_v38 = vpop.permute.xlu0 %472 }
  0xd8   :  { %654 = vperm.xlu0 %4648, %v4956_v30  }
  0xda   :  { %254 = vperm.xlu2 %4590, %v249_v29   ;;  %247 = vperm.xlu1 %4589, %v152_v25  }
  0xe0   :  { %4653 = vset.pattern.permute.xlu0 %v4865_v15 }
  0xe2   :  { %4592 = vset.pattern.permute.xlu2 %v4853_v13  ;;  %4591 = vset.pattern.permute.xlu1 %v4828_v3  ;;  %v5017_v42 = vpop.permute.xlu0 %502 }
  0xe3   :  { %8866 = vst [vmem:[#allocation20_spill] sm:$0xff] %v5017_v42 }
  0xe8   :  { %199 = vperm.xlu0 %4653, %v152_v25  }
  0xea   :  { %272 = vperm.xlu2 %4592, %v249_v29   ;;  %266 = vperm.xlu1 %4591, %v249_v29  }
  0xf0   :  { %684 = vperm.xlu0 %4653, %v4956_v30  }
  0xf2   :  { %4594 = vset.pattern.permute.xlu2 %v4850_v12  ;;  %4593 = vset.pattern.permute.xlu1 %v4825_v2  ;;  %v5029_v48 = vpop.permute.xlu0 %532 }
  0xf8   :  { %4658 = vset.pattern.permute.xlu0 %v4892_v20 }
  0xfa   :  { %284 = vperm.xlu2 %4594, %v249_v29   ;;  %278 = vperm.xlu1 %4593, %v249_v29  }
 0x100   :  { %229 = vperm.xlu0 %4658, %v152_v25   ;;  %v5068_v25 = vpop.permute.xlu2 %120 }
 0x102   :  { %4596 = vset.pattern.permute.xlu2 %v4934_v27  ;;  %4595 = vset.pattern.permute.xlu1 %v4865_v15  ;;  %v5043_v55 = vpop.permute.xlu0 %563 }
 0x108   :  { %714 = vperm.xlu0 %4658, %v4956_v30   ;;  %v133_v41 = vpop.permute.xlu2 %132 }
 0x109   :  { %vm857_vm13 = vcmp.lt.s32.totalorder %v4844_v11, %v133_v41 }
 0x10a   :  { %302 = vperm.xlu2 %4596, %v249_v29   ;;  %296 = vperm.xlu1 %4595, %v249_v29  }
 0x110   :  { %4663 = vset.pattern.permute.xlu0 %v4916_v24 }
 0x112   :  { %4598 = vset.pattern.permute.xlu2 %v4874_v17  ;;  %4597 = vset.pattern.permute.xlu1 %v4880_v18  ;;  %v109_v60 = vpop.permute.xlu0 %108 }
 0x113   :  { %vm853_vm10 = vcmp.lt.s32.totalorder %v4844_v11, %v109_v60 }
 0x114   :  { %v5055_v62 = vsel %vm853_vm10, 1, %v8718_v36 }
 0x115   :  { %v1197_v0 = vand.u32 65535, %v5055_v62 }
 0x117   :  { %v1199_v7 = vcvt.s32.f32 %v1197_v0 }
 0x118   :  { %66 = vperm.xlu0 %4663, %v4844_v11  }
 0x11a   :  { %314 = vperm.xlu2 %4598, %v249_v29   ;;  %308 = vperm.xlu1 %4597, %v249_v29   ;;  %v5078_v45 = vpop.permute.xlu0 %593 }
 0x11b   :  { %8867 = vst [vmem:[#allocation21_spill] sm:$0xff] %v5078_v45 }
 0x120   :  { %260 = vperm.xlu0 %4663, %v249_v29  }
 0x122   :  { %4600 = vset.pattern.permute.xlu2 %v4942_v28  ;;  %4599 = vset.pattern.permute.xlu1 %v4892_v20 }
 0x128   :  { %745 = vperm.xlu0 %4663, %v4976_v31  }
 0x12a   :  { %332 = vperm.xlu2 %4600, %v249_v29   ;;  %326 = vperm.xlu1 %4599, %v249_v29  }
 0x130   :  { %4668 = vset.pattern.permute.xlu0 %v4868_v16 }
 0x132   :  { %4602 = vset.pattern.permute.xlu2 %v4886_v19  ;;  %4601 = vset.pattern.permute.xlu1 %v4904_v22 }
 0x138   :  { %290 = vperm.xlu0 %4668, %v249_v29  }
 0x13a   :  { %344 = vperm.xlu2 %4602, %v249_v29   ;;  %338 = vperm.xlu1 %4601, %v249_v29  }
 0x140   :  { %775 = vperm.xlu0 %4668, %v4976_v31  }
 0x142   :  { %4604 = vset.pattern.permute.xlu2 %v4828_v3  ;;  %4603 = vset.pattern.permute.xlu1 %v4916_v24 }
 0x148   :  { %4673 = vset.pattern.permute.xlu0 %v4895_v21 }
 0x14a   :  { %363 = vperm.xlu2 %4604, %v4856_v14   ;;  %357 = vperm.xlu1 %4603, %v4856_v14  }
 0x150   :  { %320 = vperm.xlu0 %4673, %v249_v29   ;;  %v1210_v29 = vshrl.u32 %v5066_v9, 16 }
 0x152   :  { %4606 = vset.pattern.permute.xlu2 %v4825_v2  ;;  %4605 = vset.pattern.permute.xlu1 %v4853_v13  ;;  %v1212_v32 = vcvt.s32.f32 %v1210_v29 }
 0x158   :  { %805 = vperm.xlu0 %4673, %v4976_v31  }
 0x15a   :  { %375 = vperm.xlu2 %4606, %v4856_v14   ;;  %369 = vperm.xlu1 %4605, %v4856_v14  }
 0x160   :  { %4683 = vset.pattern.permute.xlu0 %v8718_v36 }
 0x162   :  { %4609 = vset.pattern.permute.xlu2 %v4865_v15  ;;  %4608 = vset.pattern.permute.xlu1 %v4868_v16 }
 0x16a   :  { %393 = vperm.xlu2 %4609, %v4856_v14   ;;  %387 = vperm.xlu1 %4608, %v4856_v14  }
 0x172   :  { %4611 = vset.pattern.permute.xlu2 %v4880_v18  ;;  %4610 = vset.pattern.permute.xlu1 %v4934_v27 }
 0x17a   :  { %405 = vperm.xlu2 %4611, %v4856_v14   ;;  %399 = vperm.xlu1 %4610, %v4856_v14  }
 0x182   :  { %4614 = vset.pattern.permute.xlu2 %v4892_v20  ;;  %4613 = vset.pattern.permute.xlu1 %v4895_v21 }
 0x183   :  { %1105 = vadd.xlane.f32.xlu0 %v1103_v43 }
 0x18a   :  { %423 = vperm.xlu2 %4614, %v4856_v14   ;;  %417 = vperm.xlu1 %4613, %v4856_v14  }
 0x18b   :  { %1129 = vadd.xlane.f32.xlu0 %v1127_v49  ;;  %v5084_v49 = vsel %vm857_vm13, 1, %v8718_v36 }
 0x18c   :  { %v1246_v52 = vshrl.u32 %v5084_v49, 16 }
 0x18e   :  { %v1248_v56 = vcvt.s32.f32 %v1246_v52 }
 0x192   :  { %4616 = vset.pattern.permute.xlu2 %v4904_v22  ;;  %4615 = vset.pattern.permute.xlu1 %v4942_v28 }
 0x193   :  { %1143 = vadd.xlane.f32.xlu0 %v1140_v53  ;;  %v5088_v53 = vpop.permute.xlu0 %138 }
 0x19a   :  { %435 = vperm.xlu2 %4616, %v4856_v14   ;;  %429 = vperm.xlu1 %4615, %v4856_v14   ;;  %v127_v14 = vpop.permute.xlu1 %126 }
 0x19b   :  { %1165 = vadd.xlane.f32.xlu0 %v1163_v58  ;;  %vm856_vm12 = vcmp.lt.s32.totalorder %v4844_v11, %v127_v14  ;;  %v151_v58 = vpop.permute.xlu2 %150  ;;  %v5103_v5 = vpop.permute.xlu0 %623  ;;  %v5105_v14 = vperm.slane %v831_v61, 0 }
 0x19c   :  { %v5075_v40 = vsel %vm856_vm12, 1, %v8718_v36  ;;  %vm860_vm15 = vcmp.lt.s32.totalorder %v4844_v11, %v151_v58 }
 0x19d   :  { %v1233_v43 = vand.u32 65535, %v5075_v40  ;;  %v5101_v0 = vsel %vm860_vm15, 1, %v8718_v36 }
 0x19e   :  { %v1282_v29 = vshrl.u32 %v5101_v0, 16 }
 0x19f   :  { %v1235_v47 = vcvt.s32.f32 %v1233_v43 }
 0x1a2   :  { %4619 = vset.pattern.permute.xlu2 %v4916_v24  ;;  %4618 = vset.pattern.permute.xlu1 %v4821_v1  ;;  %v145_v51 = vpop.permute.xlu1 %144 }
 0x1a3   :  { %1179 = vadd.xlane.f32.xlu0 %v1176_v63  ;;  %vm859_vm14 = vcmp.lt.s32.totalorder %v4844_v11, %v145_v51 }
 0x1a4   :  { %v5093_v57 = vsel %vm859_vm14, 1, %v8718_v36 }
 0x1a5   :  { %v1269_v60 = vand.u32 65535, %v5093_v57 }
 0x1a7   :  { %v1271_v63 = vcvt.s32.f32 %v1269_v60 }
 0x1aa   :  { %454 = vperm.xlu2 %4619, %v4907_v23   ;;  %448 = vperm.xlu1 %4618, %v4907_v23   ;;  %v5114_v43 = vpop.permute.xlu1 %157 }
 0x1ab   :  { %1201 = vadd.xlane.f32.xlu0 %v1199_v7  ;;  %v164_v7 = vpop.permute.xlu2 %163 }
 0x1ac   :  { %vm862_vm0 = vcmp.lt.s32.totalorder %v5105_v14, %v164_v7 }
 0x1ad   :  { %v5112_v41 = vsel %vm862_vm0, 1, %v8718_v36 }
 0x1ae   :  { %v1305_v51 = vand.u32 65535, %v5112_v41 }
 0x1b2   :  { %4621 = vset.pattern.permute.xlu2 %v4853_v13  ;;  %4620 = vset.pattern.permute.xlu1 %v4828_v3  ;;  %v5124_v60 = vpop.permute.xlu1 %175 }
 0x1b3   :  { %1215 = vadd.xlane.f32.xlu0 %v1212_v32  ;;  %v1284_v32 = vcvt.s32.f32 %v1282_v29  ;;  %v182_v61 = vpop.permute.xlu2 %181 }
 0x1b4   :  { %vm865_vm2 = vcmp.lt.s32.totalorder %v5105_v14, %v182_v61 }
 0x1b5   :  { %v5130_v7 = vsel %vm865_vm2, 1, %v8718_v36 }
 0x1ba   :  { %466 = vperm.xlu2 %4621, %v4907_v23   ;;  %460 = vperm.xlu1 %4620, %v4907_v23  }
 0x1bb   :  { %1237 = vadd.xlane.f32.xlu0 %v1235_v47  ;;  %v170_v47 = vpop.permute.xlu0 %169  ;;  %v5149_v8 = vpop.permute.xlu2 %193 }
 0x1bc   :  { %vm863_vm1 = vcmp.lt.s32.totalorder %v5105_v14, %v170_v47  ;;  %v1341_v47 = vand.u32 65535, %v5130_v7  ;;  %8870 = vst [vmem:[#allocation24_spill] sm:$0xff] %v5149_v8 }
 0x1bd   :  { %v5119_v52 = vsel %vm863_vm1, 1, %v8718_v36 }
 0x1be   :  { %v1318_v58 = vshrl.u32 %v5119_v52, 16 }
 0x1c2   :  { %4624 = vset.pattern.permute.xlu2 %v4868_v16  ;;  %4623 = vset.pattern.permute.xlu1 %v4850_v12 }
 0x1c3   :  { %1251 = vadd.xlane.f32.xlu0 %v1248_v56  ;;  %v1307_v56 = vcvt.s32.f32 %v1305_v51  ;;  %v5132_v29 = vpop.permute.xlu0 %654  ;;  %v1343_v51 = vcvt.s32.f32 %v1341_v47  ;;  %v5157_v42 = vpop.permute.xlu2 %211 }
 0x1c4   :  { %8872 = vst [vmem:[#allocation26_spill] sm:$0xff] %v5157_v42 }
 0x1ca   :  { %484 = vperm.xlu2 %4624, %v4907_v23   ;;  %478 = vperm.xlu1 %4623, %v4907_v23  }
 0x1cb   :  { %1273 = vadd.xlane.f32.xlu0 %v1271_v63  ;;  %v1320_v63 = vcvt.s32.f32 %v1318_v58  ;;  %v200_v58 = vpop.permute.xlu0 %199  ;;  %v224_v35 = vpop.permute.xlu2 %223 }
 0x1cc   :  { %vm868_vm5 = vcmp.lt.s32.totalorder %v5105_v14, %v200_v58  ;;  %vm872_vm8 = vcmp.lt.s32.totalorder %v5105_v14, %v224_v35 }
 0x1d2   :  { %4626 = vset.pattern.permute.xlu2 %v4934_v27  ;;  %4625 = vset.pattern.permute.xlu1 %v4865_v15 }
 0x1d3   :  { %1287 = vadd.xlane.f32.xlu0 %v1284_v32  ;;  %v188_v32 = vpop.permute.xlu1 %187 }
 0x1d4   :  { %vm866_vm3 = vcmp.lt.s32.totalorder %v5105_v14, %v188_v32 }
 0x1da   :  { %496 = vperm.xlu2 %4626, %v4907_v23   ;;  %490 = vperm.xlu1 %4625, %v4907_v23  }
 0x1db   :  { %1309 = vadd.xlane.f32.xlu0 %v1307_v56  ;;  %v5139_v56 = vsel %vm866_vm3, 1, %v8718_v36  ;;  %v206_v4 = vpop.permute.xlu1 %205 }
 0x1dc   :  { %8868 = vst [vmem:[#allocation22_spill] sm:$0xff] %v5139_v56  ;;  %v1354_v61 = vshrl.u32 %v5139_v56, 16  ;;  %vm869_vm6 = vcmp.lt.s32.totalorder %v5105_v14, %v206_v4 }
 0x1dd   :  { %v5155_v58 = vsel %vm869_vm6, 1, %v8718_v36 }
 0x1de   :  { %v1356_v32 = vcvt.s32.f32 %v1354_v61  ;;  %8871 = vst [vmem:[#allocation25_spill] sm:$0xff] %v5155_v58  ;;  %v5159_v61 = vpop.permute.xlu0 %684 }
 0x1df   :  { %8873 = vst [vmem:[#allocation27_spill] sm:$0xff] %v5159_v61  ;;  %v5175_v61 = vsel %vm872_vm8, 1, %v8718_v36 }
 0x1e0   :  { %8876 = vst [vmem:[#allocation30_spill] sm:$0xff] %v5175_v61 }
 0x1e2   :  { %4629 = vset.pattern.permute.xlu2 %v4895_v21  ;;  %4628 = vset.pattern.permute.xlu1 %v4874_v17 }
 0x1e3   :  { %1323 = vadd.xlane.f32.xlu0 %v1320_v63  ;;  %v5144_v63 = vsel %vm868_vm5, 1, %v8718_v36  ;;  %v218_v45 = vpop.permute.xlu1 %217 }
 0x1e4   :  { %8869 = vst [vmem:[#allocation23_spill] sm:$0xff] %v5144_v63  ;;  %v1377_v47 = vand.u32 65535, %v5144_v63  ;;  %vm871_vm7 = vcmp.lt.s32.totalorder %v5105_v14, %v218_v45 }
 0x1e6   :  { %v5169_v63 = vpop.permute.xlu0 %229 }
 0x1e7   :  { %8875 = vst [vmem:[#allocation29_spill] sm:$0xff] %v5169_v63 }
 0x1ea   :  { %514 = vperm.xlu2 %4629, %v4907_v23   ;;  %508 = vperm.xlu1 %4628, %v4907_v23  }
 0x1eb   :  { %1345 = vadd.xlane.f32.xlu0 %v1343_v51  ;;  %v1379_v51 = vcvt.s32.f32 %v1377_v47  ;;  %v5166_v47 = vsel %vm871_vm7, 1, %v8718_v36 }
 0x1ec   :  { %8874 = vst [vmem:[#allocation28_spill] sm:$0xff] %v5166_v47 }
 0x1f2   :  { %4631 = vset.pattern.permute.xlu2 %v4942_v28  ;;  %4630 = vset.pattern.permute.xlu1 %v4892_v20 }
 0x1f3   :  { %1359 = vadd.xlane.f32.xlu0 %v1356_v32  ;;  %v1390_v32 = vshrl.u32 %v5155_v58, 16  ;;  %v1426_v58 = vshrl.u32 %v5175_v61, 16 }
 0x1f5   :  { %v1392_v4 = vcvt.s32.f32 %v1390_v32  ;;  %v236_v32 = vpop.permute.xlu1 %235  ;;  %v1428_v35 = vcvt.s32.f32 %v1426_v58 }
 0x1f6   :  { %vm874_vm9 = vcmp.lt.s32.totalorder %v5105_v14, %v236_v32 }
 0x1f7   :  { %v5184_v63 = vsel %vm874_vm9, 1, %v8718_v36 }
 0x1f8   :  { %8877 = vst [vmem:[#allocation31_spill] sm:$0xff] %v5184_v63 }
 0x1fa   :  { %526 = vperm.xlu2 %4631, %v4907_v23   ;;  %520 = vperm.xlu1 %4630, %v4907_v23  }
 0x1fb   :  { %1381 = vadd.xlane.f32.xlu0 %v1379_v51  ;;  %v1413_v51 = vand.u32 65535, %v5166_v47 }
 0x1fd   :  { %v1415_v45 = vcvt.s32.f32 %v1413_v51  ;;  %v1449_v51 = vand.u32 65535, %v5184_v63  ;;  %v5205_v42 = vpop.permute.xlu1 %247 }
 0x1fe   :  { %8880 = vst [vmem:[#allocation34_spill] sm:$0xff] %v5205_v42 }
 0x1ff   :  { %v1451_v32 = vcvt.s32.f32 %v1449_v51 }
 0x202   :  { %4634 = vset.pattern.permute.xlu2 %v4821_v1  ;;  %4633 = vset.pattern.permute.xlu1 %v4886_v19 }
 0x203   :  { %1395 = vadd.xlane.f32.xlu0 %v1392_v4  ;;  %v5179_v4 = vpop.permute.xlu0 %714 }
 0x20a   :  { %545 = vperm.xlu2 %4634, %v4928_v26   ;;  %538 = vperm.xlu1 %4633, %v4907_v23   ;;  %v242_v23 = vpop.permute.xlu2 %241 }
 0x20b   :  { %1417 = vadd.xlane.f32.xlu0 %v1415_v45  ;;  %vm875_vm10 = vcmp.lt.s32.totalorder %v5105_v14, %v242_v23  ;;  %v832_v45 = vrot.slane %v4841_v10, 2  ;;  %v5194_v58 = vpop.permute.xlu0 %66 }
 0x20c   :  { %v5192_v61 = vsel %vm875_vm10, 1, %v8718_v36 }
 0x20d   :  { %8878 = vst [vmem:[#allocation32_spill] sm:$0xff] %v5192_v61  ;;  %v1462_v63 = vshrl.u32 %v5192_v61, 16  ;;  %v5215_v61 = vpop.permute.xlu1 %266 }
 0x20e   :  { %8882 = vst [vmem:[#allocation36_spill] sm:$0xff] %v5215_v61 }
 0x20f   :  { %v1464_v23 = vcvt.s32.f32 %v1462_v63 }
 0x212   :  { %4636 = vset.pattern.permute.xlu2 %v4828_v3  ;;  %4635 = vset.pattern.permute.xlu1 %v4916_v24  ;;  %v255_v47 = vpop.permute.xlu2 %254 }
 0x213   :  { %1431 = vadd.xlane.f32.xlu0 %v1428_v35  ;;  %v5196_v35 = vperm.slane %v832_v45, 0  ;;  %v261_v56 = vpop.permute.xlu0 %260 }
 0x215   :  { %vm877_vm11 = vcmp.lt.s32.totalorder %v5196_v35, %v255_v47  ;;  %vm878_vm12 = vcmp.lt.s32.totalorder %v5196_v35, %v261_v56 }
 0x216   :  { %v5203_v51 = vsel %vm877_vm11, 1, %v8718_v36 }
 0x217   :  { %8879 = vst [vmem:[#allocation33_spill] sm:$0xff] %v5203_v51  ;;  %v1485_v45 = vand.u32 65535, %v5203_v51 }
 0x219   :  { %v1487_v47 = vcvt.s32.f32 %v1485_v45  ;;  %v279_v45 = vpop.permute.xlu1 %278 }
 0x21a   :  { %557 = vperm.xlu2 %4636, %v4928_v26   ;;  %551 = vperm.xlu1 %4635, %v4928_v26   ;;  %vm881_vm14 = vcmp.lt.s32.totalorder %v5196_v35, %v279_v45 }
 0x21b   :  { %1453 = vadd.xlane.f32.xlu0 %v1451_v32  ;;  %v5210_v32 = vsel %vm878_vm12, 1, %v8718_v36  ;;  %v5223_v51 = vpop.permute.xlu0 %745 }
 0x21c   :  { %8881 = vst [vmem:[#allocation35_spill] sm:$0xff] %v5210_v32  ;;  %v1498_v63 = vshrl.u32 %v5210_v32, 16 }
 0x21d   :  { %8884 = vst [vmem:[#allocation38_spill] sm:$0xff] %v5223_v51 }
 0x21e   :  { %v1500_v42 = vcvt.s32.f32 %v1498_v63 }
 0x222   :  { %4640 = vset.pattern.permute.xlu2 %v4850_v12  ;;  %4639 = vset.pattern.permute.xlu1 %v4825_v2 }
 0x223   :  { %1467 = vadd.xlane.f32.xlu0 %v1464_v23  ;;  %v273_v23 = vpop.permute.xlu2 %272  ;;  %v291_v32 = vpop.permute.xlu0 %290 }
 0x224   :  { %vm880_vm13 = vcmp.lt.s32.totalorder %v5196_v35, %v273_v23  ;;  %v5230_v23 = vsel %vm881_vm14, 1, %v8718_v36  ;;  %vm883_vm15 = vcmp.lt.s32.totalorder %v5196_v35, %v291_v32 }
 0x225   :  { %v5221_v56 = vsel %vm880_vm13, 1, %v8718_v36  ;;  %8885 = vst [vmem:[#allocation39_spill] sm:$0xff] %v5230_v23  ;;  %v1534_v61 = vshrl.u32 %v5230_v23, 16 }
 0x226   :  { %8883 = vst [vmem:[#allocation37_spill] sm:$0xff] %v5221_v56 }
 0x227   :  { %v1536_v45 = vcvt.s32.f32 %v1534_v61 }
 0x22a   :  { %575 = vperm.xlu2 %4640, %v4928_v26   ;;  %569 = vperm.xlu1 %4639, %v4928_v26  }
 0x22b   :  { %1489 = vadd.xlane.f32.xlu0 %v1487_v47  ;;  %v1521_v47 = vand.u32 65535, %v5221_v56  ;;  %v5240_v51 = vpop.permute.xlu2 %284 }
 0x22d   :  { %v1523_v63 = vcvt.s32.f32 %v1521_v47  ;;  %v297_v47 = vpop.permute.xlu1 %296 }
 0x22e   :  { %vm884_vm0 = vcmp.lt.s32.totalorder %v5196_v35, %v297_v47 }
 0x22f   :  { %v5246_v32 = vsel %vm884_vm0, 1, %v8718_v36 }
 0x230   :  { %8887 = vst [vmem:[#allocation41_spill] sm:$0xff] %v5246_v32  ;;  %v1570_v61 = vshrl.u32 %v5246_v32, 16 }
 0x232   :  { %4642 = vset.pattern.permute.xlu2 %v4865_v15  ;;  %4641 = vset.pattern.permute.xlu1 %v4868_v16 }
 0x233   :  { %1503 = vadd.xlane.f32.xlu0 %v1500_v42  ;;  %v5235_v42 = vsel %vm883_vm15, 1, %v8718_v36  ;;  %v5248_v8 = vpop.permute.xlu2 %302 }
 0x234   :  { %8886 = vst [vmem:[#allocation40_spill] sm:$0xff] %v5235_v42  ;;  %v1557_v56 = vand.u32 65535, %v5235_v42 }
 0x235   :  { %v309_v23 = vpop.permute.xlu1 %308 }
 0x236   :  { %vm886_vm1 = vcmp.lt.s32.totalorder %v5196_v35, %v309_v23 }
 0x23a   :  { %587 = vperm.xlu2 %4642, %v4928_v26   ;;  %581 = vperm.xlu1 %4641, %v4928_v26  }
 0x23b   :  { %1525 = vadd.xlane.f32.xlu0 %v1523_v63  ;;  %v1559_v63 = vcvt.s32.f32 %v1557_v56  ;;  %v1572_v56 = vcvt.s32.f32 %v1570_v61  ;;  %v315_v47 = vpop.permute.xlu2 %314 }
 0x23c   :  { %vm887_vm2 = vcmp.lt.s32.totalorder %v5196_v35, %v315_v47 }
 0x23d   :  { %v5262_v23 = vsel %vm887_vm2, 1, %v8718_v36  ;;  %v327_v32 = vpop.permute.xlu1 %326 }
 0x23e   :  { %8889 = vst [vmem:[#allocation43_spill] sm:$0xff] %v5262_v23  ;;  %v1606_v61 = vshrl.u32 %v5262_v23, 16  ;;  %vm889_vm3 = vcmp.lt.s32.totalorder %v5196_v35, %v327_v32 }
 0x23f   :  { %v5269_v47 = vsel %vm889_vm3, 1, %v8718_v36 }
 0x240   :  { %8890 = vst [vmem:[#allocation44_spill] sm:$0xff] %v5269_v47 }
 0x242   :  { %4645 = vset.pattern.permute.xlu2 %v4874_v17  ;;  %4644 = vset.pattern.permute.xlu1 %v4880_v18 }
 0x243   :  { %1539 = vadd.xlane.f32.xlu0 %v1536_v45  ;;  %v5255_v45 = vsel %vm886_vm1, 1, %v8718_v36 }
 0x244   :  { %8888 = vst [vmem:[#allocation42_spill] sm:$0xff] %v5255_v45  ;;  %v1593_v42 = vand.u32 65535, %v5255_v45  ;;  %v333_v45 = vpop.permute.xlu2 %332 }
 0x245   :  { %vm890_vm5 = vcmp.lt.s32.totalorder %v5196_v35, %v333_v45  ;;  %v833_v45 = vrot.slane %v4841_v10, 3 }
 0x246   :  { %v5276_v32 = vsel %vm890_vm5, 1, %v8718_v36 }
 0x247   :  { %8891 = vst [vmem:[#allocation45_spill] sm:$0xff] %v5276_v32 }
 0x24a   :  { %605 = vperm.xlu2 %4645, %v4928_v26   ;;  %599 = vperm.xlu1 %4644, %v4928_v26  }
 0x24b   :  { %1561 = vadd.xlane.f32.xlu0 %v1559_v63  ;;  %v1595_v63 = vcvt.s32.f32 %v1593_v42  ;;  %v1629_v42 = vand.u32 65535, %v5269_v47 }
 0x24c   :  { %v345_v23 = vpop.permute.xlu2 %344 }
 0x24d   :  { %vm892_vm6 = vcmp.lt.s32.totalorder %v5196_v35, %v345_v23 }
 0x24e   :  { %v5284_v47 = vsel %vm892_vm6, 1, %v8718_v36 }
 0x24f   :  { %8892 = vst [vmem:[#allocation46_spill] sm:$0xff] %v5284_v47 }
 0x252   :  { %4647 = vset.pattern.permute.xlu2 %v4892_v20  ;;  %4646 = vset.pattern.permute.xlu1 %v4895_v21 }
 0x253   :  { %1575 = vadd.xlane.f32.xlu0 %v1572_v56  ;;  %v1608_v56 = vcvt.s32.f32 %v1606_v61  ;;  %v1642_v61 = vshrl.u32 %v5276_v32, 16 }
 0x25a   :  { %617 = vperm.xlu2 %4647, %v4928_v26   ;;  %611 = vperm.xlu1 %4646, %v4928_v26  }
 0x25b   :  { %1597 = vadd.xlane.f32.xlu0 %v1595_v63  ;;  %v1631_v63 = vcvt.s32.f32 %v1629_v42  ;;  %v5288_v42 = vperm.slane %v833_v45, 0 }
 0x25d   :  { %vm893_vm7 = vcmp.lt.s32.totalorder %v5288_v42, %v4988_v33  ;;  %vm898_vm10 = vcmp.lt.s32.totalorder %v5288_v42, %v4992_v34  ;;  %vm908_vm1 = vcmp.lt.s32.totalorder %v5288_v42, %v5004_v37 }
 0x262   :  { %4650 = vset.pattern.permute.xlu2 %v4886_v19  ;;  %4649 = vset.pattern.permute.xlu1 %v4904_v22 }
 0x263   :  { %1611 = vadd.xlane.f32.xlu0 %v1608_v56  ;;  %v1644_v56 = vcvt.s32.f32 %v1642_v61  ;;  %v5296_v61 = vsel %vm893_vm7, 1, %v8718_v36 }
 0x264   :  { %8893 = vst [vmem:[#allocation47_spill] sm:$0xff] %v5296_v61  ;;  %v1678_v45 = vshrl.u32 %v5296_v61, 16 }
 0x266   :  { %v1680_v33 = vcvt.s32.f32 %v1678_v45 }
 0x26a   :  { %635 = vperm.xlu2 %4650, %v4928_v26   ;;  %629 = vperm.xlu1 %4649, %v4928_v26   ;;  %v5286_v26 = vpop.permute.xlu1 %338 }
 0x26b   :  { %1633 = vadd.xlane.f32.xlu0 %v1631_v63  ;;  %v1665_v63 = vand.u32 65535, %v5284_v47 }
 0x26d   :  { %v1667_v23 = vcvt.s32.f32 %v1665_v63 }
 0x272   :  { %4652 = vset.pattern.permute.xlu2 %v4916_v24  ;;  %4651 = vset.pattern.permute.xlu1 %v4821_v1  ;;  %v5298_v24 = vpop.permute.xlu1 %357 }
 0x273   :  { %1647 = vadd.xlane.f32.xlu0 %v1644_v56  ;;  %v364_v56 = vpop.permute.xlu2 %363 }
 0x274   :  { %vm895_vm8 = vcmp.lt.s32.totalorder %v5288_v42, %v364_v56 }
 0x275   :  { %v5305_v47 = vsel %vm895_vm8, 1, %v8718_v36 }
 0x276   :  { %8894 = vst [vmem:[#allocation48_spill] sm:$0xff] %v5305_v47  ;;  %v1701_v32 = vand.u32 65535, %v5305_v47 }
 0x27a   :  { %648 = vperm.xlu2 %4652, %v4956_v30   ;;  %642 = vperm.xlu1 %4651, %v4956_v30   ;;  %v370_v63 = vpop.permute.xlu1 %369 }
 0x27b   :  { %1669 = vadd.xlane.f32.xlu0 %v1667_v23  ;;  %vm896_vm9 = vcmp.lt.s32.totalorder %v5288_v42, %v370_v63  ;;  %v1703_v23 = vcvt.s32.f32 %v1701_v32  ;;  %v5320_v63 = vsel %vm898_vm10, 1, %v8718_v36  ;;  %v5322_v32 = vpop.permute.xlu2 %375 }
 0x27c   :  { %v5312_v56 = vsel %vm896_vm9, 1, %v8718_v36  ;;  %8896 = vst [vmem:[#allocation50_spill] sm:$0xff] %v5320_v63  ;;  %v1737_v61 = vand.u32 65535, %v5320_v63 }
 0x27d   :  { %8895 = vst [vmem:[#allocation49_spill] sm:$0xff] %v5312_v56  ;;  %v1714_v45 = vshrl.u32 %v5312_v56, 16 }
 0x27e   :  { %8897 = vst [vmem:[#allocation51_spill] sm:$0xff] %v5322_v32  ;;  %v1739_v34 = vcvt.s32.f32 %v1737_v61 }
 0x282   :  { %4655 = vset.pattern.permute.xlu2 %v4825_v2  ;;  %4654 = vset.pattern.permute.xlu1 %v4853_v13  ;;  %v388_v47 = vpop.permute.xlu1 %387 }
 0x283   :  { %1683 = vadd.xlane.f32.xlu0 %v1680_v33  ;;  %v1716_v33 = vcvt.s32.f32 %v1714_v45  ;;  %vm899_vm11 = vcmp.lt.s32.totalorder %v5288_v42, %v388_v47  ;;  %v5331_v45 = vpop.permute.xlu2 %393 }
 0x284   :  { %8899 = vst [vmem:[#allocation53_spill] sm:$0xff] %v5331_v45 }
 0x28a   :  { %666 = vperm.xlu2 %4655, %v4956_v30   ;;  %660 = vperm.xlu1 %4654, %v4956_v30  }
 0x28b   :  { %1705 = vadd.xlane.f32.xlu0 %v1703_v23  ;;  %v400_v23 = vpop.permute.xlu1 %399  ;;  %v406_v61 = vpop.permute.xlu2 %405 }
 0x28c   :  { %vm901_vm12 = vcmp.lt.s32.totalorder %v5288_v42, %v400_v23  ;;  %vm902_vm13 = vcmp.lt.s32.totalorder %v5288_v42, %v406_v61 }
 0x28d   :  { %v5338_v63 = vsel %vm901_vm12, 1, %v8718_v36 }
 0x28e   :  { %8900 = vst [vmem:[#allocation54_spill] sm:$0xff] %v5338_v63  ;;  %v1773_v56 = vand.u32 65535, %v5338_v63 }
 0x290   :  { %v1775_v23 = vcvt.s32.f32 %v1773_v56 }
 0x292   :  { %4657 = vset.pattern.permute.xlu2 %v4868_v16  ;;  %4656 = vset.pattern.permute.xlu1 %v4850_v12  ;;  %v5329_v16 = vsel %vm899_vm11, 1, %v8718_v36 }
 0x293   :  { %1719 = vadd.xlane.f32.xlu0 %v1716_v33  ;;  %8898 = vst [vmem:[#allocation52_spill] sm:$0xff] %v5329_v16  ;;  %v1750_v33 = vshrl.u32 %v5329_v16, 16  ;;  %v5347_v16 = vsel %vm902_vm13, 1, %v8718_v36  ;;  %v424_v56 = vpop.permute.xlu2 %423 }
 0x294   :  { %8902 = vst [vmem:[#allocation56_spill] sm:$0xff] %v5347_v16  ;;  %v1786_v45 = vshrl.u32 %v5347_v16, 16  ;;  %vm905_vm15 = vcmp.lt.s32.totalorder %v5288_v42, %v424_v56 }
 0x295   :  { %v1752_v47 = vcvt.s32.f32 %v1750_v33  ;;  %v418_v33 = vpop.permute.xlu1 %417 }
 0x296   :  { %vm904_vm14 = vcmp.lt.s32.totalorder %v5288_v42, %v418_v33  ;;  %v1788_v61 = vcvt.s32.f32 %v1786_v45 }
 0x29a   :  { %678 = vperm.xlu2 %4657, %v4956_v30   ;;  %672 = vperm.xlu1 %4656, %v4956_v30  }
 0x29b   :  { %1741 = vadd.xlane.f32.xlu0 %v1739_v34  ;;  %v5341_v34 = vpop.permute.xlu0 %775  ;;  %v436_v45 = vpop.permute.xlu2 %435 }
 0x29c   :  { %8901 = vst [vmem:[#allocation55_spill] sm:$0xff] %v5341_v34  ;;  %v5356_v34 = vsel %vm904_vm14, 1, %v8718_v36  ;;  %vm907_vm0 = vcmp.lt.s32.totalorder %v5288_v42, %v436_v45  ;;  %v834_v45 = vrot.slane %v4841_v10, 4 }
 0x29d   :  { %8903 = vst [vmem:[#allocation57_spill] sm:$0xff] %v5356_v34  ;;  %v1809_v63 = vand.u32 65535, %v5356_v34  ;;  %v5372_v56 = vsel %vm907_vm0, 1, %v8718_v36 }
 0x29e   :  { %8905 = vst [vmem:[#allocation59_spill] sm:$0xff] %v5372_v56 }
 0x2a2   :  { %4660 = vset.pattern.permute.xlu2 %v4880_v18  ;;  %4659 = vset.pattern.permute.xlu1 %v4934_v27 }
 0x2a3   :  { %1755 = vadd.xlane.f32.xlu0 %v1752_v47  ;;  %v5353_v47 = vpop.permute.xlu0 %320 }
 0x2aa   :  { %696 = vperm.xlu2 %4660, %v4956_v30   ;;  %690 = vperm.xlu1 %4659, %v4956_v30  }
 0x2ab   :  { %1777 = vadd.xlane.f32.xlu0 %v1775_v23  ;;  %v1811_v23 = vcvt.s32.f32 %v1809_v63  ;;  %v5365_v33 = vpop.permute.xlu0 %805  ;;  %v5374_v63 = vpop.permute.xlu1 %429 }
 0x2ac   :  { %8906 = vst [vmem:[#allocation60_spill] sm:$0xff] %v5374_v63  ;;  %v455_v63 = vpop.permute.xlu2 %454 }
 0x2b2   :  { %4662 = vset.pattern.permute.xlu2 %v4895_v21  ;;  %4661 = vset.pattern.permute.xlu1 %v4874_v17  ;;  %v5363_v21 = vsel %vm905_vm15, 1, %v8718_v36 }
 0x2b3   :  { %1791 = vadd.xlane.f32.xlu0 %v1788_v61  ;;  %8904 = vst [vmem:[#allocation58_spill] sm:$0xff] %v5363_v21  ;;  %v1822_v16 = vshrl.u32 %v5363_v21, 16  ;;  %v5376_v34 = vpop.xlane.xlu0 %1105  ;;  %v5385_v21 = vsel %vm908_vm1, 1, %v8718_v36 }
 0x2b4   :  { %8907 = vst [vmem:[#allocation61_spill] sm:$0xff] %v5376_v34  ;;  %v5389_v34 = vperm.slane %v834_v45, 0 }
 0x2b5   :  { %v1824_v61 = vcvt.s32.f32 %v1822_v16 }
 0x2b6   :  { %vm910_vm2 = vcmp.lt.s32.totalorder %v5389_v34, %v455_v63  ;;  %vm913_vm5 = vcmp.lt.s32.totalorder %v5389_v34, %v5008_v38  ;;  %vm923_vm12 = vcmp.lt.s32.totalorder %v5389_v34, %v5029_v48 }
 0x2ba   :  { %708 = vperm.xlu2 %4662, %v4956_v30   ;;  %702 = vperm.xlu1 %4661, %v4956_v30  }
 0x2bb   :  { %1813 = vadd.xlane.f32.xlu0 %v1811_v23  ;;  %v1845_v23 = vand.u32 65535, %v5372_v56  ;;  %v1858_v56 = vshrl.u32 %v5385_v21, 16  ;;  %v5392_v32 = vpop.xlane.xlu0 %1129 }
 0x2bc   :  { %8909 = vst [vmem:[#allocation63_spill] sm:$0xff] %v5392_v32 }
 0x2bd   :  { %v1847_v16 = vcvt.s32.f32 %v1845_v23  ;;  %v1860_v37 = vcvt.s32.f32 %v1858_v56  ;;  %v5398_v23 = vsel %vm910_vm2, 1, %v8718_v36 }
 0x2c2   :  { %4665 = vset.pattern.permute.xlu2 %v4904_v22  ;;  %4664 = vset.pattern.permute.xlu1 %v4942_v28 }
 0x2c3   :  { %1827 = vadd.xlane.f32.xlu0 %v1824_v61  ;;  %v5387_v61 = vpop.permute.xlu1 %448  ;;  %v5404_v45 = vpop.xlane.xlu0 %1143 }
 0x2c4   :  { %8908 = vst [vmem:[#allocation62_spill] sm:$0xff] %v5387_v61  ;;  %v1881_v61 = vand.u32 65535, %v5398_v23 }
 0x2c5   :  { %8910 = vst [vmem:[#allocation64_spill] sm:$0xff] %v5404_v45  ;;  %v5419_v45 = vpop.permute.xlu2 %466 }
 0x2c6   :  { %v1883_v63 = vcvt.s32.f32 %v1881_v61 }
 0x2ca   :  { %726 = vperm.xlu2 %4665, %v4956_v30   ;;  %720 = vperm.xlu1 %4664, %v4956_v30  }
 0x2cb   :  { %1849 = vadd.xlane.f32.xlu0 %v1847_v16  ;;  %v461_v16 = vpop.permute.xlu1 %460 }
 0x2cc   :  { %vm911_vm3 = vcmp.lt.s32.totalorder %v5389_v34, %v461_v16  ;;  %v5415_v16 = vsel %vm913_vm5, 1, %v8718_v36  ;;  %vm846_vm5 = vcmp.lt.s32.totalorder %v4844_v11, %v5194_v58 }
 0x2cd   :  { %8911 = vst [vmem:[#allocation65_spill] sm:$0xff] %v5415_v16 }
 0x2d2   :  { %4667 = vset.pattern.permute.xlu2 %v4821_v1  ;;  %4666 = vset.pattern.permute.xlu1 %v4886_v19  ;;  %v5407_v1 = vsel %vm911_vm3, 1, %v8718_v36 }
 0x2d3   :  { %1863 = vadd.xlane.f32.xlu0 %v1860_v37  ;;  %v1894_v56 = vshrl.u32 %v5407_v1, 16  ;;  %v479_v61 = vpop.permute.xlu1 %478 }
 0x2d4   :  { %vm914_vm6 = vcmp.lt.s32.totalorder %v5389_v34, %v479_v61 }
 0x2d5   :  { %v1896_v37 = vcvt.s32.f32 %v1894_v56  ;;  %v5426_v38 = vsel %vm914_vm6, 1, %v8718_v36 }
 0x2da   :  { %739 = vperm.xlu2 %4667, %v4976_v31   ;;  %732 = vperm.xlu1 %4666, %v4956_v30   ;;  %v5417_v30 = vpop.xlane.xlu0 %1165 }
 0x2db   :  { %1885 = vadd.xlane.f32.xlu0 %v1883_v63  ;;  %8912 = vst [vmem:[#allocation66_spill] sm:$0xff] %v5417_v30  ;;  %v1917_v63 = vand.u32 65535, %v5415_v16  ;;  %v491_v56 = vpop.permute.xlu1 %490  ;;  %v1930_v30 = vshrl.u32 %v5426_v38, 16 }
 0x2dc   :  { %vm916_vm7 = vcmp.lt.s32.totalorder %v5389_v34, %v491_v56 }
 0x2dd   :  { %v1932_v61 = vcvt.s32.f32 %v1930_v30 }
 0x2e2   :  { %4670 = vset.pattern.permute.xlu2 %v4853_v13  ;;  %4669 = vset.pattern.permute.xlu1 %v4828_v3  ;;  %v1919_v13 = vcvt.s32.f32 %v1917_v63  ;;  %v5428_v3 = vpop.permute.xlu2 %484  ;;  %v5437_v63 = vsel %vm916_vm7, 1, %v8718_v36 }
 0x2e3   :  { %1899 = vadd.xlane.f32.xlu0 %v1896_v37  ;;  %v5430_v37 = vpop.xlane.xlu0 %1179 }
 0x2e4   :  { %8913 = vst [vmem:[#allocation67_spill] sm:$0xff] %v5430_v37 }
 0x2ea   :  { %757 = vperm.xlu2 %4670, %v4976_v31   ;;  %751 = vperm.xlu1 %4669, %v4976_v31   ;;  %v497_v32 = vpop.permute.xlu2 %496 }
 0x2eb   :  { %1921 = vadd.xlane.f32.xlu0 %v1919_v13  ;;  %v1953_v13 = vand.u32 65535, %v5437_v63  ;;  %v5440_v16 = vpop.xlane.xlu0 %1201  ;;  %vm917_vm8 = vcmp.lt.s32.totalorder %v5389_v34, %v497_v32 }
 0x2ec   :  { %8914 = vst [vmem:[#allocation68_spill] sm:$0xff] %v5440_v16 }
 0x2ed   :  { %v1955_v56 = vcvt.s32.f32 %v1953_v13 }
 0x2f2   :  { %4672 = vset.pattern.permute.xlu2 %v4850_v12  ;;  %4671 = vset.pattern.permute.xlu1 %v4825_v2  ;;  %v5446_v12 = vsel %vm917_vm8, 1, %v8718_v36  ;;  %v509_v2 = vpop.permute.xlu1 %508  ;;  %v515_v13 = vpop.permute.xlu2 %514  ;;  %vm849_vm8 = vcmp.lt.s32.totalorder %v4844_v11, %v5025_v46 }
 0x2f3   :  { %1935 = vadd.xlane.f32.xlu0 %v1932_v61  ;;  %v1966_v30 = vshrl.u32 %v5446_v12, 16  ;;  %vm919_vm9 = vcmp.lt.s32.totalorder %v5389_v34, %v509_v2  ;;  %v5452_v61 = vpop.xlane.xlu0 %1215  ;;  %vm920_vm10 = vcmp.lt.s32.totalorder %v5389_v34, %v515_v13 }
 0x2f4   :  { %8915 = vst [vmem:[#allocation69_spill] sm:$0xff] %v5452_v61  ;;  %v5455_v37 = vsel %vm919_vm9, 1, %v8718_v36 }
 0x2f5   :  { %v1968_v32 = vcvt.s32.f32 %v1966_v30  ;;  %v1989_v16 = vand.u32 65535, %v5455_v37 }
 0x2fa   :  { %769 = vperm.xlu2 %4672, %v4976_v31   ;;  %763 = vperm.xlu1 %4671, %v4976_v31   ;;  %v527_v2 = vpop.permute.xlu2 %526 }
 0x2fb   :  { %1957 = vadd.xlane.f32.xlu0 %v1955_v56  ;;  %v1991_v56 = vcvt.s32.f32 %v1989_v16  ;;  %vm922_vm11 = vcmp.lt.s32.totalorder %v5389_v34, %v527_v2  ;;  %v5473_v16 = vpop.permute.xlu1 %520  ;;  %v5484_v2 = vsel %vm923_vm12, 1, %v8718_v36 }
 0x2fc   :  { %v5471_v13 = vsel %vm922_vm11, 1, %v8718_v36  ;;  %8919 = vst [vmem:[#allocation73_spill] sm:$0xff] %v5484_v2  ;;  %vm852_vm11 = vcmp.lt.s32.totalorder %v4844_v11, %v5060_v6 }
 0x2fd   :  { %8917 = vst [vmem:[#allocation71_spill] sm:$0xff] %v5471_v13 }
 0x302   :  { %4675 = vset.pattern.permute.xlu2 %v4934_v27  ;;  %4674 = vset.pattern.permute.xlu1 %v4865_v15  ;;  %v5462_v27 = vsel %vm920_vm10, 1, %v8718_v36  ;;  %v5464_v15 = vpop.xlane.xlu0 %1237 }
 0x303   :  { %1971 = vadd.xlane.f32.xlu0 %v1968_v32  ;;  %8916 = vst [vmem:[#allocation70_spill] sm:$0xff] %v5464_v15  ;;  %v2002_v30 = vshrl.u32 %v5462_v27, 16  ;;  %v2038_v15 = vshrl.u32 %v5484_v2, 16 }
 0x305   :  { %v2004_v32 = vcvt.s32.f32 %v2002_v30  ;;  %v5486_v30 = vpop.permute.xlu1 %538  ;;  %v2040_v48 = vcvt.s32.f32 %v2038_v15 }
 0x306   :  { %8920 = vst [vmem:[#allocation74_spill] sm:$0xff] %v5486_v30 }
 0x30a   :  { %787 = vperm.xlu2 %4675, %v4976_v31   ;;  %781 = vperm.xlu1 %4674, %v4976_v31   ;;  %v5475_v61 = vpop.xlane.xlu0 %1251 }
 0x30b   :  { %1993 = vadd.xlane.f32.xlu0 %v1991_v56  ;;  %8918 = vst [vmem:[#allocation72_spill] sm:$0xff] %v5475_v61  ;;  %v2025_v56 = vand.u32 65535, %v5471_v13 }
 0x312   :  { %4677 = vset.pattern.permute.xlu2 %v4874_v17  ;;  %4676 = vset.pattern.permute.xlu1 %v4880_v18  ;;  %v835_v17 = vrot.slane %v4841_v10, 5  ;;  %v2027_v18 = vcvt.s32.f32 %v2025_v56  ;;  %v5491_v13 = vpop.xlane.xlu0 %1273 }
 0x313   :  { %2007 = vadd.xlane.f32.xlu0 %v2004_v32  ;;  %v546_v32 = vpop.permute.xlu2 %545  ;;  %8921 = vst [vmem:[#allocation75_spill] sm:$0xff] %v5491_v13 }
 0x314   :  { %v5488_v61 = vperm.slane %v835_v17, 0 }
 0x316   :  { %vm925_vm13 = vcmp.lt.s32.totalorder %v5488_v61, %v546_v32  ;;  %vm928_vm15 = vcmp.lt.s32.totalorder %v5488_v61, %v5043_v55  ;;  %vm938_vm9 = vcmp.lt.s32.totalorder %v5488_v61, %v5103_v5  ;;  %v836_v5 = vrot.slane %v4841_v10, 6 }
 0x317   :  { %v5497_v56 = vsel %vm925_vm13, 1, %v8718_v36 }
 0x318   :  { %8922 = vst [vmem:[#allocation76_spill] sm:$0xff] %v5497_v56  ;;  %v2061_v30 = vand.u32 65535, %v5497_v56 }
 0x31a   :  { %799 = vperm.xlu2 %4677, %v4976_v31   ;;  %793 = vperm.xlu1 %4676, %v4976_v31   ;;  %v5503_v17 = vpop.xlane.xlu0 %1287  ;;  %v2063_v32 = vcvt.s32.f32 %v2061_v30 }
 0x31b   :  { %2029 = vadd.xlane.f32.xlu0 %v2027_v18  ;;  %v552_v18 = vpop.permute.xlu1 %551  ;;  %8923 = vst [vmem:[#allocation77_spill] sm:$0xff] %v5503_v17 }
 0x31c   :  { %vm926_vm14 = vcmp.lt.s32.totalorder %v5488_v61, %v552_v18  ;;  %v5516_v18 = vsel %vm928_vm15, 1, %v8718_v36 }
 0x31d   :  { %8926 = vst [vmem:[#allocation80_spill] sm:$0xff] %v5516_v18 }
 0x322   :  { %4679 = vset.pattern.permute.xlu2 %v4942_v28  ;;  %4678 = vset.pattern.permute.xlu1 %v4892_v20  ;;  %v5506_v28 = vsel %vm926_vm14, 1, %v8718_v36  ;;  %v5508_v20 = vpop.permute.xlu2 %557  ;;  %v5520_v17 = vpop.xlane.xlu0 %1309  ;;  %vm855_vm14 = vcmp.lt.s32.totalorder %v4844_v11, %v5068_v25 }
 0x323   :  { %2043 = vadd.xlane.f32.xlu0 %v2040_v48  ;;  %8924 = vst [vmem:[#allocation78_spill] sm:$0xff] %v5506_v28  ;;  %v2074_v15 = vshrl.u32 %v5506_v28, 16  ;;  %v570_v13 = vpop.permute.xlu1 %569 }
 0x324   :  { %8925 = vst [vmem:[#allocation79_spill] sm:$0xff] %v5508_v20  ;;  %vm929_vm0 = vcmp.lt.s32.totalorder %v5488_v61, %v570_v13  ;;  %v1102_v20 = vshrl.u32 %v5012_v39, 16  ;;  %v1126_v39 = vshrl.u32 %v5023_v44, 16  ;;  %v5586_v44 = vsel %vm938_vm9, 1, %v8718_v36 }
 0x325   :  { %v2076_v48 = vcvt.s32.f32 %v2074_v15  ;;  %8928 = vst [vmem:[#allocation82_spill] sm:$0xff] %v5520_v17  ;;  %v2218_v46 = vshrl.u32 %v5586_v44, 16 }
 0x326   :  { %8941 = vst [vmem:[#allocation95_spill] sm:$0xff] %v5586_v44  ;;  %v1162_v44 = vshrl.u32 %v5041_v54, 16 }
 0x32a   :  { %817 = vperm.xlu2 %4679, %v4976_v31   ;;  %811 = vperm.xlu1 %4678, %v4976_v31   ;;  %v5518_v30 = vpop.permute.xlu2 %575 }
 0x32b   :  { %2065 = vadd.xlane.f32.xlu0 %v2063_v32  ;;  %8927 = vst [vmem:[#allocation81_spill] sm:$0xff] %v5518_v30  ;;  %v2097_v32 = vand.u32 65535, %v5516_v18  ;;  %v582_v15 = vpop.permute.xlu1 %581  ;;  %v5529_v30 = vpop.xlane.xlu0 %1323 }
 0x32c   :  { %8930 = vst [vmem:[#allocation84_spill] sm:$0xff] %v5529_v30  ;;  %vm931_vm1 = vcmp.lt.s32.totalorder %v5488_v61, %v582_v15 }
 0x332   :  { %4681 = vset.pattern.permute.xlu2 %v4886_v19  ;;  %4680 = vset.pattern.permute.xlu1 %v4904_v22  ;;  %v2099_v19 = vcvt.s32.f32 %v2097_v32  ;;  %v5527_v22 = vsel %vm929_vm0, 1, %v8718_v36  ;;  %v588_v55 = vpop.permute.xlu2 %587 }
 0x333   :  { %2079 = vadd.xlane.f32.xlu0 %v2076_v48  ;;  %8929 = vst [vmem:[#allocation83_spill] sm:$0xff] %v5527_v22  ;;  %v2110_v48 = vshrl.u32 %v5527_v22, 16  ;;  %vm932_vm2 = vcmp.lt.s32.totalorder %v5488_v61, %v588_v55  ;;  %v600_v18 = vpop.permute.xlu1 %599 }
 0x334   :  { %v5543_v22 = vsel %vm932_vm2, 1, %v8718_v36  ;;  %vm934_vm3 = vcmp.lt.s32.totalorder %v5488_v61, %v600_v18 }
 0x335   :  { %v2112_v13 = vcvt.s32.f32 %v2110_v48  ;;  %8933 = vst [vmem:[#allocation87_spill] sm:$0xff] %v5543_v22  ;;  %v2146_v48 = vshrl.u32 %v5543_v22, 16 }
 0x33a   :  { %829 = vperm.xlu2 %4681, %v4976_v31   ;;  %823 = vperm.xlu1 %4680, %v4976_v31   ;;  %v5536_v31 = vsel %vm931_vm1, 1, %v8718_v36  ;;  %v606_v32 = vpop.permute.xlu2 %605  ;;  %vm858_vm1 = vcmp.lt.s32.totalorder %v4844_v11, %v5088_v53 }
 0x33b   :  { %2101 = vadd.xlane.f32.xlu0 %v2099_v19  ;;  %8931 = vst [vmem:[#allocation85_spill] sm:$0xff] %v5536_v31  ;;  %v2133_v17 = vand.u32 65535, %v5536_v31  ;;  %v5539_v19 = vpop.xlane.xlu0 %1345  ;;  %v5550_v31 = vsel %vm934_vm3, 1, %v8718_v36  ;;  %vm935_vm6 = vcmp.lt.s32.totalorder %v5488_v61, %v606_v32  ;;  %v5565_v58 = vpop.permute.xlu1 %611  ;;  %v1104_v32 = vcvt.s32.f32 %v1102_v20 }
 0x33c   :  { %8932 = vst [vmem:[#allocation86_spill] sm:$0xff] %v5539_v19  ;;  %v5558_v18 = vsel %vm935_vm6, 1, %v8718_v36  ;;  %v1128_v20 = vcvt.s32.f32 %v1126_v39 }
 0x33d   :  { %v2135_v30 = vcvt.s32.f32 %v2133_v17  ;;  %8935 = vst [vmem:[#allocation89_spill] sm:$0xff] %v5550_v31  ;;  %v2169_v17 = vand.u32 65535, %v5550_v31 }
 0x33f   :  { %v2171_v22 = vcvt.s32.f32 %v2169_v17 }
 0x342   :  { %4682 = vset.pattern.permute.xlu2 %v8718_v36  ;;  %4684 = vset.pattern.permute.xlu1 %v8718_v36  ;;  %v618_v15 = vpop.permute.xlu2 %617 }
 0x343   :  { %2115 = vadd.xlane.f32.xlu0 %v2112_v13  ;;  %v5547_v28 = vpop.xlane.xlu0 %1359  ;;  %v2148_v13 = vcvt.s32.f32 %v2146_v48  ;;  %vm937_vm7 = vcmp.lt.s32.totalorder %v5488_v61, %v618_v15 }
 0x344   :  { %8934 = vst [vmem:[#allocation88_spill] sm:$0xff] %v5547_v28  ;;  %v5570_v2 = vsel %vm937_vm7, 1, %v8718_v36 }
 0x34a   :  { %v636_v19 = vpop.permute.xlu2 %635 }
 0x34b   :  { %2137 = vadd.xlane.f32.xlu0 %v2135_v30  ;;  %v974_v30 = vsel %vm846_vm5, 1, %v8718_v36  ;;  %v5562_v28 = vpop.xlane.xlu0 %1381  ;;  %vm940_vm10 = vcmp.lt.s32.totalorder %v5488_v61, %v636_v19  ;;  %vm861_vm5 = vcmp.lt.s32.totalorder %v5105_v14, %v5114_v43 }
 0x34c   :  { %v1113_v55 = vand.u32 65535, %v974_v30  ;;  %8937 = vst [vmem:[#allocation91_spill] sm:$0xff] %v5562_v28  ;;  %v1114_v56 = vshrl.u32 %v974_v30, 16  ;;  %v5577_v28 = vpop.permute.xlu1 %629 }
 0x34d   :  { %8940 = vst [vmem:[#allocation94_spill] sm:$0xff] %v5577_v28 }
 0x34e   :  { %v1115_v31 = vcvt.s32.f32 %v1113_v55  ;;  %v2205_v55 = vand.u32 65535, %v5570_v2  ;;  %v1116_v15 = vcvt.s32.f32 %v1114_v56 }
 0x350   :  { %v2207_v30 = vcvt.s32.f32 %v2205_v55 }
 0x352   :  { %v5560_v48 = vpop.permute.xlu2 %648 }
 0x353   :  { %2151 = vadd.xlane.f32.xlu0 %v2148_v13  ;;  %8936 = vst [vmem:[#allocation90_spill] sm:$0xff] %v5560_v48  ;;  %v2182_v13 = vshrl.u32 %v5558_v18, 16 }
 0x355   :  { %v2184_v17 = vcvt.s32.f32 %v2182_v13 }
 0x35a   :  { %v5572_v48 = vpop.permute.xlu2 %666 }
 0x35b   :  { %2173 = vadd.xlane.f32.xlu0 %v2171_v22  ;;  %8938 = vst [vmem:[#allocation92_spill] sm:$0xff] %v5572_v48  ;;  %v5575_v22 = vpop.xlane.xlu0 %1395 }
 0x35c   :  { %8939 = vst [vmem:[#allocation93_spill] sm:$0xff] %v5575_v22 }
 0x362   :  { %v5588_v13 = vpop.permute.xlu2 %678 }
 0x363   :  { %1117 = vadd.xlane.f32.xlu2 %v1115_v31  ;;  %2187 = vadd.xlane.f32.xlu0 %v2184_v17  ;;  %v977_v31 = vsel %vm849_vm8, 1, %v8718_v36  ;;  %v643_v17 = vpop.permute.xlu1 %642  ;;  %v5593_v39 = vpop.xlane.xlu0 %1417  ;;  %v2220_v36 = vcvt.s32.f32 %v2218_v46  ;;  %vm864_vm8 = vcmp.lt.s32.totalorder %v5105_v14, %v5124_v60 }
 0x364   :  { %1107 = vadd.xlane.f32.xlu1 %v1104_v32  ;;  %v1137_v32 = vand.u32 65535, %v5034_v50  ;;  %v1149_v56 = vand.u32 65535, %v977_v31  ;;  %8942 = vst [vmem:[#allocation96_spill] sm:$0xff] %v5593_v39  ;;  %v1150_v48 = vshrl.u32 %v977_v31, 16  ;;  %v1173_v31 = vand.u32 65535, %v5050_v59 }
 0x365   :  { %v1198_v59 = vshrl.u32 %v5055_v62, 16  ;;  %v1209_v62 = vand.u32 65535, %v5066_v9 }
 0x366   :  { %v1139_v55 = vcvt.s32.f32 %v1137_v32  ;;  %v1152_v19 = vcvt.s32.f32 %v1150_v48  ;;  %v1164_v32 = vcvt.s32.f32 %v1162_v44  ;;  %v1175_v44 = vcvt.s32.f32 %v1173_v31 }
 0x367   :  { %v1200_v31 = vcvt.s32.f32 %v1198_v59 }
 0x36a   :  { %v5599_v50 = vpop.permute.xlu2 %696 }
 0x36b   :  { %1119 = vadd.xlane.f32.xlu2 %v1116_v15  ;;  %2209 = vadd.xlane.f32.xlu0 %v2207_v30  ;;  %v1151_v15 = vcvt.s32.f32 %v1149_v56  ;;  %v5601_v30 = vperm.slane %v836_v5, 0  ;;  %v661_v28 = vpop.permute.xlu1 %660  ;;  %v5609_v46 = vpop.xlane.xlu0 %1431 }
 0x36c   :  { %1131 = vadd.xlane.f32.xlu1 %v1128_v20  ;;  %v8943_v20 = vmov 0   ;;  %8944 = vst [vmem:[#allocation97_spill] sm:$0xff] %v5609_v46 }
 0x36d   :  { %v5597_v22 = vsel %vm940_vm10, 1, %v8943_v20  ;;  %vm941_vm12 = vcmp.lt.s32.totalorder %v5601_v30, %v643_v17  ;;  %v980_v56 = vsel %vm852_vm11, 1, %v8943_v20  ;;  %vm943_vm13 = vcmp.lt.s32.totalorder %v5601_v30, %v5132_v29 }
 0x36e   :  { %v2241_v39 = vand.u32 65535, %v5597_v22  ;;  %v1185_v6 = vand.u32 65535, %v980_v56  ;;  %vm944_vm15 = vcmp.lt.s32.totalorder %v5601_v30, %v661_v28  ;;  %vm947_vm2 = vcmp.lt.s32.totalorder %v5601_v30, %v5588_v13 }
 0x36f   :  { %vm950_vm6 = vcmp.lt.s32.totalorder %v5601_v30, %v5599_v50  ;;  %vm953_vm9 = vcmp.lt.s32.totalorder %v5601_v30, %v5179_v4 }
 0x370   :  { %v2243_v5 = vcvt.s32.f32 %v2241_v39 }
 0x372   :  { %v5614_v54 = vpop.permute.xlu2 %708 }
 0x373   :  { %1141 = vadd.xlane.f32.xlu2 %v1139_v55  ;;  %2223 = vadd.xlane.f32.xlu0 %v2220_v36  ;;  %v5612_v36 = vsel %vm941_vm12, 1, %v8943_v20  ;;  %v673_v48 = vpop.permute.xlu1 %672  ;;  %v1187_v55 = vcvt.s32.f32 %v1185_v6  ;;  %v983_v6 = vsel %vm855_vm14, 1, %v8943_v20  ;;  %vm952_vm7 = vcmp.lt.s32.totalorder %v5601_v30, %v5614_v54 }
 0x374   :  { %1153 = vadd.xlane.f32.xlu1 %v1151_v15  ;;  %8945 = vst [vmem:[#allocation98_spill] sm:$0xff] %v5612_v36  ;;  %v2254_v17 = vshrl.u32 %v5612_v36, 16  ;;  %v5621_v15 = vsel %vm943_vm13, 1, %v8943_v20  ;;  %vm946_vm0 = vcmp.lt.s32.totalorder %v5601_v30, %v673_v48  ;;  %v1222_v9 = vshrl.u32 %v983_v6, 16 }
 0x375   :  { %v2277_v46 = vand.u32 65535, %v5621_v15 }
 0x376   :  { %v2256_v39 = vcvt.s32.f32 %v2254_v17  ;;  %v5634_v17 = vsel %vm944_vm15, 1, %v8943_v20 }
 0x377   :  { %v2290_v25 = vshrl.u32 %v5634_v17, 16 }
 0x379   :  { %v2292_v59 = vcvt.s32.f32 %v2290_v25 }
 0x37b   :  { %1155 = vadd.xlane.f32.xlu2 %v1152_v19  ;;  %2245 = vadd.xlane.f32.xlu0 %v2243_v5  ;;  %v1186_v19 = vshrl.u32 %v980_v56, 16  ;;  %v5626_v5 = vpop.permute.xlu2 %726  ;;  %v691_v36 = vpop.permute.xlu1 %690  ;;  %v2279_v56 = vcvt.s32.f32 %v2277_v46 }
 0x37c   :  { %1167 = vadd.xlane.f32.xlu1 %v1164_v32  ;;  %v5623_v32 = vpop.xlane.xlu0 %1453  ;;  %vm949_vm3 = vcmp.lt.s32.totalorder %v5601_v30, %v691_v36  ;;  %vm955_vm10 = vcmp.lt.s32.totalorder %v5601_v30, %v5626_v5 }
 0x37d   :  { %8946 = vst [vmem:[#allocation99_spill] sm:$0xff] %v5623_v32  ;;  %v1188_v29 = vcvt.s32.f32 %v1186_v19  ;;  %v1211_v19 = vcvt.s32.f32 %v1209_v62  ;;  %v1224_v62 = vcvt.s32.f32 %v1222_v9 }
 0x383   :  { %1177 = vadd.xlane.f32.xlu2 %v1175_v44  ;;  %2259 = vadd.xlane.f32.xlu0 %v2256_v39  ;;  %v1221_v44 = vand.u32 65535, %v983_v6  ;;  %v5640_v39 = vpop.permute.xlu1 %702  ;;  %v5642_v28 = vpop.permute.xlu2 %739  ;;  %v986_v6 = vsel %vm858_vm1, 1, %v8943_v20 }
 0x384   :  { %1189 = vadd.xlane.f32.xlu1 %v1187_v55  ;;  %v5637_v55 = vpop.xlane.xlu0 %1467  ;;  %8948 = vst [vmem:[#allocation101_spill] sm:$0xff] %v5642_v28  ;;  %v1257_v11 = vand.u32 65535, %v986_v6 }
 0x385   :  { %8947 = vst [vmem:[#allocation100_spill] sm:$0xff] %v5637_v55  ;;  %v1223_v46 = vcvt.s32.f32 %v1221_v44 }
 0x386   :  { %v1259_v9 = vcvt.s32.f32 %v1257_v11  ;;  %v989_v11 = vsel %vm861_vm5, 1, %v8943_v20 }
 0x38b   :  { %1191 = vadd.xlane.f32.xlu2 %v1188_v29  ;;  %2281 = vadd.xlane.f32.xlu0 %v2279_v56  ;;  %v5646_v29 = vsel %vm946_vm0, 1, %v8943_v20  ;;  %v5650_v55 = vpop.permute.xlu1 %720  ;;  %v5658_v25 = vpop.permute.xlu2 %757 }
 0x38c   :  { %1203 = vadd.xlane.f32.xlu1 %v1200_v31  ;;  %v1234_v31 = vshrl.u32 %v5075_v40, 16  ;;  %v2313_v56 = vand.u32 65535, %v5646_v29  ;;  %v5654_v48 = vpop.xlane.xlu0 %1489  ;;  %8950 = vst [vmem:[#allocation103_spill] sm:$0xff] %v5658_v25 }
 0x38d   :  { %8949 = vst [vmem:[#allocation102_spill] sm:$0xff] %v5654_v48 }
 0x38e   :  { %v1236_v44 = vcvt.s32.f32 %v1234_v31  ;;  %v2315_v40 = vcvt.s32.f32 %v2313_v56 }
 0x393   :  { %1213 = vadd.xlane.f32.xlu2 %v1211_v19  ;;  %2295 = vadd.xlane.f32.xlu0 %v2292_v59  ;;  %v5662_v19 = vsel %vm947_vm2, 1, %v8943_v20  ;;  %v5665_v53 = vpop.permute.xlu1 %732 }
 0x394   :  { %1225 = vadd.xlane.f32.xlu1 %v1223_v46  ;;  %v1245_v46 = vand.u32 65535, %v5084_v49  ;;  %v2326_v13 = vshrl.u32 %v5662_v19, 16  ;;  %v5669_v31 = vpop.xlane.xlu0 %1503  ;;  %v1258_v49 = vshrl.u32 %v986_v6, 16  ;;  %v5686_v6 = vsel %vm950_vm6, 1, %v8943_v20 }
 0x395   :  { %8951 = vst [vmem:[#allocation104_spill] sm:$0xff] %v5669_v31  ;;  %v2362_v50 = vshrl.u32 %v5686_v6, 16  ;;  %vm956_vm12 = vcmp.lt.s32.totalorder %v5601_v30, %v5665_v53 }
 0x396   :  { %v1247_v59 = vcvt.s32.f32 %v1245_v46  ;;  %v2328_v56 = vcvt.s32.f32 %v2326_v13  ;;  %v1260_v36 = vcvt.s32.f32 %v1258_v49 }
 0x39b   :  { %1227 = vadd.xlane.f32.xlu2 %v1224_v62  ;;  %2317 = vadd.xlane.f32.xlu0 %v2315_v40  ;;  %v5672_v62 = vsel %vm949_vm3, 1, %v8943_v20  ;;  %v1270_v40 = vshrl.u32 %v5093_v57, 16  ;;  %v5678_v32 = vpop.permute.xlu1 %751  ;;  %v1281_v57 = vand.u32 65535, %v5101_v0  ;;  %v1294_v0 = vshrl.u32 %v989_v11, 16 }
 0x39c   :  { %1239 = vadd.xlane.f32.xlu1 %v1236_v44  ;;  %v5674_v44 = vpop.permute.xlu2 %769  ;;  %v2349_v48 = vand.u32 65535, %v5672_v62 }
 0x39d   :  { %v1272_v46 = vcvt.s32.f32 %v1270_v40  ;;  %v2364_v40 = vcvt.s32.f32 %v2362_v50  ;;  %v5715_v50 = vsel %vm953_vm9, 1, %v8943_v20 }
 0x39e   :  { %v2351_v13 = vcvt.s32.f32 %v2349_v48  ;;  %v1283_v48 = vcvt.s32.f32 %v1281_v57  ;;  %v1296_v57 = vcvt.s32.f32 %v1294_v0  ;;  %v2398_v60 = vshrl.u32 %v5715_v50, 16 }
 0x3a3   :  { %1249 = vadd.xlane.f32.xlu2 %v1247_v59  ;;  %2331 = vadd.xlane.f32.xlu0 %v2328_v56  ;;  %v5689_v59 = vpop.xlane.xlu0 %1525  ;;  %v5693_v56 = vpop.permute.xlu1 %763 }
 0x3a4   :  { %1261 = vadd.xlane.f32.xlu1 %v1259_v9  ;;  %8952 = vst [vmem:[#allocation105_spill] sm:$0xff] %v5689_v59  ;;  %v1293_v9 = vand.u32 65535, %v989_v11  ;;  %v5691_v43 = vpop.permute.xlu2 %787  ;;  %v992_v11 = vsel %vm864_vm8, 1, %v8943_v20 }
 0x3a6   :  { %v1295_v49 = vcvt.s32.f32 %v1293_v9 }
 0x3ab   :  { %1263 = vadd.xlane.f32.xlu2 %v1260_v36  ;;  %2353 = vadd.xlane.f32.xlu0 %v2351_v13  ;;  %v5699_v36 = vsel %vm952_vm7, 1, %v8943_v20  ;;  %v5702_v13 = vpop.xlane.xlu0 %1539  ;;  %v5704_v31 = vpop.permute.xlu1 %781 }
 0x3ac   :  { %1275 = vadd.xlane.f32.xlu1 %v1272_v46  ;;  %v1306_v46 = vshrl.u32 %v5112_v41, 16  ;;  %8953 = vst [vmem:[#allocation106_spill] sm:$0xff] %v5702_v13  ;;  %v2385_v59 = vand.u32 65535, %v5699_v36  ;;  %v5709_v54 = vpop.permute.xlu2 %799 }
 0x3ae   :  { %v1308_v9 = vcvt.s32.f32 %v1306_v46  ;;  %v2387_v41 = vcvt.s32.f32 %v2385_v59  ;;  %v2400_v46 = vcvt.s32.f32 %v2398_v60 }
 0x3b3   :  { %1285 = vadd.xlane.f32.xlu2 %v1283_v48  ;;  %2367 = vadd.xlane.f32.xlu0 %v2364_v40  ;;  %v1317_v48 = vand.u32 65535, %v5119_v52  ;;  %v5719_v40 = vpop.permute.xlu1 %793  ;;  %v5721_v13 = vpop.xlane.xlu0 %1561  ;;  %v1330_v52 = vshrl.u32 %v992_v11, 16 }
 0x3b4   :  { %1297 = vadd.xlane.f32.xlu1 %v1295_v49  ;;  %v1329_v49 = vand.u32 65535, %v992_v11  ;;  %8954 = vst [vmem:[#allocation107_spill] sm:$0xff] %v5719_v40  ;;  %v5725_v59 = vpop.permute.xlu2 %817  ;;  %v8957_v40 = vld [vmem:[#allocation24_spill] sm:$0xff] }
 0x3b5   :  { %8955 = vst [vmem:[#allocation108_spill] sm:$0xff] %v5721_v13  ;;  %v1319_v4 = vcvt.s32.f32 %v1317_v48  ;;  %vm867_vm11 = vcmp.lt.s32.totalorder %v5105_v14, %v8957_v40  ;;  %v1332_v5 = vcvt.s32.f32 %v1330_v52  ;;  %v8961_v40 = vld [vmem:[#allocation22_spill] sm:$0xff] }
 0x3b6   :  { %v1331_v0 = vcvt.s32.f32 %v1329_v49  ;;  %v837_v49 = vrot.slane %v4841_v10, 7  ;;  %v995_v60 = vsel %vm867_vm11, 1, %v8943_v20  ;;  %vm882_vm11 = vcmp.lt.s32.totalorder %v5196_v35, %v5240_v51 }
 0x3b7   :  { %v1365_v53 = vand.u32 65535, %v995_v60 }
 0x3b8   :  { %v5748_v52 = vperm.slane %v837_v49, 0  ;;  %v8964_v49 = vld [vmem:[#allocation23_spill] sm:$0xff] }
 0x3ba   :  { %vm959_vm15 = vcmp.lt.s32.totalorder %v5748_v52, %v5678_v32  ;;  %vm961_vm0 = vcmp.lt.s32.totalorder %v5748_v52, %v5693_v56  ;;  %vm962_vm2 = vcmp.lt.s32.totalorder %v5748_v52, %v5674_v44  ;;  %vm964_vm3 = vcmp.lt.s32.totalorder %v5748_v52, %v5704_v31  ;;  %v8984_v31 = vld [vmem:[#allocation34_spill] sm:$0xff] }
 0x3bb   :  { %1299 = vadd.xlane.f32.xlu2 %v1296_v57  ;;  %2389 = vadd.xlane.f32.xlu0 %v2387_v41  ;;  %v5728_v57 = vsel %vm955_vm10, 1, %v8943_v20  ;;  %v5732_v13 = vpop.permute.xlu1 %811  ;;  %v5740_v11 = vpop.xlane.xlu0 %1575  ;;  %vm876_vm5 = vcmp.lt.s32.totalorder %v5105_v14, %v8984_v31  ;;  %vm965_vm6 = vcmp.lt.s32.totalorder %v5748_v52, %v5691_v43  ;;  %vm967_vm7 = vcmp.lt.s32.totalorder %v5748_v52, %v5709_v54  ;;  %v8992_v54 = vld [vmem:[#allocation36_spill] sm:$0xff] }
 0x3bc   :  { %1311 = vadd.xlane.f32.xlu1 %v1308_v9  ;;  %v1342_v9 = vshrl.u32 %v5130_v7, 16  ;;  %v2421_v41 = vand.u32 65535, %v5728_v57  ;;  %8956 = vst [vmem:[#allocation109_spill] sm:$0xff] %v5732_v13  ;;  %v8962_v13 = vld [vmem:[#allocation38_spill] sm:$0xff]  ;;  %vm879_vm8 = vcmp.lt.s32.totalorder %v5196_v35, %v8992_v54  ;;  %vm968_vm9 = vcmp.lt.s32.totalorder %v5748_v52, %v5365_v33 }
 0x3bd   :  { %8958 = vst [vmem:[#allocation24_spill] sm:$0xff] %v5740_v11  ;;  %vm958_vm13 = vcmp.lt.s32.totalorder %v5748_v52, %v8962_v13  ;;  %v8967_v13 = vld [vmem:[#allocation26_spill] sm:$0xff]  ;;  %vm970_vm10 = vcmp.lt.s32.totalorder %v5748_v52, %v5725_v59 }
 0x3be   :  { %v1344_v48 = vcvt.s32.f32 %v1342_v9  ;;  %v2423_v7 = vcvt.s32.f32 %v2421_v41  ;;  %vm870_vm14 = vcmp.lt.s32.totalorder %v5105_v14, %v8967_v13 }
 0x3c3   :  { %1321 = vadd.xlane.f32.xlu2 %v1319_v4  ;;  %2403 = vadd.xlane.f32.xlu0 %v2400_v46  ;;  %v5743_v4 = vsel %vm956_vm12, 1, %v8943_v20  ;;  %v1353_v46 = vand.u32 65535, %v8961_v40  ;;  %v5751_v9 = vpop.permute.xlu1 %823  ;;  %v1366_v40 = vshrl.u32 %v995_v60, 16  ;;  %v998_v60 = vsel %vm870_vm14, 1, %v8943_v20 }
 0x3c4   :  { %1333 = vadd.xlane.f32.xlu1 %v1331_v0  ;;  %8959 = vst [vmem:[#allocation110_spill] sm:$0xff] %v5743_v4  ;;  %v5745_v0 = vpop.permute.xlu2 %829  ;;  %v2434_v10 = vshrl.u32 %v5743_v4, 16  ;;  %vm971_vm12 = vcmp.lt.s32.totalorder %v5748_v52, %v5751_v9  ;;  %vm888_vm14 = vcmp.lt.s32.totalorder %v5196_v35, %v5353_v47 }
 0x3c5   :  { %8960 = vst [vmem:[#allocation111_spill] sm:$0xff] %v5745_v0  ;;  %v1355_v41 = vcvt.s32.f32 %v1353_v46  ;;  %v1378_v0 = vshrl.u32 %v8964_v49, 16  ;;  %v1368_v46 = vcvt.s32.f32 %v1366_v40  ;;  %v1401_v49 = vand.u32 65535, %v998_v60 }
 0x3c6   :  { %v2436_v11 = vcvt.s32.f32 %v2434_v10  ;;  %v5772_v10 = vsel %vm959_vm15, 1, %v8943_v20  ;;  %vm891_vm15 = vcmp.lt.s32.totalorder %v5196_v35, %v5286_v26 }
 0x3c7   :  { %v2470_v32 = vshrl.u32 %v5772_v10, 16 }
 0x3cb   :  { %1335 = vadd.xlane.f32.xlu2 %v1332_v5  ;;  %2425 = vadd.xlane.f32.xlu0 %v2423_v7  ;;  %v1367_v5 = vcvt.s32.f32 %v1365_v53  ;;  %v5758_v7 = vpop.xlane.xlu0 %1597  ;;  %v1380_v53 = vcvt.s32.f32 %v1378_v0  ;;  %v1403_v0 = vcvt.s32.f32 %v1401_v49 }
 0x3cc   :  { %1347 = vadd.xlane.f32.xlu1 %v1344_v48  ;;  %v5756_v48 = vsel %vm958_vm13, 1, %v8943_v20  ;;  %8963 = vst [vmem:[#allocation22_spill] sm:$0xff] %v5758_v7  ;;  %vm885_vm13 = vcmp.lt.s32.totalorder %v5196_v35, %v5248_v8 }
 0x3cd   :  { %v2457_v4 = vand.u32 65535, %v5756_v48 }
 0x3d3   :  { %1357 = vadd.xlane.f32.xlu2 %v1355_v41  ;;  %2439 = vadd.xlane.f32.xlu0 %v2436_v11  ;;  %v2459_v11 = vcvt.s32.f32 %v2457_v4  ;;  %v8968_v41 = vld [vmem:[#allocation25_spill] sm:$0xff]  ;;  %v5777_v13 = vpop.xlane.xlu0 %1611 }
 0x3d4   :  { %1369 = vadd.xlane.f32.xlu1 %v1367_v5  ;;  %v1389_v5 = vand.u32 65535, %v8968_v41  ;;  %8970 = vst [vmem:[#allocation25_spill] sm:$0xff] %v5777_v13  ;;  %v8972_v41 = vld [vmem:[#allocation28_spill] sm:$0xff] }
 0x3d6   :  { %v5761_v25 = vpop.xlane.xlu2 %1117  ;;  %v1391_v4 = vcvt.s32.f32 %v1389_v5 }
 0x3d7   :  { %8965 = vst [vmem:[#allocation38_spill] sm:$0xff] %v5761_v25  ;;  %v5764_v28 = vpop.xlane.xlu1 %1107  ;;  %v1414_v25 = vshrl.u32 %v8972_v41, 16 }
 0x3d8   :  { %8966 = vst [vmem:[#allocation23_spill] sm:$0xff] %v5764_v28  ;;  %v8975_v28 = vld [vmem:[#allocation29_spill] sm:$0xff] }
 0x3d9   :  { %vm873_vm1 = vcmp.lt.s32.totalorder %v5105_v14, %v8975_v28  ;;  %v1416_v49 = vcvt.s32.f32 %v1414_v25 }
 0x3db   :  { %1371 = vadd.xlane.f32.xlu2 %v1368_v46  ;;  %2461 = vadd.xlane.f32.xlu0 %v2459_v11  ;;  %v2472_v46 = vcvt.s32.f32 %v2470_v32  ;;  %v1402_v11 = vshrl.u32 %v998_v60, 16  ;;  %v5795_v56 = vpop.xlane.xlu0 %1633  ;;  %v1001_v60 = vsel %vm873_vm1, 1, %v8943_v20 }
 0x3dc   :  { %1383 = vadd.xlane.f32.xlu1 %v1380_v53  ;;  %v5785_v53 = vsel %vm961_vm0, 1, %v8943_v20  ;;  %8976 = vst [vmem:[#allocation29_spill] sm:$0xff] %v5795_v56  ;;  %v1437_v41 = vand.u32 65535, %v1001_v60  ;;  %vm894_vm0 = vcmp.lt.s32.totalorder %v5288_v42, %v5298_v24 }
 0x3dd   :  { %v1404_v5 = vcvt.s32.f32 %v1402_v11 }
 0x3de   :  { %v5775_v7 = vpop.xlane.xlu2 %1119  ;;  %v1439_v44 = vcvt.s32.f32 %v1437_v41  ;;  %v1004_v41 = vsel %vm876_vm5, 1, %v8943_v20 }
 0x3df   :  { %8969 = vst [vmem:[#allocation26_spill] sm:$0xff] %v5775_v7  ;;  %v5780_v40 = vpop.xlane.xlu1 %1131  ;;  %v2493_v7 = vand.u32 65535, %v5785_v53 }
 0x3e0   :  { %8971 = vst [vmem:[#allocation112_spill] sm:$0xff] %v5780_v40 }
 0x3e1   :  { %v2495_v32 = vcvt.s32.f32 %v2493_v7 }
 0x3e3   :  { %1393 = vadd.xlane.f32.xlu2 %v1391_v4  ;;  %2475 = vadd.xlane.f32.xlu0 %v2472_v46  ;;  %v5801_v4 = vsel %vm962_vm2, 1, %v8943_v20  ;;  %v5811_v7 = vpop.xlane.xlu0 %1647 }
 0x3e4   :  { %1405 = vadd.xlane.f32.xlu1 %v1403_v0  ;;  %v8977_v0 = vld [vmem:[#allocation30_spill] sm:$0xff]  ;;  %v2506_v56 = vshrl.u32 %v5801_v4, 16  ;;  %8980 = vst [vmem:[#allocation115_spill] sm:$0xff] %v5811_v7  ;;  %v1473_v7 = vand.u32 65535, %v1004_v41 }
 0x3e5   :  { %v1425_v46 = vand.u32 65535, %v8977_v0 }
 0x3e6   :  { %v5788_v13 = vpop.xlane.xlu2 %1141  ;;  %v2508_v11 = vcvt.s32.f32 %v2506_v56 }
 0x3e7   :  { %8973 = vst [vmem:[#allocation28_spill] sm:$0xff] %v5788_v13  ;;  %v5791_v40 = vpop.xlane.xlu1 %1153  ;;  %v1427_v25 = vcvt.s32.f32 %v1425_v46 }
 0x3e8   :  { %8974 = vst [vmem:[#allocation113_spill] sm:$0xff] %v5791_v40 }
 0x3eb   :  { %1407 = vadd.xlane.f32.xlu2 %v1404_v5  ;;  %2497 = vadd.xlane.f32.xlu0 %v2495_v32  ;;  %v5814_v5 = vsel %vm964_vm3, 1, %v8943_v20  ;;  %v8981_v32 = vld [vmem:[#allocation31_spill] sm:$0xff] }
 0x3ec   :  { %1419 = vadd.xlane.f32.xlu1 %v1416_v49  ;;  %v1438_v49 = vshrl.u32 %v1001_v60, 16  ;;  %v1450_v0 = vshrl.u32 %v8981_v32, 16  ;;  %v5831_v32 = vpop.xlane.xlu0 %1669 }
 0x3ed   :  { %8986 = vst [vmem:[#allocation34_spill] sm:$0xff] %v5831_v32 }
 0x3ee   :  { %v5804_v28 = vpop.xlane.xlu2 %1155  ;;  %v1440_v56 = vcvt.s32.f32 %v1438_v49  ;;  %v1452_v46 = vcvt.s32.f32 %v1450_v0  ;;  %v1475_v0 = vcvt.s32.f32 %v1473_v7 }
 0x3ef   :  { %8978 = vst [vmem:[#allocation30_spill] sm:$0xff] %v5804_v28  ;;  %v5807_v40 = vpop.xlane.xlu1 %1167 }
 0x3f0   :  { %8979 = vst [vmem:[#allocation114_spill] sm:$0xff] %v5807_v40  ;;  %v2529_v40 = vand.u32 65535, %v5814_v5 }
 0x3f2   :  { %v2531_v60 = vcvt.s32.f32 %v2529_v40 }
 0x3f3   :  { %1429 = vadd.xlane.f32.xlu2 %v1427_v25  ;;  %2511 = vadd.xlane.f32.xlu0 %v2508_v11  ;;  %v5828_v25 = vsel %vm965_vm6, 1, %v8943_v20 }
 0x3f4   :  { %1441 = vadd.xlane.f32.xlu1 %v1439_v44  ;;  %v8985_v44 = vld [vmem:[#allocation32_spill] sm:$0xff]  ;;  %v2542_v43 = vshrl.u32 %v5828_v25, 16 }
 0x3f5   :  { %v1461_v11 = vand.u32 65535, %v8985_v44 }
 0x3f6   :  { %v5817_v13 = vpop.xlane.xlu2 %1177  ;;  %v2544_v31 = vcvt.s32.f32 %v2542_v43 }
 0x3f7   :  { %8982 = vst [vmem:[#allocation31_spill] sm:$0xff] %v5817_v13  ;;  %v5820_v28 = vpop.xlane.xlu1 %1189  ;;  %v1463_v40 = vcvt.s32.f32 %v1461_v11 }
 0x3f8   :  { %8983 = vst [vmem:[#allocation116_spill] sm:$0xff] %v5820_v28  ;;  %v5846_v28 = vpop.xlane.xlu0 %1683 }
 0x3f9   :  { %8990 = vst [vmem:[#allocation117_spill] sm:$0xff] %v5846_v28 }
 0x3fb   :  { %1443 = vadd.xlane.f32.xlu2 %v1440_v56  ;;  %2533 = vadd.xlane.f32.xlu0 %v2531_v60  ;;  %v5841_v56 = vsel %vm967_vm7, 1, %v8943_v20  ;;  %v8988_v60 = vld [vmem:[#allocation33_spill] sm:$0xff]  ;;  %vm912_vm7 = vcmp.lt.s32.totalorder %v5389_v34, %v5419_v45 }
 0x3fc   :  { %1455 = vadd.xlane.f32.xlu1 %v1452_v46  ;;  %v1474_v46 = vshrl.u32 %v1004_v41, 16  ;;  %v1486_v44 = vshrl.u32 %v8988_v60, 16  ;;  %v1007_v41 = vsel %vm879_vm8, 1, %v8943_v20  ;;  %vm915_vm8 = vcmp.lt.s32.totalorder %v5389_v34, %v5428_v3 }
 0x3fd   :  { %v1509_v60 = vand.u32 65535, %v1007_v41 }
 0x3fe   :  { %v5833_v14 = vpop.xlane.xlu2 %1191  ;;  %v1476_v7 = vcvt.s32.f32 %v1474_v46  ;;  %v1488_v11 = vcvt.s32.f32 %v1486_v44 }
 0x3ff   :  { %8987 = vst [vmem:[#allocation32_spill] sm:$0xff] %v5833_v14  ;;  %v5836_v49 = vpop.xlane.xlu1 %1203  ;;  %v2565_v14 = vand.u32 65535, %v5841_v56  ;;  %v1511_v46 = vcvt.s32.f32 %v1509_v60  ;;  %v1010_v60 = vsel %vm882_vm11, 1, %v8943_v20 }
 0x400   :  { %v5865_v33 = vpop.xlane.xlu0 %1705 }
 0x401   :  { %v2567_v43 = vcvt.s32.f32 %v2565_v14 }
 0x403   :  { %1465 = vadd.xlane.f32.xlu2 %v1463_v40  ;;  %2547 = vadd.xlane.f32.xlu0 %v2544_v31  ;;  %v5857_v40 = vsel %vm968_vm9, 1, %v8943_v20 }
 0x404   :  { %1477 = vadd.xlane.f32.xlu1 %v1475_v0  ;;  %v8993_v0 = vld [vmem:[#allocation35_spill] sm:$0xff]  ;;  %v2578_v54 = vshrl.u32 %v5857_v40, 16 }
 0x405   :  { %v1497_v31 = vand.u32 65535, %v8993_v0  ;;  %8995 = vst [vmem:[#allocation35_spill] sm:$0xff] %v5865_v33 }
 0x406   :  { %v5844_v32 = vpop.xlane.xlu2 %1213  ;;  %v2580_v44 = vcvt.s32.f32 %v2578_v54 }
 0x407   :  { %8989 = vst [vmem:[#allocation33_spill] sm:$0xff] %v5844_v32  ;;  %v5849_v13 = vpop.xlane.xlu1 %1225  ;;  %v1499_v14 = vcvt.s32.f32 %v1497_v31 }
 0x408   :  { %8991 = vst [vmem:[#allocation118_spill] sm:$0xff] %v5849_v13 }
 0x40b   :  { %1479 = vadd.xlane.f32.xlu2 %v1476_v7  ;;  %2569 = vadd.xlane.f32.xlu0 %v2567_v43  ;;  %v5870_v7 = vsel %vm970_vm10, 1, %v8943_v20  ;;  %v8996_v43 = vld [vmem:[#allocation37_spill] sm:$0xff]  ;;  %vm921_vm10 = vcmp.lt.s32.totalorder %v5389_v34, %v5473_v16 }
 0x40c   :  { %1491 = vadd.xlane.f32.xlu1 %v1488_v11  ;;  %v1510_v11 = vshrl.u32 %v1007_v41, 16  ;;  %v1522_v0 = vshrl.u32 %v8996_v43, 16  ;;  %v2601_v32 = vand.u32 65535, %v5870_v7  ;;  %v5883_v41 = vpop.xlane.xlu0 %1719  ;;  %v1545_v43 = vand.u32 65535, %v1010_v60 }
 0x40d   :  { %8999 = vst [vmem:[#allocation120_spill] sm:$0xff] %v5883_v41 }
 0x40e   :  { %v5860_v28 = vpop.xlane.xlu2 %1227  ;;  %v1512_v59 = vcvt.s32.f32 %v1510_v11  ;;  %v1524_v31 = vcvt.s32.f32 %v1522_v0  ;;  %v2603_v54 = vcvt.s32.f32 %v2601_v32  ;;  %v1546_v32 = vshrl.u32 %v1010_v60, 16 }
 0x40f   :  { %8994 = vst [vmem:[#allocation36_spill] sm:$0xff] %v5860_v28  ;;  %v5863_v13 = vpop.xlane.xlu1 %1239 }
 0x413   :  { %1501 = vadd.xlane.f32.xlu2 %v1499_v14  ;;  %2583 = vadd.xlane.f32.xlu0 %v2580_v44  ;;  %v5886_v14 = vsel %vm971_vm12, 1, %v8943_v20 }
 0x414   :  { %1513 = vadd.xlane.f32.xlu1 %v1511_v46  ;;  %v9000_v46 = vld [vmem:[#allocation39_spill] sm:$0xff]  ;;  %v2614_v9 = vshrl.u32 %v5886_v14, 16 }
 0x415   :  { %v1533_v44 = vand.u32 65535, %v9000_v46 }
 0x416   :  { %v5873_v28 = vpop.xlane.xlu2 %1249  ;;  %v2616_v41 = vcvt.s32.f32 %v2614_v9 }
 0x417   :  { %8997 = vst [vmem:[#allocation37_spill] sm:$0xff] %v5873_v28  ;;  %v5876_v33 = vpop.xlane.xlu1 %1261  ;;  %v1535_v0 = vcvt.s32.f32 %v1533_v44  ;;  %v1013_v44 = vsel %vm885_vm13, 1, %v8943_v20 }
 0x418   :  { %8998 = vst [vmem:[#allocation119_spill] sm:$0xff] %v5876_v33  ;;  %v1547_v33 = vcvt.s32.f32 %v1545_v43  ;;  %v1581_v43 = vand.u32 65535, %v1013_v44 }
 0x41b   :  { %1515 = vadd.xlane.f32.xlu2 %v1512_v59  ;;  %2605 = vadd.xlane.f32.xlu0 %v2603_v54  ;;  %v5894_v59 = vpop.xlane.xlu0 %1741 }
 0x41c   :  { %1527 = vadd.xlane.f32.xlu1 %v1524_v31  ;;  %9003 = vst [vmem:[#allocation122_spill] sm:$0xff] %v5894_v59  ;;  %v9004_v31 = vld [vmem:[#allocation40_spill] sm:$0xff]  ;;  %v1582_v59 = vshrl.u32 %v1013_v44, 16 }
 0x41d   :  { %v1558_v28 = vshrl.u32 %v9004_v31, 16  ;;  %v1583_v31 = vcvt.s32.f32 %v1581_v43 }
 0x41e   :  { %v5889_v51 = vpop.xlane.xlu2 %1263 }
 0x41f   :  { %9001 = vst [vmem:[#allocation39_spill] sm:$0xff] %v5889_v51  ;;  %v5892_v11 = vpop.xlane.xlu1 %1275  ;;  %v1548_v51 = vcvt.s32.f32 %v1546_v32 }
 0x420   :  { %9002 = vst [vmem:[#allocation121_spill] sm:$0xff] %v5892_v11  ;;  %v1560_v11 = vcvt.s32.f32 %v1558_v28 }
 0x423   :  { %1537 = vadd.xlane.f32.xlu2 %v1535_v0  ;;  %2619 = vadd.xlane.f32.xlu0 %v2616_v41 }
 0x424   :  { %1549 = vadd.xlane.f32.xlu1 %v1547_v33  ;;  %v9006_v33 = vld [vmem:[#allocation41_spill] sm:$0xff] }
 0x425   :  { %v1569_v60 = vand.u32 65535, %v9006_v33  ;;  %v1016_v33 = vsel %vm888_vm14, 1, %v8943_v20 }
 0x426   :  { %v5897_v46 = vpop.xlane.xlu2 %1285 }
 0x427   :  { %v5899_v54 = vpop.xlane.xlu1 %1297  ;;  %v1571_v0 = vcvt.s32.f32 %v1569_v60  ;;  %v9011_v60 = vld [vmem:[#allocation43_spill] sm:$0xff] }
 0x428   :  { %9005 = vst [vmem:[#allocation40_spill] sm:$0xff] %v5899_v54  ;;  %v9008_v54 = vld [vmem:[#allocation42_spill] sm:$0xff]  ;;  %v1605_v43 = vand.u32 65535, %v9011_v60  ;;  %v1019_v60 = vsel %vm891_vm15, 1, %v8943_v20  ;;  %vm936_vm15 = vcmp.lt.s32.totalorder %v5488_v61, %v5565_v58 }
 0x429   :  { %v1594_v8 = vshrl.u32 %v9008_v54, 16 }
 0x42a   :  { %v1607_v54 = vcvt.s32.f32 %v1605_v43  ;;  %v9016_v43 = vld [vmem:[#allocation45_spill] sm:$0xff] }
 0x42b   :  { %1551 = vadd.xlane.f32.xlu2 %v1548_v51  ;;  %v1584_v51 = vcvt.s32.f32 %v1582_v59 }
 0x42c   :  { %1563 = vadd.xlane.f32.xlu1 %v1560_v11  ;;  %v1596_v11 = vcvt.s32.f32 %v1594_v8 }
 0x42e   :  { %v5905_v9 = vpop.xlane.xlu2 %1299 }
 0x42f   :  { %9007 = vst [vmem:[#allocation41_spill] sm:$0xff] %v5905_v9  ;;  %v5907_v41 = vpop.xlane.xlu1 %1311  ;;  %v9013_v9 = vld [vmem:[#allocation44_spill] sm:$0xff] }
 0x430   :  { %v1630_v47 = vshrl.u32 %v9013_v9, 16 }
 0x433   :  { %1573 = vadd.xlane.f32.xlu2 %v1571_v0  ;;  %v1617_v0 = vand.u32 65535, %v1016_v33 }
 0x434   :  { %1585 = vadd.xlane.f32.xlu1 %v1583_v31 }
 0x436   :  { %v5910_v32 = vpop.xlane.xlu2 %1321 }
 0x437   :  { %9009 = vst [vmem:[#allocation42_spill] sm:$0xff] %v5910_v32  ;;  %v5912_v28 = vpop.xlane.xlu1 %1333  ;;  %v1619_v32 = vcvt.s32.f32 %v1617_v0  ;;  %v1641_v0 = vand.u32 65535, %v9016_v43  ;;  %v9021_v43 = vld [vmem:[#allocation47_spill] sm:$0xff] }
 0x438   :  { %9010 = vst [vmem:[#allocation123_spill] sm:$0xff] %v5912_v28  ;;  %v1618_v28 = vshrl.u32 %v1016_v33, 16 }
 0x439   :  { %v1643_v9 = vcvt.s32.f32 %v1641_v0  ;;  %v1677_v0 = vand.u32 65535, %v9021_v43 }
 0x43b   :  { %1587 = vadd.xlane.f32.xlu2 %v1584_v51  ;;  %v1620_v51 = vcvt.s32.f32 %v1618_v28 }
 0x43c   :  { %1599 = vadd.xlane.f32.xlu1 %v1596_v11  ;;  %v1632_v11 = vcvt.s32.f32 %v1630_v47 }
 0x43e   :  { %v5918_v31 = vpop.xlane.xlu2 %1335 }
 0x43f   :  { %9012 = vst [vmem:[#allocation43_spill] sm:$0xff] %v5918_v31  ;;  %v5920_v44 = vpop.xlane.xlu1 %1347  ;;  %v9018_v31 = vld [vmem:[#allocation46_spill] sm:$0xff] }
 0x440   :  { %v1666_v35 = vshrl.u32 %v9018_v31, 16  ;;  %v1679_v31 = vcvt.s32.f32 %v1677_v0  ;;  %v9027_v0 = vld [vmem:[#allocation49_spill] sm:$0xff] }
 0x443   :  { %1609 = vadd.xlane.f32.xlu2 %v1607_v54  ;;  %v1653_v54 = vand.u32 65535, %v1019_v60 }
 0x444   :  { %1621 = vadd.xlane.f32.xlu1 %v1619_v32 }
 0x446   :  { %v5923_v59 = vpop.xlane.xlu2 %1357 }
 0x447   :  { %9014 = vst [vmem:[#allocation44_spill] sm:$0xff] %v5923_v59  ;;  %v5925_v8 = vpop.xlane.xlu1 %1369  ;;  %v1655_v59 = vcvt.s32.f32 %v1653_v54 }
 0x448   :  { %9015 = vst [vmem:[#allocation124_spill] sm:$0xff] %v5925_v8  ;;  %v1654_v8 = vshrl.u32 %v1019_v60, 16 }
 0x44a   :  { %v1656_v47 = vcvt.s32.f32 %v1654_v8 }
 0x44b   :  { %1623 = vadd.xlane.f32.xlu2 %v1620_v51  ;;  %v1668_v51 = vcvt.s32.f32 %v1666_v35 }
 0x44c   :  { %1635 = vadd.xlane.f32.xlu1 %v1632_v11  ;;  %v1022_v11 = vsel %vm894_vm0, 1, %v8943_v20 }
 0x44d   :  { %v1689_v54 = vand.u32 65535, %v1022_v11 }
 0x44e   :  { %v5931_v32 = vpop.xlane.xlu2 %1371 }
 0x44f   :  { %9017 = vst [vmem:[#allocation45_spill] sm:$0xff] %v5931_v32  ;;  %v5933_v33 = vpop.xlane.xlu1 %1383  ;;  %v9030_v32 = vld [vmem:[#allocation50_spill] sm:$0xff] }
 0x453   :  { %1645 = vadd.xlane.f32.xlu2 %v1643_v9  ;;  %v1691_v9 = vcvt.s32.f32 %v1689_v54  ;;  %v1713_v54 = vand.u32 65535, %v9027_v0 }
 0x454   :  { %1657 = vadd.xlane.f32.xlu1 %v1655_v59 }
 0x456   :  { %v5936_v26 = vpop.xlane.xlu2 %1393 }
 0x457   :  { %9019 = vst [vmem:[#allocation46_spill] sm:$0xff] %v5936_v26  ;;  %v5938_v28 = vpop.xlane.xlu1 %1405  ;;  %v9023_v26 = vld [vmem:[#allocation48_spill] sm:$0xff] }
 0x458   :  { %9020 = vst [vmem:[#allocation125_spill] sm:$0xff] %v5938_v28  ;;  %v1690_v28 = vshrl.u32 %v1022_v11, 16  ;;  %v1702_v24 = vshrl.u32 %v9023_v26, 16  ;;  %v1715_v26 = vcvt.s32.f32 %v1713_v54  ;;  %v9034_v54 = vld [vmem:[#allocation52_spill] sm:$0xff] }
 0x45a   :  { %v1704_v43 = vcvt.s32.f32 %v1702_v24 }
 0x45b   :  { %1659 = vadd.xlane.f32.xlu2 %v1656_v47  ;;  %v9026_v47 = vld [vmem:[#allocation51_spill] sm:$0xff] }
 0x45c   :  { %1671 = vadd.xlane.f32.xlu1 %v1668_v51  ;;  %vm897_vm1 = vcmp.lt.s32.totalorder %v5288_v42, %v9026_v47  ;;  %v1692_v51 = vcvt.s32.f32 %v1690_v28  ;;  %v1738_v47 = vshrl.u32 %v9030_v32, 16 }
 0x45e   :  { %v5944_v59 = vpop.xlane.xlu2 %1407  ;;  %v1740_v0 = vcvt.s32.f32 %v1738_v47 }
 0x45f   :  { %9022 = vst [vmem:[#allocation47_spill] sm:$0xff] %v5944_v59  ;;  %v5946_v60 = vpop.xlane.xlu1 %1419  ;;  %v1025_v59 = vsel %vm897_vm1, 1, %v8943_v20 }
 0x463   :  { %1681 = vadd.xlane.f32.xlu2 %v1679_v31  ;;  %v1725_v31 = vand.u32 65535, %v1025_v59 }
 0x464   :  { %1693 = vadd.xlane.f32.xlu1 %v1691_v9 }
 0x466   :  { %v5949_v8 = vpop.xlane.xlu2 %1429 }
 0x467   :  { %9024 = vst [vmem:[#allocation48_spill] sm:$0xff] %v5949_v8  ;;  %v5951_v35 = vpop.xlane.xlu1 %1441  ;;  %v1727_v8 = vcvt.s32.f32 %v1725_v31  ;;  %v1749_v31 = vand.u32 65535, %v9034_v54 }
 0x468   :  { %9025 = vst [vmem:[#allocation126_spill] sm:$0xff] %v5951_v35  ;;  %v1726_v35 = vshrl.u32 %v1025_v59, 16 }
 0x469   :  { %v1751_v32 = vcvt.s32.f32 %v1749_v31  ;;  %v9041_v31 = vld [vmem:[#allocation56_spill] sm:$0xff] }
 0x46b   :  { %1695 = vadd.xlane.f32.xlu2 %v1692_v51  ;;  %v9033_v51 = vld [vmem:[#allocation53_spill] sm:$0xff] }
 0x46c   :  { %1707 = vadd.xlane.f32.xlu1 %v1704_v43  ;;  %vm900_vm2 = vcmp.lt.s32.totalorder %v5288_v42, %v9033_v51  ;;  %v1728_v43 = vcvt.s32.f32 %v1726_v35 }
 0x46e   :  { %v5957_v9 = vpop.xlane.xlu2 %1443 }
 0x46f   :  { %9028 = vst [vmem:[#allocation51_spill] sm:$0xff] %v5957_v9  ;;  %v5959_v11 = vpop.xlane.xlu1 %1455  ;;  %v1028_v9 = vsel %vm900_vm2, 1, %v8943_v20 }
 0x470   :  { %9029 = vst [vmem:[#allocation49_spill] sm:$0xff] %v5959_v11  ;;  %v9037_v11 = vld [vmem:[#allocation54_spill] sm:$0xff] }
 0x471   :  { %v1774_v51 = vshrl.u32 %v9037_v11, 16 }
 0x473   :  { %1717 = vadd.xlane.f32.xlu2 %v1715_v26  ;;  %v1761_v26 = vand.u32 65535, %v1028_v9  ;;  %v1776_v54 = vcvt.s32.f32 %v1774_v51 }
 0x474   :  { %1729 = vadd.xlane.f32.xlu1 %v1727_v8 }
 0x476   :  { %v5962_v28 = vpop.xlane.xlu2 %1465 }
 0x477   :  { %9031 = vst [vmem:[#allocation50_spill] sm:$0xff] %v5962_v28  ;;  %v5964_v24 = vpop.xlane.xlu1 %1477  ;;  %v1763_v28 = vcvt.s32.f32 %v1761_v26  ;;  %v1785_v26 = vand.u32 65535, %v9041_v31 }
 0x478   :  { %9032 = vst [vmem:[#allocation127_spill] sm:$0xff] %v5964_v24  ;;  %v1762_v24 = vshrl.u32 %v1028_v9, 16 }
 0x479   :  { %v1787_v11 = vcvt.s32.f32 %v1785_v26  ;;  %v9049_v26 = vld [vmem:[#allocation58_spill] sm:$0xff] }
 0x47b   :  { %1731 = vadd.xlane.f32.xlu2 %v1728_v43  ;;  %v9040_v43 = vld [vmem:[#allocation19_spill] sm:$0xff] }
 0x47c   :  { %1743 = vadd.xlane.f32.xlu1 %v1740_v0  ;;  %vm903_vm3 = vcmp.lt.s32.totalorder %v5288_v42, %v9040_v43  ;;  %v1764_v0 = vcvt.s32.f32 %v1762_v24  ;;  %v9045_v24 = vld [vmem:[#allocation57_spill] sm:$0xff] }
 0x47d   :  { %v1810_v51 = vshrl.u32 %v9045_v24, 16 }
 0x47e   :  { %v5970_v8 = vpop.xlane.xlu2 %1479 }
 0x47f   :  { %9035 = vst [vmem:[#allocation53_spill] sm:$0xff] %v5970_v8  ;;  %v5972_v59 = vpop.xlane.xlu1 %1491  ;;  %v1031_v8 = vsel %vm903_vm3, 1, %v8943_v20 }
 0x480   :  { %9036 = vst [vmem:[#allocation52_spill] sm:$0xff] %v5972_v59  ;;  %v5987_v59 = vpop.xlane.xlu0 %1755 }
 0x481   :  { %9044 = vst [vmem:[#allocation129_spill] sm:$0xff] %v5987_v59 }
 0x483   :  { %1753 = vadd.xlane.f32.xlu2 %v1751_v32  ;;  %v1797_v32 = vand.u32 65535, %v1031_v8 }
 0x484   :  { %1765 = vadd.xlane.f32.xlu1 %v1763_v28 }
 0x486   :  { %v5975_v35 = vpop.xlane.xlu2 %1501 }
 0x487   :  { %9038 = vst [vmem:[#allocation54_spill] sm:$0xff] %v5975_v35  ;;  %v5977_v47 = vpop.xlane.xlu1 %1513  ;;  %v1799_v35 = vcvt.s32.f32 %v1797_v32 }
 0x488   :  { %9039 = vst [vmem:[#allocation128_spill] sm:$0xff] %v5977_v47  ;;  %v1798_v47 = vshrl.u32 %v1031_v8, 16 }
 0x48a   :  { %v1800_v31 = vcvt.s32.f32 %v1798_v47  ;;  %v9052_v47 = vld [vmem:[#allocation59_spill] sm:$0xff] }
 0x48b   :  { %1767 = vadd.xlane.f32.xlu2 %v1764_v0 }
 0x48c   :  { %1779 = vadd.xlane.f32.xlu1 %v1776_v54  ;;  %v9048_v54 = vld [vmem:[#allocation60_spill] sm:$0xff] }
 0x48d   :  { %vm906_vm5 = vcmp.lt.s32.totalorder %v5288_v42, %v9048_v54 }
 0x48e   :  { %v5983_v28 = vpop.xlane.xlu2 %1515 }
 0x48f   :  { %9042 = vst [vmem:[#allocation19_spill] sm:$0xff] %v5983_v28  ;;  %v5985_v9 = vpop.xlane.xlu1 %1527  ;;  %v1812_v28 = vcvt.s32.f32 %v1810_v51  ;;  %v1846_v51 = vshrl.u32 %v9052_v47, 16 }
 0x490   :  { %9043 = vst [vmem:[#allocation56_spill] sm:$0xff] %v5985_v9  ;;  %v1034_v9 = vsel %vm906_vm5, 1, %v8943_v20  ;;  %vm951_vm5 = vcmp.lt.s32.totalorder %v5601_v30, %v5640_v39 }
 0x491   :  { %v1833_v8 = vand.u32 65535, %v1034_v9  ;;  %v1834_v42 = vshrl.u32 %v1034_v9, 16 }
 0x493   :  { %1789 = vadd.xlane.f32.xlu2 %v1787_v11  ;;  %v6000_v11 = vpop.xlane.xlu0 %1777 }
 0x494   :  { %1801 = vadd.xlane.f32.xlu1 %v1799_v35  ;;  %v1821_v35 = vand.u32 65535, %v9049_v26  ;;  %9051 = vst [vmem:[#allocation58_spill] sm:$0xff] %v6000_v11  ;;  %v1848_v11 = vcvt.s32.f32 %v1846_v51 }
 0x496   :  { %v5990_v43 = vpop.xlane.xlu2 %1537  ;;  %v1823_v59 = vcvt.s32.f32 %v1821_v35 }
 0x497   :  { %9046 = vst [vmem:[#allocation57_spill] sm:$0xff] %v5990_v43  ;;  %v5992_v0 = vpop.xlane.xlu1 %1549 }
 0x498   :  { %9047 = vst [vmem:[#allocation130_spill] sm:$0xff] %v5992_v0  ;;  %v1835_v0 = vcvt.s32.f32 %v1833_v8 }
 0x49b   :  { %1803 = vadd.xlane.f32.xlu2 %v1800_v31  ;;  %v6011_v26 = vpop.xlane.xlu0 %1791 }
 0x49c   :  { %1815 = vadd.xlane.f32.xlu1 %v1812_v28  ;;  %v9054_v28 = vld [vmem:[#allocation62_spill] sm:$0xff] }
 0x49d   :  { %vm909_vm6 = vcmp.lt.s32.totalorder %v5389_v34, %v9054_v28  ;;  %9055 = vst [vmem:[#allocation62_spill] sm:$0xff] %v6011_v26  ;;  %v1040_v26 = vsel %vm912_vm7, 1, %v8943_v20 }
 0x49e   :  { %v5998_v32 = vpop.xlane.xlu2 %1551  ;;  %v1037_v43 = vsel %vm909_vm6, 1, %v8943_v20  ;;  %v1906_v45 = vshrl.u32 %v1040_v26, 16  ;;  %vm954_vm6 = vcmp.lt.s32.totalorder %v5601_v30, %v5650_v55  ;;  %v2422_v55 = vshrl.u32 %v5728_v57, 16 }
 0x49f   :  { %9050 = vst [vmem:[#allocation60_spill] sm:$0xff] %v5998_v32  ;;  %v6002_v24 = vpop.xlane.xlu1 %1563  ;;  %v1836_v32 = vcvt.s32.f32 %v1834_v42  ;;  %v1869_v9 = vand.u32 65535, %v1037_v43  ;;  %v1870_v28 = vshrl.u32 %v1037_v43, 16  ;;  %v1882_v42 = vshrl.u32 %v5398_v23, 16 }
 0x4a0   :  { %v1905_v43 = vand.u32 65535, %v1040_v26 }
 0x4a1   :  { %v1871_v47 = vcvt.s32.f32 %v1869_v9 }
 0x4a3   :  { %1825 = vadd.xlane.f32.xlu2 %v1823_v59  ;;  %v1857_v59 = vand.u32 65535, %v5385_v21  ;;  %v1872_v21 = vcvt.s32.f32 %v1870_v28  ;;  %v9060_v28 = vld [vmem:[#allocation65_spill] sm:$0xff] }
 0x4a4   :  { %1837 = vadd.xlane.f32.xlu1 %v1835_v0 }
 0x4a5   :  { %v1859_v8 = vcvt.s32.f32 %v1857_v59  ;;  %v1893_v59 = vand.u32 65535, %v5407_v1  ;;  %v1908_v1 = vcvt.s32.f32 %v1906_v45  ;;  %v1954_v45 = vshrl.u32 %v5437_v63, 16 }
 0x4a6   :  { %v6005_v54 = vpop.xlane.xlu2 %1573 }
 0x4a7   :  { %v6007_v31 = vpop.xlane.xlu1 %1585 }
 0x4a8   :  { %9053 = vst [vmem:[#allocation59_spill] sm:$0xff] %v6007_v31  ;;  %v6019_v31 = vpop.xlane.xlu0 %1813 }
 0x4a9   :  { %9056 = vst [vmem:[#allocation131_spill] sm:$0xff] %v6019_v31  ;;  %v1907_v31 = vcvt.s32.f32 %v1905_v43 }
 0x4ab   :  { %1839 = vadd.xlane.f32.xlu2 %v1836_v32 }
 0x4ac   :  { %1851 = vadd.xlane.f32.xlu1 %v1848_v11  ;;  %v1884_v11 = vcvt.s32.f32 %v1882_v42  ;;  %v1918_v42 = vshrl.u32 %v9060_v28, 16 }
 0x4ae   :  { %v6015_v0 = vpop.xlane.xlu2 %1587 }
 0x4af   :  { %v6017_v35 = vpop.xlane.xlu1 %1599 }
 0x4b0   :  { %v6030_v9 = vpop.xlane.xlu0 %1827 }
 0x4b1   :  { %9058 = vst [vmem:[#allocation133_spill] sm:$0xff] %v6030_v9  ;;  %v1920_v9 = vcvt.s32.f32 %v1918_v42 }
 0x4b3   :  { %1861 = vadd.xlane.f32.xlu2 %v1859_v8 }
 0x4b4   :  { %1873 = vadd.xlane.f32.xlu1 %v1871_v47  ;;  %v1895_v47 = vcvt.s32.f32 %v1893_v59 }
 0x4b6   :  { %v6022_v51 = vpop.xlane.xlu2 %1609 }
 0x4b7   :  { %v6024_v32 = vpop.xlane.xlu1 %1621 }
 0x4b8   :  { %9057 = vst [vmem:[#allocation132_spill] sm:$0xff] %v6024_v32 }
 0x4bb   :  { %1875 = vadd.xlane.f32.xlu2 %v1872_v21  ;;  %v6039_v21 = vpop.xlane.xlu0 %1849 }
 0x4bc   :  { %1887 = vadd.xlane.f32.xlu1 %v1884_v11  ;;  %9062 = vst [vmem:[#allocation135_spill] sm:$0xff] %v6039_v21 }
 0x4be   :  { %v6032_v8 = vpop.xlane.xlu2 %1623 }
 0x4bf   :  { %9059 = vst [vmem:[#allocation134_spill] sm:$0xff] %v6032_v8  ;;  %v6034_v23 = vpop.xlane.xlu1 %1635  ;;  %v1043_v8 = vsel %vm915_vm8, 1, %v8943_v20 }
 0x4c0   :  { %v1941_v26 = vand.u32 65535, %v1043_v8  ;;  %v1942_v3 = vshrl.u32 %v1043_v8, 16 }
 0x4c2   :  { %v1943_v21 = vcvt.s32.f32 %v1941_v26 }
 0x4c3   :  { %1897 = vadd.xlane.f32.xlu2 %v1895_v47  ;;  %v6051_v47 = vpop.xlane.xlu0 %1863 }
 0x4c4   :  { %1909 = vadd.xlane.f32.xlu1 %v1907_v31  ;;  %v1929_v31 = vand.u32 65535, %v5426_v38  ;;  %9065 = vst [vmem:[#allocation138_spill] sm:$0xff] %v6051_v47  ;;  %v1944_v38 = vcvt.s32.f32 %v1942_v3 }
 0x4c6   :  { %v6037_v32 = vpop.xlane.xlu2 %1645  ;;  %v1931_v28 = vcvt.s32.f32 %v1929_v31 }
 0x4c7   :  { %9061 = vst [vmem:[#allocation65_spill] sm:$0xff] %v6037_v32  ;;  %v6041_v11 = vpop.xlane.xlu1 %1657 }
 0x4c8   :  { %9063 = vst [vmem:[#allocation136_spill] sm:$0xff] %v6041_v11  ;;  %v1956_v11 = vcvt.s32.f32 %v1954_v45  ;;  %v1990_v45 = vshrl.u32 %v5455_v37, 16 }
 0x4cb   :  { %1911 = vadd.xlane.f32.xlu2 %v1908_v1  ;;  %v6061_v32 = vpop.xlane.xlu0 %1885 }
 0x4cc   :  { %1923 = vadd.xlane.f32.xlu1 %v1920_v9  ;;  %v9067_v9 = vld [vmem:[#allocation20_spill] sm:$0xff] }
 0x4cd   :  { %vm918_vm9 = vcmp.lt.s32.totalorder %v5389_v34, %v9067_v9  ;;  %9068 = vst [vmem:[#allocation20_spill] sm:$0xff] %v6061_v32  ;;  %v1049_v32 = vsel %vm921_vm10, 1, %v8943_v20 }
 0x4ce   :  { %v6047_v59 = vpop.xlane.xlu2 %1659  ;;  %v2014_v16 = vshrl.u32 %v1049_v32, 16 }
 0x4cf   :  { %9064 = vst [vmem:[#allocation137_spill] sm:$0xff] %v6047_v59  ;;  %v6049_v43 = vpop.xlane.xlu1 %1671  ;;  %v1046_v59 = vsel %vm918_vm9, 1, %v8943_v20 }
 0x4d0   :  { %v1977_v8 = vand.u32 65535, %v1046_v59  ;;  %v1978_v9 = vshrl.u32 %v1046_v59, 16  ;;  %v2013_v59 = vand.u32 65535, %v1049_v32 }
 0x4d3   :  { %1933 = vadd.xlane.f32.xlu2 %v1931_v28  ;;  %v1979_v28 = vcvt.s32.f32 %v1977_v8  ;;  %v6068_v3 = vpop.xlane.xlu0 %1899 }
 0x4d4   :  { %1945 = vadd.xlane.f32.xlu1 %v1943_v21  ;;  %v1965_v21 = vand.u32 65535, %v5446_v12  ;;  %9069 = vst [vmem:[#allocation140_spill] sm:$0xff] %v6068_v3 }
 0x4d6   :  { %v6054_v42 = vpop.xlane.xlu2 %1681  ;;  %v1967_v26 = vcvt.s32.f32 %v1965_v21  ;;  %v2001_v21 = vand.u32 65535, %v5462_v27 }
 0x4d7   :  { %v6056_v1 = vpop.xlane.xlu1 %1693 }
 0x4d8   :  { %9066 = vst [vmem:[#allocation139_spill] sm:$0xff] %v6056_v1  ;;  %v2003_v37 = vcvt.s32.f32 %v2001_v21  ;;  %v9078_v21 = vld [vmem:[#allocation73_spill] sm:$0xff] }
 0x4db   :  { %1947 = vadd.xlane.f32.xlu2 %v1944_v38  ;;  %v1992_v38 = vcvt.s32.f32 %v1990_v45  ;;  %v6079_v8 = vpop.xlane.xlu0 %1921 }
 0x4dc   :  { %1959 = vadd.xlane.f32.xlu1 %v1956_v11  ;;  %v1980_v11 = vcvt.s32.f32 %v1978_v9  ;;  %9072 = vst [vmem:[#allocation143_spill] sm:$0xff] %v6079_v8  ;;  %v9074_v9 = vld [vmem:[#allocation71_spill] sm:$0xff] }
 0x4dd   :  { %v2026_v45 = vshrl.u32 %v9074_v9, 16 }
 0x4de   :  { %v6064_v31 = vpop.xlane.xlu2 %1695 }
 0x4df   :  { %v6066_v63 = vpop.xlane.xlu1 %1707  ;;  %v2028_v8 = vcvt.s32.f32 %v2026_v45 }
 0x4e3   :  { %1969 = vadd.xlane.f32.xlu2 %v1967_v26  ;;  %v6090_v27 = vpop.xlane.xlu0 %1935 }
 0x4e4   :  { %1981 = vadd.xlane.f32.xlu1 %v1979_v28  ;;  %v2015_v28 = vcvt.s32.f32 %v2013_v59  ;;  %v2037_v59 = vand.u32 65535, %v9078_v21 }
 0x4e6   :  { %v6075_v12 = vpop.xlane.xlu2 %1717  ;;  %v2039_v9 = vcvt.s32.f32 %v2037_v59  ;;  %v9085_v59 = vld [vmem:[#allocation78_spill] sm:$0xff] }
 0x4e7   :  { %v6071_v47 = vpop.xlane.xlu1 %1729  ;;  %9071 = vst [vmem:[#allocation142_spill] sm:$0xff] %v6075_v12 }
 0x4e8   :  { %9070 = vst [vmem:[#allocation141_spill] sm:$0xff] %v6071_v47 }
 0x4eb   :  { %1983 = vadd.xlane.f32.xlu2 %v1980_v11  ;;  %v9076_v11 = vld [vmem:[#allocation74_spill] sm:$0xff] }
 0x4ec   :  { %1995 = vadd.xlane.f32.xlu1 %v1992_v38  ;;  %vm924_vm11 = vcmp.lt.s32.totalorder %v5389_v34, %v9076_v11  ;;  %9077 = vst [vmem:[#allocation74_spill] sm:$0xff] %v6090_v27  ;;  %v2016_v38 = vcvt.s32.f32 %v2014_v16  ;;  %v9081_v16 = vld [vmem:[#allocation76_spill] sm:$0xff] }
 0x4ed   :  { %v1052_v1 = vsel %vm924_vm11, 1, %v8943_v20  ;;  %v2062_v45 = vshrl.u32 %v9081_v16, 16 }
 0x4ee   :  { %v6083_v3 = vpop.xlane.xlu2 %1731  ;;  %v2049_v32 = vand.u32 65535, %v1052_v1  ;;  %v2050_v34 = vshrl.u32 %v1052_v1, 16 }
 0x4ef   :  { %v6081_v26 = vpop.xlane.xlu1 %1743  ;;  %9073 = vst [vmem:[#allocation144_spill] sm:$0xff] %v6083_v3  ;;  %v6098_v3 = vpop.xlane.xlu0 %1957  ;;  %v2064_v27 = vcvt.s32.f32 %v2062_v45 }
 0x4f0   :  { %9080 = vst [vmem:[#allocation145_spill] sm:$0xff] %v6098_v3  ;;  %v2052_v21 = vcvt.s32.f32 %v2050_v34  ;;  %v9089_v34 = vld [vmem:[#allocation80_spill] sm:$0xff] }
 0x4f1   :  { %v2098_v45 = vshrl.u32 %v9089_v34, 16 }
 0x4f3   :  { %2005 = vadd.xlane.f32.xlu2 %v2003_v37 }
 0x4f4   :  { %2017 = vadd.xlane.f32.xlu1 %v2015_v28 }
 0x4f6   :  { %v6094_v37 = vpop.xlane.xlu2 %1753 }
 0x4f7   :  { %v6086_v47 = vpop.xlane.xlu1 %1765  ;;  %9079 = vst [vmem:[#allocation73_spill] sm:$0xff] %v6094_v37 }
 0x4f8   :  { %9075 = vst [vmem:[#allocation71_spill] sm:$0xff] %v6086_v47  ;;  %v2051_v47 = vcvt.s32.f32 %v2049_v32  ;;  %v2073_v32 = vand.u32 65535, %v9085_v59 }
 0x4fa   :  { %v2075_v3 = vcvt.s32.f32 %v2073_v32 }
 0x4fb   :  { %2019 = vadd.xlane.f32.xlu2 %v2016_v38 }
 0x4fc   :  { %2031 = vadd.xlane.f32.xlu1 %v2028_v8  ;;  %v9084_v8 = vld [vmem:[#allocation79_spill] sm:$0xff] }
 0x4fd   :  { %vm927_vm12 = vcmp.lt.s32.totalorder %v5488_v61, %v9084_v8 }
 0x4fe   :  { %v6101_v11 = vpop.xlane.xlu2 %1767  ;;  %v1055_v37 = vsel %vm927_vm12, 1, %v8943_v20 }
 0x4ff   :  { %v6096_v28 = vpop.xlane.xlu1 %1779  ;;  %9082 = vst [vmem:[#allocation76_spill] sm:$0xff] %v6101_v11  ;;  %v2086_v8 = vshrl.u32 %v1055_v37, 16 }
 0x501   :  { %v2088_v59 = vcvt.s32.f32 %v2086_v8 }
 0x503   :  { %2041 = vadd.xlane.f32.xlu2 %v2039_v9  ;;  %v6109_v9 = vpop.xlane.xlu0 %1971 }
 0x504   :  { %2053 = vadd.xlane.f32.xlu1 %v2051_v47  ;;  %9086 = vst [vmem:[#allocation79_spill] sm:$0xff] %v6109_v9  ;;  %v2085_v47 = vand.u32 65535, %v1055_v37  ;;  %v2100_v9 = vcvt.s32.f32 %v2098_v45  ;;  %v9098_v45 = vld [vmem:[#allocation85_spill] sm:$0xff] }
 0x506   :  { %v6113_v16 = vpop.xlane.xlu2 %1789 }
 0x507   :  { %v6103_v38 = vpop.xlane.xlu1 %1801  ;;  %9088 = vst [vmem:[#allocation147_spill] sm:$0xff] %v6113_v16 }
 0x508   :  { %9083 = vst [vmem:[#allocation146_spill] sm:$0xff] %v6103_v38  ;;  %v2087_v38 = vcvt.s32.f32 %v2085_v47 }
 0x50b   :  { %2055 = vadd.xlane.f32.xlu2 %v2052_v21  ;;  %v6116_v11 = vpop.xlane.xlu0 %1993 }
 0x50c   :  { %2067 = vadd.xlane.f32.xlu1 %v2064_v27  ;;  %9090 = vst [vmem:[#allocation80_spill] sm:$0xff] %v6116_v11  ;;  %v9092_v27 = vld [vmem:[#allocation81_spill] sm:$0xff] }
 0x50d   :  { %vm930_vm13 = vcmp.lt.s32.totalorder %v5488_v61, %v9092_v27 }
 0x50e   :  { %v6123_v12 = vpop.xlane.xlu2 %1803 }
 0x50f   :  { %v6111_v1 = vpop.xlane.xlu1 %1815  ;;  %9093 = vst [vmem:[#allocation81_spill] sm:$0xff] %v6123_v12 }
 0x510   :  { %9087 = vst [vmem:[#allocation78_spill] sm:$0xff] %v6111_v1  ;;  %v1058_v1 = vsel %vm930_vm13, 1, %v8943_v20 }
 0x511   :  { %v2121_v37 = vand.u32 65535, %v1058_v1  ;;  %v2122_v27 = vshrl.u32 %v1058_v1, 16 }
 0x513   :  { %2077 = vadd.xlane.f32.xlu2 %v2075_v3  ;;  %v9094_v3 = vld [vmem:[#allocation83_spill] sm:$0xff]  ;;  %v6128_v47 = vpop.xlane.xlu0 %2007  ;;  %v2123_v11 = vcvt.s32.f32 %v2121_v37 }
 0x514   :  { %2089 = vadd.xlane.f32.xlu1 %v2087_v38  ;;  %v2109_v38 = vand.u32 65535, %v9094_v3  ;;  %9096 = vst [vmem:[#allocation149_spill] sm:$0xff] %v6128_v47 }
 0x516   :  { %v2111_v34 = vcvt.s32.f32 %v2109_v38  ;;  %v6130_v8 = vpop.xlane.xlu2 %1825  ;;  %v9102_v38 = vld [vmem:[#allocation87_spill] sm:$0xff] }
 0x517   :  { %v6118_v21 = vpop.xlane.xlu1 %1837  ;;  %9097 = vst [vmem:[#allocation150_spill] sm:$0xff] %v6130_v8 }
 0x518   :  { %9091 = vst [vmem:[#allocation148_spill] sm:$0xff] %v6118_v21  ;;  %v2134_v21 = vshrl.u32 %v9098_v45, 16 }
 0x51a   :  { %v2136_v3 = vcvt.s32.f32 %v2134_v21  ;;  %v9104_v21 = vld [vmem:[#allocation89_spill] sm:$0xff] }
 0x51b   :  { %2091 = vadd.xlane.f32.xlu2 %v2088_v59  ;;  %v9100_v59 = vld [vmem:[#allocation21_spill] sm:$0xff] }
 0x51c   :  { %2103 = vadd.xlane.f32.xlu1 %v2100_v9  ;;  %vm933_vm14 = vcmp.lt.s32.totalorder %v5488_v61, %v9100_v59  ;;  %v2124_v9 = vcvt.s32.f32 %v2122_v27 }
 0x51d   :  { %v1061_v12 = vsel %vm933_vm14, 1, %v8943_v20 }
 0x51e   :  { %v2157_v1 = vand.u32 65535, %v1061_v12  ;;  %v6141_v37 = vpop.xlane.xlu2 %1839  ;;  %v2158_v59 = vshrl.u32 %v1061_v12, 16 }
 0x51f   :  { %v6126_v32 = vpop.xlane.xlu1 %1851 }
 0x520   :  { %9095 = vst [vmem:[#allocation83_spill] sm:$0xff] %v6126_v32  ;;  %v6138_v32 = vpop.xlane.xlu0 %2029  ;;  %v2159_v47 = vcvt.s32.f32 %v2157_v1 }
 0x521   :  { %9101 = vst [vmem:[#allocation21_spill] sm:$0xff] %v6138_v32  ;;  %v1064_v32 = vsel %vm936_vm15, 1, %v8943_v20 }
 0x522   :  { %v2193_v12 = vand.u32 65535, %v1064_v32  ;;  %v2194_v58 = vshrl.u32 %v1064_v32, 16 }
 0x523   :  { %2113 = vadd.xlane.f32.xlu2 %v2111_v34 }
 0x524   :  { %2125 = vadd.xlane.f32.xlu1 %v2123_v11  ;;  %v2145_v11 = vand.u32 65535, %v9102_v38 }
 0x526   :  { %v2147_v45 = vcvt.s32.f32 %v2145_v11 }
 0x527   :  { %v6133_v16 = vpop.xlane.xlu1 %1873 }
 0x528   :  { %9099 = vst [vmem:[#allocation85_spill] sm:$0xff] %v6133_v16  ;;  %v6145_v27 = vpop.xlane.xlu0 %2043  ;;  %v2170_v16 = vshrl.u32 %v9104_v21, 16  ;;  %v2195_v21 = vcvt.s32.f32 %v2193_v12 }
 0x529   :  { %9103 = vst [vmem:[#allocation87_spill] sm:$0xff] %v6145_v27 }
 0x52a   :  { %v2172_v38 = vcvt.s32.f32 %v2170_v16  ;;  %v2206_v16 = vshrl.u32 %v5570_v2, 16 }
 0x52b   :  { %2127 = vadd.xlane.f32.xlu2 %v2124_v9  ;;  %v6152_v9 = vpop.xlane.xlu2 %1861 }
 0x52c   :  { %2139 = vadd.xlane.f32.xlu1 %v2136_v3  ;;  %v2160_v3 = vcvt.s32.f32 %v2158_v59 }
 0x52f   :  { %v6143_v34 = vpop.xlane.xlu1 %1887 }
 0x530   :  { %v6156_v11 = vpop.xlane.xlu0 %2065 }
 0x531   :  { %9106 = vst [vmem:[#allocation151_spill] sm:$0xff] %v6156_v11  ;;  %v2208_v11 = vcvt.s32.f32 %v2206_v16 }
 0x533   :  { %2149 = vadd.xlane.f32.xlu2 %v2147_v45  ;;  %v6160_v27 = vpop.xlane.xlu2 %1875 }
 0x534   :  { %2161 = vadd.xlane.f32.xlu1 %v2159_v47  ;;  %v2181_v47 = vand.u32 65535, %v5558_v18  ;;  %9107 = vst [vmem:[#allocation152_spill] sm:$0xff] %v6160_v27 }
 0x536   :  { %v2183_v45 = vcvt.s32.f32 %v2181_v47  ;;  %v9111_v47 = vld [vmem:[#allocation95_spill] sm:$0xff] }
 0x537   :  { %v6148_v8 = vpop.xlane.xlu1 %1909  ;;  %v2217_v12 = vand.u32 65535, %v9111_v47 }
 0x538   :  { %9105 = vst [vmem:[#allocation89_spill] sm:$0xff] %v6148_v8  ;;  %v6167_v18 = vpop.xlane.xlu0 %2079 }
 0x539   :  { %v2219_v2 = vcvt.s32.f32 %v2217_v12  ;;  %v9116_v12 = vld [vmem:[#allocation98_spill] sm:$0xff] }
 0x53b   :  { %2163 = vadd.xlane.f32.xlu2 %v2160_v3  ;;  %v9109_v3 = vld [vmem:[#allocation94_spill] sm:$0xff] }
 0x53c   :  { %2175 = vadd.xlane.f32.xlu1 %v2172_v38  ;;  %vm939_vm0 = vcmp.lt.s32.totalorder %v5488_v61, %v9109_v3  ;;  %9110 = vst [vmem:[#allocation94_spill] sm:$0xff] %v6167_v18  ;;  %v2196_v38 = vcvt.s32.f32 %v2194_v58  ;;  %v2242_v58 = vshrl.u32 %v5597_v22, 16 }
 0x53d   :  { %v1067_v8 = vsel %vm939_vm0, 1, %v8943_v20 }
 0x53e   :  { %v2229_v32 = vand.u32 65535, %v1067_v8  ;;  %v2230_v61 = vshrl.u32 %v1067_v8, 16  ;;  %v2244_v47 = vcvt.s32.f32 %v2242_v58 }
 0x53f   :  { %v6158_v1 = vpop.xlane.xlu1 %1923 }
 0x540   :  { %v6175_v27 = vpop.xlane.xlu0 %2101 }
 0x541   :  { %9112 = vst [vmem:[#allocation95_spill] sm:$0xff] %v6175_v27 }
 0x543   :  { %2185 = vadd.xlane.f32.xlu2 %v2183_v45  ;;  %v6171_v45 = vpop.xlane.xlu2 %1897 }
 0x544   :  { %2197 = vadd.xlane.f32.xlu1 %v2195_v21 }
 0x547   :  { %v6163_v59 = vpop.xlane.xlu1 %1945 }
 0x548   :  { %9108 = vst [vmem:[#allocation153_spill] sm:$0xff] %v6163_v59  ;;  %v2231_v59 = vcvt.s32.f32 %v2229_v32  ;;  %v2253_v32 = vand.u32 65535, %v9116_v12 }
 0x54a   :  { %v2255_v27 = vcvt.s32.f32 %v2253_v32 }
 0x54b   :  { %2199 = vadd.xlane.f32.xlu2 %v2196_v38  ;;  %v6178_v16 = vpop.xlane.xlu2 %1911  ;;  %v2232_v38 = vcvt.s32.f32 %v2230_v61  ;;  %v2278_v61 = vshrl.u32 %v5621_v15, 16 }
 0x54c   :  { %2211 = vadd.xlane.f32.xlu1 %v2208_v11  ;;  %9113 = vst [vmem:[#allocation154_spill] sm:$0xff] %v6178_v16  ;;  %v9115_v11 = vld [vmem:[#allocation90_spill] sm:$0xff] }
 0x54d   :  { %vm942_vm1 = vcmp.lt.s32.totalorder %v5601_v30, %v9115_v11 }
 0x54e   :  { %v1070_v18 = vsel %vm942_vm1, 1, %v8943_v20 }
 0x54f   :  { %v6173_v21 = vpop.xlane.xlu1 %1959  ;;  %v2265_v8 = vand.u32 65535, %v1070_v18  ;;  %v2266_v11 = vshrl.u32 %v1070_v18, 16 }
 0x551   :  { %v2268_v12 = vcvt.s32.f32 %v2266_v11 }
 0x553   :  { %2221 = vadd.xlane.f32.xlu2 %v2219_v2  ;;  %v6186_v2 = vpop.xlane.xlu0 %2115  ;;  %v6190_v22 = vpop.xlane.xlu2 %1933 }
 0x554   :  { %2233 = vadd.xlane.f32.xlu1 %v2231_v59  ;;  %9117 = vst [vmem:[#allocation90_spill] sm:$0xff] %v6186_v2  ;;  %v2280_v2 = vcvt.s32.f32 %v2278_v61  ;;  %v2314_v61 = vshrl.u32 %v5646_v29, 16 }
 0x557   :  { %v6180_v3 = vpop.xlane.xlu1 %1981 }
 0x558   :  { %9114 = vst [vmem:[#allocation155_spill] sm:$0xff] %v6180_v3  ;;  %v2267_v3 = vcvt.s32.f32 %v2265_v8 }
 0x55b   :  { %2235 = vadd.xlane.f32.xlu2 %v2232_v38  ;;  %v6193_v58 = vpop.xlane.xlu0 %2137 }
 0x55c   :  { %2247 = vadd.xlane.f32.xlu1 %v2244_v47  ;;  %9119 = vst [vmem:[#allocation156_spill] sm:$0xff] %v6193_v58  ;;  %v9121_v47 = vld [vmem:[#allocation92_spill] sm:$0xff] }
 0x55d   :  { %vm945_vm2 = vcmp.lt.s32.totalorder %v5601_v30, %v9121_v47 }
 0x55e   :  { %v1073_v16 = vsel %vm945_vm2, 1, %v8943_v20 }
 0x55f   :  { %v6188_v59 = vpop.xlane.xlu1 %1995  ;;  %v2301_v18 = vand.u32 65535, %v1073_v16  ;;  %v2302_v47 = vshrl.u32 %v1073_v16, 16 }
 0x560   :  { %9118 = vst [vmem:[#allocation98_spill] sm:$0xff] %v6188_v59  ;;  %v6200_v59 = vpop.xlane.xlu2 %1947 }
 0x561   :  { %9122 = vst [vmem:[#allocation92_spill] sm:$0xff] %v6200_v59  ;;  %v2303_v8 = vcvt.s32.f32 %v2301_v18 }
 0x563   :  { %2257 = vadd.xlane.f32.xlu2 %v2255_v27  ;;  %v2289_v27 = vand.u32 65535, %v5634_v17  ;;  %v6205_v15 = vpop.xlane.xlu0 %2151  ;;  %v2304_v17 = vcvt.s32.f32 %v2302_v47 }
 0x564   :  { %2269 = vadd.xlane.f32.xlu1 %v2267_v3  ;;  %9123 = vst [vmem:[#allocation158_spill] sm:$0xff] %v6205_v15 }
 0x565   :  { %v2291_v32 = vcvt.s32.f32 %v2289_v27  ;;  %v2325_v27 = vand.u32 65535, %v5662_v19 }
 0x567   :  { %v6195_v38 = vpop.xlane.xlu1 %2017  ;;  %v2327_v29 = vcvt.s32.f32 %v2325_v27  ;;  %v2361_v27 = vand.u32 65535, %v5686_v6 }
 0x568   :  { %9120 = vst [vmem:[#allocation157_spill] sm:$0xff] %v6195_v38  ;;  %v6207_v11 = vpop.xlane.xlu2 %1969 }
 0x56b   :  { %2271 = vadd.xlane.f32.xlu2 %v2268_v12  ;;  %v9124_v12 = vld [vmem:[#allocation27_spill] sm:$0xff]  ;;  %v6215_v59 = vpop.xlane.xlu0 %2173 }
 0x56c   :  { %2283 = vadd.xlane.f32.xlu1 %v2280_v2  ;;  %vm948_vm3 = vcmp.lt.s32.totalorder %v5601_v30, %v9124_v12  ;;  %v2316_v2 = vcvt.s32.f32 %v2314_v61  ;;  %9125 = vst [vmem:[#allocation27_spill] sm:$0xff] %v6215_v59  ;;  %v2350_v61 = vshrl.u32 %v5672_v62, 16  ;;  %v1079_v59 = vsel %vm951_vm5, 1, %v8943_v20 }
 0x56d   :  { %v1076_v38 = vsel %vm948_vm3, 1, %v8943_v20  ;;  %v2363_v62 = vcvt.s32.f32 %v2361_v27  ;;  %v2374_v39 = vshrl.u32 %v1079_v59, 16  ;;  %v2397_v27 = vand.u32 65535, %v5715_v50 }
 0x56e   :  { %v2337_v16 = vand.u32 65535, %v1076_v38  ;;  %v2338_v12 = vshrl.u32 %v1076_v38, 16  ;;  %v2373_v38 = vand.u32 65535, %v1079_v59 }
 0x56f   :  { %v6203_v3 = vpop.xlane.xlu1 %2031 }
 0x570   :  { %v6218_v18 = vpop.xlane.xlu2 %1983 }
 0x573   :  { %2293 = vadd.xlane.f32.xlu2 %v2291_v32  ;;  %v6222_v47 = vpop.xlane.xlu0 %2187 }
 0x574   :  { %2305 = vadd.xlane.f32.xlu1 %v2303_v8  ;;  %v2339_v8 = vcvt.s32.f32 %v2337_v16  ;;  %9126 = vst [vmem:[#allocation159_spill] sm:$0xff] %v6222_v47 }
 0x577   :  { %v6210_v58 = vpop.xlane.xlu1 %2053 }
 0x578   :  { %v6229_v19 = vpop.xlane.xlu2 %2005 }
 0x57b   :  { %2307 = vadd.xlane.f32.xlu2 %v2304_v17  ;;  %v2340_v17 = vcvt.s32.f32 %v2338_v12  ;;  %v6233_v16 = vpop.xlane.xlu0 %2209  ;;  %v2386_v12 = vshrl.u32 %v5699_v36, 16  ;;  %v2399_v36 = vcvt.s32.f32 %v2397_v27  ;;  %v9134_v27 = vld [vmem:[#allocation110_spill] sm:$0xff] }
 0x57c   :  { %2319 = vadd.xlane.f32.xlu1 %v2316_v2  ;;  %v2352_v2 = vcvt.s32.f32 %v2350_v61  ;;  %9128 = vst [vmem:[#allocation161_spill] sm:$0xff] %v6233_v16  ;;  %v1082_v16 = vsel %vm954_vm6, 1, %v8943_v20 }
 0x57d   :  { %v2409_v59 = vand.u32 65535, %v1082_v16  ;;  %v2410_v30 = vshrl.u32 %v1082_v16, 16 }
 0x57f   :  { %v6220_v32 = vpop.xlane.xlu1 %2067  ;;  %v2412_v50 = vcvt.s32.f32 %v2410_v30  ;;  %v2458_v30 = vshrl.u32 %v5756_v48, 16 }
 0x580   :  { %v6237_v47 = vpop.xlane.xlu2 %2019 }
 0x583   :  { %2329 = vadd.xlane.f32.xlu2 %v2327_v29  ;;  %v6244_v6 = vpop.xlane.xlu0 %2223 }
 0x584   :  { %2341 = vadd.xlane.f32.xlu1 %v2339_v8  ;;  %v2375_v8 = vcvt.s32.f32 %v2373_v38  ;;  %9130 = vst [vmem:[#allocation163_spill] sm:$0xff] %v6244_v6 }
 0x587   :  { %v6225_v15 = vpop.xlane.xlu1 %2089 }
 0x588   :  { %9127 = vst [vmem:[#allocation160_spill] sm:$0xff] %v6225_v15  ;;  %v6248_v38 = vpop.xlane.xlu2 %2041 }
 0x58b   :  { %2343 = vadd.xlane.f32.xlu2 %v2340_v17  ;;  %v2376_v17 = vcvt.s32.f32 %v2374_v39 }
 0x58c   :  { %2355 = vadd.xlane.f32.xlu1 %v2352_v2  ;;  %v2388_v2 = vcvt.s32.f32 %v2386_v12 }
 0x58f   :  { %v6235_v29 = vpop.xlane.xlu1 %2103 }
 0x590   :  { %v6255_v39 = vpop.xlane.xlu2 %2055 }
 0x593   :  { %2365 = vadd.xlane.f32.xlu2 %v2363_v62 }
 0x594   :  { %2377 = vadd.xlane.f32.xlu1 %v2375_v8  ;;  %v2411_v8 = vcvt.s32.f32 %v2409_v59  ;;  %v2433_v59 = vand.u32 65535, %v9134_v27 }
 0x597   :  { %v6240_v61 = vpop.xlane.xlu1 %2125 }
 0x598   :  { %9129 = vst [vmem:[#allocation162_spill] sm:$0xff] %v6240_v61  ;;  %v6252_v61 = vpop.xlane.xlu0 %2245  ;;  %v6267_v57 = vpop.xlane.xlu2 %2077 }
 0x599   :  { %9131 = vst [vmem:[#allocation164_spill] sm:$0xff] %v6252_v61  ;;  %v2435_v61 = vcvt.s32.f32 %v2433_v59 }
 0x59b   :  { %2379 = vadd.xlane.f32.xlu2 %v2376_v17  ;;  %v9133_v17 = vld [vmem:[#allocation101_spill] sm:$0xff] }
 0x59c   :  { %2391 = vadd.xlane.f32.xlu1 %v2388_v2  ;;  %vm957_vm7 = vcmp.lt.s32.totalorder %v5748_v52, %v9133_v17  ;;  %v2424_v2 = vcvt.s32.f32 %v2422_v55 }
 0x59d   :  { %v1085_v6 = vsel %vm957_vm7, 1, %v8943_v20 }
 0x59e   :  { %v2445_v16 = vand.u32 65535, %v1085_v6  ;;  %v2446_v17 = vshrl.u32 %v1085_v6, 16 }
 0x59f   :  { %v6250_v62 = vpop.xlane.xlu1 %2139 }
 0x5a0   :  { %v2448_v27 = vcvt.s32.f32 %v2446_v17 }
 0x5a3   :  { %2401 = vadd.xlane.f32.xlu2 %v2399_v36  ;;  %v6263_v36 = vpop.xlane.xlu0 %2259 }
 0x5a4   :  { %2413 = vadd.xlane.f32.xlu1 %v2411_v8  ;;  %9135 = vst [vmem:[#allocation101_spill] sm:$0xff] %v6263_v36  ;;  %v2460_v36 = vcvt.s32.f32 %v2458_v30  ;;  %v2494_v30 = vshrl.u32 %v5785_v53, 16 }
 0x5a7   :  { %v6257_v12 = vpop.xlane.xlu1 %2161 }
 0x5a8   :  { %9132 = vst [vmem:[#allocation165_spill] sm:$0xff] %v6257_v12  ;;  %v2447_v12 = vcvt.s32.f32 %v2445_v16 }
 0x5ab   :  { %2415 = vadd.xlane.f32.xlu2 %v2412_v50  ;;  %v6270_v55 = vpop.xlane.xlu0 %2281 }
 0x5ac   :  { %2427 = vadd.xlane.f32.xlu1 %v2424_v2  ;;  %9137 = vst [vmem:[#allocation166_spill] sm:$0xff] %v6270_v55  ;;  %v9139_v2 = vld [vmem:[#allocation103_spill] sm:$0xff] }
 0x5ad   :  { %vm960_vm8 = vcmp.lt.s32.totalorder %v5748_v52, %v9139_v2 }
 0x5ae   :  { %v1088_v15 = vsel %vm960_vm8, 1, %v8943_v20 }
 0x5af   :  { %v6265_v8 = vpop.xlane.xlu1 %2175  ;;  %v2481_v6 = vand.u32 65535, %v1088_v15  ;;  %v2482_v2 = vshrl.u32 %v1088_v15, 16 }
 0x5b0   :  { %9136 = vst [vmem:[#allocation110_spill] sm:$0xff] %v6265_v8  ;;  %v6277_v8 = vpop.xlane.xlu2 %2091 }
 0x5b1   :  { %v2483_v16 = vcvt.s32.f32 %v2481_v6 }
 0x5b3   :  { %2437 = vadd.xlane.f32.xlu2 %v2435_v61  ;;  %v2469_v61 = vand.u32 65535, %v5772_v10  ;;  %v6282_v48 = vpop.xlane.xlu0 %2295  ;;  %v2484_v10 = vcvt.s32.f32 %v2482_v2 }
 0x5b4   :  { %2449 = vadd.xlane.f32.xlu1 %v2447_v12  ;;  %9141 = vst [vmem:[#allocation168_spill] sm:$0xff] %v6282_v48 }
 0x5b5   :  { %v2471_v59 = vcvt.s32.f32 %v2469_v61  ;;  %v2505_v61 = vand.u32 65535, %v5801_v4 }
 0x5b7   :  { %v6272_v50 = vpop.xlane.xlu1 %2197  ;;  %v2507_v53 = vcvt.s32.f32 %v2505_v61  ;;  %v2541_v61 = vand.u32 65535, %v5828_v25 }
 0x5b8   :  { %9138 = vst [vmem:[#allocation167_spill] sm:$0xff] %v6272_v50  ;;  %v6284_v17 = vpop.xlane.xlu2 %2113 }
 0x5bb   :  { %2451 = vadd.xlane.f32.xlu2 %v2448_v27  ;;  %v9143_v27 = vld [vmem:[#allocation55_spill] sm:$0xff] }
 0x5bc   :  { %2463 = vadd.xlane.f32.xlu1 %v2460_v36  ;;  %vm963_vm9 = vcmp.lt.s32.totalorder %v5748_v52, %v9143_v27  ;;  %v2496_v36 = vcvt.s32.f32 %v2494_v30  ;;  %v2530_v30 = vshrl.u32 %v5814_v5, 16  ;;  %v2543_v5 = vcvt.s32.f32 %v2541_v61 }
 0x5bd   :  { %v1091_v55 = vsel %vm963_vm9, 1, %v8943_v20  ;;  %v2637_v61 = vsel %vm4834_vm4, 1, %v8943_v20 }
 0x5be   :  { %v2517_v15 = vand.u32 65535, %v1091_v55  ;;  %v2518_v27 = vshrl.u32 %v1091_v55, 16  ;;  %v2532_v48 = vcvt.s32.f32 %v2530_v30 }
 0x5bf   :  { %v6280_v12 = vpop.xlane.xlu1 %2211 }
 0x5c0   :  { %9140 = vst [vmem:[#allocation103_spill] sm:$0xff] %v6280_v12  ;;  %v6292_v12 = vpop.xlane.xlu0 %2317  ;;  %v6295_v6 = vpop.xlane.xlu2 %2127 }
 0x5c1   :  { %9144 = vst [vmem:[#allocation55_spill] sm:$0xff] %v6292_v12 }
 0x5c3   :  { %2473 = vadd.xlane.f32.xlu2 %v2471_v59 }
 0x5c4   :  { %2485 = vadd.xlane.f32.xlu1 %v2483_v16  ;;  %v2519_v16 = vcvt.s32.f32 %v2517_v15 }
 0x5c7   :  { %v6287_v50 = vpop.xlane.xlu1 %2233 }
 0x5c8   :  { %9142 = vst [vmem:[#allocation169_spill] sm:$0xff] %v6287_v50  ;;  %v6299_v2 = vpop.xlane.xlu0 %2331  ;;  %v6306_v4 = vpop.xlane.xlu2 %2149 }
 0x5c9   :  { %9146 = vst [vmem:[#allocation171_spill] sm:$0xff] %v6299_v2 }
 0x5cb   :  { %2487 = vadd.xlane.f32.xlu2 %v2484_v10  ;;  %v9148_v10 = vld [vmem:[#allocation107_spill] sm:$0xff] }
 0x5cc   :  { %2499 = vadd.xlane.f32.xlu1 %v2496_v36  ;;  %vm966_vm10 = vcmp.lt.s32.totalorder %v5748_v52, %v9148_v10  ;;  %v2520_v36 = vcvt.s32.f32 %v2518_v27  ;;  %v2566_v27 = vshrl.u32 %v5841_v56, 16  ;;  %v2577_v56 = vand.u32 65535, %v5857_v40  ;;  %v9161_v40 = vld [vmem:[#allocation111_spill] sm:$0xff] }
 0x5cd   :  { %v1094_v12 = vsel %vm966_vm10, 1, %v8943_v20  ;;  %vm972_vm12 = vcmp.lt.s32.totalorder %v5748_v52, %v9161_v40 }
 0x5ce   :  { %v2553_v55 = vand.u32 65535, %v1094_v12  ;;  %v2554_v10 = vshrl.u32 %v1094_v12, 16 }
 0x5cf   :  { %v6297_v59 = vpop.xlane.xlu1 %2247 }
 0x5d0   :  { %9145 = vst [vmem:[#allocation170_spill] sm:$0xff] %v6297_v59  ;;  %v6310_v15 = vpop.xlane.xlu0 %2353  ;;  %v6314_v2 = vpop.xlane.xlu2 %2163 }
 0x5d1   :  { %9149 = vst [vmem:[#allocation107_spill] sm:$0xff] %v6310_v15 }
 0x5d2   :  { %9151 = vst [vmem:[#allocation174_spill] sm:$0xff] %v6314_v2 }
 0x5d3   :  { %2509 = vadd.xlane.f32.xlu2 %v2507_v53 }
 0x5d4   :  { %2521 = vadd.xlane.f32.xlu1 %v2519_v16  ;;  %v2555_v16 = vcvt.s32.f32 %v2553_v55 }
 0x5d7   :  { %v6302_v50 = vpop.xlane.xlu1 %2269 }
 0x5d8   :  { %9147 = vst [vmem:[#allocation172_spill] sm:$0xff] %v6302_v50  ;;  %v6321_v25 = vpop.xlane.xlu0 %2367  ;;  %v2568_v50 = vcvt.s32.f32 %v2566_v27  ;;  %v6328_v12 = vpop.xlane.xlu2 %2185 }
 0x5d9   :  { %9156 = vst [vmem:[#allocation176_spill] sm:$0xff] %v6328_v12 }
 0x5db   :  { %2523 = vadd.xlane.f32.xlu2 %v2520_v36  ;;  %v9153_v36 = vld [vmem:[#allocation109_spill] sm:$0xff] }
 0x5dc   :  { %2535 = vadd.xlane.f32.xlu1 %v2532_v48  ;;  %vm969_vm11 = vcmp.lt.s32.totalorder %v5748_v52, %v9153_v36  ;;  %9154 = vst [vmem:[#allocation109_spill] sm:$0xff] %v6321_v25  ;;  %v2556_v48 = vcvt.s32.f32 %v2554_v10  ;;  %v2579_v10 = vcvt.s32.f32 %v2577_v56  ;;  %v2639_v52 = vshrl.u32 %v2637_v61, 16 }
 0x5dd   :  { %v1097_v55 = vsel %vm969_vm11, 1, %v8943_v20 }
 0x5de   :  { %v2590_v15 = vshrl.u32 %v1097_v55, 16 }
 0x5df   :  { %v6312_v53 = vpop.xlane.xlu1 %2283 }
 0x5e0   :  { %9150 = vst [vmem:[#allocation173_spill] sm:$0xff] %v6312_v53  ;;  %v6332_v25 = vpop.xlane.xlu0 %2389  ;;  %v6335_v53 = vpop.xlane.xlu2 %2199 }
 0x5e1   :  { %9158 = vst [vmem:[#allocation178_spill] sm:$0xff] %v6332_v25 }
 0x5e2   :  { %9159 = vst [vmem:[#allocation179_spill] sm:$0xff] %v6335_v53 }
 0x5e3   :  { %2545 = vadd.xlane.f32.xlu2 %v2543_v5  ;;  %v2638_v5 = vand.u32 65535, %v2637_v61 }
 0x5e4   :  { %2557 = vadd.xlane.f32.xlu1 %v2555_v16 }
 0x5e5   :  { %v2640_v16 = vcvt.s32.f32 %v2638_v5  ;;  %v2592_v5 = vcvt.s32.f32 %v2590_v15 }
 0x5e7   :  { %v6317_v30 = vpop.xlane.xlu1 %2305  ;;  %2642 = vadd.xlane.f32.xlu0 %v2640_v16  ;;  %v1100_v16 = vsel %vm972_vm12, 1, %v8943_v20 }
 0x5e8   :  { %9152 = vst [vmem:[#allocation175_spill] sm:$0xff] %v6317_v30  ;;  %v2589_v30 = vand.u32 65535, %v1097_v55  ;;  %v6343_v56 = vpop.xlane.xlu0 %2403  ;;  %v2625_v55 = vand.u32 65535, %v1100_v16  ;;  %v2626_v15 = vshrl.u32 %v1100_v16, 16 }
 0x5e9   :  { %9162 = vst [vmem:[#allocation111_spill] sm:$0xff] %v6343_v56 }
 0x5ea   :  { %v2591_v27 = vcvt.s32.f32 %v2589_v30  ;;  %v2613_v30 = vand.u32 65535, %v5886_v14 }
 0x5eb   :  { %2559 = vadd.xlane.f32.xlu2 %v2556_v48  ;;  %v2602_v48 = vshrl.u32 %v5870_v7, 16  ;;  %v6347_v7 = vpop.xlane.xlu2 %2221 }
 0x5ec   :  { %2571 = vadd.xlane.f32.xlu1 %v2568_v50  ;;  %9164 = vst [vmem:[#allocation182_spill] sm:$0xff] %v6347_v7 }
 0x5ed   :  { %v2604_v12 = vcvt.s32.f32 %v2602_v48 }
 0x5ef   :  { %v6330_v36 = vpop.xlane.xlu1 %2319 }
 0x5f0   :  { %9157 = vst [vmem:[#allocation177_spill] sm:$0xff] %v6330_v36  ;;  %v6349_v48 = vpop.xlane.xlu0 %2425 }
 0x5f1   :  { %9165 = vst [vmem:[#allocation183_spill] sm:$0xff] %v6349_v48 }
 0x5f3   :  { %2581 = vadd.xlane.f32.xlu2 %v2579_v10  ;;  %v6353_v14 = vpop.xlane.xlu2 %2235 }
 0x5f4   :  { %2593 = vadd.xlane.f32.xlu1 %v2591_v27  ;;  %v2615_v27 = vcvt.s32.f32 %v2613_v30  ;;  %9167 = vst [vmem:[#allocation185_spill] sm:$0xff] %v6353_v14 }
 0x5f7   :  { %v6337_v50 = vpop.xlane.xlu1 %2341 }
 0x5f8   :  { %9160 = vst [vmem:[#allocation180_spill] sm:$0xff] %v6337_v50  ;;  %v2627_v50 = vcvt.s32.f32 %v2625_v55  ;;  %v6357_v25 = vpop.xlane.xlu0 %2439 }
 0x5f9   :  { %9169 = vst [vmem:[#allocation187_spill] sm:$0xff] %v6357_v25 }
 0x5fb   :  { %2595 = vadd.xlane.f32.xlu2 %v2592_v5  ;;  %v2628_v5 = vcvt.s32.f32 %v2626_v15  ;;  %v6359_v30 = vpop.xlane.xlu2 %2257 }
 0x5fc   :  { %2607 = vadd.xlane.f32.xlu1 %v2604_v12  ;;  %v2641_v12 = vcvt.s32.f32 %v2639_v52  ;;  %9170 = vst [vmem:[#allocation188_spill] sm:$0xff] %v6359_v30 }
 0x5ff   :  { %v6345_v10 = vpop.xlane.xlu1 %2355 }
 0x600   :  { %9163 = vst [vmem:[#allocation181_spill] sm:$0xff] %v6345_v10  ;;  %v6363_v61 = vpop.xlane.xlu0 %2461 }
 0x601   :  { %9172 = vst [vmem:[#allocation190_spill] sm:$0xff] %v6363_v61 }
 0x603   :  { %2617 = vadd.xlane.f32.xlu2 %v2615_v27 }
 0x604   :  { %2629 = vadd.xlane.f32.xlu1 %v2627_v50  ;;  %v6365_v50 = vpop.xlane.xlu2 %2271 }
 0x605   :  { %9173 = vst [vmem:[#allocation191_spill] sm:$0xff] %v6365_v50 }
 0x607   :  { %v6351_v40 = vpop.xlane.xlu1 %2377 }
 0x608   :  { %9166 = vst [vmem:[#allocation184_spill] sm:$0xff] %v6351_v40  ;;  %v6369_v27 = vpop.xlane.xlu0 %2475 }
 0x609   :  { %9175 = vst [vmem:[#allocation193_spill] sm:$0xff] %v6369_v27 }
 0x60b   :  { %2631 = vadd.xlane.f32.xlu2 %v2628_v5 }
 0x60c   :  { %2644 = vadd.xlane.f32.xlu1 %v2641_v12  ;;  %v6373_v15 = vpop.xlane.xlu2 %2293 }
 0x60d   :  { %9177 = vst [vmem:[#allocation195_spill] sm:$0xff] %v6373_v15 }
 0x60f   :  { %v6355_v56 = vpop.xlane.xlu1 %2391 }
 0x610   :  { %9168 = vst [vmem:[#allocation186_spill] sm:$0xff] %v6355_v56  ;;  %v6375_v12 = vpop.xlane.xlu0 %2497 }
 0x611   :  { %9178 = vst [vmem:[#allocation196_spill] sm:$0xff] %v6375_v12 }
 0x614   :  { %v6379_v25 = vpop.xlane.xlu2 %2307 }
 0x615   :  { %9180 = vst [vmem:[#allocation198_spill] sm:$0xff] %v6379_v25 }
 0x617   :  { %v6361_v55 = vpop.xlane.xlu1 %2413 }
 0x618   :  { %9171 = vst [vmem:[#allocation189_spill] sm:$0xff] %v6361_v55  ;;  %v6383_v55 = vpop.xlane.xlu0 %2511 }
 0x619   :  { %9182 = vst [vmem:[#allocation200_spill] sm:$0xff] %v6383_v55 }
 0x61c   :  { %v6385_v61 = vpop.xlane.xlu2 %2329 }
 0x61d   :  { %9183 = vst [vmem:[#allocation201_spill] sm:$0xff] %v6385_v61 }
 0x61f   :  { %v6367_v16 = vpop.xlane.xlu1 %2427 }
 0x620   :  { %9174 = vst [vmem:[#allocation192_spill] sm:$0xff] %v6367_v16  ;;  %v6389_v16 = vpop.xlane.xlu0 %2533 }
 0x621   :  { %9185 = vst [vmem:[#allocation203_spill] sm:$0xff] %v6389_v16 }
 0x624   :  { %v6391_v27 = vpop.xlane.xlu2 %2343 }
 0x625   :  { %9186 = vst [vmem:[#allocation204_spill] sm:$0xff] %v6391_v27 }
 0x627   :  { %v6371_v52 = vpop.xlane.xlu1 %2449 }
 0x628   :  { %9176 = vst [vmem:[#allocation194_spill] sm:$0xff] %v6371_v52  ;;  %v6395_v56 = vpop.xlane.xlu0 %2547 }
 0x629   :  { %9188 = vst [vmem:[#allocation206_spill] sm:$0xff] %v6395_v56 }
 0x62f   :  { %v6377_v5 = vpop.xlane.xlu1 %2463 }
 0x630   :  { %9179 = vst [vmem:[#allocation197_spill] sm:$0xff] %v6377_v5  ;;  %v6399_v5 = vpop.xlane.xlu2 %2365  ;;  %v6401_v25 = vpop.xlane.xlu0 %2569 }
 0x631   :  { %9190 = vst [vmem:[#allocation208_spill] sm:$0xff] %v6399_v5 }
 0x632   :  { %9191 = vst [vmem:[#allocation209_spill] sm:$0xff] %v6401_v25 }
 0x637   :  { %v6381_v40 = vpop.xlane.xlu1 %2485 }
 0x638   :  { %9181 = vst [vmem:[#allocation199_spill] sm:$0xff] %v6381_v40  ;;  %v6405_v55 = vpop.xlane.xlu2 %2379 }
 0x639   :  { %9193 = vst [vmem:[#allocation211_spill] sm:$0xff] %v6405_v55 }
 0x63f   :  { %v6387_v48 = vpop.xlane.xlu1 %2499 }
 0x640   :  { %9184 = vst [vmem:[#allocation202_spill] sm:$0xff] %v6387_v48  ;;  %v6409_v48 = vpop.xlane.xlu0 %2583  ;;  %v6411_v16 = vpop.xlane.xlu2 %2401 }
 0x641   :  { %9195 = vst [vmem:[#allocation213_spill] sm:$0xff] %v6409_v48 }
 0x642   :  { %9196 = vst [vmem:[#allocation214_spill] sm:$0xff] %v6411_v16 }
 0x647   :  { %v6393_v52 = vpop.xlane.xlu1 %2521 }
 0x648   :  { %9187 = vst [vmem:[#allocation205_spill] sm:$0xff] %v6393_v52  ;;  %v6415_v52 = vpop.xlane.xlu0 %2605  ;;  %v6417_v56 = vpop.xlane.xlu2 %2415 }
 0x649   :  { %9198 = vst [vmem:[#allocation216_spill] sm:$0xff] %v6415_v52  ;;  %v9205_v52 = vld [vmem:[#allocation23_spill] sm:$0xff] }
 0x64a   :  { %9199 = vst [vmem:[#allocation217_spill] sm:$0xff] %v6417_v56  ;;  %v1110_v30 = vcvt.f32.s32 %v9205_v52  ;;  %v9206_v56 = vld [vmem:[#allocation26_spill] sm:$0xff]  ;;  %v9212_v52 = vld [vmem:[#allocation63_spill] sm:$0xff] }
 0x64b   :  { %v1122_v36 = vcvt.f32.s32 %v9206_v56  ;;  %v1206_v56 = vcvt.f32.s32 %v5836_v49  ;;  %v9218_v49 = vld [vmem:[#allocation28_spill] sm:$0xff] }
 0x64d   :  { %v1123_v59 = vshll.u32 %v1122_v36, 16 }
 0x64f   :  { %v6397_v12 = vpop.xlane.xlu1 %2535 }
 0x650   :  { %9189 = vst [vmem:[#allocation207_spill] sm:$0xff] %v6397_v12  ;;  %v6421_v5 = vpop.xlane.xlu0 %2619 }
 0x651   :  { %9201 = vst [vmem:[#allocation219_spill] sm:$0xff] %v6421_v5 }
 0x657   :  { %v6403_v40 = vpop.xlane.xlu1 %2557 }
 0x658   :  { %9192 = vst [vmem:[#allocation210_spill] sm:$0xff] %v6403_v40  ;;  %v6425_v40 = vpop.xlane.xlu2 %2437 }
 0x659   :  { %9203 = vst [vmem:[#allocation221_spill] sm:$0xff] %v6425_v40  ;;  %v1111_v40 = vshll.u32 %v1110_v30, 16  ;;  %v9217_v30 = vld [vmem:[#allocation64_spill] sm:$0xff] }
 0x65a   :  { %v2643_v55 = vpop.xlane.xlu0 %2642 }
 0x65b   :  { %v2646_v48 = vcvt.f32.s32 %v2643_v55  ;;  %v9209_v55 = vld [vmem:[#allocation30_spill] sm:$0xff] }
 0x65f   :  { %v6407_v61 = vpop.xlane.xlu1 %2571 }
 0x660   :  { %9194 = vst [vmem:[#allocation212_spill] sm:$0xff] %v6407_v61  ;;  %v6427_v16 = vpop.xlane.xlu2 %2451 }
 0x661   :  { %9204 = vst [vmem:[#allocation222_spill] sm:$0xff] %v6427_v16  ;;  %v1133_v16 = vcvt.f32.s32 %v9212_v52 }
 0x667   :  { %v6413_v27 = vpop.xlane.xlu1 %2593 }
 0x668   :  { %9197 = vst [vmem:[#allocation215_spill] sm:$0xff] %v6413_v27 }
 0x66f   :  { %v6419_v12 = vpop.xlane.xlu1 %2607 }
 0x670   :  { %9200 = vst [vmem:[#allocation218_spill] sm:$0xff] %v6419_v12  ;;  %v9207_v12 = vld [vmem:[#allocation112_spill] sm:$0xff] }
 0x671   :  { %v1134_v14 = vcvt.f32.s32 %v9207_v12 }
 0x673   :  { %v1135_v2 = vshll.u32 %v1134_v14, 16 }
 0x675   :  { %v6445_v36 = vadd.s32 %v1135_v2, %v1133_v16  ;;  %v9219_v16 = vld [vmem:[#allocation68_spill] sm:$0xff] }
 0x677   :  { %v6423_v25 = vpop.xlane.xlu1 %2629  ;;  %9216 = vst [vmem:[#allocation30_spill] sm:$0xff] %v6445_v36 }
 0x678   :  { %9202 = vst [vmem:[#allocation220_spill] sm:$0xff] %v6423_v25  ;;  %v9208_v25 = vld [vmem:[#allocation38_spill] sm:$0xff] }
 0x679   :  { %v1121_v53 = vcvt.f32.s32 %v9208_v25 }
 0x67b   :  { %v6443_v25 = vadd.s32 %v1123_v59, %v1121_v53  ;;  %v1145_v59 = vcvt.f32.s32 %v9218_v49 }
 0x67d   :  { %9215 = vst [vmem:[#allocation38_spill] sm:$0xff] %v6443_v25 }
 0x67f   :  { %v2645_v61 = vpop.xlane.xlu1 %2644 }
 0x680   :  { %v2647_v15 = vcvt.f32.s32 %v2645_v61  ;;  %v1158_v61 = vcvt.f32.s32 %v9209_v55  ;;  %v1207_v55 = vshll.u32 %v1206_v56, 16 }
 0x682   :  { %v2648_v50 = vshll.u32 %v2647_v15, 16  ;;  %v6434_v15 = vpop.xlane.xlu2 %2473 }
 0x683   :  { %9210 = vst [vmem:[#allocation23_spill] sm:$0xff] %v6434_v15  ;;  %v9226_v15 = vld [vmem:[#allocation67_spill] sm:$0xff] }
 0x684   :  { %v2649_v27 = vadd.s32 %v2648_v50, %v2646_v48  ;;  %v9211_v50 = vld [vmem:[#allocation61_spill] sm:$0xff] }
 0x686   :  { %v2650_v10 = vcvt.s32.f32 %v2649_v27  ;;  %v1109_v27 = vcvt.f32.s32 %v9211_v50 }
 0x688   :  { %v2651_v5 = vmul.f32 0.15, %v2650_v10  ;;  %v6441_v12 = vadd.s32 %v1111_v40, %v1109_v27 }
 0x68a   :  { %v4558_v7 = vcvt.f32.s32 %v2651_v5  ;;  %9214 = vst [vmem:[#allocation112_spill] sm:$0xff] %v6441_v12  ;;  %v1159_v5 = vshll.u32 %v1158_v61, 16  ;;  %v1205_v61 = vcvt.f32.s32 %v9219_v16  ;;  %v1182_v16 = vcvt.f32.s32 %v9226_v15 }
 0x68c   :  { %vm2653_vm13 = vcmp.gt.s32.totalorder %v4558_v7, 1  ;;  %v6465_v56 = vadd.s32 %v1207_v55, %v1205_v61  ;;  %v9229_v61 = vld [vmem:[#allocation66_spill] sm:$0xff] }
 0x68d   :  { %v2654_v48 = vsel %vm2653_vm13, %v4558_v7, 1  ;;  %v1146_v7 = vcvt.f32.s32 %v9217_v30  ;;  %v1242_v30 = vcvt.f32.s32 %v5863_v13 }
 0x68e   :  { %vm2655_vm14 = vcmp.lt.s32.totalorder %v2654_v48, 20  ;;  %9222 = vst [vmem:[#allocation63_spill] sm:$0xff] %v6465_v56 }
 0x68f   :  { %v6439_v10 = vsel %vm2655_vm14, %v2654_v48, 20  ;;  %v9220_v48 = vld [vmem:[#allocation113_spill] sm:$0xff]  ;;  %v1147_v27 = vshll.u32 %v1146_v7, 16  ;;  %v9227_v7 = vld [vmem:[#allocation31_spill] sm:$0xff]  ;;  %v1243_v13 = vshll.u32 %v1242_v30, 16 }
 0x690   :  { %9213 = vst [vmem:[#allocation26_spill] sm:$0xff] %v6439_v10  ;;  %v6448_v14 = vperm.slane %v6439_v10, 0  ;;  %v1157_v50 = vcvt.f32.s32 %v9220_v48  ;;  %v1169_v48 = vcvt.f32.s32 %v9229_v61  ;;  %v9232_v30 = vld [vmem:[#allocation121_spill] sm:$0xff] }
 0x691   :  { %v6468_v49 = vadd.s32 %v1147_v27, %v1145_v59 }
 0x692   :  { %vm2667_vm15 = vcmp.lt.s32.totalorder %v6445_v36, %v6448_v14  ;;  %vm2666_vm0 = vcmp.lt.s32.totalorder %v6443_v25, %v6448_v14  ;;  %vm2665_vm1 = vcmp.lt.s32.totalorder %v6441_v12, %v6448_v14  ;;  %v6463_v52 = vadd.s32 %v1159_v5, %v1157_v50  ;;  %v9224_v36 = vld [vmem:[#allocation114_spill] sm:$0xff]  ;;  %v6471_v25 = vpop.xlane.xlu2 %2487 }
 0x693   :  { %v2795_v2 = vsel %vm2667_vm15, 1, %v8943_v20  ;;  %v2794_v53 = vsel %vm2666_vm0, 1, %v8943_v20  ;;  %v2793_v40 = vsel %vm2665_vm1, 1, %v8943_v20  ;;  %9223 = vst [vmem:[#allocation64_spill] sm:$0xff] %v6468_v49  ;;  %v1170_v12 = vcvt.f32.s32 %v9224_v36 }
 0x694   :  { %2928 = vperm.xlu1 %4684, %v2795_v2   ;;  %2925 = vperm.xlu0 %4683, %v2794_v53   ;;  %9221 = vst [vmem:[#allocation61_spill] sm:$0xff] %v6463_v52  ;;  %vm2669_vm2 = vcmp.lt.s32.totalorder %v6463_v52, %v6448_v14  ;;  %vm2673_vm3 = vcmp.lt.s32.totalorder %v6465_v56, %v6448_v14  ;;  %v1181_v5 = vcvt.f32.s32 %v9227_v7  ;;  %v1183_v2 = vshll.u32 %v1182_v16, 16  ;;  %v9228_v53 = vld [vmem:[#allocation70_spill] sm:$0xff]  ;;  %v9234_v56 = vld [vmem:[#allocation32_spill] sm:$0xff]  ;;  %v9235_v16 = vld [vmem:[#allocation69_spill] sm:$0xff] }
 0x695   :  { %2922 = vperm.xlu2 %4682, %v2793_v40   ;;  %9225 = vst [vmem:[#allocation28_spill] sm:$0xff] %v6471_v25  ;;  %vm2668_vm5 = vcmp.lt.s32.totalorder %v6468_v49, %v6448_v14  ;;  %v1171_v55 = vshll.u32 %v1170_v12, 16  ;;  %v2797_v59 = vsel %vm2669_vm2, 1, %v8943_v20  ;;  %v2801_v36 = vsel %vm2673_vm3, 1, %v8943_v20 }
 0x696   :  { %v1241_v15 = vcvt.f32.s32 %v9228_v53  ;;  %v2796_v40 = vsel %vm2668_vm5, 1, %v8943_v20  ;;  %v6486_v50 = vadd.s32 %v1183_v2, %v1181_v5  ;;  %v1278_v12 = vcvt.f32.s32 %v9232_v30  ;;  %v9237_v5 = vld [vmem:[#allocation33_spill] sm:$0xff] }
 0x697   :  { %v6491_v7 = vadd.s32 %v1171_v55, %v1169_v48  ;;  %v1194_v52 = vcvt.f32.s32 %v9234_v56  ;;  %v1218_v49 = vcvt.f32.s32 %v9235_v16  ;;  %v9239_v48 = vld [vmem:[#allocation116_spill] sm:$0xff] }
 0x698   :  { %9230 = vst [vmem:[#allocation68_spill] sm:$0xff] %v6486_v50  ;;  %v6488_v27 = vadd.s32 %v1243_v13, %v1241_v15  ;;  %vm2671_vm6 = vcmp.lt.s32.totalorder %v6486_v50, %v6448_v14  ;;  %v1217_v13 = vcvt.f32.s32 %v9237_v5  ;;  %v9238_v15 = vld [vmem:[#allocation75_spill] sm:$0xff]  ;;  %v1193_v30 = vcvt.f32.s32 %v9239_v48  ;;  %v9243_v5 = vld [vmem:[#allocation36_spill] sm:$0xff] }
 0x699   :  { %9233 = vst [vmem:[#allocation114_spill] sm:$0xff] %v6491_v7  ;;  %vm2670_vm8 = vcmp.lt.s32.totalorder %v6491_v7, %v6448_v14  ;;  %v1195_v55 = vshll.u32 %v1194_v52, 16  ;;  %v2799_v2 = vsel %vm2671_vm6, 1, %v8943_v20  ;;  %v1219_v53 = vshll.u32 %v1218_v49, 16  ;;  %v9244_v49 = vld [vmem:[#allocation72_spill] sm:$0xff] }
 0x69a   :  { %9231 = vst [vmem:[#allocation113_spill] sm:$0xff] %v6488_v27  ;;  %vm2676_vm7 = vcmp.lt.s32.totalorder %v6488_v27, %v6448_v14  ;;  %v2798_v61 = vsel %vm2670_vm8, 1, %v8943_v20  ;;  %v1314_v52 = vcvt.f32.s32 %v5907_v41  ;;  %v1230_v50 = vcvt.f32.s32 %v9243_v5  ;;  %v9248_v5 = vld [vmem:[#allocation118_spill] sm:$0xff] }
 0x69b   :  { %v2804_v56 = vsel %vm2676_vm7, 1, %v8943_v20  ;;  %v6509_v16 = vadd.s32 %v1219_v53, %v1217_v13  ;;  %v1254_v7 = vcvt.f32.s32 %v9244_v49  ;;  %v9245_v13 = vld [vmem:[#allocation37_spill] sm:$0xff]  ;;  %v6531_v48 = vperm.slane %v6439_v10, 1 }
 0x69c   :  { %2934 = vperm.xlu1 %4684, %v2797_v59   ;;  %2946 = vperm.xlu0 %4683, %v2801_v36   ;;  %v6499_v59 = vpop.xlane.xlu2 %2509  ;;  %v1279_v36 = vshll.u32 %v1278_v12, 16  ;;  %v6514_v12 = vadd.s32 %v1195_v55, %v1193_v30  ;;  %v1229_v49 = vcvt.f32.s32 %v9248_v5 }
 0x69d   :  { %2931 = vperm.xlu2 %4682, %v2796_v40   ;;  %9236 = vst [vmem:[#allocation67_spill] sm:$0xff] %v6499_v59  ;;  %v1277_v40 = vcvt.f32.s32 %v9238_v15  ;;  %vm2674_vm9 = vcmp.lt.s32.totalorder %v6509_v16, %v6448_v14  ;;  %v1255_v15 = vshll.u32 %v1254_v7, 16  ;;  %v9252_v7 = vld [vmem:[#allocation39_spill] sm:$0xff] }
 0x69e   :  { %9240 = vst [vmem:[#allocation31_spill] sm:$0xff] %v6509_v16  ;;  %vm2672_vm11 = vcmp.lt.s32.totalorder %v6514_v12, %v6448_v14  ;;  %v2802_v55 = vsel %vm2674_vm9, 1, %v8943_v20  ;;  %v9253_v16 = vld [vmem:[#allocation77_spill] sm:$0xff] }
 0x69f   :  { %v6511_v27 = vadd.s32 %v1279_v36, %v1277_v40  ;;  %9242 = vst [vmem:[#allocation66_spill] sm:$0xff] %v6514_v12  ;;  %v1253_v36 = vcvt.f32.s32 %v9245_v13  ;;  %v9247_v40 = vld [vmem:[#allocation82_spill] sm:$0xff]  ;;  %v2800_v30 = vsel %vm2672_vm11, 1, %v8943_v20  ;;  %v1350_v13 = vcvt.f32.s32 %v5920_v44 }
 0x6a0   :  { %v1290_v12 = vcvt.f32.s32 %v9253_v16 }
 0x6a1   :  { %9241 = vst [vmem:[#allocation70_spill] sm:$0xff] %v6511_v27  ;;  %vm2679_vm10 = vcmp.lt.s32.totalorder %v6511_v27, %v6448_v14 }
 0x6a2   :  { %v2807_v53 = vsel %vm2679_vm10, 1, %v8943_v20 }
 0x6a4   :  { %2940 = vperm.xlu1 %4684, %v2799_v2   ;;  %2955 = vperm.xlu0 %4683, %v2804_v56   ;;  %v1315_v2 = vshll.u32 %v1314_v52, 16  ;;  %v1231_v56 = vshll.u32 %v1230_v50, 16  ;;  %v6525_v41 = vpop.xlane.xlu2 %2523  ;;  %v6535_v50 = vadd.s32 %v1255_v15, %v1253_v36  ;;  %v1289_v36 = vcvt.f32.s32 %v5897_v46  ;;  %v9254_v15 = vld [vmem:[#allocation86_spill] sm:$0xff] }
 0x6a5   :  { %2937 = vperm.xlu2 %4682, %v2798_v61   ;;  %9246 = vst [vmem:[#allocation121_spill] sm:$0xff] %v6525_v41  ;;  %v1313_v61 = vcvt.f32.s32 %v9247_v40  ;;  %v1266_v40 = vcvt.f32.s32 %v9252_v7  ;;  %v1349_v16 = vcvt.f32.s32 %v9254_v15  ;;  %v9261_v15 = vld [vmem:[#allocation84_spill] sm:$0xff] }
 0x6a6   :  { %9249 = vst [vmem:[#allocation32_spill] sm:$0xff] %v6535_v50  ;;  %v6540_v27 = vadd.s32 %v1231_v56, %v1229_v49  ;;  %vm2677_vm12 = vcmp.lt.s32.totalorder %v6535_v50, %v6448_v14 }
 0x6a7   :  { %v6537_v52 = vadd.s32 %v1315_v2, %v1313_v61  ;;  %v1351_v2 = vshll.u32 %v1350_v13, 16  ;;  %v2805_v44 = vsel %vm2677_vm12, 1, %v8943_v20  ;;  %v1386_v13 = vcvt.f32.s32 %v5933_v33 }
 0x6a8   :  { %9251 = vst [vmem:[#allocation33_spill] sm:$0xff] %v6540_v27  ;;  %vm2675_vm14 = vcmp.lt.s32.totalorder %v6540_v27, %v6448_v14 }
 0x6a9   :  { %9250 = vst [vmem:[#allocation69_spill] sm:$0xff] %v6537_v52  ;;  %vm2682_vm13 = vcmp.lt.s32.totalorder %v6537_v52, %v6531_v48  ;;  %v2803_v61 = vsel %vm2675_vm14, 1, %v8943_v20  ;;  %v6560_v46 = vadd.s32 %v1351_v2, %v1349_v16 }
 0x6aa   :  { %v2810_v56 = vsel %vm2682_vm13, 1, %v8943_v20 }
 0x6ab   :  { %9258 = vst [vmem:[#allocation36_spill] sm:$0xff] %v6560_v46  ;;  %vm2685_vm0 = vcmp.lt.s32.totalorder %v6560_v46, %v6531_v48  ;;  %v9278_v46 = vld [vmem:[#allocation45_spill] sm:$0xff] }
 0x6ac   :  { %2949 = vperm.xlu1 %4684, %v2802_v55   ;;  %2964 = vperm.xlu0 %4683, %v2807_v53   ;;  %v1267_v55 = vshll.u32 %v1266_v40, 16  ;;  %v1291_v53 = vshll.u32 %v1290_v12, 16  ;;  %v6556_v49 = vpop.xlane.xlu2 %2545  ;;  %v9260_v12 = vld [vmem:[#allocation41_spill] sm:$0xff] }
 0x6ad   :  { %2943 = vperm.xlu2 %4682, %v2800_v30   ;;  %v9255_v30 = vld [vmem:[#allocation119_spill] sm:$0xff]  ;;  %9256 = vst [vmem:[#allocation75_spill] sm:$0xff] %v6556_v49  ;;  %v1302_v50 = vcvt.f32.s32 %v9260_v12  ;;  %v9264_v12 = vld [vmem:[#allocation40_spill] sm:$0xff]  ;;  %v9391_v49 = vld [vmem:[#allocation138_spill] sm:$0xff] }
 0x6ae   :  { %v1265_v5 = vcvt.f32.s32 %v9255_v30  ;;  %v6558_v7 = vadd.s32 %v1291_v53, %v1289_v36  ;;  %v9262_v36 = vld [vmem:[#allocation42_spill] sm:$0xff]  ;;  %v1866_v41 = vcvt.f32.s32 %v9391_v49 }
 0x6af   :  { %v1325_v2 = vcvt.f32.s32 %v9262_v36  ;;  %v1303_v53 = vshll.u32 %v1302_v50, 16  ;;  %v1422_v50 = vcvt.f32.s32 %v5946_v60  ;;  %v9268_v36 = vld [vmem:[#allocation43_spill] sm:$0xff] }
 0x6b0   :  { %9257 = vst [vmem:[#allocation116_spill] sm:$0xff] %v6558_v7  ;;  %v6563_v40 = vadd.s32 %v1267_v55, %v1265_v5  ;;  %vm2680_vm15 = vcmp.lt.s32.totalorder %v6558_v7, %v6448_v14  ;;  %v2813_v55 = vsel %vm2685_vm0, 1, %v8943_v20 }
 0x6b1   :  { %v2808_v33 = vsel %vm2680_vm15, 1, %v8943_v20  ;;  %v1423_v60 = vshll.u32 %v1422_v50, 16  ;;  %v9276_v50 = vld [vmem:[#allocation49_spill] sm:$0xff] }
 0x6b2   :  { %9259 = vst [vmem:[#allocation72_spill] sm:$0xff] %v6563_v40  ;;  %vm2678_vm1 = vcmp.lt.s32.totalorder %v6563_v40, %v6448_v14  ;;  %v1338_v40 = vcvt.f32.s32 %v9268_v36  ;;  %v9273_v36 = vld [vmem:[#allocation123_spill] sm:$0xff] }
 0x6b3   :  { %v2806_v5 = vsel %vm2678_vm1, 1, %v8943_v20 }
 0x6b4   :  { %2958 = vperm.xlu1 %4684, %v2805_v44   ;;  %2973 = vperm.xlu0 %4683, %v2810_v56   ;;  %v1326_v44 = vcvt.f32.s32 %v9261_v15  ;;  %v1387_v56 = vshll.u32 %v1386_v13, 16  ;;  %v1301_v15 = vcvt.f32.s32 %v9264_v12 }
 0x6b5   :  { %2952 = vperm.xlu2 %4682, %v2803_v61   ;;  %v9263_v61 = vld [vmem:[#allocation91_spill] sm:$0xff] }
 0x6b6   :  { %v1327_v16 = vshll.u32 %v1326_v44, 16  ;;  %v1385_v30 = vcvt.f32.s32 %v9263_v61  ;;  %v6584_v13 = vadd.s32 %v1303_v53, %v1301_v15  ;;  %v6587_v44 = vpop.xlane.xlu2 %2559  ;;  %v9270_v61 = vld [vmem:[#allocation88_spill] sm:$0xff]  ;;  %v1339_v53 = vshll.u32 %v1338_v40, 16 }
 0x6b7   :  { %9269 = vst [vmem:[#allocation39_spill] sm:$0xff] %v6587_v44  ;;  %v1458_v40 = vcvt.f32.s32 %v9276_v50 }
 0x6b8   :  { %v6579_v7 = vadd.s32 %v1327_v16, %v1325_v2  ;;  %v6581_v14 = vadd.s32 %v1387_v56, %v1385_v30  ;;  %9267 = vst [vmem:[#allocation118_spill] sm:$0xff] %v6584_v13  ;;  %vm2681_vm5 = vcmp.lt.s32.totalorder %v6584_v13, %v6531_v48  ;;  %v9271_v2 = vld [vmem:[#allocation44_spill] sm:$0xff] }
 0x6b9   :  { %v1361_v56 = vcvt.f32.s32 %v9271_v2  ;;  %v2809_v15 = vsel %vm2681_vm5, 1, %v8943_v20 }
 0x6ba   :  { %9265 = vst [vmem:[#allocation37_spill] sm:$0xff] %v6579_v7  ;;  %vm2683_vm2 = vcmp.lt.s32.totalorder %v6579_v7, %v6531_v48  ;;  %vm2688_vm3 = vcmp.lt.s32.totalorder %v6581_v14, %v6531_v48  ;;  %v1374_v7 = vcvt.f32.s32 %v9278_v46 }
 0x6bb   :  { %9266 = vst [vmem:[#allocation82_spill] sm:$0xff] %v6581_v14  ;;  %v2816_v16 = vsel %vm2688_vm3, 1, %v8943_v20 }
 0x6bc   :  { %2967 = vperm.xlu1 %4684, %v2808_v33   ;;  %2982 = vperm.xlu0 %4683, %v2813_v55   ;;  %v1362_v33 = vcvt.f32.s32 %v9270_v61  ;;  %v2811_v55 = vsel %vm2683_vm2, 1, %v8943_v20  ;;  %v1337_v61 = vcvt.f32.s32 %v9273_v36 }
 0x6bd   :  { %2961 = vperm.xlu2 %4682, %v2806_v5   ;;  %v9272_v5 = vld [vmem:[#allocation96_spill] sm:$0xff] }
 0x6be   :  { %v1363_v30 = vshll.u32 %v1362_v33, 16  ;;  %v1421_v12 = vcvt.f32.s32 %v9272_v5  ;;  %v6607_v2 = vadd.s32 %v1339_v53, %v1337_v61  ;;  %v9279_v33 = vld [vmem:[#allocation93_spill] sm:$0xff]  ;;  %v1375_v53 = vshll.u32 %v1374_v7, 16  ;;  %v9283_v61 = vld [vmem:[#allocation124_spill] sm:$0xff] }
 0x6bf   :  { %v1398_v52 = vcvt.f32.s32 %v9279_v33  ;;  %v1373_v50 = vcvt.f32.s32 %v9283_v61  ;;  %v6647_v61 = vperm.slane %v6439_v10, 2 }
 0x6c0   :  { %v6602_v14 = vadd.s32 %v1363_v30, %v1361_v56  ;;  %v6604_v27 = vadd.s32 %v1423_v60, %v1421_v12  ;;  %9277 = vst [vmem:[#allocation119_spill] sm:$0xff] %v6607_v2  ;;  %vm2684_vm8 = vcmp.lt.s32.totalorder %v6607_v2, %v6531_v48  ;;  %v9281_v56 = vld [vmem:[#allocation46_spill] sm:$0xff]  ;;  %v9282_v12 = vld [vmem:[#allocation99_spill] sm:$0xff] }
 0x6c1   :  { %v1397_v60 = vcvt.f32.s32 %v9281_v56  ;;  %v1399_v5 = vshll.u32 %v1398_v52, 16  ;;  %v2812_v36 = vsel %vm2684_vm8, 1, %v8943_v20  ;;  %v6630_v56 = vadd.s32 %v1375_v53, %v1373_v50  ;;  %v9289_v52 = vld [vmem:[#allocation97_spill] sm:$0xff] }
 0x6c2   :  { %9274 = vst [vmem:[#allocation77_spill] sm:$0xff] %v6602_v14  ;;  %vm2686_vm6 = vcmp.lt.s32.totalorder %v6602_v14, %v6531_v48  ;;  %vm2691_vm7 = vcmp.lt.s32.totalorder %v6604_v27, %v6531_v48  ;;  %v9288_v14 = vld [vmem:[#allocation47_spill] sm:$0xff]  ;;  %v1434_v13 = vcvt.f32.s32 %v9289_v52 }
 0x6c3   :  { %9275 = vst [vmem:[#allocation86_spill] sm:$0xff] %v6604_v27  ;;  %v2814_v30 = vsel %vm2686_vm6, 1, %v8943_v20  ;;  %v2819_v46 = vsel %vm2691_vm7, 1, %v8943_v20  ;;  %v6625_v33 = vadd.s32 %v1399_v5, %v1397_v60  ;;  %v1410_v2 = vcvt.f32.s32 %v9288_v14  ;;  %v9290_v60 = vld [vmem:[#allocation48_spill] sm:$0xff] }
 0x6c4   :  { %2976 = vperm.xlu1 %4684, %v2811_v55   ;;  %2991 = vperm.xlu0 %4683, %v2816_v16   ;;  %v6615_v55 = vpop.xlane.xlu2 %2581  ;;  %v1459_v16 = vshll.u32 %v1458_v40, 16  ;;  %v9286_v40 = vld [vmem:[#allocation52_spill] sm:$0xff]  ;;  %9287 = vst [vmem:[#allocation91_spill] sm:$0xff] %v6630_v56  ;;  %vm2687_vm11 = vcmp.lt.s32.totalorder %v6630_v56, %v6531_v48 }
 0x6c5   :  { %2970 = vperm.xlu2 %4682, %v2809_v15   ;;  %9280 = vst [vmem:[#allocation41_spill] sm:$0xff] %v6615_v55  ;;  %v1457_v15 = vcvt.f32.s32 %v9282_v12  ;;  %v1494_v7 = vcvt.f32.s32 %v9286_v40  ;;  %vm2689_vm9 = vcmp.lt.s32.totalorder %v6625_v33, %v6531_v48  ;;  %v1435_v12 = vshll.u32 %v1434_v13, 16  ;;  %v9293_v40 = vld [vmem:[#allocation125_spill] sm:$0xff]  ;;  %v9298_v13 = vld [vmem:[#allocation51_spill] sm:$0xff]  ;;  %v9299_v56 = vld [vmem:[#allocation100_spill] sm:$0xff] }
 0x6c6   :  { %9284 = vst [vmem:[#allocation84_spill] sm:$0xff] %v6625_v33  ;;  %v2817_v53 = vsel %vm2689_vm9, 1, %v8943_v20  ;;  %v2815_v50 = vsel %vm2687_vm11, 1, %v8943_v20  ;;  %v1409_v52 = vcvt.f32.s32 %v9293_v40  ;;  %v9383_v55 = vld [vmem:[#allocation133_spill] sm:$0xff] }
 0x6c7   :  { %v6627_v27 = vadd.s32 %v1459_v16, %v1457_v15  ;;  %v1433_v16 = vcvt.f32.s32 %v9290_v60  ;;  %v9292_v15 = vld [vmem:[#allocation102_spill] sm:$0xff]  ;;  %v9296_v60 = vld [vmem:[#allocation56_spill] sm:$0xff]  ;;  %v1830_v44 = vcvt.f32.s32 %v9383_v55 }
 0x6c9   :  { %9285 = vst [vmem:[#allocation42_spill] sm:$0xff] %v6627_v27  ;;  %vm2694_vm10 = vcmp.lt.s32.totalorder %v6627_v27, %v6531_v48  ;;  %v1530_v27 = vcvt.f32.s32 %v9296_v60 }
 0x6ca   :  { %v2822_v14 = vsel %vm2694_vm10, 1, %v8943_v20 }
 0x6cc   :  { %2985 = vperm.xlu1 %4684, %v2814_v30   ;;  %3000 = vperm.xlu0 %4683, %v2819_v46   ;;  %v1495_v30 = vshll.u32 %v1494_v7, 16  ;;  %v1411_v46 = vshll.u32 %v1410_v2, 16  ;;  %v6641_v5 = vpop.xlane.xlu2 %2595  ;;  %v6651_v2 = vadd.s32 %v1435_v12, %v1433_v16  ;;  %v9300_v16 = vld [vmem:[#allocation50_spill] sm:$0xff] }
 0x6cd   :  { %2979 = vperm.xlu2 %4682, %v2812_v36   ;;  %9291 = vst [vmem:[#allocation40_spill] sm:$0xff] %v6641_v5  ;;  %v1493_v36 = vcvt.f32.s32 %v9292_v15  ;;  %v1446_v15 = vcvt.f32.s32 %v9298_v13  ;;  %v1470_v5 = vcvt.f32.s32 %v9299_v56 }
 0x6ce   :  { %9294 = vst [vmem:[#allocation43_spill] sm:$0xff] %v6651_v2  ;;  %v6656_v33 = vadd.s32 %v1411_v46, %v1409_v52  ;;  %vm2692_vm12 = vcmp.lt.s32.totalorder %v6651_v2, %v6531_v48  ;;  %v9302_v52 = vld [vmem:[#allocation126_spill] sm:$0xff] }
 0x6cf   :  { %v6653_v7 = vadd.s32 %v1495_v30, %v1493_v36  ;;  %v1469_v30 = vcvt.f32.s32 %v9300_v16  ;;  %v2820_v46 = vsel %vm2692_vm12, 1, %v8943_v20  ;;  %v1471_v36 = vshll.u32 %v1470_v5, 16  ;;  %v9307_v5 = vld [vmem:[#allocation53_spill] sm:$0xff] }
 0x6d0   :  { %9297 = vst [vmem:[#allocation44_spill] sm:$0xff] %v6656_v33  ;;  %vm2690_vm14 = vcmp.lt.s32.totalorder %v6656_v33, %v6531_v48  ;;  %v1445_v60 = vcvt.f32.s32 %v9302_v52  ;;  %v1482_v33 = vcvt.f32.s32 %v9307_v5  ;;  %v9311_v5 = vld [vmem:[#allocation127_spill] sm:$0xff] }
 0x6d1   :  { %9295 = vst [vmem:[#allocation88_spill] sm:$0xff] %v6653_v7  ;;  %vm2697_vm13 = vcmp.lt.s32.totalorder %v6653_v7, %v6647_v61  ;;  %v2818_v40 = vsel %vm2690_vm14, 1, %v8943_v20  ;;  %v6674_v2 = vadd.s32 %v1471_v36, %v1469_v30  ;;  %v9309_v30 = vld [vmem:[#allocation54_spill] sm:$0xff]  ;;  %v9364_v7 = vld [vmem:[#allocation129_spill] sm:$0xff] }
 0x6d2   :  { %v2825_v12 = vsel %vm2697_vm13, 1, %v8943_v20  ;;  %v1483_v36 = vshll.u32 %v1482_v33, 16  ;;  %v1602_v33 = vcvt.f32.s32 %v6017_v35 }
 0x6d3   :  { %9304 = vst [vmem:[#allocation123_spill] sm:$0xff] %v6674_v2  ;;  %vm2695_vm15 = vcmp.lt.s32.totalorder %v6674_v2, %v6531_v48 }
 0x6d4   :  { %2994 = vperm.xlu1 %4684, %v2817_v53   ;;  %3009 = vperm.xlu0 %4683, %v2822_v14   ;;  %v1531_v53 = vshll.u32 %v1530_v27, 16  ;;  %v1447_v14 = vshll.u32 %v1446_v15, 16  ;;  %v6672_v13 = vpop.xlane.xlu2 %2617  ;;  %v1566_v15 = vcvt.f32.s32 %v6002_v24  ;;  %v2823_v24 = vsel %vm2695_vm15, 1, %v8943_v20 }
 0x6d5   :  { %2988 = vperm.xlu2 %4682, %v2815_v50   ;;  %v9301_v50 = vld [vmem:[#allocation105_spill] sm:$0xff]  ;;  %9303 = vst [vmem:[#allocation96_spill] sm:$0xff] %v6672_v13  ;;  %v1603_v35 = vshll.u32 %v1602_v33, 16 }
 0x6d6   :  { %v1529_v56 = vcvt.f32.s32 %v9301_v50  ;;  %v6679_v16 = vadd.s32 %v1447_v14, %v1445_v60  ;;  %v9308_v50 = vld [vmem:[#allocation104_spill] sm:$0xff] }
 0x6d8   :  { %v6676_v27 = vadd.s32 %v1531_v53, %v1529_v56  ;;  %9306 = vst [vmem:[#allocation45_spill] sm:$0xff] %v6679_v16  ;;  %vm2693_vm1 = vcmp.lt.s32.totalorder %v6679_v16, %v6531_v48  ;;  %v1505_v53 = vcvt.f32.s32 %v9309_v30  ;;  %v9315_v30 = vld [vmem:[#allocation19_spill] sm:$0xff] }
 0x6d9   :  { %v2821_v60 = vsel %vm2693_vm1, 1, %v8943_v20 }
 0x6da   :  { %9305 = vst [vmem:[#allocation49_spill] sm:$0xff] %v6676_v27  ;;  %vm2700_vm0 = vcmp.lt.s32.totalorder %v6676_v27, %v6647_v61  ;;  %v1518_v27 = vcvt.f32.s32 %v9315_v30  ;;  %v9320_v30 = vld [vmem:[#allocation128_spill] sm:$0xff] }
 0x6db   :  { %v2828_v14 = vsel %vm2700_vm0, 1, %v8943_v20 }
 0x6dc   :  { %3003 = vperm.xlu1 %4684, %v2820_v46   ;;  %3018 = vperm.xlu0 %4683, %v2825_v12   ;;  %v1506_v46 = vcvt.f32.s32 %v9308_v50  ;;  %v1567_v12 = vshll.u32 %v1566_v15, 16  ;;  %v1481_v50 = vcvt.f32.s32 %v9311_v5 }
 0x6dd   :  { %2997 = vperm.xlu2 %4682, %v2818_v40   ;;  %v9310_v40 = vld [vmem:[#allocation108_spill] sm:$0xff] }
 0x6de   :  { %v1507_v56 = vshll.u32 %v1506_v46, 16  ;;  %v1565_v52 = vcvt.f32.s32 %v9310_v40  ;;  %v6700_v15 = vadd.s32 %v1483_v36, %v1481_v50  ;;  %v6703_v46 = vpop.xlane.xlu2 %2631  ;;  %v9317_v40 = vld [vmem:[#allocation106_spill] sm:$0xff]  ;;  %v1519_v36 = vshll.u32 %v1518_v27, 16 }
 0x6df   :  { %9316 = vst [vmem:[#allocation124_spill] sm:$0xff] %v6703_v46  ;;  %v1638_v27 = vcvt.f32.s32 %v6034_v23  ;;  %v9374_v46 = vld [vmem:[#allocation62_spill] sm:$0xff] }
 0x6e0   :  { %v6695_v2 = vadd.s32 %v1507_v56, %v1505_v53  ;;  %v6697_v16 = vadd.s32 %v1567_v12, %v1565_v52  ;;  %9314 = vst [vmem:[#allocation99_spill] sm:$0xff] %v6700_v15  ;;  %vm2696_vm5 = vcmp.lt.s32.totalorder %v6700_v15, %v6531_v48  ;;  %v9318_v53 = vld [vmem:[#allocation57_spill] sm:$0xff]  ;;  %v1794_v13 = vcvt.f32.s32 %v9374_v46 }
 0x6e1   :  { %v1541_v12 = vcvt.f32.s32 %v9318_v53  ;;  %v2824_v50 = vsel %vm2696_vm5, 1, %v8943_v20  ;;  %v9324_v53 = vld [vmem:[#allocation60_spill] sm:$0xff]  ;;  %v1639_v23 = vshll.u32 %v1638_v27, 16  ;;  %v1590_v27 = vcvt.f32.s32 %v6015_v0 }
 0x6e2   :  { %9312 = vst [vmem:[#allocation93_spill] sm:$0xff] %v6695_v2  ;;  %vm2698_vm2 = vcmp.lt.s32.totalorder %v6695_v2, %v6647_v61  ;;  %vm2703_vm3 = vcmp.lt.s32.totalorder %v6697_v16, %v6647_v61  ;;  %v1554_v15 = vcvt.f32.s32 %v9324_v53 }
 0x6e3   :  { %9313 = vst [vmem:[#allocation46_spill] sm:$0xff] %v6697_v16  ;;  %v2831_v56 = vsel %vm2703_vm3, 1, %v8943_v20 }
 0x6e4   :  { %3012 = vperm.xlu1 %4684, %v2823_v24   ;;  %3027 = vperm.xlu0 %4683, %v2828_v14   ;;  %v1542_v24 = vcvt.f32.s32 %v9317_v40  ;;  %v2826_v14 = vsel %vm2698_vm2, 1, %v8943_v20  ;;  %v1517_v40 = vcvt.f32.s32 %v9320_v30 }
 0x6e5   :  { %3006 = vperm.xlu2 %4682, %v2821_v60   ;;  %v9319_v60 = vld [vmem:[#allocation22_spill] sm:$0xff] }
 0x6e6   :  { %v1543_v52 = vshll.u32 %v1542_v24, 16  ;;  %v1601_v5 = vcvt.f32.s32 %v9319_v60  ;;  %v6723_v33 = vadd.s32 %v1519_v36, %v1517_v40  ;;  %v9325_v60 = vld [vmem:[#allocation24_spill] sm:$0xff]  ;;  %v9327_v40 = vld [vmem:[#allocation130_spill] sm:$0xff] }
 0x6e7   :  { %v1553_v53 = vcvt.f32.s32 %v9327_v40  ;;  %v9333_v40 = vld [vmem:[#allocation59_spill] sm:$0xff] }
 0x6e8   :  { %v6718_v16 = vadd.s32 %v1543_v52, %v1541_v12  ;;  %v6720_v48 = vadd.s32 %v1603_v35, %v1601_v5  ;;  %9323 = vst [vmem:[#allocation97_spill] sm:$0xff] %v6723_v33  ;;  %vm2699_vm8 = vcmp.lt.s32.totalorder %v6723_v33, %v6647_v61  ;;  %v1577_v12 = vcvt.f32.s32 %v6005_v54  ;;  %v9326_v5 = vld [vmem:[#allocation29_spill] sm:$0xff] }
 0x6e9   :  { %v1555_v35 = vshll.u32 %v1554_v15, 16  ;;  %v2827_v30 = vsel %vm2699_vm8, 1, %v8943_v20  ;;  %v1674_v54 = vcvt.f32.s32 %v6049_v43  ;;  %v1758_v33 = vcvt.f32.s32 %v9364_v7 }
 0x6ea   :  { %9321 = vst [vmem:[#allocation52_spill] sm:$0xff] %v6718_v16  ;;  %vm2701_vm6 = vcmp.lt.s32.totalorder %v6718_v16, %v6647_v61  ;;  %vm2706_vm7 = vcmp.lt.s32.totalorder %v6720_v48, %v6647_v61 }
 0x6eb   :  { %9322 = vst [vmem:[#allocation47_spill] sm:$0xff] %v6720_v48  ;;  %v2829_v36 = vsel %vm2701_vm6, 1, %v8943_v20  ;;  %v6746_v15 = vadd.s32 %v1555_v35, %v1553_v53  ;;  %v1675_v43 = vshll.u32 %v1674_v54, 16  ;;  %v1589_v53 = vcvt.f32.s32 %v9333_v40 }
 0x6ec   :  { %3021 = vperm.xlu1 %4684, %v2826_v14   ;;  %3036 = vperm.xlu0 %4683, %v2831_v56   ;;  %v1578_v14 = vcvt.f32.s32 %v9325_v60  ;;  %v2834_v56 = vsel %vm2706_vm7, 1, %v8943_v20 }
 0x6ed   :  { %3015 = vperm.xlu2 %4682, %v2824_v50   ;;  %v1637_v50 = vcvt.f32.s32 %v9326_v5  ;;  %9330 = vst [vmem:[#allocation125_spill] sm:$0xff] %v6746_v15  ;;  %v9331_v5 = vld [vmem:[#allocation25_spill] sm:$0xff]  ;;  %vm2702_vm11 = vcmp.lt.s32.totalorder %v6746_v15, %v6647_v61 }
 0x6ee   :  { %v1579_v52 = vshll.u32 %v1578_v14, 16  ;;  %v9346_v15 = vld [vmem:[#allocation117_spill] sm:$0xff] }
 0x6ef   :  { %v6726_v24 = vpop.permute.xlu2 %2922  ;;  %v6743_v48 = vadd.s32 %v1639_v23, %v1637_v50  ;;  %v1591_v23 = vshll.u32 %v1590_v27, 16  ;;  %v9337_v27 = vld [vmem:[#allocation134_spill] sm:$0xff]  ;;  %v1686_v16 = vcvt.f32.s32 %v9346_v15 }
 0x6f0   :  { %v6741_v60 = vadd.s32 %v1579_v52, %v1577_v12  ;;  %v1613_v12 = vcvt.f32.s32 %v6022_v51  ;;  %v9332_v52 = vld [vmem:[#allocation34_spill] sm:$0xff]  ;;  %v1710_v51 = vcvt.f32.s32 %v6066_v63 }
 0x6f1   :  { %9329 = vst [vmem:[#allocation102_spill] sm:$0xff] %v6743_v48  ;;  %vm2709_vm10 = vcmp.lt.s32.totalorder %v6743_v48, %v6647_v61  ;;  %v1673_v50 = vcvt.f32.s32 %v9332_v52  ;;  %v6769_v54 = vadd.s32 %v1591_v23, %v1589_v53  ;;  %v9338_v52 = vld [vmem:[#allocation115_spill] sm:$0xff]  ;;  %v6786_v53 = vperm.slane %v6439_v10, 3 }
 0x6f2   :  { %9328 = vst [vmem:[#allocation48_spill] sm:$0xff] %v6741_v60  ;;  %vm2704_vm9 = vcmp.lt.s32.totalorder %v6741_v60, %v6647_v61  ;;  %v2837_v0 = vsel %vm2709_vm10, 1, %v8943_v20  ;;  %v1626_v60 = vcvt.f32.s32 %v9337_v27  ;;  %v1711_v63 = vshll.u32 %v1710_v51, 16 }
 0x6f3   :  { %v2832_v35 = vsel %vm2704_vm9, 1, %v8943_v20  ;;  %v6766_v48 = vadd.s32 %v1675_v43, %v1673_v50  ;;  %9336 = vst [vmem:[#allocation100_spill] sm:$0xff] %v6769_v54  ;;  %vm2705_vm14 = vcmp.lt.s32.totalorder %v6769_v54, %v6647_v61  ;;  %v1746_v51 = vcvt.f32.s32 %v6081_v26  ;;  %v9345_v54 = vld [vmem:[#allocation137_spill] sm:$0xff] }
 0x6f4   :  { %3030 = vperm.xlu1 %4684, %v2829_v36   ;;  %3045 = vperm.xlu0 %4683, %v2834_v56   ;;  %v1614_v36 = vcvt.f32.s32 %v9331_v5  ;;  %v1627_v23 = vshll.u32 %v1626_v60, 16  ;;  %v2833_v27 = vsel %vm2705_vm14, 1, %v8943_v20  ;;  %v1685_v26 = vcvt.f32.s32 %v6054_v42 }
 0x6f5   :  { %3024 = vperm.xlu2 %4682, %v2827_v30   ;;  %v2830_v30 = vsel %vm2702_vm11, 1, %v8943_v20  ;;  %9335 = vst [vmem:[#allocation51_spill] sm:$0xff] %v6766_v48  ;;  %vm2712_vm13 = vcmp.lt.s32.totalorder %v6766_v48, %v6647_v61  ;;  %v1782_v42 = vcvt.f32.s32 %v6096_v28  ;;  %v9354_v28 = vld [vmem:[#allocation142_spill] sm:$0xff] }
 0x6f6   :  { %v1615_v56 = vshll.u32 %v1614_v36, 16 }
 0x6f7   :  { %v6749_v14 = vpop.permute.xlu2 %2931 }
 0x6f8   :  { %v6764_v5 = vadd.s32 %v1615_v56, %v1613_v12  ;;  %v9339_v12 = vld [vmem:[#allocation65_spill] sm:$0xff]  ;;  %v2840_v56 = vsel %vm2712_vm13, 1, %v8943_v20 }
 0x6f9   :  { %v1649_v43 = vcvt.f32.s32 %v9339_v12 }
 0x6fa   :  { %9334 = vst [vmem:[#allocation56_spill] sm:$0xff] %v6764_v5  ;;  %vm2707_vm12 = vcmp.lt.s32.totalorder %v6764_v5, %v6647_v61 }
 0x6fc   :  { %3039 = vperm.xlu1 %4684, %v2832_v35   ;;  %3054 = vperm.xlu0 %4683, %v2837_v0   ;;  %v1650_v35 = vcvt.f32.s32 %v9338_v52  ;;  %v2835_v0 = vsel %vm2707_vm12, 1, %v8943_v20  ;;  %v9341_v52 = vld [vmem:[#allocation132_spill] sm:$0xff] }
 0x6fd   :  { %3033 = vperm.xlu2 %4682, %v2830_v30   ;;  %v9340_v30 = vld [vmem:[#allocation35_spill] sm:$0xff]  ;;  %v1625_v48 = vcvt.f32.s32 %v9341_v52 }
 0x6fe   :  { %v1651_v50 = vshll.u32 %v1650_v35, 16  ;;  %v1709_v40 = vcvt.f32.s32 %v9340_v30 }
 0x6ff   :  { %v6772_v36 = vpop.permute.xlu2 %2937  ;;  %v6799_v30 = vadd.s32 %v1627_v23, %v1625_v48  ;;  %v1687_v23 = vshll.u32 %v1686_v16, 16 }
 0x700   :  { %v6790_v12 = vadd.s32 %v1651_v50, %v1649_v43  ;;  %v6792_v60 = vadd.s32 %v1711_v63, %v1709_v40  ;;  %v1747_v43 = vshll.u32 %v1746_v51, 16  ;;  %v9347_v50 = vld [vmem:[#allocation122_spill] sm:$0xff] }
 0x701   :  { %9344 = vst [vmem:[#allocation126_spill] sm:$0xff] %v6799_v30  ;;  %vm2708_vm1 = vcmp.lt.s32.totalorder %v6799_v30, %v6647_v61  ;;  %v1745_v15 = vcvt.f32.s32 %v9347_v50  ;;  %v9353_v50 = vld [vmem:[#allocation120_spill] sm:$0xff] }
 0x702   :  { %9342 = vst [vmem:[#allocation50_spill] sm:$0xff] %v6790_v12  ;;  %vm2710_vm15 = vcmp.lt.s32.totalorder %v6790_v12, %v6647_v61  ;;  %vm2715_vm0 = vcmp.lt.s32.totalorder %v6792_v60, %v6786_v53  ;;  %v2836_v40 = vsel %vm2708_vm1, 1, %v8943_v20  ;;  %v6817_v12 = vadd.s32 %v1687_v23, %v1685_v26 }
 0x703   :  { %9343 = vst [vmem:[#allocation105_spill] sm:$0xff] %v6792_v60  ;;  %v2838_v63 = vsel %vm2710_vm15, 1, %v8943_v20  ;;  %v6819_v30 = vadd.s32 %v1747_v43, %v1745_v15  ;;  %v1722_v60 = vcvt.f32.s32 %v9353_v50  ;;  %v1721_v26 = vcvt.f32.s32 %v9354_v28  ;;  %v9356_v50 = vld [vmem:[#allocation139_spill] sm:$0xff] }
 0x704   :  { %3048 = vperm.xlu1 %4684, %v2835_v0   ;;  %3063 = vperm.xlu0 %4683, %v2840_v56   ;;  %v1662_v0 = vcvt.f32.s32 %v9345_v54  ;;  %v2843_v54 = vsel %vm2715_vm0, 1, %v8943_v20  ;;  %9349 = vst [vmem:[#allocation53_spill] sm:$0xff] %v6817_v12  ;;  %vm2713_vm2 = vcmp.lt.s32.totalorder %v6817_v12, %v6786_v53  ;;  %v1783_v43 = vshll.u32 %v1782_v42, 16  ;;  %v9359_v42 = vld [vmem:[#allocation78_spill] sm:$0xff] }
 0x705   :  { %3042 = vperm.xlu2 %4682, %v2833_v27   ;;  %v9348_v27 = vld [vmem:[#allocation136_spill] sm:$0xff]  ;;  %9350 = vst [vmem:[#allocation104_spill] sm:$0xff] %v6819_v30  ;;  %vm2718_vm3 = vcmp.lt.s32.totalorder %v6819_v30, %v6786_v53  ;;  %v2841_v23 = vsel %vm2713_vm2, 1, %v8943_v20  ;;  %v1723_v15 = vshll.u32 %v1722_v60, 16  ;;  %v1697_v30 = vcvt.f32.s32 %v9356_v50  ;;  %v9366_v50 = vld [vmem:[#allocation131_spill] sm:$0xff] }
 0x706   :  { %v6795_v5 = vpop.permute.xlu1 %2928  ;;  %v6797_v35 = vpop.permute.xlu0 %2925  ;;  %v1663_v48 = vshll.u32 %v1662_v0, 16  ;;  %v1661_v52 = vcvt.f32.s32 %v9348_v27  ;;  %v1817_v7 = vcvt.f32.s32 %v9366_v50  ;;  %v9373_v50 = vld [vmem:[#allocation76_spill] sm:$0xff] }
 0x707   :  { %v6802_v56 = vpop.permute.xlu2 %2943  ;;  %v6844_v12 = vadd.s32 %v1723_v15, %v1721_v26  ;;  %v9365_v26 = vld [vmem:[#allocation73_spill] sm:$0xff] }
 0x708   :  { %v6826_v16 = vadd.s32 %v1663_v48, %v1661_v52 }
 0x709   :  { %9357 = vst [vmem:[#allocation127_spill] sm:$0xff] %v6844_v12  ;;  %vm2716_vm6 = vcmp.lt.s32.totalorder %v6844_v12, %v6786_v53 }
 0x70a   :  { %9351 = vst [vmem:[#allocation54_spill] sm:$0xff] %v6826_v16  ;;  %vm2711_vm5 = vcmp.lt.s32.totalorder %v6826_v16, %v6647_v61 }
 0x70b   :  { %v2839_v52 = vsel %vm2711_vm5, 1, %v8943_v20 }
 0x70c   :  { %3057 = vperm.xlu1 %4684, %v2838_v63   ;;  %3072 = vperm.xlu0 %4683, %v2843_v54   ;;  %v1698_v63 = vcvt.f32.s32 %v6064_v31  ;;  %v2846_v31 = vsel %vm2718_vm3, 1, %v8943_v20 }
 0x70d   :  { %3051 = vperm.xlu2 %4682, %v2836_v40   ;;  %v9355_v40 = vld [vmem:[#allocation58_spill] sm:$0xff] }
 0x70e   :  { %v6822_v51 = vpop.permute.xlu1 %2934  ;;  %v6824_v0 = vpop.permute.xlu0 %2946  ;;  %v1699_v48 = vshll.u32 %v1698_v63, 16  ;;  %v1781_v27 = vcvt.f32.s32 %v9355_v40  ;;  %v1818_v63 = vcvt.f32.s32 %v9359_v42  ;;  %v9362_v40 = vld [vmem:[#allocation144_spill] sm:$0xff] }
 0x70f   :  { %v6829_v54 = vpop.permute.xlu2 %2952 }
 0x710   :  { %9352 = vst [vmem:[#allocation108_spill] sm:$0xff] %v6829_v54  ;;  %v6846_v61 = vadd.s32 %v1783_v43, %v1781_v27  ;;  %v6853_v60 = vadd.s32 %v1699_v48, %v1697_v30  ;;  %v1757_v43 = vcvt.f32.s32 %v9365_v26  ;;  %v1819_v15 = vshll.u32 %v1818_v63, 16  ;;  %v9370_v63 = vld [vmem:[#allocation83_spill] sm:$0xff] }
 0x711   :  { %v2844_v48 = vsel %vm2716_vm6, 1, %v8943_v20  ;;  %vm3308_vm6 = vcmask 130112  }
 0x712   :  { %9358 = vst [vmem:[#allocation19_spill] sm:$0xff] %v6846_v61  ;;  %vm2721_vm7 = vcmp.lt.s32.totalorder %v6846_v61, %v6786_v53  ;;  %vm2714_vm8 = vcmp.lt.s32.totalorder %v6853_v60, %v6786_v53 }
 0x713   :  { %9361 = vst [vmem:[#allocation57_spill] sm:$0xff] %v6853_v60  ;;  %v2849_v27 = vsel %vm2721_vm7, 1, %v8943_v20  ;;  %v2842_v42 = vsel %vm2714_vm8, 1, %v8943_v20  ;;  %v6873_v60 = vadd.s32 %v1819_v15, %v1817_v7  ;;  %vm8818_vm7 = vcmask 195712  }
 0x714   :  { %3066 = vperm.xlu1 %4684, %v2841_v23   ;;  %3081 = vperm.xlu0 %4683, %v2846_v31   ;;  %v1734_v23 = vcvt.f32.s32 %v9362_v40  ;;  %v9367_v40 = vld [vmem:[#allocation141_spill] sm:$0xff]  ;;  %vm8810_vm8 = vcmask 261312  }
 0x715   :  { %3060 = vperm.xlu2 %4682, %v2839_v52   ;;  %v1759_v52 = vshll.u32 %v1758_v33, 16  ;;  %v1733_v61 = vcvt.f32.s32 %v9367_v40  ;;  %9369 = vst [vmem:[#allocation60_spill] sm:$0xff] %v6873_v60  ;;  %vm2724_vm10 = vcmp.lt.s32.totalorder %v6873_v60, %v6786_v53  ;;  %v9376_v40 = vld [vmem:[#allocation135_spill] sm:$0xff] }
 0x716   :  { %v6849_v28 = vpop.permute.xlu1 %2940  ;;  %v6851_v16 = vpop.permute.xlu0 %2955  ;;  %v1735_v30 = vshll.u32 %v1734_v23, 16  ;;  %v1854_v23 = vcvt.f32.s32 %v9370_v63  ;;  %v2852_v7 = vsel %vm2724_vm10, 1, %v8943_v20  ;;  %v1853_v46 = vcvt.f32.s32 %v9376_v40  ;;  %v9382_v40 = vld [vmem:[#allocation81_spill] sm:$0xff] }
 0x717   :  { %9360 = vst [vmem:[#allocation106_spill] sm:$0xff] %v6851_v16  ;;  %v6856_v31 = vpop.permute.xlu2 %2961  ;;  %v6871_v12 = vadd.s32 %v1759_v52, %v1757_v43  ;;  %v9375_v43 = vld [vmem:[#allocation147_spill] sm:$0xff]  ;;  %v9415_v16 = vld [vmem:[#allocation92_spill] sm:$0xff] }
 0x718   :  { %9363 = vst [vmem:[#allocation22_spill] sm:$0xff] %v6856_v31  ;;  %v6880_v33 = vadd.s32 %v1735_v30, %v1733_v61  ;;  %v1793_v15 = vcvt.f32.s32 %v9375_v43  ;;  %v1855_v52 = vshll.u32 %v1854_v23, 16  ;;  %v1890_v23 = vcvt.f32.s32 %v6143_v34  ;;  %v9384_v34 = vld [vmem:[#allocation150_spill] sm:$0xff] }
 0x719   :  { %9368 = vst [vmem:[#allocation128_spill] sm:$0xff] %v6871_v12  ;;  %vm2719_vm9 = vcmp.lt.s32.totalorder %v6871_v12, %v6786_v53 }
 0x71a   :  { %9372 = vst [vmem:[#allocation29_spill] sm:$0xff] %v6880_v33  ;;  %vm2717_vm11 = vcmp.lt.s32.totalorder %v6880_v33, %v6786_v53  ;;  %v2847_v30 = vsel %vm2719_vm9, 1, %v8943_v20  ;;  %v6900_v33 = vadd.s32 %v1855_v52, %v1853_v46  ;;  %v1891_v52 = vshll.u32 %v1890_v23, 16 }
 0x71b   :  { %v2845_v63 = vsel %vm2717_vm11, 1, %v8943_v20  ;;  %v1831_v46 = vshll.u32 %v1830_v44, 16  ;;  %vm8809_vm11 = vcmask 326912  }
 0x71c   :  { %3075 = vperm.xlu1 %4684, %v2844_v48   ;;  %3090 = vperm.xlu0 %4683, %v2849_v27   ;;  %v1770_v48 = vcvt.f32.s32 %v9373_v50  ;;  %v9377_v50 = vld [vmem:[#allocation71_spill] sm:$0xff]  ;;  %9379 = vst [vmem:[#allocation25_spill] sm:$0xff] %v6900_v33  ;;  %vm2727_vm13 = vcmp.lt.s32.totalorder %v6900_v33, %v6786_v53  ;;  %v9386_v33 = vld [vmem:[#allocation146_spill] sm:$0xff] }
 0x71d   :  { %3069 = vperm.xlu2 %4682, %v2842_v42   ;;  %v1795_v42 = vshll.u32 %v1794_v13, 16  ;;  %v1769_v60 = vcvt.f32.s32 %v9377_v50  ;;  %v6924_v50 = vperm.slane %v6439_v10, 4 }
 0x71e   :  { %v6876_v26 = vpop.permute.xlu1 %2949  ;;  %v6878_v2 = vpop.permute.xlu0 %2964  ;;  %v1771_v61 = vshll.u32 %v1770_v48, 16 }
 0x71f   :  { %9371 = vst [vmem:[#allocation24_spill] sm:$0xff] %v6878_v2  ;;  %v6883_v27 = vpop.permute.xlu2 %2970  ;;  %v6898_v12 = vadd.s32 %v1795_v42, %v1793_v15  ;;  %v1829_v15 = vcvt.f32.s32 %v9384_v34  ;;  %v2855_v42 = vsel %vm2727_vm13, 1, %v8943_v20  ;;  %vm8811_vm13 = vcmask 392512  }
 0x720   :  { %v6907_v13 = vadd.s32 %v1771_v61, %v1769_v60 }
 0x721   :  { %9378 = vst [vmem:[#allocation130_spill] sm:$0xff] %v6898_v12  ;;  %vm2722_vm12 = vcmp.lt.s32.totalorder %v6898_v12, %v6786_v53  ;;  %v1805_v12 = vcvt.f32.s32 %v9386_v33  ;;  %v6928_v34 = vadd.s32 %v1831_v46, %v1829_v15 }
 0x722   :  { %9381 = vst [vmem:[#allocation59_spill] sm:$0xff] %v6907_v13  ;;  %vm2720_vm14 = vcmp.lt.s32.totalorder %v6907_v13, %v6786_v53  ;;  %v2850_v61 = vsel %vm2722_vm12, 1, %v8943_v20 }
 0x723   :  { %9387 = vst [vmem:[#allocation134_spill] sm:$0xff] %v6928_v34  ;;  %vm2725_vm15 = vcmp.lt.s32.totalorder %v6928_v34, %v6786_v53  ;;  %v9394_v34 = vld [vmem:[#allocation148_spill] sm:$0xff] }
 0x724   :  { %3084 = vperm.xlu1 %4684, %v2847_v30   ;;  %3099 = vperm.xlu0 %4683, %v2852_v7   ;;  %v1806_v30 = vcvt.f32.s32 %v9382_v40  ;;  %v2848_v40 = vsel %vm2720_vm14, 1, %v8943_v20  ;;  %v2853_v15 = vsel %vm2725_vm15, 1, %v8943_v20  ;;  %vm3328_vm14 = vcmask 458112  }
 0x725   :  { %3078 = vperm.xlu2 %4682, %v2845_v63   ;;  %v9385_v63 = vld [vmem:[#allocation20_spill] sm:$0xff] }
 0x726   :  { %v6903_v48 = vpop.permute.xlu1 %2958  ;;  %v6905_v43 = vpop.permute.xlu0 %2973  ;;  %v1807_v60 = vshll.u32 %v1806_v30, 16  ;;  %v1889_v55 = vcvt.f32.s32 %v9385_v63  ;;  %v1926_v30 = vcvt.f32.s32 %v6158_v1  ;;  %v1865_v1 = vcvt.f32.s32 %v6152_v9 }
 0x727   :  { %9380 = vst [vmem:[#allocation34_spill] sm:$0xff] %v6903_v48  ;;  %v6910_v7 = vpop.permute.xlu2 %2979 }
 0x728   :  { %v6930_v23 = vadd.s32 %v1891_v52, %v1889_v55  ;;  %v6937_v63 = vadd.s32 %v1807_v60, %v1805_v12  ;;  %v1927_v33 = vshll.u32 %v1926_v30, 16  ;;  %v1867_v52 = vshll.u32 %v1866_v41, 16  ;;  %v9392_v60 = vld [vmem:[#allocation143_spill] sm:$0xff]  ;;  %v9393_v55 = vld [vmem:[#allocation140_spill] sm:$0xff] }
 0x729   :  { %v1925_v49 = vcvt.f32.s32 %v9392_v60  ;;  %v1962_v41 = vcvt.f32.s32 %v6173_v21 }
 0x72a   :  { %9388 = vst [vmem:[#allocation115_spill] sm:$0xff] %v6930_v23  ;;  %vm2730_vm0 = vcmp.lt.s32.totalorder %v6930_v23, %v6924_v50  ;;  %vm2723_vm1 = vcmp.lt.s32.totalorder %v6937_v63, %v6786_v53  ;;  %v1841_v23 = vcvt.f32.s32 %v9394_v34  ;;  %v6959_v30 = vadd.s32 %v1867_v52, %v1865_v1 }
 0x72b   :  { %9390 = vst [vmem:[#allocation35_spill] sm:$0xff] %v6937_v63  ;;  %v2851_v46 = vsel %vm2723_vm1, 1, %v8943_v20  ;;  %v9395_v63 = vld [vmem:[#allocation16_spill] sm:$0xff]  ;;  %v1963_v25 = vshll.u32 %v1962_v41, 16  ;;  %vm3332_vm1 = vcmask 523712  }
 0x72c   :  { %3093 = vperm.xlu1 %4684, %v2850_v61   ;;  %3108 = vperm.xlu0 %4683, %v2855_v42   ;;  %v1842_v61 = vcvt.f32.s32 %v6141_v37  ;;  %v2858_v37 = vsel %vm2730_vm0, 1, %v8943_v20  ;;  %v6957_v9 = vadd.s32 4294967288, %v9395_v63  ;;  %9396 = vst [vmem:[#allocation132_spill] sm:$0xff] %v6959_v30  ;;  %vm2728_vm2 = vcmp.lt.s32.totalorder %v6959_v30, %v6786_v53 }
 0x72d   :  { %3087 = vperm.xlu2 %4682, %v2848_v40   ;;  %v1902_v40 = vcvt.f32.s32 %v9393_v55  ;;  %v9399_v55 = vld [vmem:[#allocation152_spill] sm:$0xff] }
 0x72e   :  { %v6933_v13 = vpop.permute.xlu1 %2967  ;;  %v6935_v44 = vpop.permute.xlu0 %2982  ;;  %v1843_v12 = vshll.u32 %v1842_v61, 16  ;;  %v6961_v61 = vadd.s32 %v1927_v33, %v1925_v49  ;;  %v1878_v34 = vcvt.f32.s32 %v9399_v55  ;;  %v3367_v1 = vperm.slane %v6905_v43, %v6957_v9  ;;  %v9400_v33 = vld [vmem:[#allocation74_spill] sm:$0xff] }
 0x72f   :  { %9389 = vst [vmem:[#allocation65_spill] sm:$0xff] %v6933_v13  ;;  %v6940_v42 = vpop.permute.xlu2 %2988  ;;  %v1903_v21 = vshll.u32 %v1902_v40, 16  ;;  %v1938_v52 = vcvt.f32.s32 %v9400_v33  ;;  %v1901_v55 = vcvt.f32.s32 %v6171_v45  ;;  %v3366_v43 = vperm.slane %v6883_v27, %v9395_v63  ;;  %v9402_v27 = vld [vmem:[#allocation85_spill] sm:$0xff]  ;;  %v9405_v13 = vld [vmem:[#allocation98_spill] sm:$0xff] }
 0x730   :  { %9397 = vst [vmem:[#allocation137_spill] sm:$0xff] %v6961_v61  ;;  %vm2733_vm3 = vcmp.lt.s32.totalorder %v6961_v61, %v6924_v50  ;;  %v1879_v30 = vshll.u32 %v1878_v34, 16  ;;  %v2856_v61 = vsel %vm2728_vm2, 1, %v8943_v20  ;;  %v6996_v33 = vadd.s32 4294967256, %v9395_v63 }
 0x731   :  { %v2861_v40 = vsel %vm2733_vm3, 1, %v8943_v20  ;;  %v1939_v41 = vshll.u32 %v1938_v52, 16  ;;  %v1877_v34 = vcvt.f32.s32 %v9402_v27  ;;  %v1998_v31 = vcvt.f32.s32 %v9405_v13 }
 0x732   :  { %v7010_v52 = vadd.s32 4294967264, %v9395_v63  ;;  %vm3336_vm2 = vcmask 589312  }
 0x733   :  { %v1999_v27 = vshll.u32 %v1998_v31, 16  ;;  %v9411_v31 = vld [vmem:[#allocation89_spill] sm:$0xff] }
 0x734   :  { %3102 = vperm.xlu1 %4684, %v2853_v15   ;;  %3117 = vperm.xlu0 %4683, %v2858_v37   ;;  %v6967_v15 = vadd.s32 4294967280, %v9395_v63  ;;  %v6969_v37 = vadd.s32 %v1843_v12, %v1841_v23  ;;  %v9401_v23 = vld [vmem:[#allocation145_spill] sm:$0xff] }
 0x735   :  { %3096 = vperm.xlu2 %4682, %v2851_v46   ;;  %v1961_v12 = vcvt.f32.s32 %v9401_v23 }
 0x736   :  { %v2977_v59 = vpop.permute.xlu1 %2976  ;;  %v6964_v60 = vpop.permute.xlu0 %2991  ;;  %9398 = vst [vmem:[#allocation117_spill] sm:$0xff] %v6969_v37  ;;  %vm2726_vm5 = vcmp.lt.s32.totalorder %v6969_v37, %v6786_v53  ;;  %v3368_v53 = vsel %vm3308_vm6, %v3367_v1, %v3366_v43  ;;  %v7000_v37 = vadd.s32 %v1903_v21, %v1901_v55  ;;  %v7029_v55 = vadd.s32 4294967248, %v9395_v63 }
 0x737   :  { %v6972_v46 = vpop.permute.xlu2 %2997  ;;  %v3369_v49 = vperm.slane %v2977_v59, %v6967_v15  ;;  %v6991_v59 = vadd.s32 4294967272, %v9395_v63  ;;  %v2854_v45 = vsel %vm2726_vm5, 1, %v8943_v20  ;;  %v7002_v2 = vadd.s32 %v1963_v25, %v1961_v12 }
 0x738   :  { %9403 = vst [vmem:[#allocation122_spill] sm:$0xff] %v7000_v37  ;;  %vm2731_vm9 = vcmp.lt.s32.totalorder %v7000_v37, %v6924_v50  ;;  %vm3340_vm5 = vcmask 654912  }
 0x739   :  { %v3370_v23 = vsel %vm8818_vm7, %v3369_v49, %v3368_v53  ;;  %9404 = vst [vmem:[#allocation136_spill] sm:$0xff] %v7002_v2  ;;  %v9407_v49 = vld [vmem:[#allocation154_spill] sm:$0xff]  ;;  %vm2736_vm10 = vcmp.lt.s32.totalorder %v7002_v2, %v6924_v50 }
 0x73a   :  { %v1914_v53 = vcvt.f32.s32 %v9407_v49  ;;  %v9409_v49 = vld [vmem:[#allocation80_spill] sm:$0xff] }
 0x73c   :  { %3111 = vperm.xlu1 %4684, %v2856_v61   ;;  %3126 = vperm.xlu0 %4683, %v2861_v40   ;;  %v3371_v61 = vperm.slane %v6910_v7, %v6991_v59  ;;  %v7012_v40 = vadd.s32 %v1879_v30, %v1877_v34  ;;  %v9408_v7 = vld [vmem:[#allocation79_spill] sm:$0xff]  ;;  %v3373_v30 = vperm.slane %v6935_v44, %v7010_v52  ;;  %v1915_v34 = vshll.u32 %v1914_v53, 16  ;;  %v9410_v44 = vld [vmem:[#allocation149_spill] sm:$0xff] }
 0x73d   :  { %3105 = vperm.xlu2 %4682, %v2854_v45   ;;  %v1974_v12 = vcvt.f32.s32 %v9408_v7  ;;  %v1937_v45 = vcvt.f32.s32 %v6190_v22  ;;  %v1997_v7 = vcvt.f32.s32 %v9409_v49  ;;  %v2010_v2 = vcvt.f32.s32 %v9410_v44 }
 0x73e   :  { %v2986_v1 = vpop.permute.xlu1 %2985  ;;  %v7007_v43 = vpop.permute.xlu0 %3000  ;;  %9406 = vst [vmem:[#allocation120_spill] sm:$0xff] %v7012_v40  ;;  %v3372_v25 = vsel %vm8810_vm8, %v3371_v61, %v3370_v23  ;;  %vm2729_vm12 = vcmp.lt.s32.totalorder %v7012_v40, %v6924_v50  ;;  %v2859_v61 = vsel %vm2731_vm9, 1, %v8943_v20  ;;  %v7040_v22 = vadd.s32 4294967232, %v9395_v63 }
 0x73f   :  { %v7015_v21 = vpop.permute.xlu2 %3006  ;;  %v3375_v13 = vperm.slane %v2986_v1, %v6996_v33  ;;  %v3374_v23 = vsel %vm8809_vm11, %v3373_v30, %v3372_v25  ;;  %v2864_v1 = vsel %vm2736_vm10, 1, %v8943_v20  ;;  %v2857_v40 = vsel %vm2729_vm12, 1, %v8943_v20 }
 0x740   :  { %v1913_v53 = vcvt.f32.s32 %v9411_v31  ;;  %v3377_v25 = vperm.slane %v6940_v42, %v7029_v55  ;;  %v7046_v30 = vadd.s32 4294967240, %v9395_v63  ;;  %v7048_v49 = vadd.s32 %v1939_v41, %v1937_v45 }
 0x741   :  { %v3376_v37 = vsel %vm8811_vm13, %v3375_v13, %v3374_v23  ;;  %v7050_v13 = vadd.s32 %v1999_v27, %v1997_v7  ;;  %v2034_v23 = vcvt.f32.s32 %v6203_v3  ;;  %v1950_v31 = vcvt.f32.s32 %v9415_v16  ;;  %v9416_v7 = vld [vmem:[#allocation21_spill] sm:$0xff] }
 0x742   :  { %9412 = vst [vmem:[#allocation142_spill] sm:$0xff] %v7048_v49  ;;  %v7055_v44 = vadd.s32 %v1915_v34, %v1913_v53  ;;  %v3378_v48 = vsel %vm3328_vm14, %v3377_v25, %v3376_v37  ;;  %v1975_v54 = vshll.u32 %v1974_v12, 16  ;;  %v3379_v41 = vperm.slane %v6964_v60, %v7046_v30  ;;  %v9417_v25 = vld [vmem:[#allocation87_spill] sm:$0xff] }
 0x743   :  { %9413 = vst [vmem:[#allocation58_spill] sm:$0xff] %v7050_v13  ;;  %vm2734_vm15 = vcmp.lt.s32.totalorder %v7048_v49, %v6924_v50  ;;  %vm2739_vm0 = vcmp.lt.s32.totalorder %v7050_v13, %v6924_v50  ;;  %v2011_v3 = vshll.u32 %v2010_v2, 16  ;;  %v7071_v16 = vadd.s32 4294967224, %v9395_v63 }
 0x744   :  { %3120 = vperm.xlu1 %4684, %v2859_v61   ;;  %3135 = vperm.xlu0 %4683, %v2864_v1   ;;  %9414 = vst [vmem:[#allocation139_spill] sm:$0xff] %v7055_v44  ;;  %vm2732_vm3 = vcmp.lt.s32.totalorder %v7055_v44, %v6924_v50  ;;  %v1973_v37 = vcvt.f32.s32 %v6207_v11  ;;  %v2035_v12 = vshll.u32 %v2034_v23, 16  ;;  %v3380_v60 = vsel %vm3332_vm1, %v3379_v41, %v3378_v48 }
 0x745   :  { %3114 = vperm.xlu2 %4682, %v2857_v40   ;;  %v1951_v45 = vshll.u32 %v1950_v31, 16  ;;  %v2862_v34 = vsel %vm2734_vm15, 1, %v8943_v20  ;;  %v2867_v2 = vsel %vm2739_vm0, 1, %v8943_v20  ;;  %v2033_v53 = vcvt.f32.s32 %v9416_v7  ;;  %v9418_v31 = vld [vmem:[#allocation153_spill] sm:$0xff] }
 0x746   :  { %v2995_v61 = vpop.permute.xlu1 %2994  ;;  %v7053_v1 = vpop.permute.xlu0 %3009  ;;  %v3383_v13 = vperm.slane %v6972_v46, %v7071_v16  ;;  %v2860_v11 = vsel %vm2732_vm3, 1, %v8943_v20  ;;  %v7084_v48 = vadd.s32 4294967216, %v9395_v63  ;;  %v7087_v23 = vadd.s32 4294967208, %v9395_v63 }
 0x747   :  { %v3381_v42 = vperm.slane %v2995_v61, %v7040_v22  ;;  %v7060_v40 = vpop.permute.xlu2 %3015  ;;  %v7090_v41 = vadd.s32 %v1975_v54, %v1973_v37  ;;  %v2070_v46 = vcvt.f32.s32 %v6220_v32  ;;  %v1986_v49 = vcvt.f32.s32 %v6218_v18  ;;  %v9422_v37 = vld [vmem:[#allocation151_spill] sm:$0xff] }
 0x748   :  { %v3385_v44 = vperm.slane %v7007_v43, %v7084_v48  ;;  %vm8799_vm9 = vcmask 720512   ;;  %vm8806_vm15 = vcmask 786112   ;;  %v7112_v32 = vadd.s32 4294967200, %v9395_v63 }
 0x749   :  { %v3382_v27 = vsel %vm3336_vm2, %v3381_v42, %v3380_v60  ;;  %v1949_v42 = vcvt.f32.s32 %v9418_v31  ;;  %9419 = vst [vmem:[#allocation78_spill] sm:$0xff] %v7090_v41  ;;  %v7092_v60 = vadd.s32 %v2035_v12, %v2033_v53  ;;  %v2069_v12 = vcvt.f32.s32 %v9422_v37 }
 0x74a   :  { %vm2737_vm10 = vcmp.lt.s32.totalorder %v7090_v41, %v6924_v50  ;;  %vm8805_vm3 = vcmask 851712   ;;  %v2009_v43 = vcvt.f32.s32 %v6229_v19  ;;  %v3389_v53 = vperm.slane %v7015_v21, %v7112_v32 }
 0x74b   :  { %9420 = vst [vmem:[#allocation144_spill] sm:$0xff] %v7092_v60  ;;  %v7098_v61 = vadd.s32 %v1951_v45, %v1949_v42  ;;  %vm2742_vm12 = vcmp.lt.s32.totalorder %v7092_v60, %v6924_v50  ;;  %v2865_v31 = vsel %vm2737_vm10, 1, %v8943_v20  ;;  %v7134_v21 = vadd.s32 4294967176, %v9395_v63 }
 0x74c   :  { %3129 = vperm.xlu1 %4684, %v2862_v34   ;;  %3144 = vperm.xlu0 %4683, %v2867_v2   ;;  %v3384_v34 = vsel %vm3340_vm5, %v3383_v13, %v3382_v27  ;;  %v2071_v13 = vshll.u32 %v2070_v46, 16  ;;  %v1987_v27 = vshll.u32 %v1986_v49, 16  ;;  %v2870_v42 = vsel %vm2742_vm12, 1, %v8943_v20  ;;  %v9423_v46 = vld [vmem:[#allocation155_spill] sm:$0xff] }
 0x74d   :  { %3123 = vperm.xlu2 %4682, %v2860_v11   ;;  %9421 = vst [vmem:[#allocation129_spill] sm:$0xff] %v7098_v61  ;;  %v3386_v18 = vsel %vm8799_vm9, %v3385_v44, %v3384_v34  ;;  %vm2735_vm0 = vcmp.lt.s32.totalorder %v7098_v61, %v6924_v50  ;;  %vm3356_vm9 = vcmask 917312   ;;  %v7127_v44 = vperm.slane %v6439_v10, 5 }
 0x74e   :  { %v3004_v2 = vpop.permute.xlu1 %3003  ;;  %v7096_v7 = vpop.permute.xlu0 %3018  ;;  %v2863_v19 = vsel %vm2735_vm0, 1, %v8943_v20  ;;  %v7131_v49 = vadd.s32 4294967184, %v9395_v63  ;;  %v1985_v34 = vcvt.f32.s32 %v9423_v46  ;;  %v7138_v37 = vadd.s32 %v2011_v3, %v2009_v43 }
 0x74f   :  { %v3387_v11 = vperm.slane %v3004_v2, %v7087_v23  ;;  %v7104_v54 = vpop.permute.xlu2 %3024  ;;  %v7124_v2 = vadd.s32 4294967192, %v9395_v63  ;;  %vm8855_vm10 = vcmask 982912   ;;  %v2022_v10 = vcvt.f32.s32 %v6237_v47 }
 0x750   :  { %v7145_v61 = vadd.s32 %v1987_v27, %v1985_v34  ;;  %v3395_v3 = vperm.slane %v7060_v40, %v7134_v21  ;;  %vm2740_vm12 = vcmp.lt.s32.totalorder %v7138_v37, %v6924_v50  ;;  %v2045_v47 = vcvt.f32.s32 %v6248_v38 }
 0x751   :  { %v3388_v45 = vsel %vm8806_vm15, %v3387_v11, %v3386_v18  ;;  %v7140_v18 = vadd.s32 %v2071_v13, %v2069_v12  ;;  %v2023_v40 = vshll.u32 %v2022_v10, 16  ;;  %v2868_v43 = vsel %vm2740_vm12, 1, %v8943_v20 }
 0x752   :  { %v3390_v11 = vsel %vm8805_vm3, %v3389_v53, %v3388_v45  ;;  %vm8856_vm3 = vcmask 1048512   ;;  %vm2738_vm15 = vcmp.lt.s32.totalorder %v7145_v61, %v6924_v50  ;;  %v9424_v27 = vcvt.f32.s32 %v9417_v25 }
 0x753   :  { %vm2745_vm0 = vcmp.lt.s32.totalorder %v7140_v18, %v7127_v44  ;;  %v2142_v10 = vcvt.f32.s32 %v6250_v62  ;;  %v2058_v25 = vcvt.f32.s32 %v6255_v39 }
 0x754   :  { %3138 = vperm.xlu1 %4684, %v2865_v31   ;;  %3153 = vperm.xlu0 %4683, %v2870_v42   ;;  %v2106_v31 = vcvt.f32.s32 %v6235_v29  ;;  %v3391_v42 = vperm.slane %v7053_v1, %v7124_v2  ;;  %v2873_v13 = vsel %vm2745_vm0, 1, %v8943_v20  ;;  %v2047_v53 = vshll.u32 %v9424_v27, 16 }
 0x755   :  { %3132 = vperm.xlu2 %4682, %v2863_v19   ;;  %v9425_v19 = vld [vmem:[#allocation95_spill] sm:$0xff] }
 0x756   :  { %v3013_v60 = vpop.permute.xlu1 %3012  ;;  %v3028_v41 = vpop.permute.xlu0 %3027  ;;  %v3392_v12 = vsel %vm3356_vm9, %v3391_v42, %v3390_v11  ;;  %v2107_v1 = vshll.u32 %v2106_v31, 16  ;;  %v2105_v34 = vcvt.f32.s32 %v9425_v19  ;;  %v2866_v11 = vsel %vm2738_vm15, 1, %v8943_v20  ;;  %v9426_v42 = vld [vmem:[#allocation157_spill] sm:$0xff]  ;;  %v9428_v19 = vld [vmem:[#allocation94_spill] sm:$0xff] }
 0x757   :  { %v3393_v46 = vperm.slane %v3013_v60, %v7131_v49  ;;  %v7149_v45 = vpop.permute.xlu2 %3033  ;;  %v2021_v38 = vcvt.f32.s32 %v9426_v42  ;;  %v7172_v31 = vadd.s32 %v2047_v53, %v2045_v47  ;;  %v2082_v47 = vcvt.f32.s32 %v9428_v19  ;;  %v9430_v19 = vld [vmem:[#allocation110_spill] sm:$0xff] }
 0x758   :  { %v3402_v62 = vperm.slane %v3028_v41, %v6991_v59 }
 0x759   :  { %v3394_v29 = vsel %vm8855_vm10, %v3393_v46, %v3392_v12  ;;  %9427 = vst [vmem:[#allocation73_spill] sm:$0xff] %v7172_v31  ;;  %v7174_v46 = vadd.s32 %v2107_v1, %v2105_v34  ;;  %v3400_v1 = vperm.slane %v7104_v54, %v6967_v15  ;;  %vm2743_vm15 = vcmp.lt.s32.totalorder %v7172_v31, %v6924_v50 }
 0x75a   :  { %v7163_v60 = vsel %vm8856_vm3, %v3395_v3, %v3394_v29  ;;  %v7177_v29 = vadd.s32 %v2023_v40, %v2021_v38  ;;  %v2143_v40 = vshll.u32 %v2142_v10, 16  ;;  %v2059_v34 = vshll.u32 %v2058_v25, 16 }
 0x75b   :  { %vm2748_vm12 = vcmp.lt.s32.totalorder %v7174_v46, %v7127_v44  ;;  %v2871_v54 = vsel %vm2743_vm15, 1, %v8943_v20  ;;  %v2083_v38 = vshll.u32 %v2082_v47, 16  ;;  %v2094_v10 = vcvt.f32.s32 %v6277_v8  ;;  %v9433_v8 = vld [vmem:[#allocation158_spill] sm:$0xff] }
 0x75c   :  { %3147 = vperm.xlu1 %4684, %v2868_v43   ;;  %3162 = vperm.xlu0 %4683, %v2873_v13   ;;  %v3397_v43 = vperm.slane %v7096_v7, %v9395_v63  ;;  %vm2741_vm0 = vcmp.lt.s32.totalorder %v7177_v29, %v6924_v50  ;;  %v2081_v7 = vcvt.f32.s32 %v6267_v57 }
 0x75d   :  { %3141 = vperm.xlu2 %4682, %v2866_v11   ;;  %v2876_v11 = vsel %vm2748_vm12, 1, %v8943_v20 }
 0x75e   :  { %v3022_v3 = vpop.permute.xlu1 %3021  ;;  %v3037_v12 = vpop.permute.xlu0 %3036  ;;  %v7204_v57 = vadd.s32 %v2083_v38, %v2081_v7  ;;  %v2154_v7 = vcvt.f32.s32 %v9433_v8  ;;  %v2095_v38 = vshll.u32 %v2094_v10, 16  ;;  %v9435_v10 = vld [vmem:[#allocation160_spill] sm:$0xff] }
 0x75f   :  { %v3398_v13 = vperm.slane %v3022_v3, %v6957_v9  ;;  %v7183_v27 = vpop.permute.xlu2 %3042  ;;  %v9429_v3 = vld [vmem:[#allocation156_spill] sm:$0xff] }
 0x760   :  { %v2141_v41 = vcvt.f32.s32 %v9429_v3  ;;  %vm2746_vm15 = vcmp.lt.s32.totalorder %v7204_v57, %v7127_v44 }
 0x761   :  { %v3399_v39 = vsel %vm3308_vm6, %v3398_v13, %v3397_v43  ;;  %v2869_v43 = vsel %vm2741_vm0, 1, %v8943_v20  ;;  %v2057_v13 = vcvt.f32.s32 %v6210_v58  ;;  %v3406_v58 = vperm.slane %v7149_v45, %v6996_v33 }
 0x762   :  { %v3401_v53 = vsel %vm8818_vm7, %v3400_v1, %v3399_v39  ;;  %v7207_v25 = vadd.s32 %v2143_v40, %v2141_v41  ;;  %v2178_v1 = vcvt.f32.s32 %v9430_v19  ;;  %v3408_v40 = vperm.slane %v3037_v12, %v7029_v55 }
 0x763   :  { %v3403_v42 = vsel %vm8810_vm8, %v3402_v62, %v3401_v53  ;;  %v7210_v47 = vadd.s32 %v2059_v34, %v2057_v13  ;;  %v2117_v41 = vcvt.f32.s32 %v6284_v17  ;;  %v3307_v13 = vperm.slane %v6797_v35, %v6957_v9 }
 0x764   :  { %3156 = vperm.xlu1 %4684, %v2871_v54   ;;  %3171 = vperm.xlu0 %4683, %v2876_v11   ;;  %v9432_v11 = vld [vmem:[#allocation90_spill] sm:$0xff]  ;;  %vm2751_vm12 = vcmp.lt.s32.totalorder %v7207_v25, %v7127_v44  ;;  %v2874_v19 = vsel %vm2746_vm15, 1, %v8943_v20  ;;  %v3305_v35 = vperm.slane %v6726_v24, %v9395_v63 }
 0x765   :  { %3150 = vperm.xlu2 %4682, %v2869_v43   ;;  %9431 = vst [vmem:[#allocation131_spill] sm:$0xff] %v7210_v47  ;;  %v2118_v3 = vcvt.f32.s32 %v9432_v11  ;;  %vm2744_vm0 = vcmp.lt.s32.totalorder %v7210_v47, %v6924_v50  ;;  %v2179_v43 = vshll.u32 %v2178_v1, 16  ;;  %v2130_v50 = vcvt.f32.s32 %v6295_v6 }
 0x766   :  { %v3031_v39 = vpop.permute.xlu1 %3030  ;;  %v3046_v62 = vpop.permute.xlu0 %3045  ;;  %v2872_v17 = vsel %vm2744_vm0, 1, %v8943_v20  ;;  %v2093_v1 = vcvt.f32.s32 %v9435_v10 }
 0x767   :  { %v3404_v53 = vperm.slane %v3031_v39, %v7010_v52  ;;  %v7213_v54 = vpop.permute.xlu2 %3051  ;;  %v2879_v39 = vsel %vm2751_vm12, 1, %v8943_v20  ;;  %v2119_v11 = vshll.u32 %v2118_v3, 16 }
 0x769   :  { %v3405_v34 = vsel %vm8809_vm11, %v3404_v53, %v3403_v42  ;;  %v9434_v42 = vld [vmem:[#allocation27_spill] sm:$0xff] }
 0x76a   :  { %v3407_v45 = vsel %vm8811_vm13, %v3406_v58, %v3405_v34  ;;  %v2177_v53 = vcvt.f32.s32 %v9434_v42  ;;  %v7240_v58 = vadd.s32 %v2119_v11, %v2117_v41  ;;  %v3311_v34 = vperm.slane %v6795_v5, %v6967_v15 }
 0x76b   :  { %v3409_v12 = vsel %vm3328_vm14, %v3408_v40, %v3407_v45  ;;  %v9436_v40 = vld [vmem:[#allocation103_spill] sm:$0xff]  ;;  %v3309_v42 = vsel %vm3308_vm6, %v3307_v13, %v3305_v35  ;;  %v2131_v41 = vshll.u32 %v2130_v50, 16  ;;  %v2153_v5 = vcvt.f32.s32 %v6306_v4  ;;  %v9438_v35 = vld [vmem:[#allocation174_spill] sm:$0xff] }
 0x76c   :  { %3165 = vperm.xlu1 %4684, %v2874_v19   ;;  %3180 = vperm.xlu0 %4683, %v2879_v39   ;;  %v7242_v8 = vadd.s32 %v2179_v43, %v2177_v53  ;;  %v2214_v3 = vcvt.f32.s32 %v9436_v40  ;;  %v2155_v19 = vshll.u32 %v2154_v7, 16  ;;  %v7247_v39 = vadd.s32 %v2095_v38, %v2093_v1 }
 0x76d   :  { %3159 = vperm.xlu2 %4682, %v2872_v17   ;;  %v3412_v43 = vperm.slane %v7183_v27, %v7040_v22  ;;  %vm2749_vm15 = vcmp.lt.s32.totalorder %v7240_v58, %v7127_v44  ;;  %v3414_v7 = vperm.slane %v3046_v62, %v7071_v16  ;;  %v3313_v11 = vsel %vm8818_vm7, %v3311_v34, %v3309_v42  ;;  %v9437_v17 = vld [vmem:[#allocation161_spill] sm:$0xff] }
 0x76e   :  { %v3040_v6 = vpop.permute.xlu1 %3039  ;;  %v3055_v45 = vpop.permute.xlu0 %3054  ;;  %vm2754_vm12 = vcmp.lt.s32.totalorder %v7242_v8, %v7127_v44  ;;  %vm2747_vm0 = vcmp.lt.s32.totalorder %v7247_v39, %v7127_v44  ;;  %v2215_v13 = vshll.u32 %v2214_v3, 16  ;;  %v3319_v27 = vperm.slane %v6822_v51, %v7010_v52  ;;  %v9439_v51 = vld [vmem:[#allocation159_spill] sm:$0xff] }
 0x76f   :  { %v3410_v10 = vperm.slane %v3040_v6, %v7046_v30  ;;  %v7251_v24 = vpop.permute.xlu2 %3060  ;;  %v3315_v50 = vperm.slane %v6749_v14, %v6991_v59  ;;  %v2877_v4 = vsel %vm2749_vm15, 1, %v8943_v20  ;;  %v2882_v62 = vsel %vm2754_vm12, 1, %v8943_v20  ;;  %v9440_v6 = vld [vmem:[#allocation162_spill] sm:$0xff] }
 0x770   :  { %v2213_v1 = vcvt.f32.s32 %v9437_v17  ;;  %v2166_v40 = vcvt.f32.s32 %v9438_v35  ;;  %v2875_v3 = vsel %vm2747_vm0, 1, %v8943_v20  ;;  %v2190_v34 = vcvt.f32.s32 %v9439_v51  ;;  %v9443_v35 = vld [vmem:[#allocation163_spill] sm:$0xff] }
 0x771   :  { %v3411_v38 = vsel %vm3332_vm1, %v3410_v10, %v3409_v12  ;;  %v2129_v42 = vcvt.f32.s32 %v9440_v6  ;;  %v7278_v10 = vadd.s32 %v2155_v19, %v2153_v5  ;;  %v3317_v14 = vsel %vm8810_vm8, %v3315_v50, %v3313_v11  ;;  %v9445_v50 = vld [vmem:[#allocation176_spill] sm:$0xff] }
 0x772   :  { %v3413_v53 = vsel %vm3336_vm2, %v3412_v43, %v3411_v38  ;;  %v7281_v43 = vadd.s32 %v2215_v13, %v2213_v1  ;;  %v2226_v51 = vcvt.f32.s32 %v9443_v35  ;;  %v3323_v19 = vperm.slane %v6772_v36, %v6996_v33 }
 0x773   :  { %v3415_v12 = vsel %vm3340_vm5, %v3414_v7, %v3413_v53  ;;  %v9442_v7 = vld [vmem:[#allocation170_spill] sm:$0xff]  ;;  %v3321_v53 = vsel %vm8809_vm11, %v3319_v27, %v3317_v14  ;;  %v7288_v47 = vadd.s32 %v2131_v41, %v2129_v42  ;;  %v2167_v11 = vshll.u32 %v2166_v40, 16 }
 0x774   :  { %3174 = vperm.xlu1 %4684, %v2877_v4   ;;  %3189 = vperm.xlu0 %4683, %v2882_v62   ;;  %9441 = vst [vmem:[#allocation141_spill] sm:$0xff] %v7281_v43  ;;  %v2250_v38 = vcvt.f32.s32 %v9442_v7  ;;  %v3327_v4 = vperm.slane %v6849_v28, %v7029_v55  ;;  %v3418_v27 = vperm.slane %v7213_v54, %v7087_v23  ;;  %vm9444_vm0 = vcmask 720512   ;;  %v9448_v7 = vld [vmem:[#allocation164_spill] sm:$0xff] }
 0x775   :  { %3168 = vperm.xlu2 %4682, %v2875_v3   ;;  %vm2752_vm15 = vcmp.lt.s32.totalorder %v7278_v10, %v7127_v44  ;;  %vm2757_vm12 = vcmp.lt.s32.totalorder %v7281_v43, %v7127_v44  ;;  %v3325_v28 = vsel %vm8811_vm13, %v3323_v19, %v3321_v53  ;;  %v3420_v41 = vperm.slane %v3055_v45, %v7112_v32 }
 0x776   :  { %v3049_v62 = vpop.permute.xlu1 %3048  ;;  %v3064_v17 = vpop.permute.xlu0 %3063  ;;  %vm2750_vm11 = vcmp.lt.s32.totalorder %v7288_v47, %v7127_v44  ;;  %v2189_v1 = vcvt.f32.s32 %v9445_v50  ;;  %v2251_v40 = vshll.u32 %v2250_v38, 16  ;;  %v3329_v54 = vsel %vm3328_vm14, %v3327_v4, %v3325_v28  ;;  %v9449_v4 = vld [vmem:[#allocation165_spill] sm:$0xff] }
 0x777   :  { %v3416_v5 = vperm.slane %v3049_v62, %v7084_v48  ;;  %v7293_v13 = vpop.permute.xlu2 %3069  ;;  %vm9446_vm8 = vcmask 786112   ;;  %v3331_v6 = vperm.slane %v6802_v56, %v7046_v30  ;;  %v2880_v42 = vsel %vm2752_vm15, 1, %v8943_v20  ;;  %vm9457_vm15 = vmmov %vm9444_vm0 }
 0x778   :  { %v2885_v14 = vsel %vm2757_vm12, 1, %v8943_v20  ;;  %vm9447_vm13 = vcmask 851712   ;;  %v2249_v53 = vcvt.f32.s32 %v9448_v7  ;;  %v2878_v38 = vsel %vm2750_vm11, 1, %v8943_v20  ;;  %v9454_v7 = vld [vmem:[#allocation182_spill] sm:$0xff] }
 0x779   :  { %v3417_v36 = vsel %vm9444_vm0, %v3416_v5, %v3415_v12  ;;  %v2191_v12 = vshll.u32 %v2190_v34, 16  ;;  %v2227_v62 = vshll.u32 %v2226_v51, 16  ;;  %v2165_v35 = vcvt.f32.s32 %v9449_v4  ;;  %v9451_v34 = vld [vmem:[#allocation173_spill] sm:$0xff]  ;;  %v9452_v51 = vld [vmem:[#allocation166_spill] sm:$0xff] }
 0x77a   :  { %v3419_v3 = vsel %vm9446_vm8, %v3418_v27, %v3417_v36  ;;  %v3333_v19 = vsel %vm3332_vm1, %v3331_v6, %v3329_v54  ;;  %v3339_v56 = vperm.slane %v6876_v26, %v7071_v16  ;;  %v7322_v27 = vadd.s32 %v2251_v40, %v2249_v53  ;;  %v9453_v54 = vld [vmem:[#allocation179_spill] sm:$0xff] }
 0x77b   :  { %v3421_v45 = vsel %vm9447_vm13, %v3420_v41, %v3419_v3  ;;  %v7320_v5 = vadd.s32 %v2191_v12, %v2189_v1  ;;  %v2286_v28 = vcvt.f32.s32 %v9451_v34  ;;  %v3335_v41 = vperm.slane %v6824_v0, %v7040_v22 }
 0x77c   :  { %3183 = vperm.xlu1 %4684, %v2880_v42   ;;  %3198 = vperm.xlu0 %4683, %v2885_v14   ;;  %9450 = vst [vmem:[#allocation83_spill] sm:$0xff] %v7322_v27  ;;  %v2285_v3 = vcvt.f32.s32 %v9452_v51  ;;  %v7328_v42 = vadd.s32 %v2167_v11, %v2165_v35  ;;  %v2202_v6 = vcvt.f32.s32 %v9453_v54  ;;  %v3424_v40 = vperm.slane %v7251_v24, %v7131_v49  ;;  %v9455_v24 = vld [vmem:[#allocation108_spill] sm:$0xff] }
 0x77d   :  { %3177 = vperm.xlu2 %4682, %v2878_v38   ;;  %v3337_v1 = vsel %vm3336_vm2, %v3335_v41, %v3333_v19  ;;  %vm2755_vm8 = vcmp.lt.s32.totalorder %v7320_v5, %v7127_v44  ;;  %vm2760_vm11 = vcmp.lt.s32.totalorder %v7322_v27, %v7127_v44  ;;  %v3426_v11 = vperm.slane %v3064_v17, %v7134_v21 }
 0x77e   :  { %v3058_v36 = vpop.permute.xlu1 %3057  ;;  %v3073_v50 = vpop.permute.xlu0 %3072  ;;  %v3341_v0 = vsel %vm3340_vm5, %v3339_v56, %v3337_v1  ;;  %vm2753_vm13 = vcmp.lt.s32.totalorder %v7328_v42, %v7127_v44  ;;  %v2225_v53 = vcvt.f32.s32 %v9454_v7  ;;  %v2287_v38 = vshll.u32 %v2286_v28, 16  ;;  %v9458_v28 = vld [vmem:[#allocation34_spill] sm:$0xff]  ;;  %v9460_v1 = vld [vmem:[#allocation167_spill] sm:$0xff] }
 0x77f   :  { %v3422_v26 = vperm.slane %v3058_v36, %v7124_v2  ;;  %v7332_v14 = vpop.permute.xlu2 %3078  ;;  %v3343_v4 = vperm.slane %v9455_v24, %v7084_v48  ;;  %v2203_v19 = vshll.u32 %v2202_v6, 16  ;;  %v2883_v56 = vsel %vm2755_vm8, 1, %v8943_v20  ;;  %v9459_v6 = vld [vmem:[#allocation101_spill] sm:$0xff] }
 0x780   :  { %v2888_v17 = vsel %vm2760_vm11, 1, %v8943_v20  ;;  %v3351_v51 = vperm.slane %v9458_v28, %v7112_v32  ;;  %v2881_v54 = vsel %vm2753_vm13, 1, %v8943_v20  ;;  %v7366_v7 = vadd.s32 %v2227_v62, %v2225_v53  ;;  %v9463_v24 = vld [vmem:[#allocation185_spill] sm:$0xff]  ;;  %v9468_v53 = vld [vmem:[#allocation188_spill] sm:$0xff] }
 0x781   :  { %v3423_v12 = vsel %vm3356_vm9, %v3422_v26, %v3421_v45  ;;  %v9456_v45 = vld [vmem:[#allocation26_spill] sm:$0xff]  ;;  %v3345_v36 = vsel %vm9457_vm15, %v3343_v4, %v3341_v0  ;;  %v2262_v26 = vcvt.f32.s32 %v9459_v6  ;;  %v7369_v0 = vadd.s32 %v2287_v38, %v2285_v3  ;;  %v9464_v4 = vld [vmem:[#allocation177_spill] sm:$0xff] }
 0x782   :  { %v3425_v35 = vsel %vm8855_vm10, %v3424_v40, %v3423_v12  ;;  %v7356_v41 = vperm.slane %v9456_v45, 6  ;;  %v2201_v40 = vcvt.f32.s32 %v9460_v1  ;;  %9462 = vst [vmem:[#allocation76_spill] sm:$0xff] %v7366_v7  ;;  %v2322_v28 = vcvt.f32.s32 %v9464_v4  ;;  %v9470_v4 = vld [vmem:[#allocation65_spill] sm:$0xff] }
 0x783   :  { %v7351_v34 = vsel %vm8856_vm3, %v3426_v11, %v3425_v35  ;;  %v9461_v11 = vld [vmem:[#allocation106_spill] sm:$0xff]  ;;  %v2238_v35 = vcvt.f32.s32 %v9463_v24  ;;  %vm9466_vm12 = vcmask 786112   ;;  %v3429_v1 = vperm.slane %v7293_v13, %v6957_v9 }
 0x784   :  { %3192 = vperm.xlu1 %4684, %v2883_v56   ;;  %3207 = vperm.xlu0 %4683, %v2888_v17   ;;  %v3347_v12 = vperm.slane %v9461_v11, %v7087_v23  ;;  %v7372_v27 = vadd.s32 %v2203_v19, %v2201_v40  ;;  %vm9467_vm0 = vcmask 851712   ;;  %v3431_v3 = vperm.slane %v3073_v50, %v6967_v15  ;;  %v9469_v19 = vld [vmem:[#allocation22_spill] sm:$0xff] }
 0x785   :  { %3186 = vperm.xlu2 %4682, %v2881_v54   ;;  %vm2758_vm8 = vcmp.lt.s32.totalorder %v7366_v7, %v7127_v44  ;;  %vm2763_vm11 = vcmp.lt.s32.totalorder %v7369_v0, %v7356_v41  ;;  %v2261_v38 = vcvt.f32.s32 %v9468_v53  ;;  %v2263_v40 = vshll.u32 %v2262_v26, 16 }
 0x786   :  { %v3067_v56 = vpop.permute.xlu1 %3066  ;;  %v3082_v17 = vpop.permute.xlu0 %3081  ;;  %9465 = vst [vmem:[#allocation62_spill] sm:$0xff] %v7372_v27  ;;  %v3349_v6 = vsel %vm9466_vm12, %v3347_v12, %v3345_v36  ;;  %v3355_v36 = vperm.slane %v9469_v19, %v7124_v2  ;;  %vm2756_vm13 = vcmp.lt.s32.totalorder %v7372_v27, %v7127_v44  ;;  %v2323_v12 = vshll.u32 %v2322_v28, 16  ;;  %v9471_v19 = vld [vmem:[#allocation55_spill] sm:$0xff] }
 0x787   :  { %v3428_v11 = vperm.slane %v3067_v56, %v9395_v63  ;;  %v7378_v54 = vpop.permute.xlu2 %3087  ;;  %v3353_v62 = vsel %vm9467_vm0, %v3351_v51, %v3349_v6  ;;  %v2239_v51 = vshll.u32 %v2238_v35, 16  ;;  %v3363_v56 = vperm.slane %v9470_v4, %v7134_v21  ;;  %v9473_v35 = vld [vmem:[#allocation168_spill] sm:$0xff]  ;;  %v9476_v4 = vld [vmem:[#allocation181_spill] sm:$0xff] }
 0x788   :  { %v3357_v24 = vsel %vm3356_vm9, %v3355_v36, %v3353_v62  ;;  %v2886_v6 = vsel %vm2758_vm8, 1, %v8943_v20  ;;  %v2891_v53 = vsel %vm2763_vm11, 1, %v8943_v20  ;;  %v2321_v7 = vcvt.f32.s32 %v9471_v19 }
 0x789   :  { %v3430_v13 = vsel %vm3308_vm6, %v3429_v1, %v3428_v11  ;;  %v9472_v1 = vld [vmem:[#allocation24_spill] sm:$0xff]  ;;  %v2884_v26 = vsel %vm2756_vm13, 1, %v8943_v20  ;;  %v2298_v28 = vcvt.f32.s32 %v9473_v35  ;;  %v7404_v36 = vadd.s32 %v2263_v40, %v2261_v38 }
 0x78a   :  { %v3432_v50 = vsel %vm8818_vm7, %v3431_v3, %v3430_v13  ;;  %v3359_v11 = vperm.slane %v9472_v1, %v7131_v49  ;;  %v9474_v3 = vld [vmem:[#allocation169_spill] sm:$0xff]  ;;  %vm8817_vm15 = vcmask 1041409   ;;  %v7406_v13 = vadd.s32 %v2323_v12, %v2321_v7 }
 0x78b   :  { %v2237_v62 = vcvt.f32.s32 %v9474_v3  ;;  %v2358_v43 = vcvt.f32.s32 %v9476_v4  ;;  %vm8853_vm12 = vcmask 1042434   ;;  %v3435_v12 = vperm.slane %v7332_v14, %v7010_v52  ;;  %v9483_v4 = vld [vmem:[#allocation107_spill] sm:$0xff] }
 0x78c   :  { %3201 = vperm.xlu1 %4684, %v2886_v6   ;;  %3216 = vperm.xlu0 %4683, %v2891_v53   ;;  %9475 = vst [vmem:[#allocation147_spill] sm:$0xff] %v7406_v13  ;;  %v3361_v19 = vsel %vm8855_vm10, %v3359_v11, %v3357_v24  ;;  %v9478_v53 = vld [vmem:[#allocation191_spill] sm:$0xff]  ;;  %vm2761_vm0 = vcmp.lt.s32.totalorder %v7404_v36, %v7356_v41  ;;  %vm9479_vm11 = vcmask 261312   ;;  %vm9482_vm7 = vcmask 392512  }
 0x78d   :  { %3195 = vperm.xlu2 %4682, %v2884_v26   ;;  %v7410_v6 = vadd.s32 %v2239_v51, %v2237_v62  ;;  %v2274_v27 = vcvt.f32.s32 %v9478_v53  ;;  %v3365_v35 = vsel %vm8856_vm3, %v3363_v56, %v3361_v19  ;;  %vm2766_vm8 = vcmp.lt.s32.totalorder %v7406_v13, %v7356_v41 }
 0x78e   :  { %v3076_v31 = vpop.permute.xlu1 %3075  ;;  %v3091_v1 = vpop.permute.xlu0 %3090  ;;  %v3584_v7 = vsel %vm8817_vm15, %v7163_v60, %v3365_v35  ;;  %v3437_v51 = vperm.slane %v3082_v17, %v6996_v33  ;;  %v9480_v60 = vld [vmem:[#allocation195_spill] sm:$0xff]  ;;  %v2359_v14 = vshll.u32 %v2358_v43, 16  ;;  %vm9481_vm15 = vcmask 326912  }
 0x78f   :  { %9477 = vst [vmem:[#allocation135_spill] sm:$0xff] %v7410_v6  ;;  %v3433_v38 = vperm.slane %v3076_v31, %v6991_v59  ;;  %v7415_v40 = vpop.permute.xlu2 %3096  ;;  %vm2759_vm13 = vcmp.lt.s32.totalorder %v7410_v6, %v7127_v44  ;;  %v7431_v31 = vsel %vm8853_vm12, %v7351_v34, %v3584_v7  ;;  %v2297_v56 = vcvt.f32.s32 %v9480_v60  ;;  %v9484_v34 = vld [vmem:[#allocation172_spill] sm:$0xff] }
 0x790   :  { %v2275_v26 = vshll.u32 %v2274_v27, 16  ;;  %v2889_v3 = vsel %vm2761_vm0, 1, %v8943_v20  ;;  %v2894_v62 = vsel %vm2766_vm8, 1, %v8943_v20  ;;  %v2357_v19 = vcvt.f32.s32 %v9483_v4  ;;  %v9487_v27 = vld [vmem:[#allocation186_spill] sm:$0xff] }
 0x791   :  { %v3434_v24 = vsel %vm9479_vm11, %v3433_v38, %v3432_v50  ;;  %v2299_v50 = vshll.u32 %v2298_v28, 16  ;;  %v2887_v44 = vsel %vm2759_vm13, 1, %v8943_v20  ;;  %v2273_v53 = vcvt.f32.s32 %v9484_v34  ;;  %v9488_v28 = vld [vmem:[#allocation198_spill] sm:$0xff] }
 0x792   :  { %v3436_v11 = vsel %vm9481_vm15, %v3435_v12, %v3434_v24  ;;  %v7443_v35 = vadd.s32 %v2359_v14, %v2357_v19  ;;  %v2394_v38 = vcvt.f32.s32 %v9487_v27  ;;  %v3443_v14 = vperm.slane %v3091_v1, %v7040_v22 }
 0x793   :  { %v3438_v17 = vsel %vm9482_vm7, %v3437_v51, %v3436_v11  ;;  %v7441_v43 = vadd.s32 %v2299_v50, %v2297_v56  ;;  %v7446_v24 = vadd.s32 %v2275_v26, %v2273_v53  ;;  %v2310_v51 = vcvt.f32.s32 %v9488_v28  ;;  %v9490_v50 = vld [vmem:[#allocation201_spill] sm:$0xff]  ;;  %v9491_v28 = vld [vmem:[#allocation178_spill] sm:$0xff] }
 0x794   :  { %3210 = vperm.xlu1 %4684, %v2889_v3   ;;  %3225 = vperm.xlu0 %4683, %v2894_v62   ;;  %9486 = vst [vmem:[#allocation81_spill] sm:$0xff] %v7443_v35  ;;  %v9489_v3 = vld [vmem:[#allocation171_spill] sm:$0xff]  ;;  %v3441_v56 = vperm.slane %v7378_v54, %v7046_v30  ;;  %vm2769_vm15 = vcmp.lt.s32.totalorder %v7443_v35, %v7356_v41  ;;  %v2333_v4 = vcvt.f32.s32 %v9490_v50  ;;  %v2395_v19 = vshll.u32 %v2394_v38, 16  ;;  %v9496_v50 = vld [vmem:[#allocation192_spill] sm:$0xff] }
 0x795   :  { %3204 = vperm.xlu2 %4682, %v2887_v44   ;;  %9485 = vst [vmem:[#allocation71_spill] sm:$0xff] %v7441_v43  ;;  %v2334_v62 = vcvt.f32.s32 %v9489_v3  ;;  %vm2764_vm7 = vcmp.lt.s32.totalorder %v7441_v43, %v7356_v41  ;;  %vm2762_vm0 = vcmp.lt.s32.totalorder %v7446_v24, %v7356_v41  ;;  %v2311_v34 = vshll.u32 %v2310_v51, 16 }
 0x796   :  { %v3085_v7 = vpop.permute.xlu1 %3084  ;;  %v3100_v12 = vpop.permute.xlu0 %3099  ;;  %v2892_v54 = vsel %vm2764_vm7, 1, %v8943_v20  ;;  %v2897_v53 = vsel %vm2769_vm15, 1, %v8943_v20  ;;  %v2393_v1 = vcvt.f32.s32 %v9491_v28  ;;  %v2430_v6 = vcvt.f32.s32 %v9496_v50 }
 0x797   :  { %v3439_v60 = vperm.slane %v3085_v7, %v7029_v55  ;;  %v7450_v11 = vpop.permute.xlu2 %3105  ;;  %v2335_v7 = vshll.u32 %v2334_v62, 16  ;;  %vm9500_vm7 = vcmask 720512   ;;  %vm9501_vm15 = vcmask 786112  }
 0x798   :  { %vm9699_vm12 = vcmask 851712  }
 0x799   :  { %v3440_v26 = vsel %vm3328_vm14, %v3439_v60, %v3438_v17  ;;  %v2890_v17 = vsel %vm2762_vm0, 1, %v8943_v20  ;;  %v9492_v60 = vld [vmem:[#allocation175_spill] sm:$0xff]  ;;  %v7471_v38 = vadd.s32 %v2335_v7, %v2333_v4  ;;  %v3449_v4 = vperm.slane %v3100_v12, %v7087_v23 }
 0x79a   :  { %v3442_v44 = vsel %vm3332_vm1, %v3441_v56, %v3440_v26  ;;  %v2309_v3 = vcvt.f32.s32 %v9492_v60  ;;  %v9494_v56 = vld [vmem:[#allocation204_spill] sm:$0xff]  ;;  %v7474_v26 = vadd.s32 %v2395_v19, %v2393_v1  ;;  %v2431_v1 = vshll.u32 %v2430_v6, 16 }
 0x79b   :  { %v3444_v27 = vsel %vm3336_vm2, %v3443_v14, %v3442_v44  ;;  %9493 = vst [vmem:[#allocation133_spill] sm:$0xff] %v7471_v38  ;;  %v2346_v51 = vcvt.f32.s32 %v9494_v56  ;;  %vm2767_vm8 = vcmp.lt.s32.totalorder %v7471_v38, %v7356_v41 }
 0x79c   :  { %3219 = vperm.xlu1 %4684, %v2892_v54   ;;  %3234 = vperm.xlu0 %4683, %v2897_v53   ;;  %9495 = vst [vmem:[#allocation150_spill] sm:$0xff] %v7474_v26  ;;  %v7477_v62 = vadd.s32 %v2311_v34, %v2309_v3  ;;  %v9498_v53 = vld [vmem:[#allocation109_spill] sm:$0xff]  ;;  %vm2772_vm11 = vcmp.lt.s32.totalorder %v7474_v26, %v7356_v41  ;;  %v9499_v34 = vld [vmem:[#allocation208_spill] sm:$0xff] }
 0x79d   :  { %3213 = vperm.xlu2 %4682, %v2890_v17   ;;  %v2370_v28 = vcvt.f32.s32 %v9498_v53  ;;  %v3447_v17 = vperm.slane %v7415_v40, %v7084_v48  ;;  %v2369_v7 = vcvt.f32.s32 %v9499_v34  ;;  %v2895_v40 = vsel %vm2767_vm8, 1, %v8943_v20  ;;  %v9502_v53 = vld [vmem:[#allocation183_spill] sm:$0xff]  ;;  %v9503_v26 = vld [vmem:[#allocation180_spill] sm:$0xff] }
 0x79e   :  { %v3094_v35 = vpop.permute.xlu1 %3093  ;;  %v3109_v14 = vpop.permute.xlu0 %3108  ;;  %9497 = vst [vmem:[#allocation20_spill] sm:$0xff] %v7477_v62  ;;  %vm2765_vm13 = vcmp.lt.s32.totalorder %v7477_v62, %v7356_v41  ;;  %v2900_v3 = vsel %vm2772_vm11, 1, %v8943_v20  ;;  %v2429_v12 = vcvt.f32.s32 %v9502_v53  ;;  %vm9510_vm11 = vcmask 851712  }
 0x79f   :  { %v3445_v44 = vperm.slane %v3094_v35, %v7071_v16  ;;  %v3115_v54 = vpop.permute.xlu2 %3114  ;;  %v2347_v35 = vshll.u32 %v2346_v51, 16  ;;  %v2371_v50 = vshll.u32 %v2370_v28, 16  ;;  %v2893_v51 = vsel %vm2765_vm13, 1, %v8943_v20  ;;  %v9508_v28 = vld [vmem:[#allocation211_spill] sm:$0xff] }
 0x7a0   :  { %v3459_v53 = vperm.slane %v3115_v54, %v9395_v63 }
 0x7a1   :  { %v3446_v19 = vsel %vm3340_vm5, %v3445_v44, %v3444_v27  ;;  %v2345_v27 = vcvt.f32.s32 %v9503_v26  ;;  %v7501_v6 = vadd.s32 %v2371_v50, %v2369_v7  ;;  %v3453_v7 = vperm.slane %v7450_v11, %v7124_v2  ;;  %v9511_v50 = vld [vmem:[#allocation214_spill] sm:$0xff] }
 0x7a2   :  { %v3448_v60 = vsel %vm9500_vm7, %v3447_v17, %v3446_v19  ;;  %v7503_v17 = vadd.s32 %v2431_v1, %v2429_v12  ;;  %v9507_v19 = vld [vmem:[#allocation197_spill] sm:$0xff]  ;;  %v3455_v1 = vperm.slane %v3109_v14, %v7131_v49  ;;  %v2405_v12 = vcvt.f32.s32 %v9511_v50 }
 0x7a3   :  { %v3450_v56 = vsel %vm9501_vm15, %v3449_v4, %v3448_v60  ;;  %v7499_v44 = vadd.s32 %v2347_v35, %v2345_v27  ;;  %9505 = vst [vmem:[#allocation138_spill] sm:$0xff] %v7501_v6  ;;  %v2466_v34 = vcvt.f32.s32 %v9507_v19  ;;  %v2382_v60 = vcvt.f32.s32 %v9508_v28  ;;  %v9509_v35 = vld [vmem:[#allocation111_spill] sm:$0xff] }
 0x7a4   :  { %3228 = vperm.xlu1 %4684, %v2895_v40   ;;  %3243 = vperm.xlu0 %4683, %v2900_v3   ;;  %9506 = vst [vmem:[#allocation143_spill] sm:$0xff] %v7503_v17  ;;  %v2406_v27 = vcvt.f32.s32 %v9509_v35  ;;  %vm2770_vm0 = vcmp.lt.s32.totalorder %v7501_v6, %v7356_v41  ;;  %vm2775_vm8 = vcmp.lt.s32.totalorder %v7503_v17, %v7356_v41  ;;  %v9512_v17 = vld [vmem:[#allocation190_spill] sm:$0xff]  ;;  %vm8830_vm7 = vcmask 1043459   ;;  %v9519_v6 = vld [vmem:[#allocation187_spill] sm:$0xff] }
 0x7a5   :  { %3222 = vperm.xlu2 %4682, %v2893_v51   ;;  %9504 = vst [vmem:[#allocation146_spill] sm:$0xff] %v7499_v44  ;;  %vm2768_vm13 = vcmp.lt.s32.totalorder %v7499_v44, %v7356_v41  ;;  %v2467_v51 = vshll.u32 %v2466_v34, 16  ;;  %v2383_v19 = vshll.u32 %v2382_v60, 16  ;;  %v2903_v28 = vsel %vm2775_vm8, 1, %v8943_v20  ;;  %v9513_v34 = vld [vmem:[#allocation184_spill] sm:$0xff] }
 0x7a6   :  { %v3103_v38 = vpop.permute.xlu1 %3102  ;;  %v3118_v4 = vpop.permute.xlu0 %3117  ;;  %v2407_v14 = vshll.u32 %v2406_v27, 16 }
 0x7a7   :  { %v3451_v26 = vperm.slane %v3103_v38, %v7112_v32  ;;  %v3460_v40 = vperm.slane %v3118_v4, %v6957_v9  ;;  %v7510_v3 = vpop.permute.xlu2 %3123  ;;  %v2898_v4 = vsel %vm2770_vm0, 1, %v8943_v20 }
 0x7a8   :  { %v7535_v60 = vadd.s32 %v2407_v14, %v2405_v12 }
 0x7a9   :  { %v3452_v54 = vsel %vm9510_vm11, %v3451_v26, %v3450_v56  ;;  %v3461_v38 = vsel %vm3308_vm6, %v3460_v40, %v3459_v53  ;;  %v2465_v56 = vcvt.f32.s32 %v9512_v17  ;;  %v7531_v53 = vperm.slane %v9456_v45, 7  ;;  %v9518_v17 = vld [vmem:[#allocation217_spill] sm:$0xff] }
 0x7aa   :  { %v3454_v11 = vsel %vm3356_vm9, %v3453_v7, %v3452_v54  ;;  %v2896_v26 = vsel %vm2768_vm13, 1, %v8943_v20  ;;  %v2381_v40 = vcvt.f32.s32 %v9513_v34  ;;  %9514 = vst [vmem:[#allocation140_spill] sm:$0xff] %v7535_v60  ;;  %v9516_v54 = vld [vmem:[#allocation202_spill] sm:$0xff]  ;;  %v2418_v45 = vcvt.f32.s32 %v9518_v17 }
 0x7ab   :  { %v3456_v35 = vsel %vm8855_vm10, %v3455_v1, %v3454_v11  ;;  %v7537_v7 = vadd.s32 %v2467_v51, %v2465_v56  ;;  %v2502_v50 = vcvt.f32.s32 %v9516_v54  ;;  %v2442_v34 = vcvt.f32.s32 %v9519_v6  ;;  %v9520_v51 = vld [vmem:[#allocation221_spill] sm:$0xff] }
 0x7ac   :  { %3237 = vperm.xlu1 %4684, %v2898_v4   ;;  %3252 = vperm.xlu0 %4683, %v2903_v28   ;;  %v7540_v11 = vadd.s32 %v2383_v19, %v2381_v40  ;;  %vm2773_vm15 = vcmp.lt.s32.totalorder %v7535_v60, %v7356_v41  ;;  %v2441_v19 = vcvt.f32.s32 %v9520_v51 }
 0x7ad   :  { %3231 = vperm.xlu2 %4682, %v2896_v26   ;;  %9515 = vst [vmem:[#allocation148_spill] sm:$0xff] %v7537_v7  ;;  %vm2778_vm0 = vcmp.lt.s32.totalorder %v7537_v7, %v7531_v53  ;;  %v2503_v14 = vshll.u32 %v2502_v50, 16  ;;  %v2419_v26 = vshll.u32 %v2418_v45, 16  ;;  %v2901_v6 = vsel %vm2773_vm15, 1, %v8943_v20 }
 0x7ae   :  { %v3112_v1 = vpop.permute.xlu1 %3111  ;;  %v3127_v27 = vpop.permute.xlu0 %3126  ;;  %9517 = vst [vmem:[#allocation16_spill] sm:$0xff] %v7540_v11  ;;  %vm2771_vm8 = vcmp.lt.s32.totalorder %v7540_v11, %v7356_v41  ;;  %v2906_v40 = vsel %vm2778_vm0, 1, %v8943_v20  ;;  %v2443_v54 = vshll.u32 %v2442_v34, 16  ;;  %v9527_v34 = vld [vmem:[#allocation222_spill] sm:$0xff]  ;;  %vm9529_vm15 = vcmask 195712  }
 0x7af   :  { %v3457_v4 = vperm.slane %v3112_v1, %v7134_v21  ;;  %v7544_v28 = vpop.permute.xlu2 %3132  ;;  %v9521_v1 = vld [vmem:[#allocation196_spill] sm:$0xff]  ;;  %v2454_v44 = vcvt.f32.s32 %v9527_v34 }
 0x7b0   :  { %v2501_v17 = vcvt.f32.s32 %v9521_v1  ;;  %v7564_v50 = vadd.s32 %v2443_v54, %v2441_v19  ;;  %v9528_v1 = vld [vmem:[#allocation193_spill] sm:$0xff]  ;;  %v3464_v19 = vperm.slane %v7510_v3, %v6991_v59 }
 0x7b1   :  { %v3458_v12 = vsel %vm8856_vm3, %v3457_v4, %v3456_v35  ;;  %v2899_v35 = vsel %vm2771_vm8, 1, %v8943_v20  ;;  %v9522_v4 = vld [vmem:[#allocation189_spill] sm:$0xff]  ;;  %v2478_v13 = vcvt.f32.s32 %v9528_v1  ;;  %vm9531_vm8 = vcmask 261312   ;;  %v9533_v1 = vld [vmem:[#allocation203_spill] sm:$0xff] }
 0x7b2   :  { %v7557_v56 = vsel %vm8830_vm7, %v3458_v12, %v7431_v31  ;;  %v2417_v60 = vcvt.f32.s32 %v9522_v4  ;;  %9523 = vst [vmem:[#allocation152_spill] sm:$0xff] %v7564_v50  ;;  %v7566_v51 = vadd.s32 %v2503_v14, %v2501_v17  ;;  %v9525_v31 = vld [vmem:[#allocation207_spill] sm:$0xff]  ;;  %vm2776_vm11 = vcmp.lt.s32.totalorder %v7564_v50, %v7356_v41 }
 0x7b3   :  { %v2538_v45 = vcvt.f32.s32 %v9525_v31  ;;  %v2455_v4 = vshll.u32 %v2454_v44, 16  ;;  %v2904_v3 = vsel %vm2776_vm11, 1, %v8943_v20  ;;  %vm9532_vm7 = vcmask 326912   ;;  %v9537_v44 = vld [vmem:[#allocation212_spill] sm:$0xff] }
 0x7b4   :  { %3246 = vperm.xlu1 %4684, %v2901_v6   ;;  %3261 = vperm.xlu0 %4683, %v2906_v40   ;;  %9524 = vst [vmem:[#allocation74_spill] sm:$0xff] %v7566_v51  ;;  %v7569_v11 = vadd.s32 %v2419_v26, %v2417_v60  ;;  %vm2781_vm13 = vcmp.lt.s32.totalorder %v7566_v51, %v7531_v53  ;;  %v9530_v26 = vld [vmem:[#allocation23_spill] sm:$0xff]  ;;  %v2479_v34 = vshll.u32 %v2478_v13, 16  ;;  %v9539_v13 = vld [vmem:[#allocation28_spill] sm:$0xff] }
 0x7b5   :  { %3240 = vperm.xlu2 %4682, %v2899_v35   ;;  %v3466_v60 = vperm.slane %v3127_v27, %v7010_v52  ;;  %v2477_v54 = vcvt.f32.s32 %v9530_v26  ;;  %v2539_v17 = vshll.u32 %v2538_v45, 16  ;;  %v2909_v31 = vsel %vm2781_vm13, 1, %v8943_v20 }
 0x7b6   :  { %v3121_v12 = vpop.permute.xlu1 %3120  ;;  %v3136_v7 = vpop.permute.xlu0 %3135  ;;  %9526 = vst [vmem:[#allocation145_spill] sm:$0xff] %v7569_v11  ;;  %vm2774_vm0 = vcmp.lt.s32.totalorder %v7569_v11, %v7356_v41  ;;  %v2537_v27 = vcvt.f32.s32 %v9533_v1  ;;  %v9534_v41 = vld [vmem:[#allocation194_spill] sm:$0xff]  ;;  %vm9541_vm13 = vcmask 392512  }
 0x7b7   :  { %v3462_v6 = vperm.slane %v3121_v12, %v6967_v15  ;;  %v7573_v40 = vpop.permute.xlu2 %3141  ;;  %v7594_v45 = vadd.s32 %v2479_v34, %v2477_v54  ;;  %v3470_v54 = vperm.slane %v7544_v28, %v7029_v55  ;;  %v9542_v34 = vld [vmem:[#allocation67_spill] sm:$0xff] }
 0x7b9   :  { %v3463_v14 = vsel %vm9529_vm15, %v3462_v6, %v3461_v38  ;;  %v2902_v38 = vsel %vm2774_vm0, 1, %v8943_v20  ;;  %v2453_v6 = vcvt.f32.s32 %v9534_v41  ;;  %9535 = vst [vmem:[#allocation85_spill] sm:$0xff] %v7594_v45 }
 0x7ba   :  { %v3465_v35 = vsel %vm9531_vm8, %v3464_v19, %v3463_v14  ;;  %v7596_v19 = vadd.s32 %v2539_v17, %v2537_v27  ;;  %v2574_v14 = vcvt.f32.s32 %v9537_v44  ;;  %v3472_v17 = vperm.slane %v3136_v7, %v7046_v30 }
 0x7bb   :  { %v3467_v12 = vsel %vm9532_vm7, %v3466_v60, %v3465_v35  ;;  %v7599_v51 = vadd.s32 %v2455_v4, %v2453_v6  ;;  %v2490_v60 = vcvt.f32.s32 %v9539_v13  ;;  %vm2779_vm7 = vcmp.lt.s32.totalorder %v7594_v45, %v7531_v53 }
 0x7bc   :  { %3255 = vperm.xlu1 %4684, %v2904_v3   ;;  %3270 = vperm.xlu0 %4683, %v2909_v31   ;;  %9536 = vst [vmem:[#allocation98_spill] sm:$0xff] %v7596_v19  ;;  %v9540_v31 = vld [vmem:[#allocation200_spill] sm:$0xff]  ;;  %vm2784_vm11 = vcmp.lt.s32.totalorder %v7596_v19, %v7531_v53  ;;  %v2513_v27 = vcvt.f32.s32 %v9542_v34  ;;  %v2907_v28 = vsel %vm2779_vm7, 1, %v8943_v20 }
 0x7bd   :  { %3249 = vperm.xlu2 %4682, %v2902_v38   ;;  %9538 = vst [vmem:[#allocation154_spill] sm:$0xff] %v7599_v51  ;;  %v2514_v1 = vcvt.f32.s32 %v9540_v31  ;;  %vm2777_vm15 = vcmp.lt.s32.totalorder %v7599_v51, %v7531_v53  ;;  %v2575_v38 = vshll.u32 %v2574_v14, 16  ;;  %v2491_v6 = vshll.u32 %v2490_v60, 16  ;;  %v9543_v31 = vld [vmem:[#allocation209_spill] sm:$0xff]  ;;  %v9547_v60 = vld [vmem:[#allocation218_spill] sm:$0xff] }
 0x7be   :  { %v3130_v26 = vpop.permute.xlu1 %3129  ;;  %v3145_v50 = vpop.permute.xlu0 %3144  ;;  %v2912_v44 = vsel %vm2784_vm11, 1, %v8943_v20  ;;  %v2573_v7 = vcvt.f32.s32 %v9543_v31  ;;  %vm9552_vm11 = vcmask 720512  }
 0x7bf   :  { %v3468_v35 = vperm.slane %v3130_v26, %v6996_v33  ;;  %v7603_v3 = vpop.permute.xlu2 %3150  ;;  %v2515_v13 = vshll.u32 %v2514_v1, 16  ;;  %v9549_v1 = vld [vmem:[#allocation121_spill] sm:$0xff] }
 0x7c1   :  { %v3469_v4 = vsel %vm9541_vm13, %v3468_v35, %v3467_v12  ;;  %v2905_v12 = vsel %vm2777_vm15, 1, %v8943_v20  ;;  %v9544_v35 = vld [vmem:[#allocation199_spill] sm:$0xff]  ;;  %v7624_v14 = vadd.s32 %v2515_v13, %v2513_v27  ;;  %v3476_v27 = vperm.slane %v7573_v40, %v7071_v16 }
 0x7c2   :  { %v3471_v41 = vsel %vm3328_vm14, %v3470_v54, %v3469_v4  ;;  %v2489_v19 = vcvt.f32.s32 %v9544_v35  ;;  %v7626_v54 = vadd.s32 %v2575_v38, %v2573_v7  ;;  %v2610_v4 = vcvt.f32.s32 %v9547_v60 }
 0x7c3   :  { %v3473_v26 = vsel %vm3332_vm1, %v3472_v17, %v3471_v41  ;;  %9545 = vst [vmem:[#allocation79_spill] sm:$0xff] %v7624_v14  ;;  %v2526_v17 = vcvt.f32.s32 %v9549_v1  ;;  %vm2782_vm0 = vcmp.lt.s32.totalorder %v7624_v14, %v7531_v53  ;;  %v9558_v14 = vld [vmem:[#allocation39_spill] sm:$0xff] }
 0x7c4   :  { %3264 = vperm.xlu1 %4684, %v2907_v28   ;;  %3279 = vperm.xlu0 %4683, %v2912_v44   ;;  %9546 = vst [vmem:[#allocation80_spill] sm:$0xff] %v7626_v54  ;;  %v7629_v45 = vadd.s32 %v2491_v6, %v2489_v19  ;;  %v9550_v44 = vld [vmem:[#allocation206_spill] sm:$0xff]  ;;  %vm2787_vm8 = vcmp.lt.s32.totalorder %v7626_v54, %v7531_v53  ;;  %v9551_v6 = vld [vmem:[#allocation75_spill] sm:$0xff]  ;;  %v2611_v7 = vshll.u32 %v2610_v4, 16  ;;  %v2910_v40 = vsel %vm2782_vm0, 1, %v8943_v20 }
 0x7c5   :  { %3258 = vperm.xlu2 %4682, %v2905_v12   ;;  %v2550_v31 = vcvt.f32.s32 %v9550_v44  ;;  %v3478_v19 = vperm.slane %v3145_v50, %v7084_v48  ;;  %v2549_v13 = vcvt.f32.s32 %v9551_v6  ;;  %v2527_v35 = vshll.u32 %v2526_v17, 16  ;;  %v9553_v44 = vld [vmem:[#allocation216_spill] sm:$0xff] }
 0x7c6   :  { %v3139_v34 = vpop.permute.xlu1 %3138  ;;  %v3154_v11 = vpop.permute.xlu0 %3153  ;;  %9548 = vst [vmem:[#allocation149_spill] sm:$0xff] %v7629_v45  ;;  %vm2780_vm7 = vcmp.lt.s32.totalorder %v7629_v45, %v7531_v53  ;;  %v2915_v60 = vsel %vm2787_vm8, 1, %v8943_v20  ;;  %v2609_v50 = vcvt.f32.s32 %v9553_v44  ;;  %v3482_v44 = vperm.slane %v7603_v3, %v7112_v32  ;;  %v9624_v45 = vld [vmem:[#allocation125_spill] sm:$0xff] }
 0x7c7   :  { %v3474_v41 = vperm.slane %v3139_v34, %v7040_v22  ;;  %v7633_v28 = vpop.permute.xlu2 %3159  ;;  %v2551_v1 = vshll.u32 %v2550_v31, 16  ;;  %vm9560_vm0 = vcmask 786112  }
 0x7c9   :  { %v3475_v38 = vsel %vm3336_vm2, %v3474_v41, %v3473_v26  ;;  %v2908_v26 = vsel %vm2780_vm7, 1, %v8943_v20  ;;  %v9554_v41 = vld [vmem:[#allocation205_spill] sm:$0xff]  ;;  %v7654_v4 = vadd.s32 %v2551_v1, %v2549_v13  ;;  %v3484_v13 = vperm.slane %v3154_v11, %v7124_v2 }
 0x7ca   :  { %v3477_v12 = vsel %vm3340_vm5, %v3476_v27, %v3475_v38  ;;  %v2525_v54 = vcvt.f32.s32 %v9554_v41  ;;  %v7656_v27 = vadd.s32 %v2611_v7, %v2609_v50  ;;  %vm9562_vm7 = vcmask 851712  }
 0x7cb   :  { %v3479_v34 = vsel %vm9552_vm11, %v3478_v19, %v3477_v12  ;;  %9555 = vst [vmem:[#allocation89_spill] sm:$0xff] %v7654_v4  ;;  %v2562_v19 = vcvt.f32.s32 %v9558_v14  ;;  %vm2785_vm13 = vcmp.lt.s32.totalorder %v7654_v4, %v7531_v53  ;;  %v9561_v14 = vld [vmem:[#allocation41_spill] sm:$0xff]  ;;  %vm8852_vm11 = vcmask 1044484  }
 0x7cc   :  { %3273 = vperm.xlu1 %4684, %v2910_v40   ;;  %3288 = vperm.xlu0 %4683, %v2915_v60   ;;  %9556 = vst [vmem:[#allocation92_spill] sm:$0xff] %v7656_v27  ;;  %v7658_v6 = vadd.s32 %v2527_v35, %v2525_v54  ;;  %v9559_v40 = vld [vmem:[#allocation213_spill] sm:$0xff]  ;;  %vm2790_vm15 = vcmp.lt.s32.totalorder %v7656_v27, %v7531_v53  ;;  %v2585_v7 = vcvt.f32.s32 %v9561_v14  ;;  %v2913_v3 = vsel %vm2785_vm13, 1, %v8943_v20 }
 0x7cd   :  { %3267 = vperm.xlu2 %4682, %v2908_v26   ;;  %v2586_v60 = vcvt.f32.s32 %v9559_v40  ;;  %v2563_v1 = vshll.u32 %v2562_v19, 16  ;;  %v2918_v50 = vsel %vm2790_vm15, 1, %v8943_v20  ;;  %v9566_v19 = vld [vmem:[#allocation40_spill] sm:$0xff] }
 0x7ce   :  { %v3148_v17 = vpop.permute.xlu1 %3147  ;;  %v3163_v38 = vpop.permute.xlu0 %3162  ;;  %9557 = vst [vmem:[#allocation21_spill] sm:$0xff] %v7658_v6  ;;  %vm2783_vm8 = vcmp.lt.s32.totalorder %v7658_v6, %v7531_v53 }
 0x7cf   :  { %v3480_v31 = vperm.slane %v3148_v17, %v7087_v23  ;;  %v3169_v12 = vpop.permute.xlu2 %3168  ;;  %v2587_v41 = vshll.u32 %v2586_v60, 16  ;;  %v2911_v11 = vsel %vm2783_vm8, 1, %v8943_v20 }
 0x7d1   :  { %v3481_v54 = vsel %vm9560_vm0, %v3480_v31, %v3479_v34  ;;  %v9563_v34 = vld [vmem:[#allocation210_spill] sm:$0xff]  ;;  %v7680_v31 = vadd.s32 %v2587_v41, %v2585_v7 }
 0x7d2   :  { %v3483_v35 = vsel %vm9562_vm7, %v3482_v44, %v3481_v54  ;;  %v2561_v17 = vcvt.f32.s32 %v9563_v34  ;;  %v2598_v54 = vcvt.f32.s32 %v9566_v19  ;;  %vm9573_vm7 = vcmask 195712  }
 0x7d3   :  { %v3485_v26 = vsel %vm3356_vm9, %v3484_v13, %v3483_v35  ;;  %9564 = vst [vmem:[#allocation87_spill] sm:$0xff] %v7680_v31  ;;  %v9567_v13 = vld [vmem:[#allocation219_spill] sm:$0xff]  ;;  %v3488_v35 = vperm.slane %v7633_v28, %v7134_v21  ;;  %vm2788_vm13 = vcmp.lt.s32.totalorder %v7680_v31, %v7531_v53 }
 0x7d4   :  { %3282 = vperm.xlu1 %4684, %v2913_v3   ;;  %3297 = vperm.xlu0 %4683, %v2918_v50   ;;  %v7682_v44 = vadd.s32 %v2563_v1, %v2561_v17  ;;  %v2622_v60 = vcvt.f32.s32 %v9567_v13  ;;  %v9568_v1 = vld [vmem:[#allocation96_spill] sm:$0xff]  ;;  %v2599_v41 = vshll.u32 %v2598_v54, 16  ;;  %v2916_v28 = vsel %vm2788_vm13, 1, %v8943_v20  ;;  %v9605_v31 = vld [vmem:[#allocation63_spill] sm:$0xff] }
 0x7d5   :  { %3276 = vperm.xlu2 %4682, %v2911_v11   ;;  %v2621_v3 = vcvt.f32.s32 %v9568_v1  ;;  %v9572_v54 = vld [vmem:[#allocation124_spill] sm:$0xff]  ;;  %vm9574_vm13 = vcmask 261312  }
 0x7d6   :  { %v3157_v40 = vpop.permute.xlu1 %3156  ;;  %v3172_v14 = vpop.permute.xlu0 %3171  ;;  %9565 = vst [vmem:[#allocation153_spill] sm:$0xff] %v7682_v44  ;;  %vm2786_vm15 = vcmp.lt.s32.totalorder %v7682_v44, %v7531_v53  ;;  %v2623_v34 = vshll.u32 %v2622_v60, 16  ;;  %v3493_v60 = vperm.slane %v3169_v12, %v6967_v15 }
 0x7d7   :  { %v3486_v27 = vperm.slane %v3157_v40, %v7131_v49  ;;  %v3178_v4 = vpop.permute.xlu2 %3177  ;;  %v2914_v17 = vsel %vm2786_vm15, 1, %v8943_v20  ;;  %v9569_v40 = vld [vmem:[#allocation215_spill] sm:$0xff]  ;;  %vm9577_vm15 = vcmask 326912  }
 0x7d9   :  { %v3487_v7 = vsel %vm8855_vm10, %v3486_v27, %v3485_v26  ;;  %v2597_v27 = vcvt.f32.s32 %v9569_v40  ;;  %v7703_v26 = vadd.s32 %v2623_v34, %v2621_v3  ;;  %v9575_v40 = vld [vmem:[#allocation220_spill] sm:$0xff] }
 0x7da   :  { %v3489_v50 = vsel %vm8856_vm3, %v3488_v35, %v3487_v7  ;;  %v2634_v35 = vcvt.f32.s32 %v9572_v54 }
 0x7db   :  { %v7698_v11 = vsel %vm8852_vm11, %v3489_v50, %v7557_v56  ;;  %9570 = vst [vmem:[#allocation151_spill] sm:$0xff] %v7703_v26  ;;  %v7705_v1 = vadd.s32 %v2599_v41, %v2597_v27  ;;  %v3490_v56 = vperm.slane %v3163_v38, %v9395_v63  ;;  %vm2791_vm0 = vcmp.lt.s32.totalorder %v7703_v26, %v7531_v53 }
 0x7dc   :  { %3291 = vperm.xlu1 %4684, %v2916_v28   ;;  %v3495_v28 = vperm.slane %v3172_v14, %v6991_v59  ;;  %v2635_v34 = vshll.u32 %v2634_v35, 16  ;;  %v2919_v38 = vsel %vm2791_vm0, 1, %v8943_v20  ;;  %v2633_v27 = vcvt.f32.s32 %v9575_v40 }
 0x7dd   :  { %3285 = vperm.xlu2 %4682, %v2914_v17   ;;  %9571 = vst [vmem:[#allocation155_spill] sm:$0xff] %v7705_v1  ;;  %vm2789_vm8 = vcmp.lt.s32.totalorder %v7705_v1, %v7531_v53  ;;  %vm9698_vm11 = vcmask 326912  }
 0x7de   :  { %v3166_v19 = vpop.permute.xlu1 %3165  ;;  %v3181_v13 = vpop.permute.xlu0 %3180  ;;  %v2917_v12 = vsel %vm2789_vm8, 1, %v8943_v20  ;;  %v7722_v54 = vadd.s32 %v2635_v34, %v2633_v27  ;;  %vm9578_vm8 = vcmask 392512  }
 0x7df   :  { %v3491_v7 = vperm.slane %v3166_v19, %v6957_v9  ;;  %v3187_v50 = vpop.permute.xlu2 %3186  ;;  %v3501_v35 = vperm.slane %v3181_v13, %v7029_v55 }
 0x7e0   :  { %9576 = vst [vmem:[#allocation95_spill] sm:$0xff] %v7722_v54  ;;  %vm2792_vm0 = vcmp.lt.s32.totalorder %v7722_v54, %v7531_v53 }
 0x7e1   :  { %v3492_v3 = vsel %vm3308_vm6, %v3491_v7, %v3490_v56 }
 0x7e2   :  { %v3494_v41 = vsel %vm9573_vm7, %v3493_v60, %v3492_v3  ;;  %v3499_v60 = vperm.slane %v3178_v4, %v6996_v33  ;;  %v3505_v4 = vperm.slane %v3187_v50, %v7040_v22  ;;  %vm9579_vm7 = vcmask 720512  }
 0x7e3   :  { %v3496_v17 = vsel %vm9574_vm13, %v3495_v28, %v3494_v41  ;;  %vm9580_vm13 = vcmask 786112  }
 0x7e4   :  { %3300 = vperm.xlu1 %4684, %v2919_v38   ;;  %v2920_v38 = vsel %vm2792_vm0, 1, %v8943_v20  ;;  %vm8842_vm0 = vcmask 1045509  }
 0x7e5   :  { %3294 = vperm.xlu2 %4682, %v2917_v12  }
 0x7e6   :  { %v3175_v19 = vpop.permute.xlu1 %3174  ;;  %v3190_v14 = vpop.permute.xlu0 %3189 }
 0x7e7   :  { %v3497_v56 = vperm.slane %v3175_v19, %v7010_v52  ;;  %v3196_v7 = vpop.permute.xlu2 %3195  ;;  %v3507_v13 = vperm.slane %v3190_v14, %v7071_v16 }
 0x7e9   :  { %v3498_v3 = vsel %vm9577_vm15, %v3497_v56, %v3496_v17  ;;  %vm9581_vm15 = vcmask 851712  }
 0x7ea   :  { %v3500_v28 = vsel %vm9578_vm8, %v3499_v60, %v3498_v3  ;;  %vm9582_vm8 = vcmask 195712  }
 0x7eb   :  { %v3502_v41 = vsel %vm3328_vm14, %v3501_v35, %v3500_v28  ;;  %v3511_v28 = vperm.slane %v3196_v7, %v7087_v23 }
 0x7ed   :  { %3303 = vperm.xlu2 %4682, %v2920_v38  }
 0x7ee   :  { %v3184_v34 = vpop.permute.xlu1 %3183  ;;  %v3199_v12 = vpop.permute.xlu0 %3198 }
 0x7ef   :  { %v3503_v40 = vperm.slane %v3184_v34, %v7046_v30  ;;  %v3205_v27 = vpop.permute.xlu2 %3204  ;;  %v3513_v38 = vperm.slane %v3199_v12, %v7112_v32 }
 0x7f1   :  { %v3504_v17 = vsel %vm3332_vm1, %v3503_v40, %v3502_v41 }
 0x7f2   :  { %v3506_v53 = vsel %vm3336_vm2, %v3505_v4, %v3504_v17  ;;  %v3517_v17 = vperm.slane %v3205_v27, %v7131_v49 }
 0x7f3   :  { %v3508_v19 = vsel %vm3340_vm5, %v3507_v13, %v3506_v53 }
 0x7f6   :  { %v3193_v56 = vpop.permute.xlu1 %3192  ;;  %v3208_v60 = vpop.permute.xlu0 %3207 }
 0x7f7   :  { %v3509_v35 = vperm.slane %v3193_v56, %v7084_v48  ;;  %v3214_v3 = vpop.permute.xlu2 %3213  ;;  %v3519_v53 = vperm.slane %v3208_v60, %v7134_v21 }
 0x7f9   :  { %v3510_v34 = vsel %vm9579_vm7, %v3509_v35, %v3508_v19  ;;  %vm9583_vm7 = vcmask 261312  }
 0x7fa   :  { %v3512_v50 = vsel %vm9580_vm13, %v3511_v28, %v3510_v34  ;;  %v3522_v28 = vperm.slane %v3214_v3, %v6957_v9  ;;  %vm9584_vm13 = vcmask 326912  }
 0x7fb   :  { %v3514_v14 = vsel %vm9581_vm15, %v3513_v38, %v3512_v50  ;;  %vm9585_vm15 = vcmask 392512  }
 0x7fe   :  { %v3202_v41 = vpop.permute.xlu1 %3201  ;;  %v3217_v40 = vpop.permute.xlu0 %3216 }
 0x7ff   :  { %v3515_v4 = vperm.slane %v3202_v41, %v7124_v2  ;;  %v3223_v13 = vpop.permute.xlu2 %3222 }
 0x801   :  { %v3516_v56 = vsel %vm3356_vm9, %v3515_v4, %v3514_v14  ;;  %v3524_v4 = vperm.slane %v3217_v40, %v6967_v15 }
 0x802   :  { %v3518_v7 = vsel %vm8855_vm10, %v3517_v17, %v3516_v56 }
 0x803   :  { %v3520_v12 = vsel %vm8856_vm3, %v3519_v53, %v3518_v7  ;;  %v3528_v53 = vperm.slane %v3223_v13, %v7010_v52 }
 0x804   :  { %v7757_v14 = vsel %vm8842_vm0, %v3520_v12, %v7698_v11  ;;  %vm9597_vm0 = vcmask 326912  }
 0x806   :  { %v3211_v19 = vpop.permute.xlu1 %3210  ;;  %v3226_v35 = vpop.permute.xlu0 %3225 }
 0x807   :  { %v3521_v38 = vperm.slane %v3211_v19, %v9395_v63  ;;  %v3232_v34 = vpop.permute.xlu2 %3231 }
 0x808   :  { %v3534_v40 = vperm.slane %v3232_v34, %v7046_v30  ;;  %v9587_v34 = vld [vmem:[#allocation112_spill] sm:$0xff] }
 0x809   :  { %v3523_v50 = vsel %vm3308_vm6, %v3522_v28, %v3521_v38  ;;  %v3530_v38 = vperm.slane %v3226_v35, %v6996_v33 }
 0x80a   :  { %v3525_v17 = vsel %vm9582_vm8, %v3524_v4, %v3523_v50  ;;  %vm9589_vm8 = vcmask 720512  }
 0x80e   :  { %v3220_v41 = vpop.permute.xlu1 %3219  ;;  %v3235_v54 = vpop.permute.xlu0 %3234 }
 0x80f   :  { %v3241_v27 = vpop.permute.xlu2 %3240  ;;  %v3526_v60 = vperm.slane %v3220_v41, %v6991_v59  ;;  %v3536_v4 = vperm.slane %v3235_v54, %v7040_v22 }
 0x811   :  { %v3527_v3 = vsel %vm9583_vm7, %v3526_v60, %v3525_v17  ;;  %vm9592_vm7 = vcmask 786112  }
 0x812   :  { %v3529_v19 = vsel %vm9584_vm13, %v3528_v53, %v3527_v3  ;;  %v9586_v53 = vld [vmem:[#allocation38_spill] sm:$0xff]  ;;  %vm9593_vm13 = vcmask 195712  }
 0x813   :  { %v3531_v11 = vsel %vm9585_vm15, %v3530_v38, %v3529_v19  ;;  %v3608_v35 = vperm.slane %v9586_v53, %v6957_v9  ;;  %v3607_v38 = vperm.slane %v9587_v34, %v9395_v63  ;;  %vm9594_vm15 = vcmask 851712  }
 0x816   :  { %v3229_v56 = vpop.permute.xlu1 %3228  ;;  %v3244_v7 = vpop.permute.xlu0 %3243 }
 0x817   :  { %v3532_v28 = vperm.slane %v3229_v56, %v7029_v55  ;;  %v3250_v41 = vpop.permute.xlu2 %3249 }
 0x819   :  { %v3533_v12 = vsel %vm3328_vm14, %v3532_v28, %v3531_v11  ;;  %v3540_v28 = vperm.slane %v3241_v27, %v7084_v48  ;;  %v9588_v11 = vld [vmem:[#allocation30_spill] sm:$0xff]  ;;  %v9591_v27 = vld [vmem:[#allocation61_spill] sm:$0xff] }
 0x81a   :  { %v3535_v60 = vsel %vm3332_vm1, %v3534_v40, %v3533_v12  ;;  %v3610_v12 = vperm.slane %v9588_v11, %v6967_v15  ;;  %v3614_v53 = vperm.slane %v9591_v27, %v7010_v52 }
 0x81b   :  { %v3537_v3 = vsel %vm3336_vm2, %v3536_v4, %v3535_v60  ;;  %v9590_v60 = vld [vmem:[#allocation64_spill] sm:$0xff] }
 0x81c   :  { %v3612_v4 = vperm.slane %v9590_v60, %v6991_v59 }
 0x81e   :  { %v3238_v50 = vpop.permute.xlu1 %3237  ;;  %v3253_v17 = vpop.permute.xlu0 %3252 }
 0x81f   :  { %v3538_v13 = vperm.slane %v3238_v50, %v7071_v16  ;;  %v7776_v19 = vpop.permute.xlu2 %3258  ;;  %v3609_v50 = vsel %vm3308_vm6, %v3608_v35, %v3607_v38  ;;  %v9596_v35 = vld [vmem:[#allocation114_spill] sm:$0xff]  ;;  %v3546_v38 = vperm.slane %v3250_v41, %v7124_v2 }
 0x820   :  { %v3611_v26 = vsel %vm9593_vm13, %v3610_v12, %v3609_v50  ;;  %v9600_v12 = vld [vmem:[#allocation69_spill] sm:$0xff] }
 0x821   :  { %v3539_v56 = vsel %vm3340_vm5, %v3538_v13, %v3537_v3  ;;  %v3542_v13 = vperm.slane %v3244_v7, %v7087_v23  ;;  %v3639_v50 = vperm.slane %v9600_v12, %v6957_v9 }
 0x822   :  { %v3541_v54 = vsel %vm9589_vm8, %v3540_v28, %v3539_v56  ;;  %vm9595_vm8 = vcmask 261312   ;;  %v3616_v28 = vperm.slane %v9596_v35, %v6996_v33 }
 0x823   :  { %v3543_v34 = vsel %vm9592_vm7, %v3542_v13, %v3541_v54  ;;  %v3613_v56 = vsel %vm9595_vm8, %v3612_v4, %v3611_v26  ;;  %v9599_v54 = vld [vmem:[#allocation118_spill] sm:$0xff]  ;;  %vm8850_vm7 = vcmask 1046534  }
 0x824   :  { %v3615_v7 = vsel %vm9597_vm0, %v3614_v53, %v3613_v56  ;;  %v3638_v13 = vperm.slane %v9599_v54, %v9395_v63  ;;  %v9601_v26 = vld [vmem:[#allocation66_spill] sm:$0xff]  ;;  %v9603_v53 = vld [vmem:[#allocation119_spill] sm:$0xff]  ;;  %vm9604_vm0 = vcmask 392512  }
 0x825   :  { %v3620_v4 = vperm.slane %v9601_v26, %v7046_v30  ;;  %v3643_v56 = vperm.slane %v9603_v53, %v6991_v59  ;;  %v3617_v54 = vsel %vm9604_vm0, %v3616_v28, %v3615_v7 }
 0x826   :  { %v3247_v40 = vpop.permute.xlu1 %3246  ;;  %v7798_v60 = vpop.permute.xlu0 %3261 }
 0x827   :  { %v3544_v3 = vperm.slane %v3247_v40, %v7112_v32  ;;  %v9598_v40 = vld [vmem:[#allocation68_spill] sm:$0xff]  ;;  %v7812_v35 = vpop.permute.xlu2 %3267 }
 0x828   :  { %v3618_v27 = vperm.slane %v9598_v40, %v7029_v55  ;;  %v3548_v40 = vperm.slane %v3253_v17, %v7131_v49  ;;  %v9606_v17 = vld [vmem:[#allocation36_spill] sm:$0xff] }
 0x829   :  { %v3545_v11 = vsel %vm9594_vm15, %v3544_v3, %v3543_v34  ;;  %v9602_v3 = vld [vmem:[#allocation37_spill] sm:$0xff]  ;;  %v3645_v6 = vperm.slane %v9606_v17, %v7010_v52  ;;  %vm9608_vm15 = vmmov %vm9595_vm8  ;;  %vm9613_vm8 = vcmask 326912  }
 0x82a   :  { %v3641_v34 = vperm.slane %v9602_v3, %v6967_v15  ;;  %v3547_v41 = vsel %vm3356_vm9, %v3546_v38, %v3545_v11  ;;  %v3619_v26 = vsel %vm3328_vm14, %v3618_v27, %v3617_v54  ;;  %v3622_v3 = vperm.slane %v9605_v31, %v7040_v22  ;;  %v9609_v31 = vld [vmem:[#allocation77_spill] sm:$0xff] }
 0x82b   :  { %v3640_v11 = vsel %vm3308_vm6, %v3639_v50, %v3638_v13  ;;  %v3549_v38 = vsel %vm8855_vm10, %v3548_v40, %v3547_v41  ;;  %v3621_v44 = vsel %vm3332_vm1, %v3620_v4, %v3619_v26  ;;  %v3647_v54 = vperm.slane %v9609_v31, %v6996_v33  ;;  %v9610_v50 = vld [vmem:[#allocation33_spill] sm:$0xff]  ;;  %v9616_v31 = vld [vmem:[#allocation88_spill] sm:$0xff] }
 0x82c   :  { %v3642_v53 = vsel %vm9593_vm13, %v3641_v34, %v3640_v11  ;;  %v3626_v4 = vperm.slane %v9610_v50, %v7084_v48  ;;  %v9611_v34 = vld [vmem:[#allocation91_spill] sm:$0xff]  ;;  %v9612_v40 = vld [vmem:[#allocation93_spill] sm:$0xff]  ;;  %v3623_v26 = vsel %vm3336_vm2, %v3622_v3, %v3621_v44  ;;  %v3669_v50 = vperm.slane %v9616_v31, %v9395_v63 }
 0x82d   :  { %v3644_v27 = vsel %vm9608_vm15, %v3643_v56, %v3642_v53  ;;  %v3649_v41 = vperm.slane %v9611_v34, %v7029_v55  ;;  %v9614_v11 = vld [vmem:[#allocation97_spill] sm:$0xff]  ;;  %vm9617_vm13 = vcmask 720512   ;;  %vm9622_vm15 = vcmask 195712  }
 0x82e   :  { %v3256_v1 = vpop.permute.xlu1 %3255  ;;  %v3646_v56 = vsel %vm9613_vm8, %v3645_v6, %v3644_v27  ;;  %v3271_v53 = vpop.permute.xlu0 %3270  ;;  %v9618_v44 = vld [vmem:[#allocation113_spill] sm:$0xff]  ;;  %v9619_v27 = vld [vmem:[#allocation84_spill] sm:$0xff]  ;;  %vm9625_vm8 = vcmask 786112  }
 0x82f   :  { %v3550_v12 = vperm.slane %v3256_v1, %v7134_v21  ;;  %v9607_v1 = vld [vmem:[#allocation31_spill] sm:$0xff]  ;;  %v3648_v17 = vsel %vm9604_vm0, %v3647_v54, %v3646_v56  ;;  %v3628_v6 = vperm.slane %v9618_v44, %v7087_v23  ;;  %v9620_v54 = vld [vmem:[#allocation44_spill] sm:$0xff]  ;;  %vm9629_vm0 = vcmask 261312  }
 0x830   :  { %v3624_v7 = vperm.slane %v9607_v1, %v7071_v16  ;;  %v3650_v3 = vsel %vm3328_vm14, %v3649_v41, %v3648_v17  ;;  %v9623_v41 = vld [vmem:[#allocation52_spill] sm:$0xff] }
 0x831   :  { %v3551_v28 = vsel %vm8856_vm3, %v3550_v12, %v3549_v38  ;;  %v3670_v12 = vperm.slane %v9612_v40, %v6957_v9  ;;  %v3672_v38 = vperm.slane %v9614_v11, %v6967_v15  ;;  %v3653_v11 = vperm.slane %v9619_v27, %v7040_v22 }
 0x832   :  { %v7836_v13 = vsel %vm8850_vm7, %v3551_v28, %v7757_v14  ;;  %v3625_v14 = vsel %vm3340_vm5, %v3624_v7, %v3623_v26  ;;  %v9615_v28 = vld [vmem:[#allocation82_spill] sm:$0xff]  ;;  %v7860_v7 = vpop.permute.xlu2 %3276  ;;  %v3655_v26 = vperm.slane %v9620_v54, %v7071_v16  ;;  %v3676_v17 = vperm.slane %v9623_v41, %v7010_v52 }
 0x833   :  { %v3651_v1 = vperm.slane %v9615_v28, %v7046_v30  ;;  %v3627_v40 = vsel %vm9617_vm13, %v3626_v4, %v3625_v14  ;;  %v3671_v56 = vsel %vm3308_vm6, %v3670_v12, %v3669_v50  ;;  %v9621_v28 = vld [vmem:[#allocation49_spill] sm:$0xff]  ;;  %v3553_v4 = vperm.slane %v7798_v60, %v6957_v9 }
 0x834   :  { %v3674_v31 = vperm.slane %v9621_v28, %v6991_v59  ;;  %v3673_v14 = vsel %vm9622_vm15, %v3672_v38, %v3671_v56  ;;  %v3678_v54 = vperm.slane %v9624_v45, %v6996_v33  ;;  %v3552_v12 = vperm.slane %v7776_v19, %v9395_v63  ;;  %v9626_v28 = vld [vmem:[#allocation32_spill] sm:$0xff]  ;;  %v9630_v19 = vld [vmem:[#allocation43_spill] sm:$0xff] }
 0x835   :  { %v3652_v27 = vsel %vm3332_vm1, %v3651_v1, %v3650_v3  ;;  %v3629_v50 = vsel %vm9625_vm8, %v3628_v6, %v3627_v40  ;;  %v3630_v60 = vperm.slane %v9626_v28, %v7112_v32  ;;  %v9627_v38 = vld [vmem:[#allocation72_spill] sm:$0xff]  ;;  %v9628_v1 = vld [vmem:[#allocation86_spill] sm:$0xff]  ;;  %v3659_v40 = vperm.slane %v9630_v19, %v7087_v23 }
 0x836   :  { %v3265_v34 = vpop.permute.xlu1 %3264  ;;  %v3632_v56 = vperm.slane %v9627_v38, %v7124_v2  ;;  %v3654_v41 = vsel %vm3336_vm2, %v3653_v11, %v3652_v27  ;;  %v3657_v3 = vperm.slane %v9628_v1, %v7084_v48  ;;  %v3675_v45 = vsel %vm9629_vm0, %v3674_v31, %v3673_v14  ;;  %v9632_v28 = vld [vmem:[#allocation46_spill] sm:$0xff]  ;;  %v9633_v11 = vld [vmem:[#allocation45_spill] sm:$0xff] }
 0x837   :  { %v3555_v44 = vperm.slane %v3265_v34, %v6967_v15  ;;  %v3656_v34 = vsel %vm3340_vm5, %v3655_v26, %v3654_v41  ;;  %v3554_v51 = vsel %vm3308_vm6, %v3553_v4, %v3552_v12  ;;  %vm9631_vm13 = vcmask 326912   ;;  %v9635_v41 = vld [vmem:[#allocation48_spill] sm:$0xff] }
 0x838   :  { %v3677_v6 = vsel %vm9631_vm13, %v3676_v17, %v3675_v45  ;;  %v3680_v62 = vperm.slane %v9632_v28, %v7029_v55  ;;  %v3661_v26 = vperm.slane %v9633_v11, %v7112_v32  ;;  %vm9634_vm8 = vcmask 392512   ;;  %v9637_v17 = vld [vmem:[#allocation70_spill] sm:$0xff]  ;;  %v9638_v45 = vld [vmem:[#allocation100_spill] sm:$0xff] }
 0x839   :  { %v3556_v38 = vsel %vm9622_vm15, %v3555_v44, %v3554_v51  ;;  %v3679_v27 = vsel %vm9634_vm8, %v3678_v54, %v3677_v6  ;;  %v3682_v31 = vperm.slane %v9635_v41, %v7046_v30  ;;  %v3557_v4 = vperm.slane %v7812_v35, %v6991_v59  ;;  %v3280_v44 = vpop.permute.xlu0 %3279  ;;  %v9640_v54 = vld [vmem:[#allocation57_spill] sm:$0xff] }
 0x83a   :  { %vm9636_vm0 = vcmask 851712   ;;  %v3634_v1 = vperm.slane %v9637_v17, %v7131_v49  ;;  %v3684_v51 = vperm.slane %v9638_v45, %v7040_v22  ;;  %vm9639_vm13 = vcmask 720512   ;;  %v3286_v17 = vpop.permute.xlu2 %3285 }
 0x83b   :  { %v3631_v12 = vsel %vm9636_vm0, %v3630_v60, %v3629_v50  ;;  %v3658_v19 = vsel %vm9639_vm13, %v3657_v3, %v3656_v34  ;;  %v3701_v6 = vperm.slane %v9640_v54, %v6957_v9  ;;  %vm9641_vm15 = vcmask 261312   ;;  %v9643_v34 = vld [vmem:[#allocation42_spill] sm:$0xff] }
 0x83c   :  { %v3558_v28 = vsel %vm9641_vm15, %v3557_v4, %v3556_v38  ;;  %v3633_v35 = vsel %vm3356_vm9, %v3632_v56, %v3631_v12  ;;  %vm9642_vm8 = vcmask 786112   ;;  %v3681_v60 = vsel %vm3328_vm14, %v3680_v62, %v3679_v27  ;;  %v9644_v38 = vld [vmem:[#allocation53_spill] sm:$0xff]  ;;  %v9645_v56 = vld [vmem:[#allocation47_spill] sm:$0xff] }
 0x83d   :  { %v3660_v50 = vsel %vm9642_vm8, %v3659_v40, %v3658_v19  ;;  %v3559_v41 = vperm.slane %v3271_v53, %v7010_v52  ;;  %v3663_v3 = vperm.slane %v9643_v34, %v7124_v2  ;;  %v3683_v54 = vsel %vm3332_vm1, %v3682_v31, %v3681_v60  ;;  %v9646_v62 = vld [vmem:[#allocation105_spill] sm:$0xff]  ;;  %v9649_v31 = vld [vmem:[#allocation127_spill] sm:$0xff] }
 0x83e   :  { %v3274_v14 = vpop.permute.xlu1 %3273  ;;  %v3662_v45 = vsel %vm9636_vm0, %v3661_v26, %v3660_v50  ;;  %v3700_v4 = vperm.slane %v9644_v38, %v9395_v63  ;;  %v3686_v40 = vperm.slane %v9645_v56, %v7071_v16  ;;  %v3703_v27 = vperm.slane %v9646_v62, %v6967_v15  ;;  %v9648_v26 = vld [vmem:[#allocation56_spill] sm:$0xff] }
 0x83f   :  { %v3561_v11 = vperm.slane %v3274_v14, %v6996_v33  ;;  %v3685_v14 = vsel %vm3336_vm2, %v3684_v51, %v3683_v54  ;;  %vm9647_vm13 = vcmask 326912   ;;  %v3688_v12 = vperm.slane %v9648_v26, %v7084_v48  ;;  %v9651_v51 = vld [vmem:[#allocation126_spill] sm:$0xff]  ;;  %v9652_v54 = vld [vmem:[#allocation29_spill] sm:$0xff] }
 0x840   :  { %v3560_v53 = vsel %vm9647_vm13, %v3559_v41, %v3558_v28  ;;  %v3702_v19 = vsel %vm3308_vm6, %v3701_v6, %v3700_v4  ;;  %v3705_v50 = vperm.slane %v9649_v31, %v6991_v59  ;;  %vm9650_vm15 = vcmask 392512   ;;  %v9653_v41 = vld [vmem:[#allocation116_spill] sm:$0xff]  ;;  %v9654_v4 = vld [vmem:[#allocation123_spill] sm:$0xff] }
 0x841   :  { %v3562_v60 = vsel %vm9650_vm15, %v3561_v11, %v3560_v53  ;;  %v3690_v34 = vperm.slane %v9651_v51, %v7087_v23  ;;  %v3707_v38 = vperm.slane %v9652_v54, %v7010_v52  ;;  %v3563_v56 = vperm.slane %v7860_v7, %v7029_v55  ;;  %v9656_v7 = vld [vmem:[#allocation99_spill] sm:$0xff] }
 0x842   :  { %v3635_v28 = vsel %vm8855_vm10, %v3634_v1, %v3633_v35  ;;  %v3636_v62 = vperm.slane %v9653_v41, %v7134_v21  ;;  %v3664_v6 = vsel %vm3356_vm9, %v3663_v3, %v3662_v45  ;;  %v3665_v26 = vperm.slane %v9654_v4, %v7131_v49  ;;  %v9660_v4 = vld [vmem:[#allocation102_spill] sm:$0xff] }
 0x843   :  { %v3687_v53 = vsel %vm3340_vm5, %v3686_v40, %v3685_v14  ;;  %vm9655_vm8 = vcmask 195712   ;;  %v3564_v51 = vsel %vm3328_vm14, %v3563_v56, %v3562_v60  ;;  %v3667_v1 = vperm.slane %v9656_v7, %v7134_v21  ;;  %v3289_v60 = vpop.permute.xlu0 %3288  ;;  %v9663_v56 = vld [vmem:[#allocation128_spill] sm:$0xff]  ;;  %v9666_v7 = vld [vmem:[#allocation122_spill] sm:$0xff] }
 0x844   :  { %v3704_v31 = vsel %vm9655_vm8, %v3703_v27, %v3702_v19  ;;  %vm9657_vm0 = vcmask 720512   ;;  %vm9658_vm13 = vcmask 261312   ;;  %v3565_v45 = vperm.slane %v3280_v44, %v7046_v30  ;;  %v9662_v27 = vld [vmem:[#allocation104_spill] sm:$0xff] }
 0x845   :  { %v3689_v35 = vsel %vm9657_vm0, %v3688_v12, %v3687_v53  ;;  %v3706_v41 = vsel %vm9658_vm13, %v3705_v50, %v3704_v31  ;;  %vm9659_vm15 = vcmask 786112   ;;  %v3692_v14 = vperm.slane %v9660_v4, %v7112_v32  ;;  %v9664_v12 = vld [vmem:[#allocation120_spill] sm:$0xff]  ;;  %v9665_v50 = vld [vmem:[#allocation115_spill] sm:$0xff] }
 0x846   :  { %v3283_v11 = vpop.permute.xlu1 %3282  ;;  %v3691_v3 = vsel %vm9659_vm15, %v3690_v34, %v3689_v35  ;;  %vm9661_vm7 = vcmask 326912   ;;  %v3709_v19 = vperm.slane %v9662_v27, %v6996_v33  ;;  %v3731_v53 = vperm.slane %v9664_v12, %v9395_v63  ;;  %v3295_v35 = vpop.permute.xlu2 %3294  ;;  %v9667_v27 = vld [vmem:[#allocation59_spill] sm:$0xff] }
 0x847   :  { %v3567_v54 = vperm.slane %v3283_v11, %v7040_v22  ;;  %v3708_v40 = vsel %vm9661_vm7, %v3707_v38, %v3706_v41  ;;  %v3711_v11 = vperm.slane %v9663_v56, %v7029_v55  ;;  %v3732_v44 = vperm.slane %v9665_v50, %v6957_v9  ;;  %v9668_v12 = vld [vmem:[#allocation139_spill] sm:$0xff] }
 0x848   :  { %v3566_v34 = vsel %vm3332_vm1, %v3565_v45, %v3564_v51  ;;  %v3666_v31 = vsel %vm8855_vm10, %v3665_v26, %v3664_v6  ;;  %v3734_v38 = vperm.slane %v9666_v7, %v6967_v15  ;;  %v7973_v4 = vsel %vm8856_vm3, %v3636_v62, %v3635_v28  ;;  %v9670_v26 = vld [vmem:[#allocation50_spill] sm:$0xff]  ;;  %v9673_v7 = vld [vmem:[#allocation19_spill] sm:$0xff] }
 0x849   :  { %v3568_v41 = vsel %vm3336_vm2, %v3567_v54, %v3566_v34  ;;  %v3713_v56 = vperm.slane %v9667_v27, %v7046_v30  ;;  %v3736_v43 = vperm.slane %v9668_v12, %v6991_v59  ;;  %v3569_v50 = vperm.slane %v3286_v17, %v7071_v16  ;;  %v9671_v54 = vld [vmem:[#allocation54_spill] sm:$0xff] }
 0x84a   :  { %v7981_v51 = vsel %vm8856_vm3, %v3667_v1, %v3666_v31  ;;  %vm9669_vm7 = vcmask 851712   ;;  %v3694_v45 = vperm.slane %v9670_v26, %v7124_v2  ;;  %v3696_v28 = vperm.slane %v9671_v54, %v7131_v49 }
 0x84b   :  { %v3693_v6 = vsel %vm9669_vm7, %v3692_v14, %v3691_v3  ;;  %vm9672_vm8 = vcmask 392512   ;;  %v3715_v27 = vperm.slane %v9673_v7, %v7040_v22  ;;  %v3733_v17 = vsel %vm3308_vm6, %v3732_v44, %v3731_v53  ;;  %v9675_v14 = vld [vmem:[#allocation137_spill] sm:$0xff]  ;;  %v9677_v53 = vld [vmem:[#allocation142_spill] sm:$0xff] }
 0x84c   :  { %v3710_v62 = vsel %vm9672_vm8, %v3709_v19, %v3708_v40  ;;  %v3570_v1 = vsel %vm3340_vm5, %v3569_v50, %v3568_v41  ;;  %vm9674_vm0 = vcmask 195712   ;;  %v3738_v12 = vperm.slane %v9675_v14, %v7010_v52  ;;  %v9676_v19 = vld [vmem:[#allocation130_spill] sm:$0xff]  ;;  %v9679_v7 = vld [vmem:[#allocation129_spill] sm:$0xff] }
 0x84d   :  { %v3712_v34 = vsel %vm3328_vm14, %v3711_v11, %v3710_v62  ;;  %v3735_v3 = vsel %vm9674_vm0, %v3734_v38, %v3733_v17  ;;  %v3571_v26 = vperm.slane %v3289_v60, %v7084_v48  ;;  %v3717_v11 = vperm.slane %v9676_v19, %v7071_v16  ;;  %v9678_v38 = vld [vmem:[#allocation35_spill] sm:$0xff] }
 0x84e   :  { %v3292_v31 = vpop.permute.xlu1 %3291  ;;  %v3714_v40 = vsel %vm3332_vm1, %v3713_v56, %v3712_v34  ;;  %v3737_v62 = vsel %vm9658_vm13, %v3736_v43, %v3735_v3  ;;  %v3740_v44 = vperm.slane %v9677_v53, %v6996_v33  ;;  %v3695_v41 = vsel %vm3356_vm9, %v3694_v45, %v3693_v6  ;;  %v9681_v34 = vld [vmem:[#allocation51_spill] sm:$0xff] }
 0x84f   :  { %v3573_v54 = vperm.slane %v3292_v31, %v7087_v23  ;;  %v3719_v50 = vperm.slane %v9678_v38, %v7084_v48  ;;  %v3742_v60 = vperm.slane %v9679_v7, %v7029_v55  ;;  %vm9680_vm15 = vcmask 720512  }
 0x850   :  { %v3572_v17 = vsel %vm9680_vm15, %v3571_v26, %v3570_v1  ;;  %v3697_v56 = vsel %vm8855_vm10, %v3696_v28, %v3695_v41  ;;  %v3698_v31 = vperm.slane %v9681_v34, %v7134_v21  ;;  %v3763_v43 = vperm.slane %v7204_v57, %v6957_v9  ;;  %v3298_v1 = vpop.permute.xlu0 %3297  ;;  %v9684_v26 = vld [vmem:[#allocation60_spill] sm:$0xff]  ;;  %vm9686_vm13 = vmmov %vm9680_vm15 }
 0x851   :  { %vm9682_vm7 = vcmask 786112   ;;  %v3716_v6 = vsel %vm3336_vm2, %v3715_v27, %v3714_v40  ;;  %vm9683_vm8 = vcmask 326912   ;;  %v3765_v14 = vperm.slane %v7247_v39, %v6967_v15  ;;  %v3304_v40 = vpop.permute.xlu2 %3303 }
 0x852   :  { %v3574_v3 = vsel %vm9682_vm7, %v3573_v54, %v3572_v17  ;;  %v3739_v45 = vsel %vm9683_vm8, %v3738_v12, %v3737_v62  ;;  %v3575_v19 = vperm.slane %v3295_v35, %v7112_v32  ;;  %v3718_v28 = vsel %vm3340_vm5, %v3717_v11, %v3716_v6  ;;  %v9687_v54 = vld [vmem:[#allocation136_spill] sm:$0xff]  ;;  %v9689_v11 = vld [vmem:[#allocation78_spill] sm:$0xff] }
 0x853   :  { %v3721_v53 = vperm.slane %v9684_v26, %v7087_v23  ;;  %vm9685_vm0 = vcmask 392512   ;;  %v3762_v57 = vperm.slane %v7140_v18, %v9395_v63  ;;  %v3720_v27 = vsel %vm9686_vm13, %v3719_v50, %v3718_v28  ;;  %v9694_v26 = vld [vmem:[#allocation58_spill] sm:$0xff] }
 0x854   :  { %v3741_v41 = vsel %vm9685_vm0, %v3740_v44, %v3739_v45  ;;  %v3744_v39 = vperm.slane %v9687_v54, %v7046_v30  ;;  %vm9688_vm15 = vcmask 851712   ;;  %v3746_v62 = vperm.slane %v9689_v11, %v7040_v22  ;;  %v9695_v54 = vld [vmem:[#allocation14_spill] sm:$0xff] }
 0x855   :  { %v3743_v12 = vsel %vm3328_vm14, %v3742_v60, %v3741_v41  ;;  %v3576_v35 = vsel %vm9688_vm15, %v3575_v19, %v3574_v3  ;;  %v3748_v38 = vperm.slane %v7145_v61, %v7071_v16  ;;  %v3764_v44 = vsel %vm3308_vm6, %v3763_v43, %v3762_v57  ;;  %v9691_v43 = vld [vmem:[#allocation134_spill] sm:$0xff] }
 0x856   :  { %v3577_v18 = vperm.slane %v3298_v1, %v7124_v2  ;;  %v3301_v7 = vpop.permute.xlu1 %3300  ;;  %vm9690_vm7 = vcmask 195712   ;;  %v3767_v60 = vperm.slane %v7174_v46, %v6991_v59  ;;  %v3601_v34 = vshll.u32 %v9395_v63, 16  ;;  %v9692_v1 = vld [vmem:[#allocation18_spill] sm:$0xff] }
 0x857   :  { %v3766_v50 = vsel %vm9690_vm7, %v3765_v14, %v3764_v44  ;;  %v3579_v17 = vperm.slane %v3301_v7, %v7131_v49  ;;  %v3769_v3 = vperm.slane %v7240_v58, %v7010_v52  ;;  %v3581_v6 = vperm.slane %v3304_v40, %v7134_v21  ;;  %v8067_v40 = vld [vmem:[#allocation5] sm:$0xff] }
 0x858   :  { %vm8854_vm8 = vcmask 1047559   ;;  %v3578_v61 = vsel %vm3356_vm9, %v3577_v18, %v3576_v35  ;;  %v3723_v45 = vperm.slane %v9691_v43, %v7112_v32  ;;  %v3745_v14 = vsel %vm3332_vm1, %v3744_v39, %v3743_v12 }
 0x859   :  { %v3771_v46 = vperm.slane %v7288_v47, %v6996_v33  ;;  %v3580_v19 = vsel %vm8855_vm10, %v3579_v17, %v3578_v61  ;;  %vm3904_vm0 = vcmp.eq.s32.totalorder %v9692_v1, %v7973_v4  ;;  %vm9693_vm13 = vcmask 786112  }
 0x85a   :  { %v3722_v58 = vsel %vm9693_vm13, %v3721_v53, %v3720_v27  ;;  %v3747_v28 = vsel %vm3336_vm2, %v3746_v62, %v3745_v14  ;;  %v3750_v41 = vperm.slane %v9694_v26, %v7084_v48  ;;  %v3582_v57 = vsel %vm8856_vm3, %v3581_v6, %v3580_v19  ;;  %v9697_v27 = vld [vmem:[#allocation15_spill] sm:$0xff]  ;;  %v9706_v6 = vld [vmem:[#allocation25_spill] sm:$0xff]  ;;  %v9710_v19 = vld [vmem:[#allocation144_spill] sm:$0xff] }
 0x85b   :  { %vm3903_vm15 = vcmp.eq.s32.totalorder %v9695_v54, %v7973_v4  ;;  %v3749_v12 = vsel %vm3340_vm5, %v3748_v38, %v3747_v28  ;;  %vm9696_vm7 = vcmask 261312   ;;  %v3596_v39 = vsel %vm8854_vm8, %v3582_v57, %v7836_v13 }
 0x85c   :  { %v3768_v47 = vsel %vm9696_vm7, %v3767_v60, %v3766_v50  ;;  %v8070_v53 = vor.u32 %v8067_v40, %v3601_v34  ;;  %vm3905_vm13 = vcmp.eq.s32.totalorder %v9697_v27, %v7973_v4  ;;  %v3752_v35 = vperm.slane %v7138_v37, %v7087_v23 }
 0x85d   :  { %v3770_v11 = vsel %vm9698_vm11, %v3769_v3, %v3768_v47  ;;  %v3773_v62 = vperm.slane %v7207_v25, %v7029_v55  ;;  %vm3597_vm7 = vcmp.ne.s32.totalorder %v3596_v39, 0  ;;  %v8080_v38 = vsel %vm9699_vm12, %v3723_v45, %v3722_v58  ;;  %v9704_v25 = vld [vmem:[#allocation117_spill] sm:$0xff] }
 0x85e   :  { %vm9700_vm8 = vcmask 392512   ;;  %v3775_v44 = vperm.slane %v7278_v10, %v7046_v30  ;;  %vm8087_vm10 = vmand %vm4834_vm4, %vm3597_vm7  ;;  %v8092_v37 = vsel %vm8856_vm3, %v3698_v31, %v3697_v56  ;;  %v3725_v50 = vperm.slane %v9704_v25, %v7124_v2 }
 0x85f   :  { %v3772_v13 = vsel %vm9700_vm8, %v3771_v46, %v3770_v11  ;;  %vm9705_vm11 = vcmask 720512   ;;  %v3777_v17 = vperm.slane %v7328_v42, %v7040_v22  ;;  %v8102_v10 = vsel %vm8087_vm10, 1, %v8943_v20 }
 0x860   :  { %v3751_v60 = vsel %vm9705_vm11, %v3750_v41, %v3749_v12  ;;  %v3794_v34 = vperm.slane %v7446_v24, %v6957_v9  ;;  %v3949_v3 = vperm.slane %v8102_v10, 0  ;;  %v3996_v56 = vperm.slane %v8070_v53, 0 }
 0x861   :  { %v3928_v31 = vrot.slane %v8102_v10, 1  ;;  %v3727_v61 = vperm.slane %v9706_v6, %v7131_v49  ;;  %vm9707_vm4 = vcmask 786112   ;;  %v3754_v42 = vperm.slane %v7177_v29, %v7112_v32 }
 0x862   :  { %v3753_v43 = vsel %vm9707_vm4, %v3752_v35, %v3751_v60  ;;  %v3774_v45 = vsel %vm3328_vm14, %v3773_v62, %v3772_v13  ;;  %v3793_v24 = vperm.slane %v7404_v36, %v9395_v63  ;;  %vm8118_vm12 = vcmp.eq.s32.totalorder %v3949_v3, 1  ;;  %v9713_v60 = vld [vmem:[#allocation20_spill] sm:$0xff] }
 0x863   :  { %v3776_v14 = vsel %vm3332_vm1, %v3775_v44, %v3774_v45  ;;  %vm3935_vm8 = vcmp.ne.s32.totalorder %v3928_v31, 0  ;;  %v3756_v58 = vperm.slane %v9710_v19, %v7124_v2  ;;  %v3779_v29 = vperm.slane %v7242_v8, %v7071_v16  ;;  %vm3966_vm7 = vmand %vm3904_vm0, %vm8118_vm12  ;;  %v9711_v8 = vld [vmem:[#allocation71_spill] sm:$0xff]  ;;  %v9712_v44 = vld [vmem:[#allocation62_spill] sm:$0xff] }
 0x864   :  { %v3778_v28 = vsel %vm3336_vm2, %v3777_v17, %v3776_v14  ;;  %v3942_v36 = vsel %vm3935_vm8, 1, %v8943_v20  ;;  %v3781_v26 = vperm.slane %v7320_v5, %v7084_v48  ;;  %v3795_v41 = vsel %vm3308_vm6, %v3794_v34, %v3793_v24  ;;  %vm3965_vm11 = vmand %vm3903_vm15, %vm8118_vm12 }
 0x865   :  { %v3796_v57 = vperm.slane %v7369_v0, %v6967_v15  ;;  %v4005_v12 = vsel %vm3966_vm7, %v3996_v56, 0  ;;  %vm3907_vm0 = vcmp.eq.s32.totalorder %v9692_v1, %v7981_v51  ;;  %v3798_v47 = vperm.slane %v9711_v8, %v6991_v59  ;;  %vm3967_vm4 = vmand %vm3905_vm13, %vm8118_vm12  ;;  %v9720_v8 = vld [vmem:[#allocation147_spill] sm:$0xff] }
 0x866   :  { %v4040_v39 = vand.u32 65535, %v4005_v12  ;;  %v4004_v5 = vsel %vm3965_vm11, %v3996_v56, 0  ;;  %vm8857_vm8 = vcmask 1043456   ;;  %vm3906_vm7 = vcmp.eq.s32.totalorder %v9695_v54, %v7981_v51 }
 0x867   :  { %v4029_v0 = vshrl.u32 %v4004_v5, 16  ;;  %v4028_v35 = vand.u32 65535, %v4004_v5  ;;  %v4006_v11 = vsel %vm3967_vm4, %v3996_v56, 0  ;;  %v3950_v62 = vperm.slane %v3942_v36, 0  ;;  %v9715_v56 = vld [vmem:[#allocation73_spill] sm:$0xff] }
 0x868   :  { %v3780_v13 = vsel %vm3340_vm5, %v3779_v29, %v3778_v28  ;;  %v3783_v18 = vperm.slane %v9712_v44, %v7087_v23  ;;  %v3800_v17 = vperm.slane %v9713_v60, %v7010_v52  ;;  %v4042_v34 = vcvt.s32.f32 %v4040_v39  ;;  %v9718_v28 = vld [vmem:[#allocation141_spill] sm:$0xff]  ;;  %v9726_v44 = vld [vmem:[#allocation76_spill] sm:$0xff]  ;;  %v9727_v60 = vld [vmem:[#allocation146_spill] sm:$0xff] }
 0x869   :  { %v4031_v3 = vcvt.s32.f32 %v4029_v0  ;;  %v4030_v4 = vcvt.s32.f32 %v4028_v35  ;;  %v4053_v31 = vsel %vm8857_vm8, %v4006_v11, 0  ;;  %v3989_v45 = vrot.slane %v8070_v53, 1 }
 0x86a   :  { %vm9714_vm15 = vcmask 851712   ;;  %v3758_v24 = vperm.slane %v9715_v56, %v7131_v49  ;;  %vm9716_vm13 = vcmask 720512   ;;  %vm9717_vm12 = vcmask 195712   ;;  %4044 = vadd.xlane.f32.xlu2 %v4042_v34 }
 0x86b   :  { %v3755_v14 = vsel %vm9714_vm15, %v3754_v42, %v3753_v43  ;;  %v3782_v46 = vsel %vm9716_vm13, %v3781_v26, %v3780_v13  ;;  %v3797_v19 = vsel %vm9717_vm12, %v3796_v57, %v3795_v41  ;;  %vm3908_vm11 = vcmp.eq.s32.totalorder %v9697_v27, %v7981_v51  ;;  %4034 = vadd.xlane.f32.xlu1 %v4031_v3  ;;  %v9725_v41 = vld [vmem:[#allocation133_spill] sm:$0xff] }
 0x86c   :  { %v3785_v29 = vperm.slane %v9718_v28, %v7112_v32  ;;  %vm9719_vm4 = vcmask 261312   ;;  %v3802_v39 = vperm.slane %v9720_v8, %v6996_v33  ;;  %4032 = vadd.xlane.f32.xlu0 %v4030_v4  ;;  %vm8173_vm15 = vcmp.eq.s32.totalorder %v3950_v62, 1 }
 0x86d   :  { %v3799_v36 = vsel %vm9719_vm4, %v3798_v47, %v3797_v19  ;;  %vm9723_vm13 = vcmask 786112   ;;  %vm9724_vm12 = vcmask 326912   ;;  %v3804_v57 = vperm.slane %v9725_v41, %v7029_v55  ;;  %vm3969_vm4 = vmand %vm3907_vm0, %vm8173_vm15 }
 0x86e   :  { %v3784_v42 = vsel %vm9723_vm13, %v3783_v18, %v3782_v46  ;;  %v3801_v26 = vsel %vm9724_vm12, %v3800_v17, %v3799_v36  ;;  %v4055_v5 = vshrl.u32 %v4053_v31, 16  ;;  %v4054_v0 = vand.u32 65535, %v4053_v31  ;;  %vm3968_vm3 = vmand %vm3906_vm7, %vm8173_vm15  ;;  %v9733_v31 = vld [vmem:[#allocation81_spill] sm:$0xff]  ;;  %v9734_v36 = vld [vmem:[#allocation138_spill] sm:$0xff] }
 0x86f   :  { %v4041_v35 = vshrl.u32 %v4005_v12, 16  ;;  %v3997_v47 = vperm.slane %v3989_v45, 0  ;;  %v3929_v11 = vrot.slane %v8102_v10, 2  ;;  %v8187_v62 = vsel %vm3356_vm9, %v3725_v50, %v8080_v38  ;;  %v9728_v12 = vld [vmem:[#allocation132_spill] sm:$0xff]  ;;  %v9730_v50 = vld [vmem:[#allocation131_spill] sm:$0xff] }
 0x870   :  { %v3757_v13 = vsel %vm3356_vm9, %v3756_v58, %v3755_v14  ;;  %v3787_v18 = vperm.slane %v9726_v44, %v7124_v2  ;;  %v3806_v17 = vperm.slane %v9727_v60, %v7046_v30  ;;  %v3729_v25 = vperm.slane %v9728_v12, %v7134_v21 }
 0x871   :  { %vm9729_vm13 = vcmask 982912   ;;  %v3760_v58 = vperm.slane %v9730_v50, %v7134_v21  ;;  %vm9731_vm12 = vcmask 392512   ;;  %vm9732_vm8 = vcmask 851712  }
 0x872   :  { %v8202_v38 = vsel %vm9729_vm13, %v3758_v24, %v3757_v13  ;;  %v3803_v34 = vsel %vm9731_vm12, %v3802_v39, %v3801_v26  ;;  %v3786_v3 = vsel %vm9732_vm8, %v3785_v29, %v3784_v42  ;;  %v3808_v45 = vperm.slane %v9733_v31, %v7040_v22  ;;  %v9735_v39 = vld [vmem:[#allocation16_spill] sm:$0xff]  ;;  %v9736_v26 = vld [vmem:[#allocation154_spill] sm:$0xff]  ;;  %vm8233_vm8 = vmand %vm3908_vm11, %vm8173_vm15 }
 0x873   :  { %v3805_v4 = vsel %vm3328_vm14, %v3804_v57, %v3803_v34  ;;  %v4057_v14 = vcvt.s32.f32 %v4055_v5  ;;  %v4056_v56 = vcvt.s32.f32 %v4054_v0  ;;  %v4043_v24 = vcvt.s32.f32 %v4041_v35  ;;  %v9737_v57 = vld [vmem:[#allocation148_spill] sm:$0xff]  ;;  %v9740_v35 = vld [vmem:[#allocation135_spill] sm:$0xff]  ;;  %v9741_v13 = vld [vmem:[#allocation85_spill] sm:$0xff] }
 0x874   :  { %v8216_v46 = vsel %vm3969_vm4, %v3997_v47, 0  ;;  %vm3936_vm0 = vcmp.ne.s32.totalorder %v3929_v11, 0  ;;  %v3788_v19 = vsel %vm3356_vm9, %v3787_v18, %v3786_v3  ;;  %v3807_v28 = vsel %vm3332_vm1, %v3806_v17, %v3805_v4  ;;  %v9742_v17 = vld [vmem:[#allocation83_spill] sm:$0xff]  ;;  %v9743_v31 = vld [vmem:[#allocation150_spill] sm:$0xff] }
 0x875   :  { %v3810_v8 = vperm.slane %v9734_v36, %v7071_v16  ;;  %4060 = vadd.xlane.f32.xlu2 %v4057_v14  ;;  %v4007_v29 = vsel %vm3968_vm3, %v3997_v47, 0  ;;  %v3812_v42 = vperm.slane %v9735_v39, %v7084_v48  ;;  %v3824_v41 = vperm.slane %v9736_v26, %v9395_v63  ;;  %4058 = vadd.xlane.f32.xlu1 %v4056_v56  ;;  %v9744_v56 = vld [vmem:[#allocation149_spill] sm:$0xff] }
 0x876   :  { %v3825_v5 = vperm.slane %v9737_v57, %v6957_v9  ;;  %4046 = vadd.xlane.f32.xlu0 %v4043_v24  ;;  %v3789_v11 = vperm.slane %v9740_v35, %v7131_v49  ;;  %v3827_v44 = vperm.slane %v9741_v13, %v6967_v15  ;;  %v4078_v18 = vand.u32 65535, %v8216_v46  ;;  %v9747_v26 = vld [vmem:[#allocation145_spill] sm:$0xff] }
 0x877   :  { %v3943_v60 = vsel %vm3936_vm0, 1, %v8943_v20  ;;  %v3791_v43 = vperm.slane %v9742_v17, %v7134_v21  ;;  %v3809_v34 = vsel %vm3336_vm2, %v3808_v45, %v3807_v28  ;;  %v4067_v51 = vshrl.u32 %v4007_v29, 16  ;;  %v9746_v28 = vld [vmem:[#allocation140_spill] sm:$0xff] }
 0x878   :  { %v4066_v3 = vand.u32 65535, %v4007_v29  ;;  %vm3910_vm3 = vcmp.eq.s32.totalorder %v9692_v1, %v8092_v37  ;;  %v3811_v4 = vsel %vm3340_vm5, %v3810_v8, %v3809_v34  ;;  %v3814_v14 = vperm.slane %v9743_v31, %v7087_v23 }
 0x879   :  { %v3829_v24 = vperm.slane %v9744_v56, %v6991_v59  ;;  %v4009_v36 = vsel %vm8233_vm8, %v3997_v47, 0  ;;  %vm3909_vm7 = vcmp.eq.s32.totalorder %v9695_v54, %v8092_v37  ;;  %vm9745_vm11 = vcmask 720512   ;;  %v9749_v59 = vld [vmem:[#allocation74_spill] sm:$0xff] }
 0x87a   :  { %v3813_v45 = vsel %vm9745_vm11, %v3812_v42, %v3811_v4  ;;  %v3816_v29 = vperm.slane %v9746_v28, %v7112_v32  ;;  %v3826_v39 = vsel %vm3308_vm6, %v3825_v5, %v3824_v41  ;;  %v3951_v8 = vperm.slane %v3943_v60, 0  ;;  %v9753_v60 = vld [vmem:[#allocation79_spill] sm:$0xff] }
 0x87b   :  { %v3818_v57 = vperm.slane %v9747_v26, %v7124_v2  ;;  %vm9748_vm15 = vcmask 195712   ;;  %v3831_v0 = vperm.slane %v9749_v59, %v7010_v52  ;;  %v4080_v47 = vcvt.s32.f32 %v4078_v18  ;;  %v9755_v52 = vld [vmem:[#allocation143_spill] sm:$0xff]  ;;  %v9769_v26 = vld [vmem:[#allocation89_spill] sm:$0xff] }
 0x87c   :  { %v3828_v35 = vsel %vm9748_vm15, %v3827_v44, %v3826_v39  ;;  %v4069_v13 = vcvt.s32.f32 %v4067_v51  ;;  %v4068_v17 = vcvt.s32.f32 %v4066_v3  ;;  %vm9750_vm4 = vcmask 1043456   ;;  %v9756_v51 = vld [vmem:[#allocation21_spill] sm:$0xff] }
 0x87d   :  { %v4090_v34 = vsel %vm9750_vm4, %v4009_v36, 0  ;;  %v3990_v42 = vrot.slane %v8070_v53, 2  ;;  %v3790_v4 = vsel %vm9729_vm13, %v3789_v11, %v3788_v19  ;;  %vm9751_vm12 = vcmask 786112   ;;  %4082 = vadd.xlane.f32.xlu2 %v4080_v47 }
 0x87e   :  { %v3815_v41 = vsel %vm9751_vm12, %v3814_v14, %v3813_v45  ;;  %vm9752_vm0 = vcmask 261312   ;;  %v3833_v31 = vperm.slane %v9753_v60, %v6996_v33  ;;  %vm9754_vm8 = vcmask 851712   ;;  %4072 = vadd.xlane.f32.xlu1 %v4069_v13  ;;  %4070 = vadd.xlane.f32.xlu0 %v4068_v17  ;;  %v9772_v60 = vld [vmem:[#allocation153_spill] sm:$0xff] }
 0x87f   :  { %v3830_v5 = vsel %vm9752_vm0, %v3829_v24, %v3828_v35  ;;  %v3817_v44 = vsel %vm9754_vm8, %v3816_v29, %v3815_v41  ;;  %v3820_v18 = vperm.slane %v9755_v52, %v7131_v49  ;;  %v3835_v3 = vperm.slane %v9756_v51, %v7029_v55 }
 0x880   :  { %vm8278_vm11 = vcmp.eq.s32.totalorder %v3951_v8, 1  ;;  %v3819_v11 = vsel %vm3356_vm9, %v3818_v57, %v3817_v44  ;;  %v4092_v14 = vshrl.u32 %v4090_v34, 16  ;;  %v3930_v33 = vrot.slane %v8102_v10, 3 }
 0x881   :  { %vm9759_vm15 = vcmask 1048512   ;;  %vm9760_vm4 = vcmask 326912   ;;  %v4091_v24 = vand.u32 65535, %v4090_v34  ;;  %v4079_v36 = vshrl.u32 %v8216_v46, 16  ;;  %vm8304_vm0 = vmand %vm3910_vm3, %vm8278_vm11 }
 0x882   :  { %v8289_v56 = vsel %vm9759_vm15, %v3760_v58, %v8202_v38  ;;  %v3832_v55 = vsel %vm9760_vm4, %v3831_v0, %v3830_v5  ;;  %v3998_v45 = vperm.slane %v3990_v42, 0  ;;  %v3728_v28 = vsel %vm9729_vm13, %v3727_v61, %v8187_v62  ;;  %vm9764_vm4 = vmmov %vm9729_vm13  ;;  %v9765_v62 = vld [vmem:[#allocation98_spill] sm:$0xff] }
 0x883   :  { %vm9761_vm12 = vcmask 392512   ;;  %vm3911_vm8 = vcmp.eq.s32.totalorder %v9697_v27, %v8092_v37  ;;  %v8311_v50 = vsel %vm9759_vm15, %v3791_v43, %v3790_v4  ;;  %v8314_v6 = vsel %vm9764_vm4, %v3820_v18, %v3819_v11  ;;  %vm3971_vm3 = vmand %vm3909_vm7, %vm8278_vm11  ;;  %v9775_v11 = vld [vmem:[#allocation152_spill] sm:$0xff] }
 0x884   :  { %v3834_v29 = vsel %vm9761_vm12, %v3833_v31, %v3832_v55  ;;  %v3837_v58 = vperm.slane %v9765_v62, %v7046_v30  ;;  %vm9766_vm13 = vmmov %vm9759_vm15  ;;  %v4094_v43 = vcvt.s32.f32 %v4092_v14  ;;  %vm8330_vm12 = vcmp.ne.s32.totalorder %v3930_v33, 0 }
 0x885   :  { %v3836_v61 = vsel %vm3328_vm14, %v3835_v3, %v3834_v29  ;;  %v8328_v46 = vsel %vm9766_vm13, %v3729_v25, %v3728_v28  ;;  %v3931_v8 = vrot.slane %v8102_v10, 4  ;;  %vm3917_vm14 = vcmp.eq.s32.totalorder %v9697_v27, %v8289_v56  ;;  %vm8351_vm15 = vmand %vm3911_vm8, %vm8278_vm11 }
 0x886   :  { %v3932_v30 = vrot.slane %v8102_v10, 5  ;;  %v3839_v57 = vperm.slane %v9769_v26, %v7040_v22  ;;  %v4093_v35 = vcvt.s32.f32 %v4091_v24  ;;  %v4081_v12 = vcvt.s32.f32 %v4079_v36  ;;  %4097 = vadd.xlane.f32.xlu2 %v4094_v43 }
 0x887   :  { %v8342_v25 = vsel %vm8304_vm0, %v3998_v45, 0  ;;  %vm3920_vm7 = vcmp.eq.s32.totalorder %v9697_v27, %v8311_v50  ;;  %v4010_v59 = vsel %vm3971_vm3, %v3998_v45, 0  ;;  %vm3938_vm4 = vcmp.ne.s32.totalorder %v3931_v8, 0  ;;  %v9780_v8 = vld [vmem:[#allocation87_spill] sm:$0xff] }
 0x888   :  { %vm3939_vm13 = vcmp.ne.s32.totalorder %v3932_v30, 0  ;;  %v3933_v47 = vrot.slane %v8102_v10, 6  ;;  %4095 = vadd.xlane.f32.xlu1 %v4093_v35  ;;  %4084 = vadd.xlane.f32.xlu0 %v4081_v12  ;;  %v3944_v13 = vsel %vm8330_vm12, 1, %v8943_v20  ;;  %v3945_v17 = vsel %vm3938_vm4, 1, %v8943_v20  ;;  %v9783_v35 = vld [vmem:[#allocation155_spill] sm:$0xff] }
 0x889   :  { %v3992_v34 = vrot.slane %v8070_v53, 4  ;;  %v3946_v37 = vsel %vm3939_vm13, 1, %v8943_v20  ;;  %v4115_v42 = vand.u32 65535, %v8342_v25  ;;  %vm3913_vm11 = vcmp.eq.s32.totalorder %v9692_v1, %v8328_v46 }
 0x88a   :  { %v3953_v4 = vperm.slane %v3945_v17, 0  ;;  %v3954_v41 = vperm.slane %v3946_v37, 0  ;;  %v3993_v5 = vrot.slane %v8070_v53, 5  ;;  %v3841_v31 = vperm.slane %v9772_v60, %v7071_v16 }
 0x88b   :  { %v4104_v44 = vshrl.u32 %v4010_v59, 16  ;;  %v4103_v52 = vand.u32 65535, %v4010_v59  ;;  %v4012_v18 = vsel %vm8351_vm15, %v3998_v45, 0  ;;  %vm3912_vm0 = vcmp.eq.s32.totalorder %v9695_v54, %v8328_v46  ;;  %v9778_v45 = vld [vmem:[#allocation80_spill] sm:$0xff] }
 0x88c   :  { %v3952_v51 = vperm.slane %v3944_v13, 0  ;;  %vm8372_vm8 = vcmp.eq.s32.totalorder %v3953_v4, 1  ;;  %v8376_v19 = vperm.slane %v3992_v34, 0  ;;  %vm3940_vm3 = vcmp.ne.s32.totalorder %v3933_v47, 0 }
 0x88d   :  { %v3822_v14 = vperm.slane %v9775_v11, %v7134_v21  ;;  %v3838_v33 = vsel %vm3332_vm1, %v3837_v58, %v3836_v61  ;;  %vm8381_vm12 = vcmp.eq.s32.totalorder %v3954_v41, 1  ;;  %v8385_v24 = vperm.slane %v3993_v5, 0  ;;  %vm3979_vm1 = vmand %vm3917_vm14, %vm8372_vm8  ;;  %v9790_v5 = vld [vmem:[#allocation92_spill] sm:$0xff] }
 0x88e   :  { %v3840_v36 = vsel %vm3336_vm2, %v3839_v57, %v3838_v33  ;;  %v3843_v28 = vperm.slane %v9778_v45, %v7084_v48  ;;  %v4117_v29 = vcvt.s32.f32 %v4115_v42  ;;  %vm9779_vm15 = vcmask 1043456   ;;  %vm3982_vm14 = vmand %vm3920_vm7, %vm8381_vm12 }
 0x88f   :  { %v4127_v38 = vsel %vm9779_vm15, %v4012_v18, 0  ;;  %v4106_v62 = vcvt.s32.f32 %v4104_v44  ;;  %v4105_v43 = vcvt.s32.f32 %v4103_v52  ;;  %v3991_v39 = vrot.slane %v8070_v53, 3  ;;  %vm9784_vm4 = vmmov %vm9779_vm15  ;;  %v9793_v44 = vld [vmem:[#allocation151_spill] sm:$0xff] }
 0x890   :  { %v3947_v61 = vsel %vm3940_vm3, 1, %v8943_v20  ;;  %v3842_v58 = vsel %vm3340_vm5, %v3841_v31, %v3840_v36  ;;  %v3845_v30 = vperm.slane %v9780_v8, %v7087_v23  ;;  %4119 = vadd.xlane.f32.xlu2 %v4117_v29  ;;  %vm8401_vm2 = vcmp.eq.s32.totalorder %v3952_v51, 1  ;;  %vm9788_vm3 = vmmov %vm9784_vm4 }
 0x891   :  { %v4018_v57 = vsel %vm3979_vm1, %v8376_v19, 0  ;;  %v3847_v12 = vperm.slane %v9783_v35, %v7112_v32  ;;  %4109 = vadd.xlane.f32.xlu1 %v4106_v62  ;;  %4107 = vadd.xlane.f32.xlu0 %v4105_v43  ;;  %v4129_v59 = vshrl.u32 %v4127_v38, 16  ;;  %v4021_v0 = vsel %vm3982_vm14, %v8385_v24, 0  ;;  %vm8425_vm7 = vmand %vm3913_vm11, %vm8401_vm2 }
 0x892   :  { %v8414_v23 = vsel %vm9784_vm4, %v4018_v57, 0  ;;  %v4128_v47 = vand.u32 65535, %v4127_v38  ;;  %v4116_v13 = vshrl.u32 %v8342_v25, 16  ;;  %v3955_v17 = vperm.slane %v3947_v61, 0  ;;  %vm3974_vm11 = vmand %vm3912_vm0, %vm8401_vm2 }
 0x893   :  { %v3994_v34 = vrot.slane %v8070_v53, 6  ;;  %vm9785_vm13 = vcmask 720512   ;;  %v3999_v42 = vperm.slane %v3991_v39, 0  ;;  %v8430_v4 = vsel %vm9788_vm3, %v4021_v0, 0 }
 0x894   :  { %v3844_v37 = vsel %vm9785_vm13, %v3843_v28, %v3842_v58  ;;  %v3934_v25 = vrot.slane %v8102_v10, 7  ;;  %vm9789_vm15 = vcmask 786112   ;;  %v3849_v60 = vperm.slane %v9790_v5, %v7124_v2  ;;  %v9794_v2 = vld [vmem:[#allocation95_spill] sm:$0xff] }
 0x895   :  { %v3846_v41 = vsel %vm9789_vm15, %v3845_v30, %v3844_v37  ;;  %vm3914_vm1 = vcmp.eq.s32.totalorder %v9697_v27, %v8328_v46  ;;  %vm9791_vm14 = vcmask 1048512   ;;  %vm9792_vm4 = vcmask 851712  }
 0x896   :  { %v8445_v31 = vsel %vm9791_vm14, %v3822_v14, %v8314_v6  ;;  %v3848_v10 = vsel %vm9792_vm4, %v3847_v12, %v3846_v41  ;;  %v3851_v52 = vperm.slane %v9793_v44, %v7131_v49  ;;  %v3853_v18 = vperm.slane %v9794_v2, %v7134_v21  ;;  %vm8467_vm3 = vmand %vm3914_vm1, %vm8401_vm2 }
 0x897   :  { %v4131_v51 = vcvt.s32.f32 %v4129_v59  ;;  %v4130_v11 = vcvt.s32.f32 %v4128_v47  ;;  %v4118_v33 = vcvt.s32.f32 %v4116_v13  ;;  %vm8452_vm13 = vcmp.eq.s32.totalorder %v3955_v17, 1  ;;  %vm9800_vm15 = vmmov %vm9791_vm14 }
 0x898   :  { %v8456_v45 = vperm.slane %v3994_v34, 0  ;;  %v4014_v6 = vsel %vm8425_vm7, %v3999_v42, 0  ;;  %v4013_v14 = vsel %vm3974_vm11, %v3999_v42, 0  ;;  %vm3941_vm0 = vcmp.ne.s32.totalorder %v3934_v25, 0 }
 0x899   :  { %v3995_v28 = vrot.slane %v8070_v53, 7  ;;  %v3850_v49 = vsel %vm3356_vm9, %v3849_v60, %v3848_v10  ;;  %4134 = vadd.xlane.f32.xlu2 %v4131_v51  ;;  %v3948_v29 = vsel %vm3941_vm0, 1, %v8943_v20  ;;  %vm3923_vm7 = vcmp.eq.s32.totalorder %v9697_v27, %v8445_v31  ;;  %4132 = vadd.xlane.f32.xlu1 %v4130_v11 }
 0x89a   :  { %v3599_v53 = vsel %vm8087_vm10, 50264, %v8067_v40  ;;  %vm9799_vm9 = vcmask 982912   ;;  %4121 = vadd.xlane.f32.xlu0 %v4118_v33  ;;  %v3956_v62 = vperm.slane %v3948_v29, 0  ;;  %vm3985_vm2 = vmand %vm3923_vm7, %vm8452_vm13  ;;  %v4152_v46 = vand.u32 65535, %v4014_v6 }
 0x89b   :  { %v3852_v38 = vsel %vm9799_vm9, %v3851_v52, %v3850_v49  ;;  %3600 = vst [vmem:[#allocation7] sm:$0xff] %v3599_v53  ;;  %v4141_v43 = vshrl.u32 %v4013_v14, 16  ;;  %v4024_v39 = vsel %vm3985_vm2, %v8456_v45, 0  ;;  %v4140_v61 = vand.u32 65535, %v4013_v14 }
 0x89c   :  { %v8481_v20 = vsel %vm9800_vm15, %v3853_v18, %v3852_v38  ;;  %vm8484_vm11 = vcmp.eq.s32.totalorder %v3956_v62, 1  ;;  %v8488_v40 = vperm.slane %v3995_v28, 0  ;;  %vm9803_vm10 = vcmask 1043456   ;;  %4508 = dma.vmem_to_hbm [thread:$0]  %s4504_s24, 128, %s4506_s22, [#allocation4]  }
 0x89d   :  { %v8491_v58 = vsel %vm9803_vm10, %v4024_v39, 0  ;;  %v4015_v8 = vsel %vm8467_vm3, %v3999_v42, 0  ;;  %vm3926_vm1 = vcmp.eq.s32.totalorder %v9697_v27, %v8481_v20  ;;  %v4154_v30 = vcvt.s32.f32 %v4152_v46  ;;  %vm9804_vm4 = vmmov %vm9803_vm10 }
 0x89e   :  { %vm3988_vm14 = vmand %vm3926_vm1, %vm8484_vm11  ;;  %v4143_v26 = vcvt.s32.f32 %v4141_v43  ;;  %v4142_v57 = vcvt.s32.f32 %v4140_v61  ;;  %v4164_v35 = vsel %vm9804_vm4, %v4015_v8, 0  ;;  %v4153_v13 = vshrl.u32 %v4014_v6, 16 }
 0x89f   :  { %v4027_v12 = vsel %vm3988_vm14, %v8488_v40, 0  ;;  %vm9805_vm0 = vmmov %vm9804_vm4  ;;  %v4166_v0 = vshrl.u32 %v4164_v35, 16  ;;  %v4165_v47 = vand.u32 65535, %v4164_v35  ;;  %vm3916_vm3 = vcmp.eq.s32.totalorder %v9692_v1, %v8289_v56 }
 0x8a0   :  { %v8502_v59 = vsel %vm9805_vm0, %v4027_v12, 0  ;;  %vm3978_vm7 = vmand %vm3916_vm3, %vm8372_vm8  ;;  %vm3915_vm9 = vcmp.eq.s32.totalorder %v9695_v54, %v8289_v56  ;;  %v4155_v34 = vcvt.s32.f32 %v4153_v13  ;;  %v4203_v56 = vshrl.u32 %v8414_v23, 16 }
 0x8a1   :  { %4156 = vadd.xlane.f32.xlu2 %v4154_v30  ;;  %4146 = vadd.xlane.f32.xlu1 %v4143_v26  ;;  %vm3977_vm2 = vmand %vm3915_vm9, %vm8372_vm8  ;;  %v4168_v27 = vcvt.s32.f32 %v4166_v0  ;;  %v4167_v17 = vcvt.s32.f32 %v4165_v47  ;;  %v4017_v37 = vsel %vm3978_vm7, %v8376_v19, 0  ;;  %v4202_v3 = vand.u32 65535, %v8414_v23 }
 0x8a2   :  { %4144 = vadd.xlane.f32.xlu0 %v4142_v57  ;;  %v4016_v32 = vsel %vm3977_vm2, %v8376_v19, 0  ;;  %v4189_v42 = vand.u32 65535, %v4017_v37  ;;  %v4190_v44 = vshrl.u32 %v4017_v37, 16  ;;  %vm3919_vm8 = vcmp.eq.s32.totalorder %v9692_v1, %v8311_v50 }
 0x8a3   :  { %v4178_v25 = vshrl.u32 %v4016_v32, 16  ;;  %v4177_v41 = vand.u32 65535, %v4016_v32  ;;  %vm3981_vm15 = vmand %vm3919_vm8, %vm8381_vm12  ;;  %vm3918_vm10 = vcmp.eq.s32.totalorder %v9695_v54, %v8311_v50  ;;  %v4205_v19 = vcvt.s32.f32 %v4203_v56 }
 0x8a4   :  { %v4191_v5 = vcvt.s32.f32 %v4189_v42  ;;  %vm3980_vm1 = vmand %vm3918_vm10, %vm8381_vm12  ;;  %v4204_v52 = vcvt.s32.f32 %v4202_v3  ;;  %v4192_v2 = vcvt.s32.f32 %v4190_v44  ;;  %v4020_v18 = vsel %vm3981_vm15, %v8385_v24, 0 }
 0x8a5   :  { %v4180_v60 = vcvt.s32.f32 %v4178_v25  ;;  %v4179_v10 = vcvt.s32.f32 %v4177_v41  ;;  %v4019_v23 = vsel %vm3980_vm1, %v8385_v24, 0  ;;  %v4240_v51 = vshrl.u32 %v8430_v4, 16 }
 0x8a6   :  { %v4227_v11 = vshrl.u32 %v4020_v18, 16  ;;  %v4215_v33 = vshrl.u32 %v4019_v23, 16  ;;  %vm3922_vm14 = vcmp.eq.s32.totalorder %v9692_v1, %v8445_v31  ;;  %vm3921_vm4 = vcmp.eq.s32.totalorder %v9695_v54, %v8445_v31 }
 0x8a7   :  { %vm3984_vm12 = vmand %vm3922_vm14, %vm8452_vm13  ;;  %v4242_v50 = vcvt.s32.f32 %v4240_v51  ;;  %v4214_v28 = vand.u32 65535, %v4019_v23  ;;  %vm3924_vm3 = vcmp.eq.s32.totalorder %v9695_v54, %v8481_v20  ;;  %v4277_v38 = vshrl.u32 %v8491_v58, 16 }
 0x8a8   :  { %vm3983_vm0 = vmand %vm3921_vm4, %vm8452_vm13  ;;  %v4229_v55 = vcvt.s32.f32 %v4227_v11  ;;  %v4217_v24 = vcvt.s32.f32 %v4215_v33  ;;  %v4023_v6 = vsel %vm3984_vm12, %v8456_v45, 0  ;;  %v4226_v62 = vand.u32 65535, %v4020_v18 }
 0x8a9   :  { %4171 = vadd.xlane.f32.xlu2 %v4168_v27  ;;  %4169 = vadd.xlane.f32.xlu1 %v4167_v17  ;;  %v4022_v14 = vsel %vm3983_vm0, %v8456_v45, 0  ;;  %v4264_v49 = vshrl.u32 %v4023_v6, 16  ;;  %vm3986_vm7 = vmand %vm3924_vm3, %vm8484_vm11  ;;  %v4216_v31 = vcvt.s32.f32 %v4214_v28  ;;  %vm3925_vm13 = vcmp.eq.s32.totalorder %v9692_v1, %v8481_v20 }
 0x8aa   :  { %4158 = vadd.xlane.f32.xlu0 %v4155_v34  ;;  %v4252_v21 = vshrl.u32 %v4022_v14, 16  ;;  %v4025_v53 = vsel %vm3986_vm7, %v8488_v40, 0  ;;  %vm3987_vm9 = vmand %vm3925_vm13, %vm8484_vm11  ;;  %v4279_v46 = vcvt.s32.f32 %v4277_v38  ;;  %v4228_v43 = vcvt.s32.f32 %v4226_v62 }
 0x8ab   :  { %v4266_v36 = vcvt.s32.f32 %v4264_v49  ;;  %v4289_v45 = vshrl.u32 %v4025_v53, 16  ;;  %v4026_v39 = vsel %vm3987_vm9, %v8488_v40, 0  ;;  %v4251_v61 = vand.u32 65535, %v4022_v14 }
 0x8ac   :  { %v4254_v29 = vcvt.s32.f32 %v4252_v21  ;;  %v4239_v8 = vand.u32 65535, %v8430_v4  ;;  %v4301_v30 = vshrl.u32 %v4026_v39, 16  ;;  %v4276_v1 = vand.u32 65535, %v8491_v58 }
 0x8ad   :  { %v4291_v54 = vcvt.s32.f32 %v4289_v45  ;;  %v4253_v26 = vcvt.s32.f32 %v4251_v61  ;;  %v4314_v20 = vshrl.u32 %v8502_v59, 16  ;;  %v4263_v7 = vand.u32 65535, %v4023_v6 }
 0x8ae   :  { %v4241_v57 = vcvt.s32.f32 %v4239_v8  ;;  %v4303_v35 = vcvt.s32.f32 %v4301_v30  ;;  %v4278_v12 = vcvt.s32.f32 %v4276_v1  ;;  %v4313_v4 = vand.u32 65535, %v8502_v59 }
 0x8af   :  { %v4316_v0 = vcvt.s32.f32 %v4314_v20  ;;  %v4265_v40 = vcvt.s32.f32 %v4263_v7  ;;  %v4300_v13 = vand.u32 65535, %v4026_v39  ;;  %v4288_v27 = vand.u32 65535, %v4025_v53 }
 0x8b0   :  { %v4315_v58 = vcvt.s32.f32 %v4313_v4  ;;  %vm9806_vm11 = vcmask 195712   ;;  %vm9807_vm2 = vcmask 720512   ;;  %vm9810_vm10 = vcmask 1041409  }
 0x8b1   :  { %4193 = vadd.xlane.f32.xlu2 %v4191_v5  ;;  %4183 = vadd.xlane.f32.xlu1 %v4180_v60  ;;  %v4302_v25 = vcvt.s32.f32 %v4300_v13  ;;  %v4290_v41 = vcvt.s32.f32 %v4288_v27  ;;  %vm9808_vm8 = vmmov %vm9806_vm11  ;;  %vm9814_vm4 = vcmask 1042434   ;;  %vm9818_vm13 = vcmask 1043459  }
 0x8b2   :  { %4181 = vadd.xlane.f32.xlu0 %v4179_v10  ;;  %vm9809_vm15 = vmmov %vm9807_vm2 }
 0x8b3   :  { %vm9811_vm1 = vmmov %vm9810_vm10 }
 0x8b4   :  { %vm9812_vm14 = vmmov %vm9808_vm8 }
 0x8b5   :  { %vm9813_vm12 = vmmov %vm9807_vm2 }
 0x8b6   :  { %vm9815_vm0 = vmmov %vm9814_vm4 }
 0x8b7   :  { %vm9816_vm3 = vmmov %vm9808_vm8 }
 0x8b8   :  { %vm9817_vm7 = vmmov %vm9807_vm2 }
 0x8b9   :  { %4208 = vadd.xlane.f32.xlu2 %v4205_v19  ;;  %4206 = vadd.xlane.f32.xlu1 %v4204_v52  ;;  %vm9819_vm9 = vmmov %vm9818_vm13 }
 0x8ba   :  { %4195 = vadd.xlane.f32.xlu0 %v4192_v2 }
 0x8c1   :  { %4245 = vadd.xlane.f32.xlu2 %v4242_v50  ;;  %4232 = vadd.xlane.f32.xlu1 %v4229_v55 }
 0x8c2   :  { %4220 = vadd.xlane.f32.xlu0 %v4217_v24 }
 0x8c9   :  { %4218 = vadd.xlane.f32.xlu2 %v4216_v31  ;;  %4269 = vadd.xlane.f32.xlu1 %v4266_v36 }
 0x8ca   :  { %4257 = vadd.xlane.f32.xlu0 %v4254_v29 }
 0x8d1   :  { %4294 = vadd.xlane.f32.xlu2 %v4291_v54  ;;  %4282 = vadd.xlane.f32.xlu1 %v4279_v46 }
 0x8d2   :  { %4230 = vadd.xlane.f32.xlu0 %v4228_v43 }
 0x8d9   :  { %4255 = vadd.xlane.f32.xlu2 %v4253_v26  ;;  %4243 = vadd.xlane.f32.xlu1 %v4241_v57 }
 0x8da   :  { %4306 = vadd.xlane.f32.xlu0 %v4303_v35 }
 0x8dd   :  { %v4045_v47 = vpop.xlane.xlu2 %4044 }
 0x8de   :  { %v4035_v17 = vpop.xlane.xlu1 %4034  ;;  %v4048_v52 = vcvt.f32.s32 %v4045_v47 }
 0x8df   :  { %v4033_v34 = vpop.xlane.xlu0 %4032  ;;  %v4037_v37 = vcvt.f32.s32 %v4035_v17 }
 0x8e0   :  { %v4036_v42 = vcvt.f32.s32 %v4033_v34 }
 0x8e1   :  { %4280 = vadd.xlane.f32.xlu2 %v4278_v12  ;;  %4319 = vadd.xlane.f32.xlu1 %v4316_v0  ;;  %v4038_v32 = vshll.u32 %v4037_v37, 16 }
 0x8e2   :  { %4267 = vadd.xlane.f32.xlu0 %v4265_v40 }
 0x8e3   :  { %v4039_v59 = vadd.s32 %v4038_v32, %v4036_v42 }
 0x8e5   :  { %v4325_v18 = vand.u32 65535, %v4039_v59  ;;  %v4532_v51 = vshrl.u32 %v4039_v59, 16 }
 0x8e7   :  { %v4397_v14 = vperm.slane %v4325_v18, %v9395_v63  ;;  %v4444_v36 = vperm.slane %v4532_v51, %v7040_v22 }
 0x8e8   :  { %v4061_v5 = vpop.xlane.xlu2 %4060  ;;  %v4059_v10 = vpop.xlane.xlu1 %4058 }
 0x8e9   :  { %4317 = vadd.xlane.f32.xlu2 %v4315_v58  ;;  %4304 = vadd.xlane.f32.xlu1 %v4302_v25  ;;  %v4063_v60 = vcvt.f32.s32 %v4061_v5  ;;  %v4047_v56 = vpop.xlane.xlu0 %4046  ;;  %v4062_v19 = vcvt.f32.s32 %v4059_v10 }
 0x8ea   :  { %4292 = vadd.xlane.f32.xlu0 %v4290_v41  ;;  %v4049_v3 = vcvt.f32.s32 %v4047_v56 }
 0x8eb   :  { %v4064_v44 = vshll.u32 %v4063_v60, 16 }
 0x8ec   :  { %v4050_v2 = vshll.u32 %v4049_v3, 16 }
 0x8ed   :  { %v4065_v23 = vadd.s32 %v4064_v44, %v4062_v19 }
 0x8ee   :  { %v4051_v11 = vadd.s32 %v4050_v2, %v4048_v52 }
 0x8ef   :  { %v4327_v33 = vand.u32 65535, %v4065_v23  ;;  %v4534_v50 = vshrl.u32 %v4065_v23, 16 }
 0x8f0   :  { %v4326_v55 = vand.u32 65535, %v4051_v11  ;;  %v4533_v24 = vshrl.u32 %v4051_v11, 16  ;;  %v4083_v6 = vpop.xlane.xlu2 %4082 }
 0x8f1   :  { %v4400_v28 = vperm.slane %v4327_v33, %v6967_v15  ;;  %v4447_v49 = vperm.slane %v4534_v50, %v7084_v48  ;;  %v4073_v21 = vpop.xlane.xlu1 %4072  ;;  %v4071_v31 = vpop.xlane.xlu0 %4070  ;;  %v4086_v7 = vcvt.f32.s32 %v4083_v6 }
 0x8f2   :  { %v4398_v29 = vperm.slane %v4326_v55, %v6957_v9  ;;  %v4445_v53 = vperm.slane %v4533_v24, %v7071_v16  ;;  %v4075_v45 = vcvt.f32.s32 %v4073_v21  ;;  %v4074_v46 = vcvt.f32.s32 %v4071_v31 }
 0x8f4   :  { %v4399_v38 = vsel %vm3308_vm6, %v4398_v29, %v4397_v14  ;;  %v4446_v62 = vsel %vm3340_vm5, %v4445_v53, %v4444_v36  ;;  %v4076_v54 = vshll.u32 %v4075_v45, 16 }
 0x8f5   :  { %v4401_v43 = vsel %vm9806_vm11, %v4400_v28, %v4399_v38  ;;  %v4448_v39 = vsel %vm9807_vm2, %v4447_v49, %v4446_v62  ;;  %vm9820_vm11 = vmmov %vm9816_vm3 }
 0x8f6   :  { %v4077_v61 = vadd.s32 %v4076_v54, %v4074_v46 }
 0x8f8   :  { %v4328_v0 = vand.u32 65535, %v4077_v61  ;;  %v4535_v4 = vshrl.u32 %v4077_v61, 16 }
 0x8f9   :  { %v4098_v8 = vpop.xlane.xlu2 %4097 }
 0x8fa   :  { %v4100_v30 = vcvt.f32.s32 %v4098_v8  ;;  %v4402_v58 = vperm.slane %v4328_v0, %v9395_v63  ;;  %v4449_v59 = vperm.slane %v4535_v4, %v7040_v22 }
 0x8fb   :  { %v4096_v26 = vpop.xlane.xlu1 %4095  ;;  %v4085_v57 = vpop.xlane.xlu0 %4084 }
 0x8fc   :  { %v4087_v35 = vcvt.f32.s32 %v4085_v57  ;;  %v4101_v1 = vshll.u32 %v4100_v30, 16  ;;  %v4099_v20 = vcvt.f32.s32 %v4096_v26 }
 0x8fe   :  { %v4088_v12 = vshll.u32 %v4087_v35, 16  ;;  %v4102_v40 = vadd.s32 %v4101_v1, %v4099_v20 }
 0x900   :  { %v4089_v47 = vadd.s32 %v4088_v12, %v4086_v7  ;;  %v4330_v13 = vand.u32 65535, %v4102_v40  ;;  %v4537_v27 = vshrl.u32 %v4102_v40, 16 }
 0x902   :  { %v4329_v17 = vand.u32 65535, %v4089_v47  ;;  %v4536_v34 = vshrl.u32 %v4089_v47, 16  ;;  %v4405_v32 = vperm.slane %v4330_v13, %v6967_v15  ;;  %v4452_v42 = vperm.slane %v4537_v27, %v7084_v48 }
 0x903   :  { %v4120_v37 = vpop.xlane.xlu2 %4119 }
 0x904   :  { %v4110_v25 = vpop.xlane.xlu1 %4109  ;;  %v4108_v41 = vpop.xlane.xlu0 %4107  ;;  %v4403_v5 = vperm.slane %v4329_v17, %v6957_v9  ;;  %v4450_v60 = vperm.slane %v4536_v34, %v7071_v16  ;;  %v4123_v28 = vcvt.f32.s32 %v4120_v37 }
 0x905   :  { %v4112_v10 = vcvt.f32.s32 %v4110_v25  ;;  %v4111_v19 = vcvt.f32.s32 %v4108_v41 }
 0x906   :  { %v4404_v56 = vsel %vm3308_vm6, %v4403_v5, %v4402_v58  ;;  %v4451_v3 = vsel %vm3340_vm5, %v4450_v60, %v4449_v59 }
 0x907   :  { %v4113_v44 = vshll.u32 %v4112_v10, 16  ;;  %v4406_v52 = vsel %vm9808_vm8, %v4405_v32, %v4404_v56  ;;  %v4453_v2 = vsel %vm9809_vm15, %v4452_v42, %v4451_v3  ;;  %vm9821_vm8 = vmmov %vm9816_vm3 }
 0x908   :  { %v4437_v18 = vsel %vm9810_vm10, %v4406_v52, %v4401_v43  ;;  %v4484_v23 = vsel %vm9811_vm1, %v4453_v2, %v4448_v39  ;;  %vm9822_vm15 = vmmov %vm9807_vm2 }
 0x909   :  { %v4114_v51 = vadd.s32 %v4113_v44, %v4111_v19  ;;  %vm9823_vm10 = vmmov %vm9816_vm3 }
 0x90a   :  { %vm9824_vm1 = vmmov %vm9807_vm2 }
 0x90b   :  { %v4331_v21 = vand.u32 65535, %v4114_v51  ;;  %v4538_v36 = vshrl.u32 %v4114_v51, 16 }
 0x90c   :  { %v4135_v11 = vpop.xlane.xlu2 %4134  ;;  %v4133_v50 = vpop.xlane.xlu1 %4132 }
 0x90d   :  { %v4137_v33 = vcvt.f32.s32 %v4135_v11  ;;  %v4122_v55 = vpop.xlane.xlu0 %4121  ;;  %v4136_v14 = vcvt.f32.s32 %v4133_v50  ;;  %v4407_v46 = vperm.slane %v4331_v21, %v9395_v63  ;;  %v4454_v30 = vperm.slane %v4538_v36, %v7040_v22 }
 0x90e   :  { %v4124_v24 = vcvt.f32.s32 %v4122_v55 }
 0x90f   :  { %v4138_v6 = vshll.u32 %v4137_v33, 16 }
 0x910   :  { %v4125_v49 = vshll.u32 %v4124_v24, 16 }
 0x911   :  { %v4139_v31 = vadd.s32 %v4138_v6, %v4136_v14 }
 0x912   :  { %v4126_v29 = vadd.s32 %v4125_v49, %v4123_v28 }
 0x913   :  { %v4333_v53 = vand.u32 65535, %v4139_v31  ;;  %v4540_v45 = vshrl.u32 %v4139_v31, 16 }
 0x914   :  { %v4332_v38 = vand.u32 65535, %v4126_v29  ;;  %v4539_v62 = vshrl.u32 %v4126_v29, 16  ;;  %v4157_v54 = vpop.xlane.xlu2 %4156  ;;  %v4147_v61 = vpop.xlane.xlu1 %4146 }
 0x915   :  { %v4410_v43 = vperm.slane %v4333_v53, %v6967_v15  ;;  %v4457_v39 = vperm.slane %v4540_v45, %v7084_v48  ;;  %v4145_v8 = vpop.xlane.xlu0 %4144  ;;  %v4149_v35 = vcvt.f32.s32 %v4147_v61  ;;  %v4160_v25 = vcvt.f32.s32 %v4157_v54 }
 0x916   :  { %v4408_v26 = vperm.slane %v4332_v38, %v6957_v9  ;;  %v4455_v57 = vperm.slane %v4539_v62, %v7071_v16  ;;  %v4148_v12 = vcvt.f32.s32 %v4145_v8 }
 0x917   :  { %v4150_v7 = vshll.u32 %v4149_v35, 16 }
 0x918   :  { %v4409_v1 = vsel %vm3308_vm6, %v4408_v26, %v4407_v46  ;;  %v4456_v20 = vsel %vm3340_vm5, %v4455_v57, %v4454_v30 }
 0x919   :  { %v4411_v0 = vsel %vm9812_vm14, %v4410_v43, %v4409_v1  ;;  %v4458_v40 = vsel %vm9813_vm12, %v4457_v39, %v4456_v20  ;;  %v4151_v13 = vadd.s32 %v4150_v7, %v4148_v12  ;;  %vm9825_vm14 = vcmask 1044484  }
 0x91a   :  { %v4438_v4 = vsel %vm9814_vm4, %v4411_v0, %v4437_v18  ;;  %v4485_v47 = vsel %vm9815_vm0, %v4458_v40, %v4484_v23  ;;  %vm9826_vm12 = vmmov %vm9825_vm14  ;;  %vm4491_vm4 = vcmask 162816   ;;  %vm4493_vm0 = vcmask 523264  }
 0x91b   :  { %v4334_v5 = vand.u32 65535, %v4151_v13  ;;  %v4541_v60 = vshrl.u32 %v4151_v13, 16 }
 0x91c   :  { %v4172_v27 = vpop.xlane.xlu2 %4171  ;;  %v4170_v34 = vpop.xlane.xlu1 %4169 }
 0x91d   :  { %v4174_v17 = vcvt.f32.s32 %v4172_v27  ;;  %v4159_v37 = vpop.xlane.xlu0 %4158  ;;  %v4173_v42 = vcvt.f32.s32 %v4170_v34  ;;  %v4412_v11 = vperm.slane %v4334_v5, %v9395_v63  ;;  %v4459_v33 = vperm.slane %v4541_v60, %v7040_v22 }
 0x91e   :  { %v4161_v58 = vcvt.f32.s32 %v4159_v37 }
 0x91f   :  { %v4175_v32 = vshll.u32 %v4174_v17, 16 }
 0x920   :  { %v4162_v41 = vshll.u32 %v4161_v58, 16 }
 0x921   :  { %v4176_v59 = vadd.s32 %v4175_v32, %v4173_v42 }
 0x922   :  { %v4163_v10 = vadd.s32 %v4162_v41, %v4160_v25 }
 0x923   :  { %v4336_v56 = vand.u32 65535, %v4176_v59  ;;  %v4543_v3 = vshrl.u32 %v4176_v59, 16 }
 0x924   :  { %v4335_v44 = vand.u32 65535, %v4163_v10  ;;  %v4542_v19 = vshrl.u32 %v4163_v10, 16  ;;  %v4194_v52 = vpop.xlane.xlu2 %4193  ;;  %v4184_v23 = vpop.xlane.xlu1 %4183 }
 0x925   :  { %v4415_v2 = vperm.slane %v4336_v56, %v6967_v15  ;;  %v4462_v18 = vperm.slane %v4543_v3, %v7084_v48  ;;  %v4182_v51 = vpop.xlane.xlu0 %4181  ;;  %v4186_v39 = vcvt.f32.s32 %v4184_v23  ;;  %v4197_v26 = vcvt.f32.s32 %v4194_v52 }
 0x926   :  { %v4413_v50 = vperm.slane %v4335_v44, %v6957_v9  ;;  %v4460_v55 = vperm.slane %v4542_v19, %v7071_v16  ;;  %v4185_v7 = vcvt.f32.s32 %v4182_v51 }
 0x927   :  { %v4187_v57 = vshll.u32 %v4186_v39, 16 }
 0x928   :  { %v4414_v24 = vsel %vm3308_vm6, %v4413_v50, %v4412_v11  ;;  %v4461_v6 = vsel %vm3340_vm5, %v4460_v55, %v4459_v33 }
 0x929   :  { %v4416_v14 = vsel %vm9816_vm3, %v4415_v2, %v4414_v24  ;;  %v4463_v28 = vsel %vm9817_vm7, %v4462_v18, %v4461_v6  ;;  %v4188_v40 = vadd.s32 %v4187_v57, %v4185_v7  ;;  %vm9827_vm3 = vcmask 1045509  }
 0x92a   :  { %v8600_v49 = vsel %vm9818_vm13, %v4416_v14, %v4438_v4  ;;  %v8603_v21 = vsel %vm9819_vm9, %v4463_v28, %v4485_v47  ;;  %vm9828_vm7 = vmmov %vm9827_vm3  ;;  %vm9830_vm9 = vcmask 1046534  }
 0x92b   :  { %v4337_v32 = vand.u32 65535, %v4188_v40  ;;  %v4544_v41 = vshrl.u32 %v4188_v40, 16  ;;  %vm9829_vm13 = vmmov %vm9821_vm8 }
 0x92c   :  { %v4209_v31 = vpop.xlane.xlu2 %4208  ;;  %v4207_v36 = vpop.xlane.xlu1 %4206 }
 0x92d   :  { %v4196_v29 = vpop.xlane.xlu0 %4195  ;;  %v4211_v61 = vcvt.f32.s32 %v4209_v31  ;;  %v4210_v0 = vcvt.f32.s32 %v4207_v36  ;;  %v4417_v18 = vperm.slane %v4337_v32, %v9395_v63  ;;  %v4464_v11 = vperm.slane %v4544_v41, %v7040_v22 }
 0x92e   :  { %v4198_v43 = vcvt.f32.s32 %v4196_v29 }
 0x92f   :  { %v4212_v20 = vshll.u32 %v4211_v61, 16 }
 0x930   :  { %v4199_v8 = vshll.u32 %v4198_v43, 16 }
 0x931   :  { %v4213_v4 = vadd.s32 %v4212_v20, %v4210_v0 }
 0x932   :  { %v4200_v12 = vadd.s32 %v4199_v8, %v4197_v26 }
 0x933   :  { %v4339_v59 = vand.u32 65535, %v4213_v4  ;;  %v4546_v10 = vshrl.u32 %v4213_v4, 16 }
 0x934   :  { %v4246_v53 = vpop.xlane.xlu2 %4245  ;;  %v4233_v45 = vpop.xlane.xlu1 %4232  ;;  %v4338_v27 = vand.u32 65535, %v4200_v12  ;;  %v4545_v17 = vshrl.u32 %v4200_v12, 16 }
 0x935   :  { %v4221_v38 = vpop.xlane.xlu0 %4220  ;;  %v4235_v47 = vcvt.f32.s32 %v4233_v45  ;;  %v4248_v3 = vcvt.f32.s32 %v4246_v53  ;;  %v4420_v33 = vperm.slane %v4339_v59, %v6967_v15  ;;  %v4467_v24 = vperm.slane %v4546_v10, %v7084_v48 }
 0x936   :  { %v4223_v13 = vcvt.f32.s32 %v4221_v38  ;;  %v4418_v56 = vperm.slane %v4338_v27, %v6957_v9  ;;  %v4465_v44 = vperm.slane %v4545_v17, %v7071_v16 }
 0x937   :  { %v4236_v5 = vshll.u32 %v4235_v47, 16  ;;  %v4249_v14 = vshll.u32 %v4248_v3, 16 }
 0x938   :  { %v4224_v60 = vshll.u32 %v4223_v13, 16  ;;  %v4419_v6 = vsel %vm3308_vm6, %v4418_v56, %v4417_v18  ;;  %v4466_v28 = vsel %vm3340_vm5, %v4465_v44, %v4464_v11 }
 0x939   :  { %v4468_v57 = vsel %vm9807_vm2, %v4467_v24, %v4466_v28  ;;  %vm9832_vm2 = vmmov %vm9830_vm9 }
 0x93c   :  { %v4219_v62 = vpop.xlane.xlu2 %4218  ;;  %v4270_v54 = vpop.xlane.xlu1 %4269 }
 0x93d   :  { %v4258_v46 = vpop.xlane.xlu0 %4257  ;;  %v4222_v34 = vcvt.f32.s32 %v4219_v62  ;;  %v4272_v50 = vcvt.f32.s32 %v4270_v54  ;;  %v8616_v54 = vsel %vm9820_vm11, %v4420_v33, %v4419_v6  ;;  %vm9831_vm11 = vmmov %vm9824_vm1 }
 0x93e   :  { %v4260_v52 = vcvt.f32.s32 %v4258_v46 }
 0x93f   :  { %v4225_v19 = vadd.s32 %v4224_v60, %v4222_v34  ;;  %v4273_v61 = vshll.u32 %v4272_v50, 16 }
 0x940   :  { %v4261_v36 = vshll.u32 %v4260_v52, 16 }
 0x941   :  { %v4340_v31 = vand.u32 65535, %v4225_v19  ;;  %v4547_v45 = vshrl.u32 %v4225_v19, 16 }
 0x943   :  { %v4422_v7 = vperm.slane %v4340_v31, %v9395_v63  ;;  %v4469_v4 = vperm.slane %v4547_v45, %v7040_v22 }
 0x944   :  { %v8605_v30 = vpop.xlane.xlu2 %4294  ;;  %v4283_v35 = vpop.xlane.xlu1 %4282 }
 0x945   :  { %v4231_v1 = vpop.xlane.xlu0 %4230  ;;  %v4285_v23 = vcvt.f32.s32 %v4283_v35  ;;  %v4297_v35 = vcvt.f32.s32 %v8605_v30 }
 0x946   :  { %v4234_v37 = vcvt.f32.s32 %v4231_v1 }
 0x947   :  { %v4286_v38 = vshll.u32 %v4285_v23, 16  ;;  %v4298_v32 = vshll.u32 %v4297_v35, 16 }
 0x948   :  { %v4237_v2 = vadd.s32 %v4236_v5, %v4234_v37 }
 0x94a   :  { %v4341_v29 = vand.u32 65535, %v4237_v2  ;;  %v4548_v1 = vshrl.u32 %v4237_v2, 16 }
 0x94c   :  { %v4256_v58 = vpop.xlane.xlu2 %4255  ;;  %v4244_v42 = vpop.xlane.xlu1 %4243  ;;  %v4423_v12 = vperm.slane %v4341_v29, %v6957_v9  ;;  %v4470_v30 = vperm.slane %v4548_v1, %v7071_v16 }
 0x94d   :  { %v4307_v25 = vpop.xlane.xlu0 %4306  ;;  %v4247_v51 = vcvt.f32.s32 %v4244_v42  ;;  %v4259_v55 = vcvt.f32.s32 %v4256_v58 }
 0x94e   :  { %v4309_v0 = vcvt.f32.s32 %v4307_v25  ;;  %v4424_v59 = vsel %vm3308_vm6, %v4423_v12, %v4422_v7  ;;  %v4471_v33 = vsel %vm3340_vm5, %v4470_v30, %v4469_v4  ;;  %v4440_v12 = vsel %vm9825_vm14, %v8616_v54, %v8600_v49 }
 0x94f   :  { %v4250_v62 = vadd.s32 %v4249_v14, %v4247_v51  ;;  %v4262_v8 = vadd.s32 %v4261_v36, %v4259_v55 }
 0x950   :  { %v4310_v5 = vshll.u32 %v4309_v0, 16 }
 0x951   :  { %v4342_v47 = vand.u32 65535, %v4250_v62  ;;  %v4549_v13 = vshrl.u32 %v4250_v62, 16  ;;  %v4343_v17 = vand.u32 65535, %v4262_v8  ;;  %v4550_v34 = vshrl.u32 %v4262_v8, 16 }
 0x953   :  { %v4425_v56 = vperm.slane %v4342_v47, %v6967_v15  ;;  %v4472_v3 = vperm.slane %v4549_v13, %v7084_v48  ;;  %v4427_v18 = vperm.slane %v4343_v17, %v9395_v63  ;;  %v4474_v23 = vperm.slane %v4550_v34, %v7040_v22 }
 0x954   :  { %v4281_v53 = vpop.xlane.xlu2 %4280  ;;  %v4320_v43 = vpop.xlane.xlu1 %4319 }
 0x955   :  { %v4284_v46 = vcvt.f32.s32 %v4281_v53  ;;  %v4268_v39 = vpop.xlane.xlu0 %4267  ;;  %v4322_v27 = vcvt.f32.s32 %v4320_v43  ;;  %v4426_v36 = vsel %vm9821_vm8, %v4425_v56, %v4424_v59  ;;  %v4473_v29 = vsel %vm9822_vm15, %v4472_v3, %v4471_v33 }
 0x956   :  { %v4271_v26 = vcvt.f32.s32 %v4268_v39  ;;  %vm4495_vm8 = vcmask 687104  }
 0x957   :  { %v4287_v20 = vadd.s32 %v4286_v38, %v4284_v46  ;;  %v4323_v44 = vshll.u32 %v4322_v27, 16 }
 0x958   :  { %v4274_v40 = vadd.s32 %v4273_v61, %v4271_v26 }
 0x959   :  { %v4345_v42 = vand.u32 65535, %v4287_v20  ;;  %v4552_v41 = vshrl.u32 %v4287_v20, 16 }
 0x95a   :  { %v4344_v37 = vand.u32 65535, %v4274_v40  ;;  %v4551_v58 = vshrl.u32 %v4274_v40, 16 }
 0x95b   :  { %v4430_v50 = vperm.slane %v4345_v42, %v6967_v15  ;;  %v4477_v55 = vperm.slane %v4552_v41, %v7084_v48 }
 0x95c   :  { %v4428_v25 = vperm.slane %v4344_v37, %v6957_v9  ;;  %v4475_v60 = vperm.slane %v4551_v58, %v7071_v16  ;;  %v4318_v10 = vpop.xlane.xlu2 %4317  ;;  %v4305_v52 = vpop.xlane.xlu1 %4304 }
 0x95d   :  { %v4321_v19 = vcvt.f32.s32 %v4318_v10  ;;  %v4293_v2 = vpop.xlane.xlu0 %4292  ;;  %v4308_v51 = vcvt.f32.s32 %v4305_v52 }
 0x95e   :  { %v4296_v11 = vcvt.f32.s32 %v4293_v2  ;;  %v4429_v6 = vsel %vm3308_vm6, %v4428_v25, %v4427_v18  ;;  %v4476_v14 = vsel %vm3340_vm5, %v4475_v60, %v4474_v23 }
 0x95f   :  { %v4324_v24 = vadd.s32 %v4323_v44, %v4321_v19  ;;  %v4311_v28 = vadd.s32 %v4310_v5, %v4308_v51  ;;  %v4431_v8 = vsel %vm9823_vm10, %v4430_v50, %v4429_v6  ;;  %v4478_v26 = vsel %vm9824_vm1, %v4477_v55, %v4476_v14 }
 0x960   :  { %v4299_v31 = vadd.s32 %v4298_v32, %v4296_v11 }
 0x961   :  { %v4348_v53 = vand.u32 65535, %v4324_v24  ;;  %v4555_v45 = vshrl.u32 %v4324_v24, 16  ;;  %v4347_v38 = vand.u32 65535, %v4311_v28  ;;  %v4554_v62 = vshrl.u32 %v4311_v28, 16 }
 0x962   :  { %v4346_v46 = vand.u32 65535, %v4299_v31  ;;  %v4553_v43 = vshrl.u32 %v4299_v31, 16 }
 0x963   :  { %v4435_v39 = vperm.slane %v4348_v53, %v6967_v15  ;;  %v4482_v61 = vperm.slane %v4555_v45, %v7084_v48  ;;  %v4433_v35 = vperm.slane %v4347_v38, %v6957_v9  ;;  %v4480_v1 = vperm.slane %v4554_v62, %v7071_v16 }
 0x964   :  { %v4432_v20 = vperm.slane %v4346_v46, %v9395_v63  ;;  %v4479_v7 = vperm.slane %v4553_v43, %v7040_v22  ;;  %v4487_v15 = vsel %vm9826_vm12, %v4468_v57, %v8603_v21  ;;  %v4441_v9 = vsel %vm9827_vm3, %v4426_v36, %v4440_v12 }
 0x965   :  { %v4488_v16 = vsel %vm9828_vm7, %v4473_v29, %v4487_v15  ;;  %v4442_v22 = vsel %vm9830_vm9, %v4431_v8, %v4441_v9 }
 0x966   :  { %v4434_v48 = vsel %vm3308_vm6, %v4433_v35, %v4432_v20  ;;  %v4481_v0 = vsel %vm3340_vm5, %v4480_v1, %v4479_v7  ;;  %v4489_v49 = vsel %vm9832_vm2, %v4478_v26, %v4488_v16  ;;  %vm9833_vm6 = vcmask 1047559  }
 0x967   :  { %v4436_v63 = vsel %vm9829_vm13, %v4435_v39, %v4434_v48  ;;  %v4483_v40 = vsel %vm9831_vm11, %v4482_v61, %v4481_v0  ;;  %vm9834_vm5 = vmmov %vm9833_vm6 }
 0x968   :  { %v4443_v21 = vsel %vm9833_vm6, %v4436_v63, %v4442_v22  ;;  %v4490_v54 = vsel %vm9834_vm5, %v4483_v40, %v4489_v49 }
 0x969   :  { %v4492_v57 = vsel %vm4491_vm4, %v4443_v21, 0 }
 0x96a   :  { %v4494_v4 = vsel %vm4493_vm0, %v4492_v57, %v4490_v54 }
 0x96b   :  { %v4496_v47 = vsel %vm4495_vm8, %v4494_v4, 0 }
 0x96c   :  { %4497 = vst [vmem:[#allocation8] sm:$0xff] %v4496_v47 }
 0x96d   :  { %4519 = dma.vmem_to_hbm [thread:$0]  %s4515_s25, 128, %s4517_s28, [#allocation9]  }
 0x96e   :  { %4786 = dma.done.wait [#allocation4], 128  }
 0x96f   :  { %4787 = vsyncadd [#allocation4], 4294967168 }
 0x970   :  { %4788 = dma.done.wait [#allocation9], 128  }
 0x971   :  { %4789 = vsyncadd [#allocation9], 4294967168 }
 0x972   :  { %4528 = vsyncpa [#allocation3], 1 }
 0x973   :  { %4529 = vsyncpa [#allocation6], 1 }
 0x974   :  { %4530 = vsyncpa [#allocation4], 1 }
 0x975   :  { %4531 = vsyncpa [#allocation9], 1 }

</bundles_post_ra>
